<compile_context>
chip_gen: v6e
topology: v6e:2x2x1
jax: 0.10.0
libtpu: 0.0.40
codegen_flags: <defaults>
</compile_context>

<pallas_src>
import functools

import jax
import jax.numpy as jnp
from jax.experimental import pallas as pl
from jax.experimental.pallas import tpu as pltpu

BN_EPS = 1e-5


# ---------------------------------------------------------------------------
# Kernel
# ---------------------------------------------------------------------------
def building_block_kernel(xyz_ref, feat_ref, convw_ref, convgb_ref, fcw_ref,
                          linw_ref, bnlgb_ref, out_ref, *, nsample,
                          n_weightnet_layers):
    """Single-grid-point fused Building_block forward (gathers done outside).

    xyz_ref   : [CP, L]         relative xyz   (3 real channels, zero-padded)
    feat_ref  : [CP, L]         relative feats (C1 real channels, zero-padded)
    convw_ref : [7, CP, CP]     conv weights: 3 WeightNet + 4 mlp_convs layers,
                                zero-padded [Cout, Cin] (biases cancelled by BN)
    convgb_ref: [7, 2, CP, 1]   per-layer BN (gamma, beta), channels on sublanes
    fcw_ref   : [CP, CP]        attention fc weight (bias=False), zero-padded
    linw_ref  : [16*C4, C4]     final Linear weight, transposed ([in, out])
    bnlgb_ref : [2, 1, C4]      bn_linear (gamma, beta)
    out_ref   : [B*npoint, C4]  L = B * npoint * nsample
    """
    cp, total = xyz_ref.shape
    k = nsample
    n_pts = total // k                      # B * npoint
    n_layers = convw_ref.shape[0]
    c4 = out_ref.shape[1]                   # 2 * d_out
    wn_out = linw_ref.shape[0] // c4        # WeightNet output channels (16)
    inv_l = 1.0 / float(total)

    def conv_bn_relu(h, layer):
        # 1x1 Conv2d == one 2-D matmul over channels on the MXU (bias cancelled
        # by the train-mode BN that follows).
        y = jnp.dot(convw_ref[layer], h, preferred_element_type=jnp.float32)
        # Training-mode BatchNorm2d: per-channel stats over (B, npoint, nsample)
        # == the whole lane axis.  Two-pass (centered) variance for stability.
        mean = jnp.sum(y, axis=1, keepdims=True) * inv_l           # [CP, 1]
        d = y - mean
        var = jnp.sum(d * d, axis=1, keepdims=True) * inv_l
        scale = convgb_ref[layer, 0] * jax.lax.rsqrt(var + BN_EPS)
        return jnp.maximum(d * scale + convgb_ref[layer, 1], 0.0)  # BN + ReLU

    # --- WeightNet branch: localized_xyz -> per-point weights ---------------
    w = xyz_ref[...]
    for layer in range(n_weightnet_layers):
        w = conv_bn_relu(w, layer)                                 # [CP, L]

    # --- attention branch: fc (no bias) + softmax over nsample + weighting --
    feat = feat_ref[...]
    logits = jnp.dot(fcw_ref[...], feat, preferred_element_type=jnp.float32)
    logits3 = logits.reshape(cp, n_pts, k)
    mx = jnp.max(logits3, axis=2, keepdims=True)
    e = jnp.exp(logits3 - mx)
    score = (e / jnp.sum(e, axis=2, keepdims=True)).reshape(cp, total)
    h = score * feat            # padded channels of feat are exactly 0 -> stay 0

    # --- mlp_convs stack -----------------------------------------------------
    for layer in range(n_weightnet_layers, n_layers):
        h = conv_bn_relu(h, layer)                                 # [CP, L]

    # --- per-point matmul with the WeightNet output --------------------------
    # new_features[m, c, o] = sum_k feature_r[c, m, k] * weights[o, m, k]
    fr = jnp.transpose(h[:c4].reshape(c4, n_pts, k), (1, 0, 2))        # [M, C4, K]
    wn = jnp.transpose(w[:wn_out].reshape(wn_out, n_pts, k), (1, 0, 2))  # [M, 16, K]
    nf = jnp.einsum("mck,mok->mco", fr, wn,
                    preferred_element_type=jnp.float32)                # [M, C4, 16]
    nf = nf.reshape(n_pts, c4 * wn_out)          # same flattening as torch .view

    # --- Linear (bias dropped: cancelled by bn_linear) + BatchNorm1d(train) --
    y = jnp.dot(nf, linw_ref[...], preferred_element_type=jnp.float32)  # [M, C4]
    inv_m = 1.0 / float(n_pts)
    mean = jnp.sum(y, axis=0, keepdims=True) * inv_m
    d = y - mean
    var = jnp.sum(d * d, axis=0, keepdims=True) * inv_m
    scale = bnlgb_ref[0] * jax.lax.rsqrt(var + BN_EPS)
    out_ref[...] = (d * scale + bnlgb_ref[1]).astype(out_ref.dtype)


# ---------------------------------------------------------------------------
# Wrapper (gathers + layout prep in plain JAX, everything else in the kernel)
# ---------------------------------------------------------------------------
def _gather_neighbour(pc, neighbor_idx):
    """pc [B, N, D], neighbor_idx [B, N, K] -> [B, N, K, D] (torch.gather equiv)."""
    b, n, d = pc.shape
    k = neighbor_idx.shape[-1]
    idx = neighbor_idx.reshape(b, n * k)[..., None]               # [B, N*K, 1]
    return jnp.take_along_axis(pc, idx, axis=1).reshape(b, n, k, d)


@functools.partial(jax.jit, static_argnames=("n_weightnet_layers",))
def building_block_forward(xyz, feature, neigh_idx, conv_w, conv_gb, fc_w,
                           lin_wt, bnl_gb, n_weightnet_layers=3):
    """xyz [B,N,3], feature [B,C1,N,1], neigh_idx [B,N,K] -> [B, 2*d_out, N, 1]."""
    b, n, _ = xyz.shape
    k = neigh_idx.shape[-1]
    cp = conv_w.shape[1]
    c4 = lin_wt.shape[1]
    total = b * n * k

    # relative_pos_encoding + relative feature (data-dependent gathers).
    neighbor_xyz = _gather_neighbour(xyz, neigh_idx)              # [B, N, K, 3]
    rel_xyz = xyz[:, :, None, :] - neighbor_xyz
    feat_bnc = jnp.transpose(feature[..., 0], (0, 2, 1))          # [B, N, C1]
    f_neigh = _gather_neighbour(feat_bnc, neigh_idx)              # [B, N, K, C1]
    rel_f = feat_bnc[:, :, None, :] - f_neigh                     # [B, N, K, C1]

    def to_channels_by_lanes(x):
        # [B, N, K, C] -> [CP, B*N*K]: channels on sublanes (zero-padded),
        # batch/npoint/nsample collapsed onto the lane axis (lane-dense).
        c = x.shape[-1]
        x = jnp.transpose(x, (3, 0, 1, 2)).reshape(c, total)
        return jnp.pad(x, ((0, cp - c), (0, 0)))

    xyz_cl = to_channels_by_lanes(rel_xyz)
    feat_cl = to_channels_by_lanes(rel_f)

    kernel = functools.partial(building_block_kernel, nsample=k,
                               n_weightnet_layers=n_weightnet_layers)
    vmem = pl.BlockSpec(memory_space=pltpu.MemorySpace.VMEM)
    out = pl.pallas_call(
        kernel,
        out_shape=jax.ShapeDtypeStruct((b * n, c4), jnp.float32),
        in_specs=[vmem] * 7,
        out_specs=vmem,
    )(xyz_cl, feat_cl, conv_w, conv_gb, fc_w, lin_wt, bnl_gb)

    # [B*N, C4] -> [B, C4, N, 1]   (torch: permute(0, 2, 1).unsqueeze(-1))
    return jnp.transpose(out.reshape(b, n, c4), (0, 2, 1))[..., None]


# ---------------------------------------------------------------------------
# Synthetic parameters (PyTorch layout) + packing for the kernel
# ---------------------------------------------------------------------------
def init_building_block_params(key, d_out):
    c1 = d_out // 2
    c4 = 2 * d_out
    wn_dims = [3, 8, 8, 16]                     # WeightNet(3, 16, hidden=[8, 8])
    mlp_dims = [c1, d_out, d_out, d_out, c4]    # Building_block.mlp_convs

    def conv_bn(key, cin, cout):
        kw, kb, kg, kbe = jax.random.split(key, 4)
        return (jax.random.normal(kw, (cout, cin), jnp.float32) * 0.5,
                jax.random.normal(kb, (cout,), jnp.float32) * 0.1,
                1.0 + 0.1 * jax.random.normal(kg, (cout,), jnp.float32),
                0.1 * jax.random.normal(kbe, (cout,), jnp.float32))

    params = {"weightnet": [], "mlp": []}
    for i in range(len(wn_dims) - 1):
        key, sub = jax.random.split(key)
        params["weightnet"].append(conv_bn(sub, wn_dims[i], wn_dims[i + 1]))
    for i in range(len(mlp_dims) - 1):
        key, sub = jax.random.split(key)
        params["mlp"].append(conv_bn(sub, mlp_dims[i], mlp_dims[i + 1]))

    key, kfc, klw, klb, kg, kb = jax.random.split(key, 6)
    params["fc_w"] = jax.random.normal(kfc, (c1, c1), jnp.float32) * 0.5
    params["lin_w"] = jax.random.normal(klw, (c4, 16 * c4), jnp.float32) * 0.1
    params["lin_b"] = jax.random.normal(klb, (c4,), jnp.float32) * 0.1
    params["bnl_g"] = 1.0 + 0.1 * jax.random.normal(kg, (c4,), jnp.float32)
    params["bnl_b"] = 0.1 * jax.random.normal(kb, (c4,), jnp.float32)
    return params


def pack_building_block_params(params):
    """Pack all conv layers (3 WeightNet + 4 mlp_convs) + fc / linear / bn_linear.

    Biases are intentionally not packed: every conv / the final linear is followed
    by a training-mode BatchNorm whose mean subtraction cancels them exactly.
    """
    conv_layers = params["weightnet"] + params["mlp"]
    cp = max(max(w.shape) for (w, _, _, _) in conv_layers)
    cp = max(cp, params["fc_w"].shape[0])
    n = len(conv_layers)
    conv_w = jnp.zeros((n, cp, cp), jnp.float32)
    conv_gb = jnp.concatenate(
        [jnp.ones((n, 1, cp, 1), jnp.float32),      # gamma pad -> 1
         jnp.zeros((n, 1, cp, 1), jnp.float32)],    # beta  pad -> 0
        axis=1)
    for l, (w, _b, g, be) in enumerate(conv_layers):
        co, ci = w.shape
        conv_w = conv_w.at[l, :co, :ci].set(w)
        conv_gb = conv_gb.at[l, 0, :co, 0].set(g)
        conv_gb = conv_gb.at[l, 1, :co, 0].set(be)
    c1 = params["fc_w"].shape[0]
    fc_w = jnp.zeros((cp, cp), jnp.float32).at[:c1, :c1].set(params["fc_w"])
    lin_wt = params["lin_w"].T                                      # [16*C4, C4]
    bnl_gb = jnp.stack([params["bnl_g"], params["bnl_b"]])[:, None, :]  # [2,1,C4]
    return conv_w, conv_gb, fc_w, lin_wt, bnl_gb


# ---------------------------------------------------------------------------
# Pure-JAX reference mirroring the PyTorch module (with all biases applied)
# ---------------------------------------------------------------------------
def _conv_bn_relu_ref(x, w, bias, gamma, beta):
    y = jnp.einsum("oc,bcnk->bonk", w, x) + bias[None, :, None, None]
    mean = jnp.mean(y, axis=(0, 2, 3), keepdims=True)
    var = jnp.mean((y - mean) ** 2, axis=(0, 2, 3), keepdims=True)
    y = (y - mean) / jnp.sqrt(var + BN_EPS)
    return jnp.maximum(y * gamma[None, :, None, None] + beta[None, :, None, None], 0.0)


def building_block_reference(xyz, feature, neigh_idx, params):
    b, n, _ = xyz.shape
    rel_xyz = xyz[:, :, None, :] - _gather_neighbour(xyz, neigh_idx)
    w = jnp.transpose(rel_xyz, (0, 3, 1, 2))                        # [B, 3, N, K]
    for (cw, cb, g, be) in params["weightnet"]:
        w = _conv_bn_relu_ref(w, cw, cb, g, be)                     # [B, 16, N, K]
    feat_bnc = jnp.transpose(feature[..., 0], (0, 2, 1))
    rel_f = feat_bnc[:, :, None, :] - _gather_neighbour(feat_bnc, neigh_idx)
    fr = jnp.transpose(rel_f, (0, 3, 1, 2))                         # [B, C1, N, K]
    score = jax.nn.softmax(jnp.einsum("oc,bcnk->bonk", params["fc_w"], fr), axis=3)
    fr = score * fr
    for (cw, cb, g, be) in params["mlp"]:
        fr = _conv_bn_relu_ref(fr, cw, cb, g, be)                   # [B, C4, N, K]
    nf = jnp.einsum("bcnk,bonk->bnco", fr, w).reshape(b, n, -1)     # [B, N, C4*16]
    nf = nf @ params["lin_w"].T + params["lin_b"]                   # [B, N, C4]
    y = jnp.transpose(nf, (0, 2, 1))                                # [B, C4, N]
    mean = jnp.mean(y, axis=(0, 2), keepdims=True)
    var = jnp.mean((y - mean) ** 2, axis=(0, 2), keepdims=True)
    y = (y - mean) / jnp.sqrt(var + BN_EPS)
    y = y * params["bnl_g"][None, :, None] + params["bnl_b"][None, :, None]
    return y[..., None]                                             # [B, C4, N, 1]


if __name__ == "__main__":
    key = jax.random.PRNGKey(0)
    d_out = 8                         # Building_block(d_out=8): C1=4, output 2*d_out=16
    batch, npoint, nsample = 2, 16, 16

    kx, kf, ki, kp = jax.random.split(key, 4)
    xyz = jax.random.normal(kx, (batch, npoint, 3), jnp.float32)
    feature = jax.random.normal(kf, (batch, d_out // 2, npoint, 1), jnp.float32)
    neigh_idx = jax.random.randint(ki, (batch, npoint, nsample), 0, npoint,
                                   dtype=jnp.int32)

    params = init_building_block_params(kp, d_out)
    conv_w, conv_gb, fc_w, lin_wt, bnl_gb = pack_building_block_params(params)

    out = building_block_forward(xyz, feature, neigh_idx, conv_w, conv_gb,
                                 fc_w, lin_wt, bnl_gb)
    out = jax.block_until_ready(out)

    ref = building_block_reference(xyz, feature, neigh_idx, params)
    assert out.shape == (batch, 2 * d_out, npoint, 1), out.shape
    assert jnp.allclose(out, ref, atol=2e-3, rtol=2e-3), (
        "kernel output mismatch vs pure-JAX Building_block reference")

    print("KERNEL_OK")
</pallas_src>

<mosaic_0001>
module attributes {stable_mosaic.version = 11 : i64} {
  func.func @building_block_kernel(%arg0: memref<16x512xf32, #tpu.memory_space<vmem>>, %arg1: memref<16x512xf32, #tpu.memory_space<vmem>>, %arg2: memref<7x16x16xf32, #tpu.memory_space<vmem>>, %arg3: memref<7x2x16x1xf32, #tpu.memory_space<vmem>>, %arg4: memref<16x16xf32, #tpu.memory_space<vmem>>, %arg5: memref<256x16xf32, #tpu.memory_space<vmem>>, %arg6: memref<2x1x16xf32, #tpu.memory_space<vmem>>, %arg7: memref<32x16xf32, #tpu.memory_space<vmem>>) attributes {dimension_semantics = [], scalar_prefetch = 0 : i64, scratch_operands = 0 : i64, tpu.core_type = #tpu.core_type<tc>} {
    %c0 = arith.constant 0 : index
    %c0_0 = arith.constant 0 : index
    %0 = vector.load %arg0[%c0, %c0_0] : memref<16x512xf32, #tpu.memory_space<vmem>>, vector<16x512xf32>
    %c0_1 = arith.constant 0 : index
    %c0_2 = arith.constant 0 : index
    %c0_3 = arith.constant 0 : index
    %1 = vector.load %arg2[%c0_1, %c0_2, %c0_3] : memref<7x16x16xf32, #tpu.memory_space<vmem>>, vector<1x16x16xf32>
    %2 = vector.shape_cast %1 : vector<1x16x16xf32> to vector<16x16xf32>
    %cst = arith.constant dense<0.000000e+00> : vector<16x512xf32>
    %3 = tpu.matmul %2, %0, %cst {dimension_numbers = #tpu.dot_dimension_numbers<[1], [0], [0], [1], [0, 0, 1, 1], [], []>} : vector<16x16xf32>, vector<16x512xf32>, vector<16x512xf32> -> vector<16x512xf32>
    %cst_4 = arith.constant dense<0.000000e+00> : vector<16xf32>
    %4 = vector.multi_reduction <add>, %3, %cst_4 [1] : vector<16x512xf32> to vector<16xf32>
    %5 = vector.shape_cast %4 : vector<16xf32> to vector<16x1xf32>
    %cst_5 = arith.constant 0.001953125 : f32
    %6 = vector.broadcast %cst_5 : f32 to vector<16x1xf32>
    %7 = arith.mulf %5, %6 : vector<16x1xf32>
    %8 = vector.broadcast %7 : vector<16x1xf32> to vector<16x512xf32>
    %9 = arith.subf %3, %8 : vector<16x512xf32>
    %10 = arith.mulf %9, %9 : vector<16x512xf32>
    %cst_6 = arith.constant dense<0.000000e+00> : vector<16xf32>
    %11 = vector.multi_reduction <add>, %10, %cst_6 [1] : vector<16x512xf32> to vector<16xf32>
    %12 = vector.shape_cast %11 : vector<16xf32> to vector<16x1xf32>
    %cst_7 = arith.constant 0.001953125 : f32
    %13 = vector.broadcast %cst_7 : f32 to vector<16x1xf32>
    %14 = arith.mulf %12, %13 : vector<16x1xf32>
    %c0_8 = arith.constant 0 : index
    %c0_9 = arith.constant 0 : index
    %c0_10 = arith.constant 0 : index
    %c0_11 = arith.constant 0 : index
    %15 = vector.load %arg3[%c0_8, %c0_9, %c0_10, %c0_11] : memref<7x2x16x1xf32, #tpu.memory_space<vmem>>, vector<1x1x16x1xf32>
    %16 = vector.shape_cast %15 : vector<1x1x16x1xf32> to vector<16x1xf32>
    %cst_12 = arith.constant 9.99999974E-6 : f32
    %17 = vector.broadcast %cst_12 : f32 to vector<16x1xf32>
    %18 = arith.addf %14, %17 : vector<16x1xf32>
    %19 = math.rsqrt %18 : vector<16x1xf32>
    %20 = arith.mulf %16, %19 : vector<16x1xf32>
    %21 = vector.broadcast %20 : vector<16x1xf32> to vector<16x512xf32>
    %22 = arith.mulf %9, %21 : vector<16x512xf32>
    %c0_13 = arith.constant 0 : index
    %c1 = arith.constant 1 : index
    %c0_14 = arith.constant 0 : index
    %c0_15 = arith.constant 0 : index
    %23 = vector.load %arg3[%c0_13, %c1, %c0_14, %c0_15] : memref<7x2x16x1xf32, #tpu.memory_space<vmem>>, vector<1x1x16x1xf32>
    %24 = vector.shape_cast %23 : vector<1x1x16x1xf32> to vector<16x1xf32>
    %25 = vector.broadcast %24 : vector<16x1xf32> to vector<16x512xf32>
    %26 = arith.addf %22, %25 : vector<16x512xf32>
    %cst_16 = arith.constant 0.000000e+00 : f32
    %27 = vector.broadcast %cst_16 : f32 to vector<16x512xf32>
    %28 = arith.maximumf %26, %27 : vector<16x512xf32>
    %c1_17 = arith.constant 1 : index
    %c0_18 = arith.constant 0 : index
    %c0_19 = arith.constant 0 : index
    %29 = vector.load %arg2[%c1_17, %c0_18, %c0_19] : memref<7x16x16xf32, #tpu.memory_space<vmem>>, vector<1x16x16xf32>
    %30 = vector.shape_cast %29 : vector<1x16x16xf32> to vector<16x16xf32>
    %cst_20 = arith.constant dense<0.000000e+00> : vector<16x512xf32>
    %31 = tpu.matmul %30, %28, %cst_20 {dimension_numbers = #tpu.dot_dimension_numbers<[1], [0], [0], [1], [0, 0, 1, 1], [], []>} : vector<16x16xf32>, vector<16x512xf32>, vector<16x512xf32> -> vector<16x512xf32>
    %cst_21 = arith.constant dense<0.000000e+00> : vector<16xf32>
    %32 = vector.multi_reduction <add>, %31, %cst_21 [1] : vector<16x512xf32> to vector<16xf32>
    %33 = vector.shape_cast %32 : vector<16xf32> to vector<16x1xf32>
    %cst_22 = arith.constant 0.001953125 : f32
    %34 = vector.broadcast %cst_22 : f32 to vector<16x1xf32>
    %35 = arith.mulf %33, %34 : vector<16x1xf32>
    %36 = vector.broadcast %35 : vector<16x1xf32> to vector<16x512xf32>
    %37 = arith.subf %31, %36 : vector<16x512xf32>
    %38 = arith.mulf %37, %37 : vector<16x512xf32>
    %cst_23 = arith.constant dense<0.000000e+00> : vector<16xf32>
    %39 = vector.multi_reduction <add>, %38, %cst_23 [1] : vector<16x512xf32> to vector<16xf32>
    %40 = vector.shape_cast %39 : vector<16xf32> to vector<16x1xf32>
    %cst_24 = arith.constant 0.001953125 : f32
    %41 = vector.broadcast %cst_24 : f32 to vector<16x1xf32>
    %42 = arith.mulf %40, %41 : vector<16x1xf32>
    %c1_25 = arith.constant 1 : index
    %c0_26 = arith.constant 0 : index
    %c0_27 = arith.constant 0 : index
    %c0_28 = arith.constant 0 : index
    %43 = vector.load %arg3[%c1_25, %c0_26, %c0_27, %c0_28] : memref<7x2x16x1xf32, #tpu.memory_space<vmem>>, vector<1x1x16x1xf32>
    %44 = vector.shape_cast %43 : vector<1x1x16x1xf32> to vector<16x1xf32>
    %cst_29 = arith.constant 9.99999974E-6 : f32
    %45 = vector.broadcast %cst_29 : f32 to vector<16x1xf32>
    %46 = arith.addf %42, %45 : vector<16x1xf32>
    %47 = math.rsqrt %46 : vector<16x1xf32>
    %48 = arith.mulf %44, %47 : vector<16x1xf32>
    %49 = vector.broadcast %48 : vector<16x1xf32> to vector<16x512xf32>
    %50 = arith.mulf %37, %49 : vector<16x512xf32>
    %c1_30 = arith.constant 1 : index
    %c1_31 = arith.constant 1 : index
    %c0_32 = arith.constant 0 : index
    %c0_33 = arith.constant 0 : index
    %51 = vector.load %arg3[%c1_30, %c1_31, %c0_32, %c0_33] : memref<7x2x16x1xf32, #tpu.memory_space<vmem>>, vector<1x1x16x1xf32>
    %52 = vector.shape_cast %51 : vector<1x1x16x1xf32> to vector<16x1xf32>
    %53 = vector.broadcast %52 : vector<16x1xf32> to vector<16x512xf32>
    %54 = arith.addf %50, %53 : vector<16x512xf32>
    %cst_34 = arith.constant 0.000000e+00 : f32
    %55 = vector.broadcast %cst_34 : f32 to vector<16x512xf32>
    %56 = arith.maximumf %54, %55 : vector<16x512xf32>
    %c2 = arith.constant 2 : index
    %c0_35 = arith.constant 0 : index
    %c0_36 = arith.constant 0 : index
    %57 = vector.load %arg2[%c2, %c0_35, %c0_36] : memref<7x16x16xf32, #tpu.memory_space<vmem>>, vector<1x16x16xf32>
    %58 = vector.shape_cast %57 : vector<1x16x16xf32> to vector<16x16xf32>
    %cst_37 = arith.constant dense<0.000000e+00> : vector<16x512xf32>
    %59 = tpu.matmul %58, %56, %cst_37 {dimension_numbers = #tpu.dot_dimension_numbers<[1], [0], [0], [1], [0, 0, 1, 1], [], []>} : vector<16x16xf32>, vector<16x512xf32>, vector<16x512xf32> -> vector<16x512xf32>
    %cst_38 = arith.constant dense<0.000000e+00> : vector<16xf32>
    %60 = vector.multi_reduction <add>, %59, %cst_38 [1] : vector<16x512xf32> to vector<16xf32>
    %61 = vector.shape_cast %60 : vector<16xf32> to vector<16x1xf32>
    %cst_39 = arith.constant 0.001953125 : f32
    %62 = vector.broadcast %cst_39 : f32 to vector<16x1xf32>
    %63 = arith.mulf %61, %62 : vector<16x1xf32>
    %64 = vector.broadcast %63 : vector<16x1xf32> to vector<16x512xf32>
    %65 = arith.subf %59, %64 : vector<16x512xf32>
    %66 = arith.mulf %65, %65 : vector<16x512xf32>
    %cst_40 = arith.constant dense<0.000000e+00> : vector<16xf32>
    %67 = vector.multi_reduction <add>, %66, %cst_40 [1] : vector<16x512xf32> to vector<16xf32>
    %68 = vector.shape_cast %67 : vector<16xf32> to vector<16x1xf32>
    %cst_41 = arith.constant 0.001953125 : f32
    %69 = vector.broadcast %cst_41 : f32 to vector<16x1xf32>
    %70 = arith.mulf %68, %69 : vector<16x1xf32>
    %c2_42 = arith.constant 2 : index
    %c0_43 = arith.constant 0 : index
    %c0_44 = arith.constant 0 : index
    %c0_45 = arith.constant 0 : index
    %71 = vector.load %arg3[%c2_42, %c0_43, %c0_44, %c0_45] : memref<7x2x16x1xf32, #tpu.memory_space<vmem>>, vector<1x1x16x1xf32>
    %72 = vector.shape_cast %71 : vector<1x1x16x1xf32> to vector<16x1xf32>
    %cst_46 = arith.constant 9.99999974E-6 : f32
    %73 = vector.broadcast %cst_46 : f32 to vector<16x1xf32>
    %74 = arith.addf %70, %73 : vector<16x1xf32>
    %75 = math.rsqrt %74 : vector<16x1xf32>
    %76 = arith.mulf %72, %75 : vector<16x1xf32>
    %77 = vector.broadcast %76 : vector<16x1xf32> to vector<16x512xf32>
    %78 = arith.mulf %65, %77 : vector<16x512xf32>
    %c2_47 = arith.constant 2 : index
    %c1_48 = arith.constant 1 : index
    %c0_49 = arith.constant 0 : index
    %c0_50 = arith.constant 0 : index
    %79 = vector.load %arg3[%c2_47, %c1_48, %c0_49, %c0_50] : memref<7x2x16x1xf32, #tpu.memory_space<vmem>>, vector<1x1x16x1xf32>
    %80 = vector.shape_cast %79 : vector<1x1x16x1xf32> to vector<16x1xf32>
    %81 = vector.broadcast %80 : vector<16x1xf32> to vector<16x512xf32>
    %82 = arith.addf %78, %81 : vector<16x512xf32>
    %cst_51 = arith.constant 0.000000e+00 : f32
    %83 = vector.broadcast %cst_51 : f32 to vector<16x512xf32>
    %84 = arith.maximumf %82, %83 : vector<16x512xf32>
    %c0_52 = arith.constant 0 : index
    %c0_53 = arith.constant 0 : index
    %85 = vector.load %arg1[%c0_52, %c0_53] : memref<16x512xf32, #tpu.memory_space<vmem>>, vector<16x512xf32>
    %c0_54 = arith.constant 0 : index
    %c0_55 = arith.constant 0 : index
    %86 = vector.load %arg4[%c0_54, %c0_55] : memref<16x16xf32, #tpu.memory_space<vmem>>, vector<16x16xf32>
    %cst_56 = arith.constant dense<0.000000e+00> : vector<16x512xf32>
    %87 = tpu.matmul %86, %85, %cst_56 {dimension_numbers = #tpu.dot_dimension_numbers<[1], [0], [0], [1], [0, 0, 1, 1], [], []>} : vector<16x16xf32>, vector<16x512xf32>, vector<16x512xf32> -> vector<16x512xf32>
    %88 = vector.shape_cast %87 : vector<16x512xf32> to vector<16x32x16xf32>
    %cst_57 = arith.constant dense<0xFF800000> : vector<16x32xf32>
    %89 = vector.multi_reduction <maximumf>, %88, %cst_57 [2] : vector<16x32x16xf32> to vector<16x32xf32>
    %90 = vector.shape_cast %89 : vector<16x32xf32> to vector<16x32x1xf32>
    %91 = vector.broadcast %90 : vector<16x32x1xf32> to vector<16x32x16xf32>
    %92 = arith.subf %88, %91 : vector<16x32x16xf32>
    %93 = math.exp %92 : vector<16x32x16xf32>
    %cst_58 = arith.constant dense<0.000000e+00> : vector<16x32xf32>
    %94 = vector.multi_reduction <add>, %93, %cst_58 [2] : vector<16x32x16xf32> to vector<16x32xf32>
    %95 = vector.shape_cast %94 : vector<16x32xf32> to vector<16x32x1xf32>
    %96 = vector.broadcast %95 : vector<16x32x1xf32> to vector<16x32x16xf32>
    %97 = arith.divf %93, %96 : vector<16x32x16xf32>
    %98 = vector.shape_cast %97 : vector<16x32x16xf32> to vector<16x512xf32>
    %99 = arith.mulf %98, %85 : vector<16x512xf32>
    %c3 = arith.constant 3 : index
    %c0_59 = arith.constant 0 : index
    %c0_60 = arith.constant 0 : index
    %100 = vector.load %arg2[%c3, %c0_59, %c0_60] : memref<7x16x16xf32, #tpu.memory_space<vmem>>, vector<1x16x16xf32>
    %101 = vector.shape_cast %100 : vector<1x16x16xf32> to vector<16x16xf32>
    %cst_61 = arith.constant dense<0.000000e+00> : vector<16x512xf32>
    %102 = tpu.matmul %101, %99, %cst_61 {dimension_numbers = #tpu.dot_dimension_numbers<[1], [0], [0], [1], [0, 0, 1, 1], [], []>} : vector<16x16xf32>, vector<16x512xf32>, vector<16x512xf32> -> vector<16x512xf32>
    %cst_62 = arith.constant dense<0.000000e+00> : vector<16xf32>
    %103 = vector.multi_reduction <add>, %102, %cst_62 [1] : vector<16x512xf32> to vector<16xf32>
    %104 = vector.shape_cast %103 : vector<16xf32> to vector<16x1xf32>
    %cst_63 = arith.constant 0.001953125 : f32
    %105 = vector.broadcast %cst_63 : f32 to vector<16x1xf32>
    %106 = arith.mulf %104, %105 : vector<16x1xf32>
    %107 = vector.broadcast %106 : vector<16x1xf32> to vector<16x512xf32>
    %108 = arith.subf %102, %107 : vector<16x512xf32>
    %109 = arith.mulf %108, %108 : vector<16x512xf32>
    %cst_64 = arith.constant dense<0.000000e+00> : vector<16xf32>
    %110 = vector.multi_reduction <add>, %109, %cst_64 [1] : vector<16x512xf32> to vector<16xf32>
    %111 = vector.shape_cast %110 : vector<16xf32> to vector<16x1xf32>
    %cst_65 = arith.constant 0.001953125 : f32
    %112 = vector.broadcast %cst_65 : f32 to vector<16x1xf32>
    %113 = arith.mulf %111, %112 : vector<16x1xf32>
    %c3_66 = arith.constant 3 : index
    %c0_67 = arith.constant 0 : index
    %c0_68 = arith.constant 0 : index
    %c0_69 = arith.constant 0 : index
    %114 = vector.load %arg3[%c3_66, %c0_67, %c0_68, %c0_69] : memref<7x2x16x1xf32, #tpu.memory_space<vmem>>, vector<1x1x16x1xf32>
    %115 = vector.shape_cast %114 : vector<1x1x16x1xf32> to vector<16x1xf32>
    %cst_70 = arith.constant 9.99999974E-6 : f32
    %116 = vector.broadcast %cst_70 : f32 to vector<16x1xf32>
    %117 = arith.addf %113, %116 : vector<16x1xf32>
    %118 = math.rsqrt %117 : vector<16x1xf32>
    %119 = arith.mulf %115, %118 : vector<16x1xf32>
    %120 = vector.broadcast %119 : vector<16x1xf32> to vector<16x512xf32>
    %121 = arith.mulf %108, %120 : vector<16x512xf32>
    %c3_71 = arith.constant 3 : index
    %c1_72 = arith.constant 1 : index
    %c0_73 = arith.constant 0 : index
    %c0_74 = arith.constant 0 : index
    %122 = vector.load %arg3[%c3_71, %c1_72, %c0_73, %c0_74] : memref<7x2x16x1xf32, #tpu.memory_space<vmem>>, vector<1x1x16x1xf32>
    %123 = vector.shape_cast %122 : vector<1x1x16x1xf32> to vector<16x1xf32>
    %124 = vector.broadcast %123 : vector<16x1xf32> to vector<16x512xf32>
    %125 = arith.addf %121, %124 : vector<16x512xf32>
    %cst_75 = arith.constant 0.000000e+00 : f32
    %126 = vector.broadcast %cst_75 : f32 to vector<16x512xf32>
    %127 = arith.maximumf %125, %126 : vector<16x512xf32>
    %c4 = arith.constant 4 : index
    %c0_76 = arith.constant 0 : index
    %c0_77 = arith.constant 0 : index
    %128 = vector.load %arg2[%c4, %c0_76, %c0_77] : memref<7x16x16xf32, #tpu.memory_space<vmem>>, vector<1x16x16xf32>
    %129 = vector.shape_cast %128 : vector<1x16x16xf32> to vector<16x16xf32>
    %cst_78 = arith.constant dense<0.000000e+00> : vector<16x512xf32>
    %130 = tpu.matmul %129, %127, %cst_78 {dimension_numbers = #tpu.dot_dimension_numbers<[1], [0], [0], [1], [0, 0, 1, 1], [], []>} : vector<16x16xf32>, vector<16x512xf32>, vector<16x512xf32> -> vector<16x512xf32>
    %cst_79 = arith.constant dense<0.000000e+00> : vector<16xf32>
    %131 = vector.multi_reduction <add>, %130, %cst_79 [1] : vector<16x512xf32> to vector<16xf32>
    %132 = vector.shape_cast %131 : vector<16xf32> to vector<16x1xf32>
    %cst_80 = arith.constant 0.001953125 : f32
    %133 = vector.broadcast %cst_80 : f32 to vector<16x1xf32>
    %134 = arith.mulf %132, %133 : vector<16x1xf32>
    %135 = vector.broadcast %134 : vector<16x1xf32> to vector<16x512xf32>
    %136 = arith.subf %130, %135 : vector<16x512xf32>
    %137 = arith.mulf %136, %136 : vector<16x512xf32>
    %cst_81 = arith.constant dense<0.000000e+00> : vector<16xf32>
    %138 = vector.multi_reduction <add>, %137, %cst_81 [1] : vector<16x512xf32> to vector<16xf32>
    %139 = vector.shape_cast %138 : vector<16xf32> to vector<16x1xf32>
    %cst_82 = arith.constant 0.001953125 : f32
    %140 = vector.broadcast %cst_82 : f32 to vector<16x1xf32>
    %141 = arith.mulf %139, %140 : vector<16x1xf32>
    %c4_83 = arith.constant 4 : index
    %c0_84 = arith.constant 0 : index
    %c0_85 = arith.constant 0 : index
    %c0_86 = arith.constant 0 : index
    %142 = vector.load %arg3[%c4_83, %c0_84, %c0_85, %c0_86] : memref<7x2x16x1xf32, #tpu.memory_space<vmem>>, vector<1x1x16x1xf32>
    %143 = vector.shape_cast %142 : vector<1x1x16x1xf32> to vector<16x1xf32>
    %cst_87 = arith.constant 9.99999974E-6 : f32
    %144 = vector.broadcast %cst_87 : f32 to vector<16x1xf32>
    %145 = arith.addf %141, %144 : vector<16x1xf32>
    %146 = math.rsqrt %145 : vector<16x1xf32>
    %147 = arith.mulf %143, %146 : vector<16x1xf32>
    %148 = vector.broadcast %147 : vector<16x1xf32> to vector<16x512xf32>
    %149 = arith.mulf %136, %148 : vector<16x512xf32>
    %c4_88 = arith.constant 4 : index
    %c1_89 = arith.constant 1 : index
    %c0_90 = arith.constant 0 : index
    %c0_91 = arith.constant 0 : index
    %150 = vector.load %arg3[%c4_88, %c1_89, %c0_90, %c0_91] : memref<7x2x16x1xf32, #tpu.memory_space<vmem>>, vector<1x1x16x1xf32>
    %151 = vector.shape_cast %150 : vector<1x1x16x1xf32> to vector<16x1xf32>
    %152 = vector.broadcast %151 : vector<16x1xf32> to vector<16x512xf32>
    %153 = arith.addf %149, %152 : vector<16x512xf32>
    %cst_92 = arith.constant 0.000000e+00 : f32
    %154 = vector.broadcast %cst_92 : f32 to vector<16x512xf32>
    %155 = arith.maximumf %153, %154 : vector<16x512xf32>
    %c5 = arith.constant 5 : index
    %c0_93 = arith.constant 0 : index
    %c0_94 = arith.constant 0 : index
    %156 = vector.load %arg2[%c5, %c0_93, %c0_94] : memref<7x16x16xf32, #tpu.memory_space<vmem>>, vector<1x16x16xf32>
    %157 = vector.shape_cast %156 : vector<1x16x16xf32> to vector<16x16xf32>
    %cst_95 = arith.constant dense<0.000000e+00> : vector<16x512xf32>
    %158 = tpu.matmul %157, %155, %cst_95 {dimension_numbers = #tpu.dot_dimension_numbers<[1], [0], [0], [1], [0, 0, 1, 1], [], []>} : vector<16x16xf32>, vector<16x512xf32>, vector<16x512xf32> -> vector<16x512xf32>
    %cst_96 = arith.constant dense<0.000000e+00> : vector<16xf32>
    %159 = vector.multi_reduction <add>, %158, %cst_96 [1] : vector<16x512xf32> to vector<16xf32>
    %160 = vector.shape_cast %159 : vector<16xf32> to vector<16x1xf32>
    %cst_97 = arith.constant 0.001953125 : f32
    %161 = vector.broadcast %cst_97 : f32 to vector<16x1xf32>
    %162 = arith.mulf %160, %161 : vector<16x1xf32>
    %163 = vector.broadcast %162 : vector<16x1xf32> to vector<16x512xf32>
    %164 = arith.subf %158, %163 : vector<16x512xf32>
    %165 = arith.mulf %164, %164 : vector<16x512xf32>
    %cst_98 = arith.constant dense<0.000000e+00> : vector<16xf32>
    %166 = vector.multi_reduction <add>, %165, %cst_98 [1] : vector<16x512xf32> to vector<16xf32>
    %167 = vector.shape_cast %166 : vector<16xf32> to vector<16x1xf32>
    %cst_99 = arith.constant 0.001953125 : f32
    %168 = vector.broadcast %cst_99 : f32 to vector<16x1xf32>
    %169 = arith.mulf %167, %168 : vector<16x1xf32>
    %c5_100 = arith.constant 5 : index
    %c0_101 = arith.constant 0 : index
    %c0_102 = arith.constant 0 : index
    %c0_103 = arith.constant 0 : index
    %170 = vector.load %arg3[%c5_100, %c0_101, %c0_102, %c0_103] : memref<7x2x16x1xf32, #tpu.memory_space<vmem>>, vector<1x1x16x1xf32>
    %171 = vector.shape_cast %170 : vector<1x1x16x1xf32> to vector<16x1xf32>
    %cst_104 = arith.constant 9.99999974E-6 : f32
    %172 = vector.broadcast %cst_104 : f32 to vector<16x1xf32>
    %173 = arith.addf %169, %172 : vector<16x1xf32>
    %174 = math.rsqrt %173 : vector<16x1xf32>
    %175 = arith.mulf %171, %174 : vector<16x1xf32>
    %176 = vector.broadcast %175 : vector<16x1xf32> to vector<16x512xf32>
    %177 = arith.mulf %164, %176 : vector<16x512xf32>
    %c5_105 = arith.constant 5 : index
    %c1_106 = arith.constant 1 : index
    %c0_107 = arith.constant 0 : index
    %c0_108 = arith.constant 0 : index
    %178 = vector.load %arg3[%c5_105, %c1_106, %c0_107, %c0_108] : memref<7x2x16x1xf32, #tpu.memory_space<vmem>>, vector<1x1x16x1xf32>
    %179 = vector.shape_cast %178 : vector<1x1x16x1xf32> to vector<16x1xf32>
    %180 = vector.broadcast %179 : vector<16x1xf32> to vector<16x512xf32>
    %181 = arith.addf %177, %180 : vector<16x512xf32>
    %cst_109 = arith.constant 0.000000e+00 : f32
    %182 = vector.broadcast %cst_109 : f32 to vector<16x512xf32>
    %183 = arith.maximumf %181, %182 : vector<16x512xf32>
    %c6 = arith.constant 6 : index
    %c0_110 = arith.constant 0 : index
    %c0_111 = arith.constant 0 : index
    %184 = vector.load %arg2[%c6, %c0_110, %c0_111] : memref<7x16x16xf32, #tpu.memory_space<vmem>>, vector<1x16x16xf32>
    %185 = vector.shape_cast %184 : vector<1x16x16xf32> to vector<16x16xf32>
    %cst_112 = arith.constant dense<0.000000e+00> : vector<16x512xf32>
    %186 = tpu.matmul %185, %183, %cst_112 {dimension_numbers = #tpu.dot_dimension_numbers<[1], [0], [0], [1], [0, 0, 1, 1], [], []>} : vector<16x16xf32>, vector<16x512xf32>, vector<16x512xf32> -> vector<16x512xf32>
    %cst_113 = arith.constant dense<0.000000e+00> : vector<16xf32>
    %187 = vector.multi_reduction <add>, %186, %cst_113 [1] : vector<16x512xf32> to vector<16xf32>
    %188 = vector.shape_cast %187 : vector<16xf32> to vector<16x1xf32>
    %cst_114 = arith.constant 0.001953125 : f32
    %189 = vector.broadcast %cst_114 : f32 to vector<16x1xf32>
    %190 = arith.mulf %188, %189 : vector<16x1xf32>
    %191 = vector.broadcast %190 : vector<16x1xf32> to vector<16x512xf32>
    %192 = arith.subf %186, %191 : vector<16x512xf32>
    %193 = arith.mulf %192, %192 : vector<16x512xf32>
    %cst_115 = arith.constant dense<0.000000e+00> : vector<16xf32>
    %194 = vector.multi_reduction <add>, %193, %cst_115 [1] : vector<16x512xf32> to vector<16xf32>
    %195 = vector.shape_cast %194 : vector<16xf32> to vector<16x1xf32>
    %cst_116 = arith.constant 0.001953125 : f32
    %196 = vector.broadcast %cst_116 : f32 to vector<16x1xf32>
    %197 = arith.mulf %195, %196 : vector<16x1xf32>
    %c6_117 = arith.constant 6 : index
    %c0_118 = arith.constant 0 : index
    %c0_119 = arith.constant 0 : index
    %c0_120 = arith.constant 0 : index
    %198 = vector.load %arg3[%c6_117, %c0_118, %c0_119, %c0_120] : memref<7x2x16x1xf32, #tpu.memory_space<vmem>>, vector<1x1x16x1xf32>
    %199 = vector.shape_cast %198 : vector<1x1x16x1xf32> to vector<16x1xf32>
    %cst_121 = arith.constant 9.99999974E-6 : f32
    %200 = vector.broadcast %cst_121 : f32 to vector<16x1xf32>
    %201 = arith.addf %197, %200 : vector<16x1xf32>
    %202 = math.rsqrt %201 : vector<16x1xf32>
    %203 = arith.mulf %199, %202 : vector<16x1xf32>
    %204 = vector.broadcast %203 : vector<16x1xf32> to vector<16x512xf32>
    %205 = arith.mulf %192, %204 : vector<16x512xf32>
    %c6_122 = arith.constant 6 : index
    %c1_123 = arith.constant 1 : index
    %c0_124 = arith.constant 0 : index
    %c0_125 = arith.constant 0 : index
    %206 = vector.load %arg3[%c6_122, %c1_123, %c0_124, %c0_125] : memref<7x2x16x1xf32, #tpu.memory_space<vmem>>, vector<1x1x16x1xf32>
    %207 = vector.shape_cast %206 : vector<1x1x16x1xf32> to vector<16x1xf32>
    %208 = vector.broadcast %207 : vector<16x1xf32> to vector<16x512xf32>
    %209 = arith.addf %205, %208 : vector<16x512xf32>
    %cst_126 = arith.constant 0.000000e+00 : f32
    %210 = vector.broadcast %cst_126 : f32 to vector<16x512xf32>
    %211 = arith.maximumf %209, %210 : vector<16x512xf32>
    %212 = vector.shape_cast %211 : vector<16x512xf32> to vector<16x32x16xf32>
    %213 = tpu.transpose %212, [1, 0, 2] : vector<16x32x16xf32> -> vector<32x16x16xf32>
    %214 = vector.shape_cast %84 : vector<16x512xf32> to vector<16x32x16xf32>
    %215 = tpu.transpose %214, [1, 0, 2] : vector<16x32x16xf32> -> vector<32x16x16xf32>
    "tpu.trace_start"() <{level = 10 : i32, message = "mck,mok->mco"}> : () -> ()
    %cst_127 = arith.constant dense<0.000000e+00> : vector<32x16x16xf32>
    %216 = tpu.matmul %213, %215, %cst_127 {dimension_numbers = #tpu.dot_dimension_numbers<[2], [2], [1], [1], [0, 0, 0, 1, 1, 1], [0], [0]>} : vector<32x16x16xf32>, vector<32x16x16xf32>, vector<32x16x16xf32> -> vector<32x16x16xf32>
    "tpu.trace_stop"() : () -> ()
    %217 = vector.shape_cast %216 : vector<32x16x16xf32> to vector<32x256xf32>
    %c0_128 = arith.constant 0 : index
    %c0_129 = arith.constant 0 : index
    %218 = vector.load %arg5[%c0_128, %c0_129] : memref<256x16xf32, #tpu.memory_space<vmem>>, vector<256x16xf32>
    %cst_130 = arith.constant dense<0.000000e+00> : vector<32x16xf32>
    %219 = tpu.matmul %217, %218, %cst_130 {dimension_numbers = #tpu.dot_dimension_numbers<[1], [0], [0], [1], [0, 0, 1, 1], [], []>} : vector<32x256xf32>, vector<256x16xf32>, vector<32x16xf32> -> vector<32x16xf32>
    %cst_131 = arith.constant dense<0.000000e+00> : vector<16xf32>
    %220 = vector.multi_reduction <add>, %219, %cst_131 [0] : vector<32x16xf32> to vector<16xf32>
    %221 = vector.shape_cast %220 : vector<16xf32> to vector<1x16xf32>
    %cst_132 = arith.constant 3.125000e-02 : f32
    %222 = vector.broadcast %cst_132 : f32 to vector<1x16xf32>
    %223 = arith.mulf %221, %222 : vector<1x16xf32>
    %224 = vector.broadcast %223 : vector<1x16xf32> to vector<32x16xf32>
    %225 = arith.subf %219, %224 : vector<32x16xf32>
    %226 = arith.mulf %225, %225 : vector<32x16xf32>
    %cst_133 = arith.constant dense<0.000000e+00> : vector<16xf32>
    %227 = vector.multi_reduction <add>, %226, %cst_133 [0] : vector<32x16xf32> to vector<16xf32>
    %228 = vector.shape_cast %227 : vector<16xf32> to vector<1x16xf32>
    %cst_134 = arith.constant 3.125000e-02 : f32
    %229 = vector.broadcast %cst_134 : f32 to vector<1x16xf32>
    %230 = arith.mulf %228, %229 : vector<1x16xf32>
    %c0_135 = arith.constant 0 : index
    %c0_136 = arith.constant 0 : index
    %c0_137 = arith.constant 0 : index
    %231 = vector.load %arg6[%c0_135, %c0_136, %c0_137] : memref<2x1x16xf32, #tpu.memory_space<vmem>>, vector<1x1x16xf32>
    %232 = vector.shape_cast %231 : vector<1x1x16xf32> to vector<1x16xf32>
    %cst_138 = arith.constant 9.99999974E-6 : f32
    %233 = vector.broadcast %cst_138 : f32 to vector<1x16xf32>
    %234 = arith.addf %230, %233 : vector<1x16xf32>
    %235 = math.rsqrt %234 : vector<1x16xf32>
    %236 = arith.mulf %232, %235 : vector<1x16xf32>
    %237 = vector.broadcast %236 : vector<1x16xf32> to vector<32x16xf32>
    %238 = arith.mulf %225, %237 : vector<32x16xf32>
    %c1_139 = arith.constant 1 : index
    %c0_140 = arith.constant 0 : index
    %c0_141 = arith.constant 0 : index
    %239 = vector.load %arg6[%c1_139, %c0_140, %c0_141] : memref<2x1x16xf32, #tpu.memory_space<vmem>>, vector<1x1x16xf32>
    %240 = vector.shape_cast %239 : vector<1x1x16xf32> to vector<1x16xf32>
    %241 = vector.broadcast %240 : vector<1x16xf32> to vector<32x16xf32>
    %242 = arith.addf %238, %241 : vector<32x16xf32>
    %c0_142 = arith.constant 0 : index
    %c0_143 = arith.constant 0 : index
    %243 = vector.load %arg7[%c0_142, %c0_143] : memref<32x16xf32, #tpu.memory_space<vmem>>, vector<32x16xf32>
    tpu.vector_store %arg7[%c0_142, %c0_143], %242 {strides = array<i32>} : memref<32x16xf32, #tpu.memory_space<vmem>>, vector<32x16xf32>,
    return
  }
}

</mosaic_0001>

<bundles_post_ra>
// kernel: building_block_forward.1
= control target key start
LH: loop header
LB: loop body
LE: loop exit
PB: predicated region body
PF: predicated region fallthrough
CT: control target
= control target key end

     0   :  { %v20368_v3 = vmov 0.0   ;;  %vm36_vm0 = vcmask 130048   ;;  %v15583_v51 = vmov 0   ;;  %s15584_s17 = smov 112   ;;  %s15585_s18 = smov 80   ;;  %vm4262_vm1 = vcmask 261120   ;;  %s20360_s0 = inlined_call_operand.vmem [shape: f32[16,512], index: 0, kind: input, shape index: {}]   ;;  %s20361_s2 = inlined_call_operand.vmem [shape: f32[7,16,16], index: 2, kind: input, shape index: {}]   ;;  %s20362_s1 = inlined_call_operand.vmem [shape: f32[16,512], index: 1, kind: input, shape index: {}]   ;;  %s20363_s4 = inlined_call_operand.vmem [shape: f32[16,16], index: 4, kind: input, shape index: {}]   ;;  %s20364_s3 = inlined_call_operand.vmem [shape: f32[7,2,16,1], index: 3, kind: input, shape index: {}]   ;;  %s20365_s5 = inlined_call_operand.vmem [shape: f32[256,16], index: 5, kind: input, shape index: {}]   ;;  %s20366_s6 = inlined_call_operand.vmem [shape: f32[2,1,16], index: 6, kind: input, shape index: {}]   ;;  %s20367_s7 = inlined_call_operand.vmem [shape: f32[32,16], index: 7, kind: output, shape index: {}]  }
   0x1   :  { %v31_v0 = vld [vmem:[%s20360_s0 + $0x28] sm:$0xff]  ;;  %v30_v1 = vld [vmem:[%s20360_s0 + $0x20] sm:$0xff]  ;;  %107 = vmatprep.mubr.f32.mxu1 %v20368_v3  ;;  %890 = vmatprep.mubr.f32.mxu0 %v20368_v3  ;;  %v33_v6 = vld [vmem:[%s20360_s0 + $0x38] sm:$0xff]  ;;  %s15586_s19 = smov 48   ;;  %s15587_s20 = smov 16   ;;  %vm4265_vm2 = vcmask 392192  }
   0x2   :  { %v27_v2 = vld [vmem:[%s20360_s0 + $0x8] sm:$0xff]  ;;  %71 = vmatprep.subr.mxu1 %v31_v0  ;;  %v26_v4 = vld [vmem:[%s20360_s0] sm:$0xff]  ;;  %v32_v7 = vld [vmem:[%s20360_s0 + $0x30] sm:$0xff]  ;;  %15144 = vset.pattern.permute.xlu0 %v15583_v51  ;;  %s15589_s21 = smov 64   ;;  %s15590_s22 = smov 32   ;;  %vm4268_vm3 = vcmask 523264  }
   0x3   :  { %72 = vmatpush1.msra.mxu1 %v30_v1  ;;  %v34_v5 = vld [vmem:[%s20361_s2] sm:$0xff]  ;;  %v29_v8 = vld [vmem:[%s20360_s0 + $0x18] sm:$0xff]  ;;  %v28_v9 = vld [vmem:[%s20360_s0 + $0x10] sm:$0xff]  ;;  %15145 = vset.pattern.permute.xlu1 %v15583_v51  ;;  %s15588_s0 = smov 96   ;;  %vm4271_vm4 = vcmask 654336   ;;  %vm4274_vm5 = vcmask 785408  }
   0x4   :  { %73 = vmatprep.subr.mxu1 %v27_v2  ;;  %v35_v10 = vld [vmem:[%s20361_s2 + $0x8] sm:$0xff]  ;;  %v814_v53 = vld [vmem:[%s20362_s1 + $0x20] sm:$0xff]  ;;  %vm4277_vm6 = vcmask 916480  }
   0x5   :  { %74 = vmatpush1.msra.mxu1 %v26_v4  ;;  %v815_v52 = vld [vmem:[%s20362_s1 + $0x28] sm:$0xff]  ;;  %v810_v55 = vld [vmem:[%s20362_s1] sm:$0xff] }
   0x6   :  { %14409 = vmatmul.mubr.msk.f32.vlgmr.msra.gmra.mxu1 %vm36_vm0, %v34_v5  ;;  %148 = vmatprep.subr.mxu1 %v33_v6  ;;  %v811_v54 = vld [vmem:[%s20362_s1 + $0x8] sm:$0xff]  ;;  %v818_v56 = vld [vmem:[%s20363_s4] sm:$0xff] }
   0x7   :  { %113 = vmatprep.mubr.f32.mxu1 %v20368_v3  ;;  %149 = vmatpush1.msra.mxu1 %v32_v7  ;;  %v819_v57 = vld [vmem:[%s20363_s4 + $0x8] sm:$0xff]  ;;  %v237_v4 = vld [vmem:[%s20364_s3] sm:$0xff]  ;;  %v14414_v7 = vld [vmem:[%s20364_s3 + $0x18] sm:$0xff] }
   0x8   :  { %150 = vmatprep.subr.mxu1 %v29_v8  ;;  %854 = vmatprep.subr.mxu0 %v815_v52  ;;  %v238_v0 = vld [vmem:[%s20364_s3 + $0x8] sm:$0xff]  ;;  %v14413_v8 = vld [vmem:[%s20364_s3 + $0x10] sm:$0xff] }
   0x9   :  { %151 = vmatpush1.msra.mxu1 %v28_v9  ;;  %855 = vmatpush1.msra.mxu0 %v814_v53 }
   0xa   :  { %14410 = vmatmul.mubr.msk.f32.gmra.mxu1 %vm36_vm0, %v35_v10  ;;  %856 = vmatprep.subr.mxu0 %v811_v54 }
   0xb   :  { %184 = vmatprep.mubr.f32.mxu1 %v20368_v3  ;;  %857 = vmatpush1.msra.mxu0 %v810_v55 }
   0xc   :  { %14435 = vmatmul.mubr.msk.f32.vlgmr.msra.gmra.mxu0 %vm36_vm0, %v818_v56 }
   0xd   :  { %896 = vmatprep.mubr.f32.mxu0 %v20368_v3 }
   0xe   :  { %14411 = vmatmul.mubr.msk.f32.vlgmr.msra.gmra.mxu1 %vm36_vm0, %v34_v5 }
   0xf   :  { %190 = vmatprep.mubr.f32.mxu1 %v20368_v3 }
  0x10   :  { %14436 = vmatmul.mubr.msk.f32.gmra.mxu0 %vm36_vm0, %v819_v57 }
  0x11   :  { %4403 = vmatprep.mubr.f32.mxu0 %v20368_v3 }
  0x12   :  { %14412 = vmatmul.mubr.msk.f32.gmra.mxu1 %vm36_vm0, %v35_v10 }
  0x13   :  { %365 = vmatprep.mubr.f32.mxu1 %v20368_v3 }
  0xc6   :  { %v109_v11 = vpop.f32.mrf.mxu1 }
  0xc8   :  { %v111_v12 = vpop.f32.mrf.mxu1 }
  0xc9   :  { %v197_v19 = vadd.f32 %v111_v12, %v109_v11 }
  0xca   :  { %v115_v13 = vpop.f32.mrf.mxu1 }
  0xcc   :  { %v117_v14 = vpop.f32.mrf.mxu1  ;;  %v15739_v9 = vpop.f32.mrf.mxu0 }
  0xcd   :  { %v202_v17 = vadd.f32 %v117_v14, %v115_v13 }
  0xce   :  { %v186_v15 = vpop.f32.mrf.mxu1  ;;  %v15741_v10 = vpop.f32.mrf.mxu0 }
  0xcf   :  { %v198_v22 = vadd.f32 %v197_v19, %v186_v15 }
  0xd0   :  { %v188_v16 = vpop.f32.mrf.mxu1 }
  0xd1   :  { %v199_v24 = vadd.f32 %v198_v22, %v188_v16 }
  0xd2   :  { %v192_v18 = vpop.f32.mrf.mxu1 }
  0xd3   :  { %v203_v20 = vadd.f32 %v202_v17, %v192_v18 }
  0xd4   :  { %v194_v21 = vpop.f32.mrf.mxu1 }
  0xd5   :  { %v204_v23 = vadd.f32 %v203_v20, %v194_v21 }
  0xd7   :  { %205 = vadd.xlane.f32.xlu0 %v204_v23 }
  0xdb   :  { %200 = vadd.xlane.f32.xlu0 %v199_v24 }
 0x160   :  { %v206_v25 = vpop.xlane.xlu0 %205 }
 0x161   :  { %v208_v26 = vmul.f32 0.001953125, %v206_v25 }
 0x163   :  { %v15673_v27 = vsub.f32 %v115_v13, %v208_v26  ;;  %v15675_v28 = vsub.f32 %v117_v14, %v208_v26  ;;  %v15677_v29 = vsub.f32 %v192_v18, %v208_v26  ;;  %v15679_v31 = vsub.f32 %v194_v21, %v208_v26 }
 0x164   :  { %v201_v30 = vpop.xlane.xlu0 %200 }
 0x165   :  { %v207_v32 = vmul.f32 0.001953125, %v201_v30  ;;  %v221_v33 = vmul.f32 %v15673_v27, %v15673_v27  ;;  %v222_v34 = vmul.f32 %v15675_v28, %v15675_v28  ;;  %v223_v35 = vmul.f32 %v15677_v29, %v15677_v29 }
 0x166   :  { %v224_v40 = vmul.f32 %v15679_v31, %v15679_v31 }
 0x167   :  { %v230_v36 = vadd.f32 %v222_v34, %v221_v33  ;;  %v15687_v37 = vsub.f32 %v109_v11, %v207_v32  ;;  %v15689_v38 = vsub.f32 %v111_v12, %v207_v32  ;;  %v15691_v39 = vsub.f32 %v186_v15, %v207_v32  ;;  %v15743_v11 = vpop.f32.mrf.mxu0 }
 0x168   :  { %v15695_v42 = vsub.f32 %v188_v16, %v207_v32 }
 0x169   :  { %v231_v41 = vadd.f32 %v230_v36, %v223_v35  ;;  %v217_v43 = vmul.f32 %v15687_v37, %v15687_v37  ;;  %v218_v44 = vmul.f32 %v15689_v38, %v15689_v38  ;;  %v219_v46 = vmul.f32 %v15691_v39, %v15691_v39  ;;  %v15745_v12 = vpop.f32.mrf.mxu0 }
 0x16a   :  { %v220_v48 = vmul.f32 %v15695_v42, %v15695_v42 }
 0x16b   :  { %v232_v45 = vadd.f32 %v231_v41, %v224_v40  ;;  %v225_v47 = vadd.f32 %v218_v44, %v217_v43 }
 0x16d   :  { %233 = vadd.xlane.f32.xlu1 %v232_v45  ;;  %v226_v49 = vadd.f32 %v225_v47, %v219_v46 }
 0x16f   :  { %v227_v50 = vadd.f32 %v226_v49, %v220_v48 }
 0x171   :  { %228 = vadd.xlane.f32.xlu1 %v227_v50 }
 0x1f6   :  { %v234_v58 = vpop.xlane.xlu1 %233 }
 0x1f7   :  { %v236_v59 = vmul.f32 0.001953125, %v234_v58 }
 0x1f9   :  { %v240_v60 = vadd.f32 1e-05, %v236_v59 }
 0x1fa   :  { %v229_v61 = vpop.xlane.xlu1 %228 }
 0x1fb   :  { %15286 = vrsqrt.f32 %v240_v60  ;;  %v235_v62 = vmul.f32 0.001953125, %v229_v61 }
 0x1fd   :  { %v239_v63 = vadd.f32 1e-05, %v235_v62 }
 0x1ff   :  { %15288 = vrsqrt.f32 %v239_v63 }
 0x208   :  { %v15287_v1 = vpop.eup %15286 }
 0x209   :  { %v244_v2 = vmul.f32 %v15287_v1, %v238_v0  ;;  %v15591_v1 = vmov 1983009808  }
 0x20b   :  { %252 = vperm.xlu0 %15144, %v244_v2   ;;  %v1159_v2 = vunpack.c.l.s4 %v15591_v1 }
 0x20c   :  { %v15289_v5 = vpop.eup %15288 }
 0x20d   :  { %v243_v6 = vmul.f32 %v15289_v5, %v237_v4  ;;  %v1161_v4 = vlaneseq }
 0x20f   :  { %247 = vperm.xlu1 %15145, %v243_v6   ;;  %v1160_v6 = vunpack.c.0.s8 %v1159_v2 }
 0x213   :  { %273 = vperm.xlu1 %15145, %v14414_v7   ;;  %v15855_v7 = vshrl.u32 %v1161_v4, 7 }
 0x215   :  { %20421 = vst [vmem:[#allocation2_spill] sm:$0xff] %v15855_v7 }
 0x217   :  { %268 = vperm.xlu1 %15145, %v14413_v8  }
 0x21b   :  { %1028 = vrot.lane.b32.xlu1 %v15745_v12, %s15584_s17 }
 0x21f   :  { %1040 = vrot.lane.b32.xlu1 %v15745_v12, %s15585_s18 }
 0x223   :  { %1052 = vrot.lane.b32.xlu1 %v15745_v12, %s15586_s19 }
 0x227   :  { %1064 = vrot.lane.b32.xlu1 %v15745_v12, %s15587_s20 }
 0x22b   :  { %990 = vrot.lane.b32.xlu1 %v15743_v11, %s15588_s0 }
 0x22f   :  { %1002 = vrot.lane.b32.xlu1 %v15743_v11, %s15589_s21 }
 0x233   :  { %1014 = vrot.lane.b32.xlu1 %v15743_v11, %s15590_s22 }
 0x237   :  { %1026 = vrot.lane.b32.xlu1 %v15741_v10, %s15584_s17 }
 0x286   :  { %v253_v13 = vpop.permute.xlu0 %252 }
 0x287   :  { %v259_v15 = vmul.f32 %v253_v13, %v15673_v27  ;;  %v260_v16 = vmul.f32 %v253_v13, %v15675_v28  ;;  %v262_v20 = vmul.f32 %v253_v13, %v15679_v31  ;;  %v261_v25 = vmul.f32 %v253_v13, %v15677_v29 }
 0x28a   :  { %v248_v14 = vpop.permute.xlu1 %247 }
 0x28b   :  { %v255_v21 = vmul.f32 %v248_v14, %v15687_v37  ;;  %v256_v24 = vmul.f32 %v248_v14, %v15689_v38  ;;  %v258_v28 = vmul.f32 %v248_v14, %v15695_v42  ;;  %v257_v33 = vmul.f32 %v248_v14, %v15691_v39  ;;  %v14415_v37 = vld [vmem:[%s20361_s2 + $0x10] sm:$0xff]  ;;  %v14416_v42 = vld [vmem:[%s20361_s2 + $0x18] sm:$0xff] }
 0x28e   :  { %v274_v17 = vpop.permute.xlu1 %273 }
 0x28f   :  { %v281_v18 = vadd.f32 %v274_v17, %v260_v16  ;;  %v280_v19 = vadd.f32 %v274_v17, %v259_v15  ;;  %v283_v27 = vadd.f32 %v274_v17, %v262_v20  ;;  %v282_v34 = vadd.f32 %v274_v17, %v261_v25 }
 0x290   :  { %v15592_v15 = vmov 1934713408  }
 0x291   :  { %v289_v22 = vmax.f32 %v281_v18, 0.0  ;;  %v288_v23 = vmax.f32 %v280_v19, 0.0  ;;  %v291_v29 = vmax.f32 %v283_v27, 0.0  ;;  %v290_v40 = vmax.f32 %v282_v34, 0.0 }
 0x292   :  { %v269_v26 = vpop.permute.xlu1 %268  ;;  %v1223_v16 = vunpack.c.l.s4 %v15592_v15  ;;  %v15861_v18 = vsub.s32 %v1160_v6, %v15855_v7 }
 0x293   :  { %329 = vmatprep.subr.mxu1 %v289_v22  ;;  %v277_v30 = vadd.f32 %v269_v26, %v256_v24  ;;  %v276_v32 = vadd.f32 %v269_v26, %v255_v21  ;;  %v279_v36 = vadd.f32 %v269_v26, %v258_v28  ;;  %v278_v38 = vadd.f32 %v269_v26, %v257_v33 }
 0x294   :  { %330 = vmatpush1.msra.mxu1 %v288_v23 }
 0x295   :  { %v285_v31 = vmax.f32 %v277_v30, 0.0  ;;  %v284_v35 = vmax.f32 %v276_v32, 0.0  ;;  %v287_v41 = vmax.f32 %v279_v36, 0.0  ;;  %v286_v39 = vmax.f32 %v278_v38, 0.0 }
 0x296   :  { %v1029_v57 = vpop.permute.xlu1 %1028  ;;  %v1224_v30 = vunpack.c.0.s8 %v1223_v16 }
 0x297   :  { %331 = vmatprep.subr.mxu1 %v285_v31 }
 0x298   :  { %332 = vmatpush1.msra.mxu1 %v284_v35 }
 0x299   :  { %14417 = vmatmul.mubr.msk.f32.vlgmr.msra.gmra.mxu1 %vm36_vm0, %v14415_v37  ;;  %406 = vmatprep.subr.mxu1 %v291_v29 }
 0x29a   :  { %407 = vmatpush1.msra.mxu1 %v290_v40  ;;  %371 = vmatprep.mubr.f32.mxu1 %v20368_v3  ;;  %v1041_v58 = vpop.permute.xlu1 %1040 }
 0x29b   :  { %408 = vmatprep.subr.mxu1 %v287_v41  ;;  %v1852_v19 = vcombine.low %v1029_v57, %v1041_v58  ;;  %v1853_v20 = vcombine.high %v1029_v57, %v1041_v58  ;;  %v15881_v41 = vsub.s32 %v1224_v30, %v15855_v7 }
 0x29c   :  { %409 = vmatpush1.msra.mxu1 %v286_v39 }
 0x29d   :  { %14418 = vmatmul.mubr.msk.f32.gmra.mxu1 %vm36_vm0, %v14416_v42  ;;  %v1860_v34 = vrot.slane %v1852_v19, %v15861_v18  ;;  %v1867_v31 = vrot.slane %v1853_v20, %v15861_v18 }
 0x29e   :  { %442 = vmatprep.mubr.f32.mxu1 %v20368_v3  ;;  %v1053_v59 = vpop.permute.xlu1 %1052 }
 0x2a1   :  { %14419 = vmatmul.mubr.msk.f32.vlgmr.msra.gmra.mxu1 %vm36_vm0, %v14415_v37 }
 0x2a2   :  { %448 = vmatprep.mubr.f32.mxu1 %v20368_v3  ;;  %v1065_v60 = vpop.permute.xlu1 %1064 }
 0x2a3   :  { %v1884_v21 = vcombine.low %v1053_v59, %v1065_v60  ;;  %v1885_v24 = vcombine.high %v1053_v59, %v1065_v60 }
 0x2a5   :  { %14420 = vmatmul.mubr.msk.f32.gmra.mxu1 %vm36_vm0, %v14416_v42  ;;  %v1899_v29 = vrot.slane %v1885_v24, %v15861_v18 }
 0x2a6   :  { %624 = vmatprep.mubr.f32.mxu1 %v20368_v3  ;;  %v15849_v61 = vpop.permute.xlu1 %990 }
 0x2a7   :  { %v1700_v24 = vcombine.low %v15743_v11, %v15849_v61 }
 0x2aa   :  { %v15851_v62 = vpop.permute.xlu1 %1002 }
 0x2ae   :  { %v15853_v0 = vpop.permute.xlu1 %1014 }
 0x2af   :  { %v1732_v30 = vcombine.low %v15851_v62, %v15853_v0 }
 0x2b2   :  { %v15857_v8 = vpop.permute.xlu1 %1026 }
 0x359   :  { %v15785_v43 = vpop.f32.mrf.mxu1 }
 0x35b   :  { %v15787_v44 = vpop.f32.mrf.mxu1 }
 0x35c   :  { %v455_v47 = vadd.f32 %v15787_v44, %v15785_v43 }
 0x35d   :  { %v15789_v45 = vpop.f32.mrf.mxu1 }
 0x35f   :  { %v15791_v46 = vpop.f32.mrf.mxu1 }
 0x360   :  { %v460_v51 = vadd.f32 %v15791_v46, %v15789_v45 }
 0x361   :  { %v15795_v48 = vpop.f32.mrf.mxu1 }
 0x362   :  { %v456_v49 = vadd.f32 %v455_v47, %v15795_v48 }
 0x363   :  { %v15798_v50 = vpop.f32.mrf.mxu1 }
 0x364   :  { %v457_v52 = vadd.f32 %v456_v49, %v15798_v50 }
 0x365   :  { %v15803_v53 = vpop.f32.mrf.mxu1 }
 0x366   :  { %v461_v54 = vadd.f32 %v460_v51, %v15803_v53  ;;  %458 = vadd.xlane.f32.xlu0 %v457_v52 }
 0x367   :  { %v15806_v55 = vpop.f32.mrf.mxu1 }
 0x368   :  { %v462_v56 = vadd.f32 %v461_v54, %v15806_v55 }
 0x36a   :  { %463 = vadd.xlane.f32.xlu1 %v462_v56 }
 0x37b   :  { %1038 = vrot.lane.b32.xlu1 %v15741_v10, %s15585_s18 }
 0x37c   :  { %1034 = vrot.lane.b32.xlu0 %v15745_v12, %s15588_s0 }
 0x37f   :  { %1050 = vrot.lane.b32.xlu1 %v15741_v10, %s15586_s19 }
 0x380   :  { %1046 = vrot.lane.b32.xlu0 %v15745_v12, %s15589_s21 }
 0x383   :  { %1062 = vrot.lane.b32.xlu1 %v15741_v10, %s15587_s20 }
 0x384   :  { %1058 = vrot.lane.b32.xlu0 %v15745_v12, %s15590_s22 }
 0x387   :  { %988 = vrot.lane.b32.xlu1 %v15739_v9, %s15588_s0 }
 0x388   :  { %984 = vrot.lane.b32.xlu0 %v15743_v11, %s15584_s17 }
 0x38b   :  { %1000 = vrot.lane.b32.xlu1 %v15739_v9, %s15589_s21 }
 0x38c   :  { %996 = vrot.lane.b32.xlu0 %v15743_v11, %s15585_s18 }
 0x38f   :  { %1012 = vrot.lane.b32.xlu1 %v15739_v9, %s15590_s22 }
 0x390   :  { %1008 = vrot.lane.b32.xlu0 %v15743_v11, %s15586_s19 }
 0x394   :  { %1020 = vrot.lane.b32.xlu0 %v15743_v11, %s15587_s20 }
 0x398   :  { %1032 = vrot.lane.b32.xlu0 %v15741_v10, %s15588_s0 }
 0x39c   :  { %1044 = vrot.lane.b32.xlu0 %v15741_v10, %s15589_s21 }
 0x3a0   :  { %1056 = vrot.lane.b32.xlu0 %v15741_v10, %s15590_s22 }
 0x3a4   :  { %982 = vrot.lane.b32.xlu0 %v15739_v9, %s15584_s17 }
 0x3a8   :  { %994 = vrot.lane.b32.xlu0 %v15739_v9, %s15585_s18 }
 0x3ac   :  { %1006 = vrot.lane.b32.xlu0 %v15739_v9, %s15586_s19 }
 0x3b0   :  { %1018 = vrot.lane.b32.xlu0 %v15739_v9, %s15587_s20 }
 0x3ef   :  { %v459_v63 = vpop.xlane.xlu0 %458 }
 0x3f0   :  { %v465_v17 = vmul.f32 0.001953125, %v459_v63 }
 0x3f2   :  { %v15866_v28 = vsub.f32 %v15785_v43, %v465_v17  ;;  %v15869_v33 = vsub.f32 %v15787_v44, %v465_v17  ;;  %v15884_v42 = vsub.f32 %v15795_v48, %v465_v17  ;;  %v15900_v1 = vsub.f32 %v15798_v50, %v465_v17 }
 0x3f3   :  { %v1035_v5 = vpop.permute.xlu0 %1034  ;;  %v464_v23 = vpop.xlane.xlu1 %463 }
 0x3f4   :  { %v1836_v13 = vcombine.low %v15745_v12, %v1035_v5  ;;  %v1837_v22 = vcombine.high %v15745_v12, %v1035_v5  ;;  %v466_v35 = vmul.f32 0.001953125, %v464_v23  ;;  %v1892_v12 = vrot.slane %v1884_v21, %v15861_v18 }
 0x3f5   :  { %v475_v47 = vmul.f32 %v15866_v28, %v15866_v28  ;;  %v476_v49 = vmul.f32 %v15869_v33, %v15869_v33 }
 0x3f6   :  { %v1844_v25 = vrot.slane %v1836_v13, %v15861_v18  ;;  %v1851_v36 = vrot.slane %v1837_v22, %v15861_v18  ;;  %v15891_v52 = vsub.f32 %v15789_v45, %v466_v35  ;;  %v15895_v57 = vsub.f32 %v15791_v46, %v466_v35 }
 0x3f7   :  { %v1047_v14 = vpop.permute.xlu0 %1046  ;;  %v477_v45 = vmul.f32 %v15884_v42, %v15884_v42  ;;  %v483_v2 = vadd.f32 %v476_v49, %v475_v47  ;;  %v15904_v5 = vpop.permute.xlu1 %1038  ;;  %v1740_v49 = vrot.slane %v1732_v30, %v15861_v18 }
 0x3f8   :  { %v1900_v39 = vcombine.low %v1844_v25, %v1860_v34  ;;  %v1901_v51 = vcombine.high %v1844_v25, %v1860_v34  ;;  %v1916_v48 = vcombine.low %v1851_v36, %v1867_v31  ;;  %v1917_v4 = vcombine.high %v1851_v36, %v1867_v31 }
 0x3f9   :  { %v479_v15 = vmul.f32 %v15891_v52, %v15891_v52  ;;  %v480_v50 = vmul.f32 %v15895_v57, %v15895_v57  ;;  %v15931_v25 = vsub.f32 %v15803_v53, %v466_v35 }
 0x3fa   :  { %v1908_v60 = vrot.slane %v1900_v39, %v15881_v41  ;;  %v1915_v13 = vrot.slane %v1901_v51, %v15881_v41  ;;  %v1924_v16 = vrot.slane %v1916_v48, %v15881_v41  ;;  %v15954_v39 = vsub.f32 %v15806_v55, %v466_v35 }
 0x3fb   :  { %v1059_v26 = vpop.permute.xlu0 %1058  ;;  %v488_v36 = vadd.f32 %v480_v50, %v479_v15  ;;  %v481_v47 = vmul.f32 %v15931_v25, %v15931_v25 }
 0x3fc   :  { %v1868_v32 = vcombine.low %v1047_v14, %v1059_v26  ;;  %v1869_v27 = vcombine.high %v1047_v14, %v1059_v26  ;;  %v1931_v26 = vrot.slane %v1917_v4, %v15881_v41 }
 0x3fd   :  { %v489_v35 = vadd.f32 %v488_v36, %v481_v47 }
 0x3fe   :  { %v1876_v37 = vrot.slane %v1868_v32, %v15861_v18  ;;  %v1883_v38 = vrot.slane %v1869_v27, %v15861_v18  ;;  %v1733_v32 = vcombine.high %v15851_v62, %v15853_v0  ;;  %v484_v27 = vadd.f32 %v483_v2, %v477_v45 }
 0x3ff   :  { %v15878_v40 = vpop.permute.xlu0 %984 }
 0x400   :  { %v1932_v43 = vcombine.low %v1876_v37, %v1892_v12  ;;  %v1933_v44 = vcombine.high %v1876_v37, %v1892_v12  ;;  %v1948_v54 = vcombine.low %v1883_v38, %v1899_v29  ;;  %v1949_v58 = vcombine.high %v1883_v38, %v1899_v29  ;;  %v15946_v37 = vpop.permute.xlu1 %1050 }
 0x401   :  { %v478_v12 = vmul.f32 %v15900_v1, %v15900_v1  ;;  %v1747_v48 = vrot.slane %v1733_v32, %v15861_v18 }
 0x402   :  { %v1940_v56 = vrot.slane %v1932_v43, %v15881_v41  ;;  %v1947_v63 = vrot.slane %v1933_v44, %v15881_v41  ;;  %v1956_v14 = vrot.slane %v1948_v54, %v15881_v41  ;;  %v15918_v17 = vrot.slane %v1949_v58, %v15881_v41 }
 0x403   :  { %v997_v59 = vpop.permute.xlu0 %996  ;;  %v485_v51 = vadd.f32 %v484_v27, %v478_v12  ;;  %v1308_v27 = vcombine.low %v15857_v8, %v15904_v5 }
 0x404   :  { %v15906_v6 = vcombine.high %v1908_v60, %v1940_v56  ;;  %v15908_v46 = vcombine.low %v1908_v60, %v1940_v56  ;;  %v15924_v22 = vcombine.low %v1915_v13, %v1947_v63  ;;  %v15926_v23 = vcombine.high %v1915_v13, %v1947_v63  ;;  %v1063_v2 = vpop.permute.xlu1 %1062 }
 0x405   :  { %v15938_v34 = vcombine.low %v1924_v16, %v1956_v14  ;;  %v1716_v31 = vcombine.low %v15878_v40, %v997_v59  ;;  %v15944_v53 = vcombine.low %v1931_v26, %v15918_v17  ;;  %v1717_v38 = vcombine.high %v15878_v40, %v997_v59 }
 0x406   :  { %v2355_v19 = vsel %vm36_vm0, %v15906_v6, -inf  ;;  %v2343_v21 = vsel %vm36_vm0, %v15908_v46, -inf  ;;  %v2367_v29 = vsel %vm36_vm0, %v15924_v22, -inf  ;;  %v2379_v0 = vsel %vm36_vm0, %v15926_v23, -inf }
 0x407   :  { %v1009_v20 = vpop.permute.xlu0 %1008  ;;  %2356 = vmax.xlane.f32.xlu0 %v2355_v19  ;;  %2344 = vmax.xlane.f32.xlu1 %v2343_v21  ;;  %v1701_v40 = vcombine.high %v15743_v11, %v15849_v61  ;;  %v1724_v54 = vrot.slane %v1716_v31, %v15861_v18  ;;  %v1731_v58 = vrot.slane %v1717_v38, %v15861_v18 }
 0x408   :  { %v1708_v60 = vrot.slane %v1700_v24, %v15861_v18  ;;  %v482_v11 = vmul.f32 %v15954_v39, %v15954_v39  ;;  %v15971_v30 = vcombine.high %v1924_v16, %v1956_v14  ;;  %v1309_v31 = vcombine.high %v15857_v8, %v15904_v5 }
 0x409   :  { %v1715_v45 = vrot.slane %v1701_v40, %v15861_v18  ;;  %v1340_v38 = vcombine.low %v15946_v37, %v1063_v2 }
 0x40a   :  { %v490_v15 = vadd.f32 %v489_v35, %v482_v11  ;;  %v1764_v50 = vcombine.low %v1708_v60, %v1724_v54  ;;  %v1765_v19 = vcombine.high %v1708_v60, %v1724_v54  ;;  %v1316_v54 = vrot.slane %v1308_v27, %v15861_v18 }
 0x40b   :  { %v1021_v62 = vpop.permute.xlu0 %1020  ;;  %2368 = vmax.xlane.f32.xlu0 %v2367_v29  ;;  %2380 = vmax.xlane.f32.xlu1 %v2379_v0  ;;  %v1780_v24 = vcombine.low %v1715_v45, %v1731_v58  ;;  %v1781_v32 = vcombine.high %v1715_v45, %v1731_v58  ;;  %v1341_v29 = vcombine.high %v15946_v37, %v1063_v2  ;;  %v2403_v37 = vsel %vm36_vm0, %v15971_v30, -inf }
 0x40c   :  { %v1748_v43 = vcombine.low %v1009_v20, %v1021_v62  ;;  %v1749_v44 = vcombine.high %v1009_v20, %v1021_v62  ;;  %v15987_v0 = vcombine.high %v1931_v26, %v15918_v17  ;;  %v1772_v8 = vrot.slane %v1764_v50, %v15881_v41 }
 0x40d   :  { %v1779_v5 = vrot.slane %v1765_v19, %v15881_v41  ;;  %v1788_v40 = vrot.slane %v1780_v24, %v15881_v41 }
 0x40e   :  { %v1756_v56 = vrot.slane %v1748_v43, %v15861_v18  ;;  %v1763_v55 = vrot.slane %v1749_v44, %v15861_v18  ;;  %v15991_v43 = vpop.permute.xlu1 %988 }
 0x40f   :  { %v1033_v59 = vpop.permute.xlu0 %1032  ;;  %486 = vadd.xlane.f32.xlu1 %v485_v51  ;;  %v1156_v50 = vcombine.low %v15739_v9, %v15991_v43 }
 0x410   :  { %v1796_v61 = vcombine.low %v1740_v49, %v1756_v56  ;;  %v1797_v63 = vcombine.high %v1740_v49, %v1756_v56  ;;  %v1812_v4 = vcombine.low %v1747_v48, %v1763_v55  ;;  %v1813_v13 = vcombine.high %v1747_v48, %v1763_v55 }
 0x411   :  { %v1292_v20 = vcombine.low %v15741_v10, %v1033_v59  ;;  %v1293_v62 = vcombine.high %v15741_v10, %v1033_v59  ;;  %v1795_v49 = vrot.slane %v1781_v32, %v15881_v41  ;;  %v1348_v56 = vrot.slane %v1340_v38, %v15861_v18 }
 0x412   :  { %v1804_v12 = vrot.slane %v1796_v61, %v15881_v41  ;;  %v1811_v36 = vrot.slane %v1797_v63, %v15881_v41  ;;  %v1820_v14 = vrot.slane %v1812_v4, %v15881_v41  ;;  %v15983_v16 = vrot.slane %v1813_v13, %v15881_v41  ;;  %v16022_v19 = vpop.permute.xlu1 %1000 }
 0x413   :  { %v1045_v21 = vpop.permute.xlu0 %1044  ;;  %491 = vadd.xlane.f32.xlu1 %v490_v15  ;;  %v1300_v44 = vrot.slane %v1292_v20, %v15861_v18  ;;  %v1355_v48 = vrot.slane %v1341_v29, %v15861_v18  ;;  %v1307_v58 = vrot.slane %v1293_v62, %v15861_v18  ;;  %v2427_v61 = vsel %vm36_vm0, %v15987_v0, -inf }
 0x414   :  { %v15998_v17 = vcombine.low %v1772_v8, %v1804_v12  ;;  %v16000_v26 = vcombine.low %v1779_v5, %v1811_v36  ;;  %v16004_v55 = vcombine.low %v1788_v40, %v1820_v14  ;;  %v16007_v35 = vcombine.low %v1795_v49, %v15983_v16 }
 0x415   :  { %v16017_v63 = vcombine.high %v1772_v8, %v1804_v12  ;;  %v1356_v45 = vcombine.low %v1300_v44, %v1316_v54  ;;  %v1357_v2 = vcombine.high %v1300_v44, %v1316_v54  ;;  %v1323_v4 = vrot.slane %v1309_v31, %v15861_v18 }
 0x416   :  { %v16024_v24 = vcombine.high %v1779_v5, %v1811_v36  ;;  %v16044_v54 = vpop.permute.xlu1 %1012 }
 0x417   :  { %v1057_v47 = vpop.permute.xlu0 %1056  ;;  %2404 = vmax.xlane.f32.xlu1 %v2403_v37  ;;  %v1372_v12 = vcombine.low %v1307_v58, %v1323_v4  ;;  %v2352_v31 = vsel %vm36_vm0, %v16017_v63, -inf  ;;  %v1364_v29 = vrot.slane %v1356_v45, %v15881_v41  ;;  %v1371_v62 = vrot.slane %v1357_v2, %v15881_v41 }
 0x418   :  { %v1324_v10 = vcombine.low %v1045_v21, %v1057_v47  ;;  %v1325_v51 = vcombine.high %v1045_v21, %v1057_v47  ;;  %v1373_v8 = vcombine.high %v1307_v58, %v1323_v4  ;;  %v16050_v58 = vcombine.high %v1788_v40, %v1820_v14 }
 0x419   :  { %v1188_v4 = vcombine.low %v16022_v19, %v16044_v54  ;;  %v16065_v14 = vcombine.high %v1795_v49, %v15983_v16 }
 0x41a   :  { %v1332_v59 = vrot.slane %v1324_v10, %v15861_v18  ;;  %v1339_v60 = vrot.slane %v1325_v51, %v15861_v18  ;;  %v1164_v10 = vrot.slane %v1156_v50, %v15861_v18 }
 0x41b   :  { %v16013_v11 = vpop.permute.xlu0 %982  ;;  %2428 = vmax.xlane.f32.xlu1 %v2427_v61  ;;  %v1196_v50 = vrot.slane %v1188_v4, %v15861_v18 }
 0x41c   :  { %v1388_v13 = vcombine.low %v1332_v59, %v1348_v56  ;;  %v1389_v15 = vcombine.high %v1332_v59, %v1348_v56  ;;  %v1404_v20 = vcombine.low %v1339_v60, %v1355_v48  ;;  %v1405_v21 = vcombine.high %v1339_v60, %v1355_v48 }
 0x41d   :  { %v2376_v48 = vsel %vm36_vm0, %v16024_v24, -inf  ;;  %v1380_v59 = vrot.slane %v1372_v12, %v15881_v41  ;;  %v1387_v60 = vrot.slane %v1373_v8, %v15881_v41 }
 0x41e   :  { %v1396_v32 = vrot.slane %v1388_v13, %v15881_v41  ;;  %v1403_v27 = vrot.slane %v1389_v15, %v15881_v41  ;;  %v1412_v36 = vrot.slane %v1404_v20, %v15881_v41  ;;  %v1419_v5 = vrot.slane %v1405_v21, %v15881_v41 }
 0x41f   :  { %v16028_v38 = vpop.permute.xlu0 %994  ;;  %2353 = vmax.xlane.f32.xlu1 %v2352_v31  ;;  %v2400_v15 = vsel %vm36_vm0, %v16050_v58, -inf  ;;  %v2424_v21 = vsel %vm36_vm0, %v16065_v14, -inf }
 0x420   :  { %v1172_v44 = vcombine.low %v16013_v11, %v16028_v38  ;;  %v16038_v47 = vcombine.low %v1364_v29, %v1396_v32  ;;  %v16040_v37 = vcombine.low %v1371_v62, %v1403_v27  ;;  %v16054_v45 = vcombine.low %v1380_v59, %v1412_v36 }
 0x421   :  { %v16056_v2 = vcombine.low %v1387_v60, %v1419_v5  ;;  %v16073_v12 = vcombine.high %v1364_v29, %v1396_v32 }
 0x422   :  { %v1180_v51 = vrot.slane %v1172_v44, %v15861_v18 }
 0x423   :  { %v16046_v56 = vpop.permute.xlu0 %1006  ;;  %2377 = vmax.xlane.f32.xlu1 %v2376_v48  ;;  %v2259_v4 = vsel %vm36_vm0, %v16073_v12, -inf }
 0x424   :  { %v1221_v61 = vcombine.high %v1164_v10, %v1180_v51  ;;  %v1220_v31 = vcombine.low %v1164_v10, %v1180_v51 }
 0x426   :  { %v1235_v49 = vrot.slane %v1221_v61, %v15881_v41  ;;  %v16091_v61 = vcombine.high %v1380_v59, %v1412_v36  ;;  %v14424_v36 = vld [vmem:[%s20364_s3 + $0x38] sm:$0xff] }
 0x427   :  { %v16060_v13 = vpop.permute.xlu0 %1018  ;;  %2401 = vmax.xlane.f32.xlu1 %v2400_v15  ;;  %v16080_v15 = vcombine.high %v1371_v62, %v1403_v27  ;;  %v16095_v27 = vcombine.high %v1387_v60, %v1419_v5  ;;  %v14423_v5 = vld [vmem:[%s20364_s3 + $0x30] sm:$0xff] }
 0x428   :  { %v1204_v40 = vcombine.low %v16046_v56, %v16060_v13 }
 0x429   :  { %v2283_v51 = vsel %vm36_vm0, %v16080_v15, -inf  ;;  %v2331_v62 = vsel %vm36_vm0, %v16095_v27, -inf }
 0x42a   :  { %v1212_v20 = vrot.slane %v1204_v40, %v15861_v18  ;;  %v1228_v40 = vrot.slane %v1220_v31, %v15881_v41 }
 0x42b   :  { %2425 = vmax.xlane.f32.xlu1 %v2424_v21 }
 0x42c   :  { %v1252_v8 = vcombine.low %v1196_v50, %v1212_v20  ;;  %v1253_v44 = vcombine.high %v1196_v50, %v1212_v20  ;;  %v2307_v50 = vsel %vm36_vm0, %v16091_v61, -inf }
 0x42e   :  { %v1260_v16 = vrot.slane %v1252_v8, %v15881_v41  ;;  %v1267_v48 = vrot.slane %v1253_v44, %v15881_v41 }
 0x42f   :  { %2260 = vmax.xlane.f32.xlu1 %v2259_v4  ;;  %v14421_v4 = vld [vmem:[%s20364_s3 + $0x20] sm:$0xff] }
 0x430   :  { %v16083_v32 = vcombine.high %v1235_v49, %v1267_v48  ;;  %v16085_v29 = vcombine.low %v1228_v40, %v1260_v16  ;;  %v16087_v10 = vcombine.low %v1235_v49, %v1267_v48  ;;  %v16099_v20 = vcombine.high %v1228_v40, %v1260_v16 }
 0x432   :  { %v2256_v21 = vsel %vm36_vm0, %v16099_v20, -inf }
 0x433   :  { %2284 = vmax.xlane.f32.xlu1 %v2283_v51 }
 0x437   :  { %2308 = vmax.xlane.f32.xlu1 %v2307_v50  ;;  %v14422_v50 = vld [vmem:[%s20364_s3 + $0x28] sm:$0xff] }
 0x43b   :  { %2332 = vmax.xlane.f32.xlu1 %v2331_v62 }
 0x43f   :  { %2257 = vmax.xlane.f32.xlu1 %v2256_v21 }
 0x450   :  { %532 = vperm.xlu1 %15145, %v14424_v36  }
 0x454   :  { %527 = vperm.xlu1 %15145, %v14423_v5  }
 0x490   :  { %v16109_v59 = vpop.xlane.xlu1 %2344 }
 0x494   :  { %v2381_v60 = vpop.xlane.xlu1 %2380 }
 0x498   :  { %v487_v31 = vpop.xlane.xlu1 %486 }
 0x499   :  { %v493_v8 = vmul.f32 0.001953125, %v487_v31  ;;  %v1205_v31 = vcombine.high %v16046_v56, %v16060_v13 }
 0x49b   :  { %v498_v44 = vadd.f32 1e-05, %v493_v8  ;;  %v1189_v8 = vcombine.high %v16022_v19, %v16044_v54  ;;  %v2391_v19 = vsel %vm36_vm0, %v15938_v34, -inf  ;;  %v2481_v54 = vsub.f32 %v15926_v23, %v2381_v60 }
 0x49c   :  { %v492_v16 = vpop.xlane.xlu1 %491  ;;  %v2340_v23 = vsel %vm36_vm0, %v15998_v17, -inf }
 0x49d   :  { %15290 = vrsqrt.f32 %v498_v44  ;;  %v494_v49 = vmul.f32 0.001953125, %v492_v16  ;;  %v1173_v44 = vcombine.high %v16013_v11, %v16028_v38  ;;  %v2357_v16 = vpop.xlane.xlu0 %2356 }
 0x49f   :  { %v499_v48 = vadd.f32 1e-05, %v494_v49 }
 0x4a0   :  { %v2405_v36 = vpop.xlane.xlu1 %2404 }
 0x4a1   :  { %15292 = vrsqrt.f32 %v499_v48  ;;  %v1157_v48 = vcombine.high %v15739_v9, %v15991_v43  ;;  %v2415_v43 = vsel %vm36_vm0, %v15944_v53, -inf }
 0x4a3   :  { %v1171_v56 = vrot.slane %v1157_v48, %v15861_v18 }
 0x4a4   :  { %v2429_v5 = vpop.xlane.xlu1 %2428 }
 0x4a8   :  { %v2354_v49 = vpop.xlane.xlu1 %2353 }
 0x4aa   :  { %v15291_v40 = vpop.eup %15290 }
 0x4ab   :  { %v502_v51 = vmul.f32 %v15291_v40, %v14421_v4  ;;  %v1219_v4 = vrot.slane %v1205_v31, %v15861_v18  ;;  %v2473_v40 = vsub.f32 %v15906_v6, %v2357_v16  ;;  %v2489_v31 = vsub.f32 %v15971_v30, %v2405_v36 }
 0x4ac   :  { %v2378_v13 = vpop.xlane.xlu1 %2377  ;;  %v2497_v30 = vsub.f32 %v15987_v0, %v2429_v5  ;;  %v2280_v36 = vsel %vm36_vm0, %v16083_v32, -inf  ;;  %v2472_v0 = vsub.f32 %v16017_v63, %v2354_v49  ;;  %v2412_v63 = vsel %vm36_vm0, %v16007_v35, -inf }
 0x4ad   :  { %506 = vperm.xlu0 %15144, %v502_v51   ;;  %v1203_v51 = vrot.slane %v1189_v8, %v15861_v18  ;;  %v2574_v38 = vmul.f32 1.442695, %v2473_v40 }
 0x4ae   :  { %v15293_v62 = vpop.eup %15292 }
 0x4af   :  { %v503_v21 = vmul.f32 %v15293_v62, %v14422_v50  ;;  %v1187_v50 = vrot.slane %v1173_v44, %v15861_v18  ;;  %v1268_v11 = vcombine.low %v1203_v51, %v1219_v4  ;;  %v1269_v62 = vcombine.high %v1203_v51, %v1219_v4 }
 0x4b0   :  { %15294 = vpow2.f32 %v2574_v38  ;;  %v2402_v8 = vpop.xlane.xlu1 %2401  ;;  %v2606_v4 = vmul.f32 1.442695, %v2489_v31  ;;  %v2572_v38 = vmul.f32 1.442695, %v2472_v0 }
 0x4b1   :  { %511 = vperm.xlu1 %15145, %v503_v21   ;;  %v1236_v9 = vcombine.low %v1171_v56, %v1187_v50  ;;  %v16136_v6 = vrot.slane %v1268_v11, %v15881_v41  ;;  %v2590_v21 = vmul.f32 1.442695, %v2481_v54  ;;  %v1237_v16 = vcombine.high %v1171_v56, %v1187_v50 }
 0x4b2   :  { %v16149_v48 = vrot.slane %v1269_v62, %v15881_v41  ;;  %v2364_v50 = vsel %vm36_vm0, %v16000_v26, -inf  ;;  %v2388_v11 = vsel %vm36_vm0, %v16004_v55, -inf  ;;  %v2480_v54 = vsub.f32 %v16024_v24, %v2378_v13 }
 0x4b3   :  { %v16140_v44 = vrot.slane %v1236_v9, %v15881_v41  ;;  %15296 = vpow2.f32 %v2590_v21  ;;  %v16155_v40 = vrot.slane %v1237_v16, %v15881_v41  ;;  %v2488_v21 = vsub.f32 %v16050_v58, %v2402_v8 }
 0x4b4   :  { %v2426_v51 = vpop.xlane.xlu1 %2425  ;;  %15298 = vpow2.f32 %v2606_v4  ;;  %v2588_v49 = vmul.f32 1.442695, %v2480_v54  ;;  %v2247_v16 = vsel %vm36_vm0, %v16038_v47, -inf  ;;  %v2271_v8 = vsel %vm36_vm0, %v16040_v37, -inf }
 0x4b5   :  { %v16146_v60 = vcombine.high %v16140_v44, %v16136_v6  ;;  %v16161_v56 = vcombine.high %v16155_v40, %v16149_v48  ;;  %v2496_v4 = vsub.f32 %v16065_v14, %v2426_v51  ;;  %v2469_v51 = vsub.f32 %v15908_v46, %v16109_v59 }
 0x4b6   :  { %v2319_v46 = vsel %vm36_vm0, %v16056_v2, -inf }
 0x4b7   :  { %v2304_v5 = vsel %vm36_vm0, %v16146_v60, -inf  ;;  %v2328_v9 = vsel %vm36_vm0, %v16161_v56, -inf }
 0x4b8   :  { %v2261_v62 = vpop.xlane.xlu1 %2260 }
 0x4bc   :  { %v2285_v13 = vpop.xlane.xlu1 %2284 }
 0x4bd   :  { %v2449_v54 = vsub.f32 %v16080_v15, %v2285_v13 }
 0x4bf   :  { %v2526_v59 = vmul.f32 1.442695, %v2449_v54 }
 0x4c0   :  { %v2309_v14 = vpop.xlane.xlu1 %2308 }
 0x4cc   :  { %2392 = vmax.xlane.f32.xlu0 %v2391_v19  ;;  %v2622_v19 = vmul.f32 1.442695, %v2497_v30 }
 0x4ce   :  { %15300 = vpow2.f32 %v2622_v19 }
 0x4cf   :  { %15302 = vpow2.f32 %v2572_v38 }
 0x4d0   :  { %2416 = vmax.xlane.f32.xlu0 %v2415_v43  ;;  %v16171_v43 = vpop.eup %15294  ;;  %15304 = vpow2.f32 %v2588_v49  ;;  %v2333_v49 = vpop.xlane.xlu1 %2332 }
 0x4d1   :  { %v2739_v31 = vsel %vm36_vm0, %v16171_v43, 0.0  ;;  %v16178_v24 = vpop.eup %15296 }
 0x4d2   :  { %v2763_v30 = vsel %vm36_vm0, %v16178_v24, 0.0  ;;  %v16185_v58 = vpop.eup %15298 }
 0x4d3   :  { %v2787_v19 = vsel %vm36_vm0, %v16185_v58, 0.0 }
 0x4d4   :  { %2341 = vmax.xlane.f32.xlu0 %v2340_v23  ;;  %v2604_v23 = vmul.f32 1.442695, %v2488_v21  ;;  %v2457_v21 = vsub.f32 %v16091_v61, %v2309_v14 }
 0x4d5   :  { %2281 = vmax.xlane.f32.xlu1 %v2280_v36  ;;  %v2620_v36 = vmul.f32 1.442695, %v2496_v4 }
 0x4d6   :  { %15306 = vpow2.f32 %v2604_v23  ;;  %v2465_v23 = vsub.f32 %v16095_v27, %v2333_v49 }
 0x4d7   :  { %15308 = vpow2.f32 %v2620_v36  ;;  %v16222_v36 = vcombine.low %v16140_v44, %v16136_v6 }
 0x4d8   :  { %2365 = vmax.xlane.f32.xlu0 %v2364_v50  ;;  %v2441_v50 = vsub.f32 %v16073_v12, %v2261_v62  ;;  %v2566_v62 = vmul.f32 1.442695, %v2469_v51 }
 0x4d9   :  { %2305 = vmax.xlane.f32.xlu1 %v2304_v5  ;;  %v2295_v5 = vsel %vm36_vm0, %v16054_v45, -inf  ;;  %v2292_v51 = vsel %vm36_vm0, %v16222_v36, -inf }
 0x4da   :  { %v2510_v38 = vmul.f32 1.442695, %v2441_v50  ;;  %v2558_v50 = vmul.f32 1.442695, %v2465_v23 }
 0x4db   :  { %v16192_v0 = vpop.eup %15300 }
 0x4dc   :  { %2389 = vmax.xlane.f32.xlu0 %v2388_v11  ;;  %v2369_v11 = vpop.xlane.xlu0 %2368  ;;  %v2811_v12 = vsel %vm36_vm0, %v16192_v0, 0.0  ;;  %15310 = vpow2.f32 %v2510_v38 }
 0x4dd   :  { %2329 = vmax.xlane.f32.xlu1 %v2328_v9  ;;  %v16201_v9 = vpop.eup %15302  ;;  %15312 = vpow2.f32 %v2566_v62 }
 0x4de   :  { %v2736_v15 = vsel %vm36_vm0, %v16201_v9, 0.0  ;;  %15314 = vpow2.f32 %v2526_v59 }
 0x4e0   :  { %2413 = vmax.xlane.f32.xlu0 %v2412_v63  ;;  %v2477_v63 = vsub.f32 %v15924_v22, %v2369_v11  ;;  %v2244_v22 = vsel %vm36_vm0, %v16085_v29, -inf }
 0x4e1   :  { %2740 = vadd.xlane.f32.xlu1 %v2739_v31  ;;  %v16209_v31 = vpop.eup %15304 }
 0x4e2   :  { %v2582_v13 = vmul.f32 1.442695, %v2477_v63  ;;  %v2760_v61 = vsel %vm36_vm0, %v16209_v31, 0.0 }
 0x4e3   :  { %v16216_v4 = vpop.eup %15306 }
 0x4e4   :  { %2248 = vmax.xlane.f32.xlu0 %v2247_v16  ;;  %v2542_v16 = vmul.f32 1.442695, %v2457_v21  ;;  %15316 = vpow2.f32 %v2582_v13  ;;  %v16227_v14 = vpop.eup %15308 }
 0x4e5   :  { %2764 = vadd.xlane.f32.xlu1 %v2763_v30  ;;  %v2258_v30 = vpop.xlane.xlu1 %2257 }
 0x4e6   :  { %15318 = vpow2.f32 %v2542_v16  ;;  %v2440_v27 = vsub.f32 %v16099_v20, %v2258_v30  ;;  %v2808_v20 = vsel %vm36_vm0, %v16227_v14, 0.0 }
 0x4e7   :  { %15320 = vpow2.f32 %v2558_v50 }
 0x4e8   :  { %2272 = vmax.xlane.f32.xlu0 %v2271_v8  ;;  %v2268_v8 = vsel %vm36_vm0, %v16087_v10, -inf  ;;  %v2508_v6 = vmul.f32 1.442695, %v2440_v27 }
 0x4e9   :  { %2788 = vadd.xlane.f32.xlu1 %v2787_v19  ;;  %v2784_v19 = vsel %vm36_vm0, %v16216_v4, 0.0  ;;  %v16237_v44 = vpop.eup %15310 }
 0x4ea   :  { %v16241_v38 = vpop.eup %15312  ;;  %15322 = vpow2.f32 %v2508_v6 }
 0x4eb   :  { %v2727_v54 = vsel %vm36_vm0, %v16241_v38, 0.0 }
 0x4ec   :  { %2296 = vmax.xlane.f32.xlu0 %v2295_v5  ;;  %v16233_v5 = vcombine.low %v16155_v40, %v16149_v48  ;;  %v2643_v48 = vsel %vm36_vm0, %v16237_v44, 0.0  ;;  %v16245_v40 = vpop.eup %15314 }
 0x4ed   :  { %2812 = vadd.xlane.f32.xlu1 %v2811_v12  ;;  %v2667_v62 = vsel %vm36_vm0, %v16245_v40, 0.0 }
 0x4ee   :  { %v2316_v11 = vsel %vm36_vm0, %v16233_v5, -inf }
 0x4f0   :  { %2320 = vmax.xlane.f32.xlu0 %v2319_v46 }
 0x4f1   :  { %2737 = vadd.xlane.f32.xlu1 %v2736_v15  ;;  %v16249_v12 = vpop.eup %15316 }
 0x4f2   :  { %v2751_v49 = vsel %vm36_vm0, %v16249_v12, 0.0 }
 0x4f3   :  { %v16253_v63 = vpop.eup %15318 }
 0x4f4   :  { %2245 = vmax.xlane.f32.xlu0 %v2244_v22  ;;  %v2691_v46 = vsel %vm36_vm0, %v16253_v63, 0.0  ;;  %v16259_v59 = vpop.eup %15320  ;;  %v533_v22 = vpop.permute.xlu1 %532 }
 0x4f5   :  { %2761 = vadd.xlane.f32.xlu1 %v2760_v61  ;;  %v2715_v21 = vsel %vm36_vm0, %v16259_v59, 0.0 }
 0x4f7   :  { %v16263_v15 = vpop.eup %15322 }
 0x4f8   :  { %2269 = vmax.xlane.f32.xlu0 %v2268_v8  ;;  %v2640_v13 = vsel %vm36_vm0, %v16263_v15, 0.0  ;;  %v528_v16 = vpop.permute.xlu1 %527 }
 0x4f9   :  { %2785 = vadd.xlane.f32.xlu1 %v2784_v19 }
 0x4fc   :  { %2293 = vmax.xlane.f32.xlu0 %v2292_v51 }
 0x4fd   :  { %2809 = vadd.xlane.f32.xlu1 %v2808_v20 }
 0x500   :  { %2317 = vmax.xlane.f32.xlu0 %v2316_v11 }
 0x501   :  { %2644 = vadd.xlane.f32.xlu1 %v2643_v48 }
 0x504   :  { %2728 = vadd.xlane.f32.xlu0 %v2727_v54 }
 0x505   :  { %2668 = vadd.xlane.f32.xlu1 %v2667_v62 }
 0x508   :  { %2752 = vadd.xlane.f32.xlu0 %v2751_v49 }
 0x509   :  { %2692 = vadd.xlane.f32.xlu1 %v2691_v46 }
 0x50d   :  { %2716 = vadd.xlane.f32.xlu1 %v2715_v21 }
 0x511   :  { %2641 = vadd.xlane.f32.xlu1 %v2640_v13 }
 0x528   :  { %v507_v23 = vpop.permute.xlu0 %506 }
 0x529   :  { %v515_v61 = vmul.f32 %v507_v23, %v15869_v33  ;;  %v514_v30 = vmul.f32 %v507_v23, %v15866_v28  ;;  %v517_v48 = vmul.f32 %v507_v23, %v15900_v1  ;;  %v516_v54 = vmul.f32 %v507_v23, %v15884_v42  ;;  %v14426_v23 = vld [vmem:[%s20361_s2 + $0x28] sm:$0xff] }
 0x52b   :  { %v536_v11 = vadd.f32 %v528_v16, %v515_v61  ;;  %v535_v62 = vadd.f32 %v528_v16, %v514_v30  ;;  %v538_v21 = vadd.f32 %v528_v16, %v517_v48  ;;  %v816_v61 = vld [vmem:[%s20362_s1 + $0x30] sm:$0xff]  ;;  %v813_v30 = vld [vmem:[%s20362_s1 + $0x18] sm:$0xff] }
 0x52c   :  { %v512_v8 = vpop.permute.xlu1 %511 }
 0x52d   :  { %v518_v50 = vmul.f32 %v512_v8, %v15891_v52  ;;  %v519_v27 = vmul.f32 %v512_v8, %v15895_v57  ;;  %v520_v19 = vmul.f32 %v512_v8, %v15931_v25  ;;  %v521_v51 = vmul.f32 %v512_v8, %v15954_v39  ;;  %v14425_v25 = vld [vmem:[%s20361_s2 + $0x20] sm:$0xff]  ;;  %v812_v8 = vld [vmem:[%s20362_s1 + $0x10] sm:$0xff] }
 0x52e   :  { %v544_v52 = vmax.f32 %v536_v11, 0.0  ;;  %v543_v57 = vmax.f32 %v535_v62, 0.0  ;;  %v537_v39 = vadd.f32 %v528_v16, %v516_v54  ;;  %v546_v42 = vmax.f32 %v538_v21, 0.0  ;;  %v817_v16 = vld [vmem:[%s20362_s1 + $0x38] sm:$0xff] }
 0x52f   :  { %v540_v6 = vadd.f32 %v533_v22, %v519_v27  ;;  %v539_v20 = vadd.f32 %v533_v22, %v518_v50  ;;  %v542_v28 = vadd.f32 %v533_v22, %v521_v51  ;;  %v541_v46 = vadd.f32 %v533_v22, %v520_v19  ;;  %v15572_v50 = vld [vmem:[%s20363_s4] sm:$0xff]  ;;  %v15573_v27 = vld [vmem:[%s20363_s4 + $0x8] sm:$0xff] }
 0x530   :  { %v545_v22 = vmax.f32 %v537_v39, 0.0 }
 0x531   :  { %v548_v33 = vmax.f32 %v540_v6, 0.0  ;;  %v547_v49 = vmax.f32 %v539_v20, 0.0  ;;  %v550_v13 = vmax.f32 %v542_v28, 0.0  ;;  %v549_v1 = vmax.f32 %v541_v46, 0.0 }
 0x533   :  { %588 = vmatprep.subr.mxu1 %v548_v33 }
 0x534   :  { %589 = vmatpush1.msra.mxu1 %v547_v49 }
 0x535   :  { %590 = vmatprep.subr.mxu1 %v544_v52 }
 0x536   :  { %591 = vmatpush1.msra.mxu1 %v543_v57 }
 0x537   :  { %665 = vmatprep.subr.mxu1 %v550_v13  ;;  %14427 = vmatmul.mubr.msk.f32.vlgmr.msra.gmra.mxu1 %vm36_vm0, %v14425_v25 }
 0x538   :  { %666 = vmatpush1.msra.mxu1 %v549_v1  ;;  %630 = vmatprep.mubr.f32.mxu1 %v20368_v3 }
 0x539   :  { %667 = vmatprep.subr.mxu1 %v546_v42 }
 0x53a   :  { %668 = vmatpush1.msra.mxu1 %v545_v22 }
 0x53b   :  { %14428 = vmatmul.mubr.msk.f32.gmra.mxu1 %vm36_vm0, %v14426_v23  ;;  %931 = vmatprep.subr.mxu1 %v817_v16 }
 0x53c   :  { %701 = vmatprep.mubr.f32.mxu1 %v20368_v3 }
 0x53f   :  { %14429 = vmatmul.mubr.msk.f32.vlgmr.msra.gmra.mxu1 %vm36_vm0, %v14425_v25 }
 0x540   :  { %707 = vmatprep.mubr.f32.mxu1 %v20368_v3  ;;  %932 = vmatpush1.msra.mxu1 %v816_v61 }
 0x541   :  { %933 = vmatprep.subr.mxu1 %v813_v30 }
 0x542   :  { %934 = vmatpush1.msra.mxu1 %v812_v8 }
 0x543   :  { %14430 = vmatmul.mubr.msk.f32.gmra.mxu1 %vm36_vm0, %v14426_v23 }
 0x544   :  { %967 = vmatprep.mubr.f32.mxu1 %v20368_v3 }
 0x547   :  { %14437 = vmatmul.mubr.msk.f32.vlgmr.msra.gmra.mxu1 %vm36_vm0, %v15572_v50 }
 0x548   :  { %973 = vmatprep.mubr.f32.mxu1 %v20368_v3 }
 0x54b   :  { %14438 = vmatmul.mubr.msk.f32.gmra.mxu1 %vm36_vm0, %v15573_v27 }
 0x54c   :  { %4480 = vmatprep.mubr.f32.mxu1 %v20368_v3 }
 0x555   :  { %v2393_v19 = vpop.xlane.xlu0 %2392 }
 0x556   :  { %v2485_v51 = vsub.f32 %v15938_v34, %v2393_v19 }
 0x558   :  { %v2598_v6 = vmul.f32 1.442695, %v2485_v51 }
 0x559   :  { %v2417_v20 = vpop.xlane.xlu0 %2416 }
 0x55a   :  { %15324 = vpow2.f32 %v2598_v6  ;;  %v2493_v11 = vsub.f32 %v15944_v53, %v2417_v20 }
 0x55c   :  { %v2614_v48 = vmul.f32 1.442695, %v2493_v11 }
 0x55d   :  { %v2342_v54 = vpop.xlane.xlu0 %2341 }
 0x55e   :  { %15326 = vpow2.f32 %v2614_v48  ;;  %v2468_v62 = vsub.f32 %v15998_v17, %v2342_v54  ;;  %v2282_v33 = vpop.xlane.xlu1 %2281 }
 0x55f   :  { %v2448_v49 = vsub.f32 %v16083_v32, %v2282_v33 }
 0x560   :  { %v2564_v28 = vmul.f32 1.442695, %v2468_v62 }
 0x561   :  { %v2524_v46 = vmul.f32 1.442695, %v2448_v49  ;;  %v2366_v52 = vpop.xlane.xlu0 %2365 }
 0x562   :  { %15328 = vpow2.f32 %v2564_v28  ;;  %v2476_v21 = vsub.f32 %v16000_v26, %v2366_v52  ;;  %v2306_v34 = vpop.xlane.xlu1 %2305 }
 0x563   :  { %15330 = vpow2.f32 %v2524_v46  ;;  %v2456_v57 = vsub.f32 %v16146_v60, %v2306_v34 }
 0x564   :  { %v2580_v25 = vmul.f32 1.442695, %v2476_v21 }
 0x565   :  { %v2540_v53 = vmul.f32 1.442695, %v2456_v57  ;;  %v2390_v39 = vpop.xlane.xlu0 %2389 }
 0x566   :  { %15332 = vpow2.f32 %v2580_v25  ;;  %v2484_v13 = vsub.f32 %v16004_v55, %v2390_v39  ;;  %v2330_v17 = vpop.xlane.xlu1 %2329 }
 0x567   :  { %v16318_v1 = vpop.eup %15324  ;;  %15334 = vpow2.f32 %v2540_v53  ;;  %v2464_v32 = vsub.f32 %v16161_v56, %v2330_v17 }
 0x568   :  { %v2596_v42 = vmul.f32 1.442695, %v2484_v13  ;;  %v2775_v26 = vsel %vm36_vm0, %v16318_v1, 0.0 }
 0x569   :  { %v2556_v22 = vmul.f32 1.442695, %v2464_v32  ;;  %2776 = vadd.xlane.f32.xlu0 %v2775_v26  ;;  %v2414_v23 = vpop.xlane.xlu0 %2413 }
 0x56a   :  { %15336 = vpow2.f32 %v2596_v42  ;;  %v2492_v60 = vsub.f32 %v16007_v35, %v2414_v23  ;;  %v16324_v16 = vpop.xlane.xlu1 %2740 }
 0x56b   :  { %v16326_v61 = vpop.eup %15326  ;;  %15338 = vpow2.f32 %v2556_v22 }
 0x56c   :  { %v2612_v55 = vmul.f32 1.442695, %v2492_v60  ;;  %v2799_v30 = vsel %vm36_vm0, %v16326_v61, 0.0 }
 0x56d   :  { %2800 = vadd.xlane.f32.xlu0 %v2799_v30  ;;  %v2249_v56 = vpop.xlane.xlu0 %2248 }
 0x56e   :  { %15340 = vpow2.f32 %v2612_v55  ;;  %v2437_v8 = vsub.f32 %v16038_v47, %v2249_v56  ;;  %v16331_v50 = vpop.xlane.xlu1 %2764 }
 0x56f   :  { %v16333_v27 = vpop.eup %15328 }
 0x570   :  { %v16335_v19 = vpop.eup %15330  ;;  %v2502_v35 = vmul.f32 1.442695, %v2437_v8  ;;  %v2724_v51 = vsel %vm36_vm0, %v16333_v27, 0.0 }
 0x571   :  { %2725 = vadd.xlane.f32.xlu0 %v2724_v51  ;;  %v2273_v6 = vpop.xlane.xlu0 %2272  ;;  %v2664_v20 = vsel %vm36_vm0, %v16335_v19, 0.0 }
 0x572   :  { %15342 = vpow2.f32 %v2502_v35  ;;  %v2445_v11 = vsub.f32 %v16040_v37, %v2273_v6  ;;  %2665 = vadd.xlane.f32.xlu1 %v2664_v20  ;;  %v16342_v47 = vpop.xlane.xlu1 %2788 }
 0x573   :  { %v16344_v48 = vpop.eup %15332 }
 0x574   :  { %v16346_v54 = vpop.eup %15334  ;;  %v2518_v62 = vmul.f32 1.442695, %v2445_v11  ;;  %v2748_v33 = vsel %vm36_vm0, %v16344_v48, 0.0 }
 0x575   :  { %2749 = vadd.xlane.f32.xlu0 %v2748_v33  ;;  %v2297_v49 = vpop.xlane.xlu0 %2296  ;;  %v2688_v28 = vsel %vm36_vm0, %v16346_v54, 0.0 }
 0x576   :  { %15344 = vpow2.f32 %v2518_v62  ;;  %v2453_v46 = vsub.f32 %v16054_v45, %v2297_v49  ;;  %2689 = vadd.xlane.f32.xlu1 %v2688_v28  ;;  %v16353_v37 = vpop.xlane.xlu1 %2812 }
 0x577   :  { %v16355_v52 = vpop.eup %15336 }
 0x578   :  { %v16357_v21 = vpop.eup %15338  ;;  %v2534_v34 = vmul.f32 1.442695, %v2453_v46  ;;  %v2772_v57 = vsel %vm36_vm0, %v16355_v52, 0.0 }
 0x579   :  { %2773 = vadd.xlane.f32.xlu0 %v2772_v57  ;;  %v2321_v25 = vpop.xlane.xlu0 %2320  ;;  %v2712_v53 = vsel %vm36_vm0, %v16357_v21, 0.0 }
 0x57a   :  { %15346 = vpow2.f32 %v2534_v34  ;;  %v2461_v39 = vsub.f32 %v16056_v2, %v2321_v25  ;;  %2713 = vadd.xlane.f32.xlu1 %v2712_v53  ;;  %v16364_v45 = vpop.xlane.xlu1 %2737 }
 0x57b   :  { %v16366_v13 = vpop.eup %15340 }
 0x57c   :  { %v2550_v17 = vmul.f32 1.442695, %v2461_v39  ;;  %v2796_v32 = vsel %vm36_vm0, %v16366_v13, 0.0 }
 0x57d   :  { %2797 = vadd.xlane.f32.xlu0 %v2796_v32  ;;  %v2246_v42 = vpop.xlane.xlu0 %2245 }
 0x57e   :  { %15348 = vpow2.f32 %v2550_v17  ;;  %v2436_v26 = vsub.f32 %v16085_v29, %v2246_v42  ;;  %v16371_v22 = vpop.xlane.xlu1 %2761 }
 0x57f   :  { %v16373_v23 = vpop.eup %15342 }
 0x580   :  { %v2500_v60 = vmul.f32 1.442695, %v2436_v26  ;;  %v2631_v2 = vsel %vm36_vm0, %v16373_v23, 0.0 }
 0x581   :  { %2632 = vadd.xlane.f32.xlu0 %v2631_v2  ;;  %v2270_v55 = vpop.xlane.xlu0 %2269 }
 0x582   :  { %15350 = vpow2.f32 %v2500_v60  ;;  %v2444_v30 = vsub.f32 %v16087_v10, %v2270_v55  ;;  %v16378_v56 = vpop.xlane.xlu1 %2785 }
 0x583   :  { %v16380_v8 = vpop.eup %15344 }
 0x584   :  { %v2516_v35 = vmul.f32 1.442695, %v2444_v30  ;;  %v2655_v29 = vsel %vm36_vm0, %v16380_v8, 0.0 }
 0x585   :  { %2656 = vadd.xlane.f32.xlu0 %v2655_v29  ;;  %v2294_v51 = vpop.xlane.xlu0 %2293 }
 0x586   :  { %15352 = vpow2.f32 %v2516_v35  ;;  %v2452_v6 = vsub.f32 %v16222_v36, %v2294_v51  ;;  %v16385_v20 = vpop.xlane.xlu1 %2809 }
 0x587   :  { %v16387_v11 = vpop.eup %15346 }
 0x588   :  { %v2532_v62 = vmul.f32 1.442695, %v2452_v6  ;;  %v2679_v10 = vsel %vm36_vm0, %v16387_v11, 0.0 }
 0x589   :  { %2680 = vadd.xlane.f32.xlu0 %v2679_v10  ;;  %v2318_v33 = vpop.xlane.xlu0 %2317 }
 0x58a   :  { %15354 = vpow2.f32 %v2532_v62  ;;  %v2460_v49 = vsub.f32 %v16233_v5, %v2318_v33  ;;  %v2645_v28 = vpop.xlane.xlu1 %2644 }
 0x58b   :  { %v16392_v46 = vpop.eup %15348  ;;  %15356 = vrcp.f32 %v16324_v16 }
 0x58c   :  { %15358 = vrcp.f32 %v16331_v50  ;;  %v2548_v36 = vmul.f32 1.442695, %v2460_v49  ;;  %v2703_v34 = vsel %vm36_vm0, %v16392_v46, 0.0 }
 0x58d   :  { %15360 = vrcp.f32 %v2645_v28  ;;  %2704 = vadd.xlane.f32.xlu0 %v2703_v34  ;;  %v2729_v57 = vpop.xlane.xlu0 %2728 }
 0x58e   :  { %15362 = vpow2.f32 %v2548_v36  ;;  %v2669_v25 = vpop.xlane.xlu1 %2668 }
 0x58f   :  { %v16398_v53 = vpop.eup %15350  ;;  %15364 = vrcp.f32 %v2729_v57 }
 0x590   :  { %15366 = vrcp.f32 %v2669_v25  ;;  %v2628_v5 = vsel %vm36_vm0, %v16398_v53, 0.0 }
 0x591   :  { %2629 = vadd.xlane.f32.xlu0 %v2628_v5  ;;  %v2753_v16 = vpop.xlane.xlu0 %2752 }
 0x592   :  { %15368 = vrcp.f32 %v2753_v16  ;;  %v2693_v50 = vpop.xlane.xlu1 %2692 }
 0x593   :  { %v16402_v39 = vpop.eup %15352  ;;  %15370 = vrcp.f32 %v2693_v50 }
 0x594   :  { %v2652_v17 = vsel %vm36_vm0, %v16402_v39, 0.0 }
 0x595   :  { %2653 = vadd.xlane.f32.xlu0 %v2652_v17 }
 0x596   :  { %v2717_v32 = vpop.xlane.xlu1 %2716 }
 0x597   :  { %v16406_v42 = vpop.eup %15354  ;;  %15372 = vrcp.f32 %v2717_v32 }
 0x598   :  { %v15357_v26 = vpop.eup %15356  ;;  %v2676_v60 = vsel %vm36_vm0, %v16406_v42, 0.0  ;;  %15374 = vrcp.f32 %v16353_v37 }
 0x599   :  { %v15359_v2 = vpop.eup %15358  ;;  %2677 = vadd.xlane.f32.xlu0 %v2676_v60  ;;  %v2895_v62 = vmul.f32 %v15357_v26, %v16171_v43  ;;  %15376 = vrcp.f32 %v16342_v47 }
 0x59a   :  { %v15361_v55 = vpop.eup %15360  ;;  %v16413_v29 = vmul.f32 %v15359_v2, %v16178_v24  ;;  %v2642_v32 = vpop.xlane.xlu1 %2641 }
 0x59b   :  { %v16410_v30 = vpop.eup %15362  ;;  %v16419_v10 = vmul.f32 %v15361_v55, %v16237_v44 }
 0x59c   :  { %v15365_v35 = vpop.eup %15364  ;;  %v2700_v51 = vsel %vm36_vm0, %v16410_v30, 0.0  ;;  %v3373_v24 = vcombine.high %v2895_v62, %v16413_v29 }
 0x59d   :  { %v15367_v6 = vpop.eup %15366  ;;  %2701 = vadd.xlane.f32.xlu0 %v2700_v51  ;;  %v2887_v28 = vmul.f32 %v15365_v35, %v16241_v38 }
 0x59e   :  { %v16422_v33 = vmul.f32 %v15367_v6, %v16245_v40  ;;  %v16433_v44 = vrot.slane %v3373_v24, %v15861_v18  ;;  %v3372_v6 = vcombine.low %v2895_v62, %v16413_v29 }
 0x59f   :  { %v15369_v49 = vpop.eup %15368 }
 0x5a0   :  { %v2903_v36 = vmul.f32 %v15369_v49, %v16249_v12  ;;  %v3237_v34 = vcombine.high %v16419_v10, %v16422_v33  ;;  %v15371_v57 = vpop.eup %15370 }
 0x5a1   :  { %v16436_v40 = vmul.f32 %v15371_v57, %v16253_v63 }
 0x5a2   :  { %v3357_v25 = vcombine.high %v2887_v28, %v2903_v36  ;;  %v3356_v55 = vcombine.low %v2887_v28, %v2903_v36 }
 0x5a4   :  { %v15373_v5 = vpop.eup %15372  ;;  %v16430_v43 = vrot.slane %v3357_v25, %v15861_v18 }
 0x5a5   :  { %v16439_v38 = vmul.f32 %v15373_v5, %v16259_v59  ;;  %v15375_v26 = vpop.eup %15374 }
 0x5a6   :  { %v3437_v12 = vcombine.high %v16430_v43, %v16433_v44  ;;  %v15377_v2 = vpop.eup %15376  ;;  %v2943_v47 = vmul.f32 %v15375_v26, %v16192_v0 }
 0x5a7   :  { %v3269_v16 = vcombine.high %v16436_v40, %v16439_v38 }
 0x5f2   :  { %v2777_v50 = vpop.xlane.xlu0 %2776 }
 0x5f3   :  { %15378 = vrcp.f32 %v2777_v50 }
 0x5f6   :  { %v2801_v17 = vpop.xlane.xlu0 %2800 }
 0x5f7   :  { %15380 = vrcp.f32 %v2801_v17 }
 0x5f8   :  { %15382 = vrcp.f32 %v16371_v22  ;;  %v2927_v22 = vmul.f32 %v15377_v2, %v16185_v58 }
 0x5f9   :  { %15384 = vrcp.f32 %v2642_v32 }
 0x5fa   :  { %v2726_v63 = vpop.xlane.xlu0 %2725  ;;  %15386 = vrcp.f32 %v16364_v45  ;;  %v3404_v24 = vcombine.low %v2927_v22, %v2943_v47  ;;  %v3405_v36 = vcombine.high %v2927_v22, %v2943_v47 }
 0x5fb   :  { %v2666_v59 = vpop.xlane.xlu1 %2665 }
 0x5fc   :  { %15388 = vrcp.f32 %v2666_v59  ;;  %v16463_v50 = vrot.slane %v3404_v24, %v15861_v18  ;;  %v16481_v2 = vrot.slane %v3405_v36, %v15861_v18 }
 0x5fd   :  { %15390 = vrcp.f32 %v2726_v63 }
 0x5fe   :  { %v2750_v60 = vpop.xlane.xlu0 %2749 }
 0x5ff   :  { %15392 = vrcp.f32 %v2750_v60  ;;  %v2690_v37 = vpop.xlane.xlu1 %2689 }
 0x600   :  { %15394 = vrcp.f32 %v16385_v20  ;;  %v15379_v35 = vpop.eup %15378  ;;  %v16457_v20 = vrot.slane %v3356_v55, %v15861_v18 }
 0x601   :  { %15396 = vrcp.f32 %v2690_v37  ;;  %v2919_v57 = vmul.f32 %v15379_v35, %v16318_v1 }
 0x602   :  { %v2774_v51 = vpop.xlane.xlu0 %2773  ;;  %15398 = vrcp.f32 %v16378_v56  ;;  %v16460_v56 = vrot.slane %v3372_v6, %v15861_v18 }
 0x603   :  { %v2714_v45 = vpop.xlane.xlu1 %2713 }
 0x604   :  { %v15381_v49 = vpop.eup %15380  ;;  %15400 = vrcp.f32 %v2714_v45  ;;  %v3420_v32 = vcombine.low %v16457_v20, %v16460_v56 }
 0x605   :  { %v2935_v0 = vmul.f32 %v15381_v49, %v16326_v61  ;;  %15402 = vrcp.f32 %v2774_v51  ;;  %v15383_v28 = vpop.eup %15382 }
 0x606   :  { %v2798_v58 = vpop.xlane.xlu0 %2797  ;;  %v15385_v25 = vpop.eup %15384  ;;  %v2909_v61 = vmul.f32 %v15383_v28, %v16209_v31  ;;  %v16492_v22 = vrot.slane %v3420_v32, %v15881_v41 }
 0x607   :  { %15404 = vrcp.f32 %v2798_v58  ;;  %v3388_v29 = vcombine.low %v2919_v57, %v2935_v0  ;;  %v3389_v62 = vcombine.high %v2919_v57, %v2935_v0  ;;  %v15387_v5 = vpop.eup %15386  ;;  %v16475_v59 = vmul.f32 %v15385_v25, %v16263_v15 }
 0x608   :  { %v2893_v37 = vmul.f32 %v15387_v5, %v16201_v9  ;;  %20422 = vst [vmem:[#allocation3_spill] sm:$0xff] %v16492_v22  ;;  %v16507_v0 = vrot.slane %v3437_v12, %v15881_v41 }
 0x609   :  { %v15389_v1 = vpop.eup %15388  ;;  %v16467_v17 = vrot.slane %v3388_v29, %v15861_v18  ;;  %v16472_v63 = vrot.slane %v3389_v62, %v15861_v18 }
 0x60a   :  { %v16478_v26 = vmul.f32 %v15389_v1, %v16335_v19  ;;  %v2633_v60 = vpop.xlane.xlu0 %2632  ;;  %v15391_v31 = vpop.eup %15390  ;;  %v3101_v45 = vcombine.high %v2893_v37, %v2909_v61  ;;  %v3100_v36 = vcombine.low %v2893_v37, %v2909_v61 }
 0x60b   :  { %v3452_v47 = vcombine.low %v16467_v17, %v16463_v50  ;;  %v3469_v35 = vcombine.high %v16472_v63, %v16481_v2  ;;  %v2885_v6 = vmul.f32 %v15391_v31, %v16333_v27  ;;  %15406 = vrcp.f32 %v2633_v60 }
 0x60c   :  { %v15393_v55 = vpop.eup %15392  ;;  %v2965_v15 = vcombine.high %v16475_v59, %v16478_v26  ;;  %v3115_v62 = vrot.slane %v3101_v45, %v15861_v18 }
 0x60d   :  { %v2901_v19 = vmul.f32 %v15393_v55, %v16344_v48  ;;  %v16495_v51 = vrot.slane %v3452_v47, %v15881_v41  ;;  %v15395_v9 = vpop.eup %15394  ;;  %v16499_v24 = vrot.slane %v3469_v35, %v15881_v41 }
 0x60e   :  { %v2657_v49 = vpop.xlane.xlu0 %2656  ;;  %v15397_v57 = vpop.eup %15396  ;;  %v2941_v29 = vmul.f32 %v15395_v9, %v16227_v14 }
 0x60f   :  { %20423 = vst [vmem:[#allocation4_spill] sm:$0xff] %v16495_v51  ;;  %15408 = vrcp.f32 %v2657_v49  ;;  %v3485_v48 = vcombine.high %v16492_v22, %v16495_v51  ;;  %v15399_v28 = vpop.eup %15398  ;;  %v3084_v58 = vcombine.low %v2885_v6, %v2901_v19  ;;  %v3085_v27 = vcombine.high %v2885_v6, %v2901_v19 }
 0x610   :  { %v16517_v12 = vmul.f32 %v15397_v57, %v16346_v54  ;;  %v2925_v37 = vmul.f32 %v15399_v28, %v16216_v4  ;;  %v3108_v49 = vrot.slane %v3100_v36, %v15861_v18  ;;  %v16532_v57 = vpop.f32.mrf.mxu1 }
 0x611   :  { %v15401_v25 = vpop.eup %15400  ;;  %4096 = vrot.lane.b32.xlu0 %v3485_v48, %s15587_s20  ;;  %v3099_v14 = vrot.slane %v3085_v27, %v15861_v18  ;;  %v3092_v55 = vrot.slane %v3084_v58, %v15861_v18  ;;  %20424 = vst [vmem:[#allocation5_spill] sm:$0xff] %v16532_v57 }
 0x612   :  { %v15403_v32 = vpop.eup %15402  ;;  %v16520_v61 = vmul.f32 %v15401_v25, %v16357_v21  ;;  %v2681_v60 = vpop.xlane.xlu0 %2680  ;;  %v3132_v45 = vcombine.low %v2925_v37, %v2941_v29  ;;  %v3133_v9 = vcombine.high %v2925_v37, %v2941_v29  ;;  %v3453_v29 = vcombine.high %v16467_v17, %v16463_v50 }
 0x613   :  { %15410 = vrcp.f32 %v2681_v60  ;;  %v3165_v35 = vcombine.high %v3099_v14, %v3115_v62  ;;  %v2917_v19 = vmul.f32 %v15403_v32, %v16355_v52  ;;  %v3149_v28 = vcombine.high %v3092_v55, %v3108_v49  ;;  %v16540_v36 = vpop.f32.mrf.mxu1 }
 0x614   :  { %v15405_v47 = vpop.eup %15404  ;;  %v2997_v54 = vcombine.high %v16517_v12, %v16520_v61  ;;  %v3148_v58 = vcombine.low %v3092_v55, %v3108_v49  ;;  %v3140_v25 = vrot.slane %v3132_v45, %v15861_v18  ;;  %20425 = vst [vmem:[#allocation6_spill] sm:$0xff] %v16540_v36  ;;  %v3164_v60 = vcombine.low %v3099_v14, %v3115_v62 }
 0x615   :  { %v2933_v21 = vmul.f32 %v15405_v47, %v16366_v13  ;;  %v3147_v13 = vrot.slane %v3133_v9, %v15861_v18  ;;  %v3421_v55 = vcombine.high %v16457_v20, %v16460_v56  ;;  %v3163_v45 = vrot.slane %v3149_v28, %v15881_v41 }
 0x616   :  { %v2705_v6 = vpop.xlane.xlu0 %2704  ;;  %v16546_v9 = vrot.slane %v3148_v58, %v15881_v41  ;;  %v16561_v28 = vrot.slane %v3164_v60, %v15881_v41 }
 0x617   :  { %15412 = vrcp.f32 %v2705_v6  ;;  %v3116_v4 = vcombine.low %v2917_v19, %v2933_v21  ;;  %v3117_v48 = vcombine.high %v2917_v19, %v2933_v21 }
 0x618   :  { %v15407_v37 = vpop.eup %15406  ;;  %20426 = vst [vmem:[#allocation7_spill] sm:$0xff] %v16546_v9 }
 0x619   :  { %v3124_v27 = vrot.slane %v3116_v4, %v15861_v18  ;;  %v3131_v52 = vrot.slane %v3117_v48, %v15861_v18  ;;  %v2823_v20 = vmul.f32 %v15407_v37, %v16373_v23  ;;  %v3467_v4 = vrot.slane %v3453_v29, %v15881_v41  ;;  %v16558_v48 = vpop.f32.mrf.mxu1 }
 0x61a   :  { %v2630_v32 = vpop.xlane.xlu0 %2629  ;;  %20428 = vst [vmem:[#allocation9_spill] sm:$0xff] %v16558_v48  ;;  %v3435_v29 = vrot.slane %v3421_v55, %v15881_v41 }
 0x61b   :  { %v3181_v47 = vcombine.high %v3124_v27, %v3140_v25  ;;  %v3180_v19 = vcombine.low %v3124_v27, %v3140_v25  ;;  %v3196_v21 = vcombine.low %v3131_v52, %v3147_v13  ;;  %15414 = vrcp.f32 %v2630_v32 }
 0x61c   :  { %v15409_v6 = vpop.eup %15408  ;;  %v3197_v49 = vcombine.high %v3131_v52, %v3147_v13  ;;  %v16569_v25 = vrot.slane %v3165_v35, %v15881_v41 }
 0x61d   :  { %v2839_v50 = vmul.f32 %v15409_v6, %v16380_v8  ;;  %v3195_v17 = vrot.slane %v3181_v47, %v15881_v41  ;;  %v16551_v62 = vrot.slane %v3180_v19, %v15881_v41  ;;  %v16554_v14 = vrot.slane %v3196_v21, %v15881_v41  ;;  %v16582_v19 = vpop.f32.mrf.mxu1 }
 0x61e   :  { %v2654_v56 = vpop.xlane.xlu0 %2653  ;;  %v16564_v8 = vrot.slane %v3197_v49, %v15881_v41  ;;  %v3468_v47 = vcombine.low %v16472_v63, %v16481_v2  ;;  %20429 = vst [vmem:[#allocation10_spill] sm:$0xff] %v16582_v19  ;;  %v3236_v21 = vcombine.low %v16419_v10, %v16422_v33  ;;  %v3487_v49 = vcombine.high %v3435_v29, %v3467_v4 }
 0x61f   :  { %20427 = vst [vmem:[#allocation8_spill] sm:$0xff] %v16551_v62  ;;  %15416 = vrcp.f32 %v2654_v56  ;;  %v3214_v58 = vcombine.low %v3163_v45, %v3195_v17  ;;  %v3213_v27 = vcombine.high %v16546_v9, %v16551_v62  ;;  %v3220_v23 = vcombine.low %v2823_v20, %v2839_v50 }
 0x620   :  { %v15411_v32 = vpop.eup %15410  ;;  %v3221_v37 = vcombine.high %v2823_v20, %v2839_v50  ;;  %v3486_v56 = vcombine.low %v3435_v29, %v3467_v4  ;;  %v3251_v50 = vrot.slane %v3237_v34, %v15861_v18  ;;  %v3436_v2 = vcombine.low %v16430_v43, %v16433_v44 }
 0x621   :  { %4048 = vrot.lane.b32.xlu0 %v3214_v58, %s15590_s22  ;;  %4040 = vrot.lane.b32.xlu1 %v3213_v27, %s15587_s20  ;;  %v2855_v63 = vmul.f32 %v15411_v32, %v16387_v11  ;;  %v16597_v58 = vrot.slane %v3220_v23, %v15861_v18  ;;  %v3268_v27 = vcombine.low %v16436_v40, %v16439_v38  ;;  %v16605_v32 = vpop.f32.mrf.mxu1 }
 0x622   :  { %v2678_v35 = vpop.xlane.xlu0 %2677  ;;  %v3235_v55 = vrot.slane %v3221_v37, %v15861_v18  ;;  %v3476_v11 = vrot.slane %v3468_v47, %v15881_v41  ;;  %20430 = vst [vmem:[#allocation11_spill] sm:$0xff] %v16605_v32  ;;  %v16608_v43 = vrot.slane %v3236_v21, %v15861_v18  ;;  %v3215_v44 = vcombine.high %v3163_v45, %v3195_v17 }
 0x623   :  { %15418 = vrcp.f32 %v2678_v35  ;;  %v16618_v47 = vrot.slane %v3268_v27, %v15861_v18  ;;  %v3283_v45 = vrot.slane %v3269_v16, %v15861_v18  ;;  %v16625_v17 = vpop.f32.mrf.mxu1 }
 0x624   :  { %v15413_v20 = vpop.eup %15412  ;;  %v3300_v10 = vcombine.low %v3235_v55, %v3251_v50  ;;  %v3301_v33 = vcombine.high %v3235_v55, %v3251_v50  ;;  %v3284_v37 = vcombine.low %v16597_v58, %v16608_v43  ;;  %20431 = vst [vmem:[#allocation12_spill] sm:$0xff] %v16625_v17 }
 0x625   :  { %v2871_v4 = vmul.f32 %v15413_v20, %v16392_v46  ;;  %4112 = vrot.lane.b32.xlu0 %v3487_v49, %s15586_s19  ;;  %4104 = vrot.lane.b32.xlu1 %v3486_v56, %s15590_s22  ;;  %v3444_v46 = vrot.slane %v3436_v2, %v15881_v41  ;;  %v16641_v16 = vpop.f32.mrf.mxu1 }
 0x626   :  { %v2702_v34 = vpop.xlane.xlu0 %2701  ;;  %v16630_v2 = vrot.slane %v3284_v37, %v15881_v41  ;;  %20434 = vst [vmem:[#allocation15_spill] sm:$0xff] %v16641_v16 }
 0x627   :  { %15420 = vrcp.f32 %v2702_v34  ;;  %v3252_v23 = vcombine.low %v2855_v63, %v2871_v4  ;;  %v3253_v29 = vcombine.high %v2855_v63, %v2871_v4  ;;  %v3488_v56 = vcombine.low %v3444_v46, %v3476_v11 }
 0x628   :  { %v15415_v35 = vpop.eup %15414  ;;  %20432 = vst [vmem:[#allocation13_spill] sm:$0xff] %v16630_v2  ;;  %v16644_v34 = vrot.slane %v3300_v10, %v15881_v41 }
 0x629   :  { %4056 = vrot.lane.b32.xlu0 %v3215_v44, %s15586_s19  ;;  %v16615_v49 = vrot.slane %v3252_v23, %v15861_v18  ;;  %v3267_v21 = vrot.slane %v3253_v29, %v15861_v18  ;;  %v2821_v27 = vmul.f32 %v15415_v35, %v16398_v53  ;;  %v3216_v53 = vcombine.low %v16561_v28, %v16554_v14 }
 0x62a   :  { %v16654_v29 = vrot.slane %v3301_v33, %v15881_v41  ;;  %v16666_v33 = vpop.f32.mrf.mxu1 }
 0x62b   :  { %v3316_v55 = vcombine.low %v16615_v49, %v16618_v47  ;;  %v3332_v50 = vcombine.low %v3267_v21, %v3283_v45  ;;  %v3333_v20 = vcombine.high %v3267_v21, %v3283_v45  ;;  %20437 = vst [vmem:[#allocation18_spill] sm:$0xff] %v16666_v33 }
 0x62c   :  { %v15417_v63 = vpop.eup %15416  ;;  %20436 = vst [vmem:[#allocation17_spill] sm:$0xff] %v16654_v29 }
 0x62d   :  { %v2837_v4 = vmul.f32 %v15417_v63, %v16402_v39  ;;  %4120 = vrot.lane.b32.xlu0 %v3488_v56, %s15589_s21  ;;  %v16636_v40 = vrot.slane %v3316_v55, %v15881_v41  ;;  %v16639_v38 = vrot.slane %v3332_v50, %v15881_v41  ;;  %v16647_v44 = vrot.slane %v3333_v20, %v15881_v41 }
 0x62e   :  { %v2964_v55 = vcombine.low %v16475_v59, %v16478_v26  ;;  %v2979_v20 = vrot.slane %v2965_v15, %v15861_v18  ;;  %v16683_v59 = vpop.f32.mrf.mxu1 }
 0x62f   :  { %20433 = vst [vmem:[#allocation14_spill] sm:$0xff] %v16636_v40  ;;  %20435 = vst [vmem:[#allocation16_spill] sm:$0xff] %v16647_v44  ;;  %v3349_v39 = vcombine.high %v16630_v2, %v16636_v40  ;;  %v2948_v23 = vcombine.low %v2821_v27, %v2837_v4  ;;  %v2949_v35 = vcombine.high %v2821_v27, %v2837_v4 }
 0x630   :  { %v15419_v56 = vpop.eup %15418  ;;  %v3489_v27 = vcombine.high %v3444_v46, %v3476_v11  ;;  %v2972_v26 = vrot.slane %v2964_v55, %v15861_v18  ;;  %v3317_v55 = vcombine.high %v16615_v49, %v16618_v47 }
 0x631   :  { %4064 = vrot.lane.b32.xlu0 %v3216_v53, %s15589_s21  ;;  %4094 = vrot.lane.b32.xlu1 %v3349_v39, %s15587_s20  ;;  %v2963_v50 = vrot.slane %v2949_v35, %v15861_v18  ;;  %v2956_v53 = vrot.slane %v2948_v23, %v15861_v18  ;;  %v2853_v37 = vmul.f32 %v15419_v56, %v16406_v42 }
 0x632   :  { %v2996_v35 = vcombine.low %v16517_v12, %v16520_v61  ;;  %v3011_v56 = vrot.slane %v2997_v54, %v15861_v18  ;;  %v3331_v47 = vrot.slane %v3317_v55, %v15881_v41 }
 0x633   :  { %v3028_v39 = vcombine.low %v2963_v50, %v2979_v20  ;;  %v3029_v3 = vcombine.high %v2963_v50, %v2979_v20  ;;  %v3012_v46 = vcombine.low %v2956_v53, %v2972_v26  ;;  %v3013_v5 = vcombine.high %v2956_v53, %v2972_v26 }
 0x634   :  { %v15421_v4 = vpop.eup %15420 }
 0x635   :  { %v2869_v52 = vmul.f32 %v15421_v4, %v16410_v30  ;;  %4128 = vrot.lane.b32.xlu0 %v3489_v27, %s15585_s18  ;;  %v3004_v30 = vrot.slane %v2996_v35, %v15861_v18  ;;  %v16698_v27 = vrot.slane %v3012_v46, %v15881_v41  ;;  %v3285_v4 = vcombine.high %v16597_v58, %v16608_v43 }
 0x636   :  { %v16703_v53 = vrot.slane %v3013_v5, %v15881_v41  ;;  %v16720_v58 = vrot.slane %v3028_v39, %v15881_v41  ;;  %v16723_v5 = vrot.slane %v3029_v3, %v15881_v41 }
 0x637   :  { %v2980_v15 = vcombine.low %v2853_v37, %v2869_v52  ;;  %v2981_v11 = vcombine.high %v2853_v37, %v2869_v52  ;;  %20438 = vst [vmem:[#allocation19_spill] sm:$0xff] %v16698_v27  ;;  %v3299_v46 = vrot.slane %v3285_v4, %v15881_v41 }
 0x639   :  { %1070 = vrot.lane.b32.xlu0 %v16683_v59, %s15584_s17  ;;  %v2988_v42 = vrot.slane %v2980_v15, %v15861_v18  ;;  %v2995_v23 = vrot.slane %v2981_v11, %v15861_v18 }
 0x63b   :  { %v3044_v52 = vcombine.low %v2988_v42, %v3004_v30  ;;  %v3045_v37 = vcombine.high %v2988_v42, %v3004_v30  ;;  %v3060_v50 = vcombine.low %v2995_v23, %v3011_v56  ;;  %v3061_v20 = vcombine.high %v2995_v23, %v3011_v56  ;;  %v16747_v30 = vpop.f32.mrf.mxu1 }
 0x63c   :  { %v3350_v42 = vcombine.low %v3299_v46, %v3331_v47  ;;  %v3351_v56 = vcombine.high %v3299_v46, %v3331_v47 }
 0x63d   :  { %1082 = vrot.lane.b32.xlu0 %v16683_v59, %s15585_s18  ;;  %v16708_v12 = vrot.slane %v3044_v52, %v15881_v41  ;;  %v16711_v61 = vrot.slane %v3045_v37, %v15881_v41  ;;  %v16714_v54 = vrot.slane %v3060_v50, %v15881_v41  ;;  %v16717_v49 = vrot.slane %v3061_v20, %v15881_v41  ;;  %v16761_v55 = vpop.f32.mrf.mxu1 }
 0x63f   :  { %20439 = vst [vmem:[#allocation20_spill] sm:$0xff] %v16708_v12  ;;  %20440 = vst [vmem:[#allocation21_spill] sm:$0xff] %v16717_v49  ;;  %v3077_v43 = vcombine.high %v16698_v27, %v16708_v12  ;;  %v3078_v23 = vcombine.low %v16703_v53, %v16711_v61  ;;  %v16779_v52 = vpop.f32.mrf.mxu1 }
 0x641   :  { %1094 = vrot.lane.b32.xlu0 %v16683_v59, %s15586_s19  ;;  %4038 = vrot.lane.b32.xlu1 %v3077_v43, %s15587_s20 }
 0x645   :  { %1106 = vrot.lane.b32.xlu0 %v16683_v59, %s15587_s20  ;;  %4102 = vrot.lane.b32.xlu1 %v3350_v42, %s15590_s22 }
 0x649   :  { %1120 = vrot.lane.b32.xlu0 %v16747_v30, %s15588_s0  ;;  %4046 = vrot.lane.b32.xlu1 %v3078_v23, %s15590_s22 }
 0x64d   :  { %1132 = vrot.lane.b32.xlu0 %v16747_v30, %s15589_s21  ;;  %4110 = vrot.lane.b32.xlu1 %v3351_v56, %s15586_s19 }
 0x651   :  { %1144 = vrot.lane.b32.xlu0 %v16747_v30, %s15590_s22  ;;  %1076 = vrot.lane.b32.xlu1 %v16683_v59, %s15588_s0 }
 0x655   :  { %1072 = vrot.lane.b32.xlu0 %v16761_v55, %s15584_s17  ;;  %1088 = vrot.lane.b32.xlu1 %v16683_v59, %s15589_s21 }
 0x659   :  { %1084 = vrot.lane.b32.xlu0 %v16761_v55, %s15585_s18  ;;  %1100 = vrot.lane.b32.xlu1 %v16683_v59, %s15590_s22 }
 0x65d   :  { %1096 = vrot.lane.b32.xlu0 %v16761_v55, %s15586_s19  ;;  %1114 = vrot.lane.b32.xlu1 %v16747_v30, %s15584_s17 }
 0x661   :  { %1108 = vrot.lane.b32.xlu0 %v16761_v55, %s15587_s20  ;;  %1126 = vrot.lane.b32.xlu1 %v16747_v30, %s15585_s18 }
 0x665   :  { %1122 = vrot.lane.b32.xlu0 %v16779_v52, %s15588_s0  ;;  %1138 = vrot.lane.b32.xlu1 %v16747_v30, %s15586_s19 }
 0x669   :  { %1134 = vrot.lane.b32.xlu0 %v16779_v52, %s15589_s21  ;;  %1150 = vrot.lane.b32.xlu1 %v16747_v30, %s15587_s20 }
 0x66d   :  { %1146 = vrot.lane.b32.xlu0 %v16779_v52, %s15590_s22  ;;  %1078 = vrot.lane.b32.xlu1 %v16761_v55, %s15588_s0 }
 0x671   :  { %1090 = vrot.lane.b32.xlu1 %v16761_v55, %s15589_s21 }
 0x675   :  { %1102 = vrot.lane.b32.xlu1 %v16761_v55, %s15590_s22 }
 0x679   :  { %1116 = vrot.lane.b32.xlu1 %v16779_v52, %s15584_s17 }
 0x67d   :  { %1128 = vrot.lane.b32.xlu1 %v16779_v52, %s15585_s18 }
 0x681   :  { %1140 = vrot.lane.b32.xlu1 %v16779_v52, %s15586_s19 }
 0x683   :  { %v16805_v37 = vpop.permute.xlu0 %4096 }
 0x684   :  { %20441 = vst [vmem:[#allocation22_spill] sm:$0xff] %v16805_v37 }
 0x685   :  { %1152 = vrot.lane.b32.xlu1 %v16779_v52, %s15587_s20 }
 0x693   :  { %v16807_v50 = vpop.permute.xlu0 %4048  ;;  %v16817_v46 = vpop.permute.xlu1 %4040 }
 0x694   :  { %20442 = vst [vmem:[#allocation23_spill] sm:$0xff] %v16807_v50  ;;  %20447 = vst [vmem:[#allocation28_spill] sm:$0xff] %v16817_v46 }
 0x697   :  { %v16809_v20 = vpop.permute.xlu0 %4112  ;;  %v16821_v23 = vpop.permute.xlu1 %4104 }
 0x698   :  { %20443 = vst [vmem:[#allocation24_spill] sm:$0xff] %v16809_v20  ;;  %20449 = vst [vmem:[#allocation30_spill] sm:$0xff] %v16821_v23 }
 0x69b   :  { %v16811_v4 = vpop.permute.xlu0 %4056 }
 0x69c   :  { %20444 = vst [vmem:[#allocation25_spill] sm:$0xff] %v16811_v4 }
 0x69f   :  { %v16813_v43 = vpop.permute.xlu0 %4120 }
 0x6a0   :  { %20445 = vst [vmem:[#allocation26_spill] sm:$0xff] %v16813_v43 }
 0x6a3   :  { %v16815_v47 = vpop.permute.xlu0 %4064  ;;  %v16823_v35 = vpop.permute.xlu1 %4094 }
 0x6a4   :  { %20446 = vst [vmem:[#allocation27_spill] sm:$0xff] %v16815_v47  ;;  %20450 = vst [vmem:[#allocation31_spill] sm:$0xff] %v16823_v35 }
 0x6a7   :  { %v16819_v42 = vpop.permute.xlu0 %4128 }
 0x6a8   :  { %20448 = vst [vmem:[#allocation29_spill] sm:$0xff] %v16819_v42 }
 0x6ab   :  { %v1071_v56 = vpop.permute.xlu0 %1070 }
 0x6af   :  { %v1083_v63 = vpop.permute.xlu0 %1082 }
 0x6b0   :  { %v1444_v26 = vcombine.low %v1071_v56, %v1083_v63 }
 0x6b2   :  { %v1452_v19 = vrot.slane %v1444_v26, %v15861_v18 }
 0x6b3   :  { %v1095_v45 = vpop.permute.xlu0 %1094  ;;  %v16825_v11 = vpop.permute.xlu1 %4038 }
 0x6b4   :  { %20451 = vst [vmem:[#allocation32_spill] sm:$0xff] %v16825_v11 }
 0x6b7   :  { %v1107_v31 = vpop.permute.xlu0 %1106  ;;  %v16827_v3 = vpop.permute.xlu1 %4102 }
 0x6b8   :  { %20452 = vst [vmem:[#allocation33_spill] sm:$0xff] %v16827_v3  ;;  %v1476_v7 = vcombine.low %v1095_v45, %v1107_v31  ;;  %v1477_v48 = vcombine.high %v1095_v45, %v1107_v31  ;;  %v1445_v3 = vcombine.high %v1071_v56, %v1083_v63 }
 0x6ba   :  { %v1484_v57 = vrot.slane %v1476_v7, %v15861_v18  ;;  %v1459_v7 = vrot.slane %v1445_v3, %v15861_v18 }
 0x6bb   :  { %v16829_v39 = vpop.permute.xlu1 %4046  ;;  %v16831_v6 = vpop.permute.xlu0 %1120 }
 0x6bc   :  { %20453 = vst [vmem:[#allocation34_spill] sm:$0xff] %v16829_v39 }
 0x6bf   :  { %v16833_v21 = vpop.permute.xlu1 %4110  ;;  %v16835_v15 = vpop.permute.xlu0 %1132 }
 0x6c0   :  { %20454 = vst [vmem:[#allocation35_spill] sm:$0xff] %v16833_v21 }
 0x6c3   :  { %v1077_v10 = vpop.permute.xlu1 %1076  ;;  %v16838_v13 = vpop.permute.xlu0 %1144 }
 0x6c4   :  { %v1428_v60 = vcombine.low %v16683_v59, %v1077_v10  ;;  %v1429_v36 = vcombine.high %v16683_v59, %v1077_v10 }
 0x6c6   :  { %v1436_v33 = vrot.slane %v1428_v60, %v15861_v18  ;;  %v1443_v31 = vrot.slane %v1429_v36, %v15861_v18 }
 0x6c7   :  { %v1089_v1 = vpop.permute.xlu1 %1088  ;;  %v16845_v2 = vpop.permute.xlu0 %1072 }
 0x6c8   :  { %v1492_v40 = vcombine.low %v1436_v33, %v1452_v19 }
 0x6ca   :  { %v1500_v63 = vrot.slane %v1492_v40, %v15881_v41 }
 0x6cb   :  { %v1101_v17 = vpop.permute.xlu1 %1100  ;;  %v16856_v26 = vpop.permute.xlu0 %1084 }
 0x6cc   :  { %v1460_v16 = vcombine.low %v1089_v1, %v1101_v17  ;;  %v1461_v32 = vcombine.high %v1089_v1, %v1101_v17  ;;  %v1491_v1 = vrot.slane %v1477_v48, %v15861_v18  ;;  %v1493_v17 = vcombine.high %v1436_v33, %v1452_v19 }
 0x6cd   :  { %v1564_v48 = vcombine.low %v16747_v30, %v16831_v6 }
 0x6ce   :  { %v1468_v21 = vrot.slane %v1460_v16, %v15861_v18  ;;  %v1475_v35 = vrot.slane %v1461_v32, %v15861_v18  ;;  %v1508_v32 = vcombine.low %v1443_v31, %v1459_v7  ;;  %v1507_v36 = vrot.slane %v1493_v17, %v15881_v41 }
 0x6cf   :  { %v16848_v39 = vpop.permute.xlu1 %1114  ;;  %v1509_v17 = vcombine.high %v1443_v31, %v1459_v7  ;;  %v1572_v27 = vrot.slane %v1564_v48, %v15861_v18  ;;  %v16880_v11 = vpop.permute.xlu0 %1096  ;;  %v1597_v48 = vcombine.high %v16835_v15, %v16838_v13 }
 0x6d0   :  { %v1524_v60 = vcombine.low %v1468_v21, %v1484_v57  ;;  %v1525_v12 = vcombine.high %v1468_v21, %v1484_v57  ;;  %v1540_v16 = vcombine.low %v1475_v35, %v1491_v1  ;;  %v1541_v19 = vcombine.high %v1475_v35, %v1491_v1 }
 0x6d1   :  { %v1516_v35 = vrot.slane %v1508_v32, %v15881_v41  ;;  %v1596_v1 = vcombine.low %v16835_v15, %v16838_v13 }
 0x6d2   :  { %v1532_v10 = vrot.slane %v1524_v60, %v15881_v41  ;;  %v1539_v59 = vrot.slane %v1525_v12, %v15881_v41  ;;  %v1548_v60 = vrot.slane %v1540_v16, %v15881_v41  ;;  %v1555_v31 = vrot.slane %v1541_v19, %v15881_v41 }
 0x6d3   :  { %v1127_v45 = vpop.permute.xlu1 %1126  ;;  %v1604_v43 = vrot.slane %v1596_v1, %v15861_v18  ;;  %v1565_v19 = vcombine.high %v16747_v30, %v16831_v6  ;;  %v1611_v1 = vrot.slane %v1597_v48, %v15861_v18  ;;  %v1109_v6 = vpop.permute.xlu0 %1108 }
 0x6d4   :  { %v16858_v56 = vcombine.high %v1500_v63, %v1532_v10  ;;  %v16860_v57 = vcombine.low %v1500_v63, %v1532_v10  ;;  %v1580_v21 = vcombine.low %v16848_v39, %v1127_v45  ;;  %v16870_v3 = vcombine.high %v1507_v36, %v1539_v59 }
 0x6d5   :  { %v16873_v10 = vcombine.low %v1507_v36, %v1539_v59  ;;  %v16889_v36 = vcombine.low %v1516_v35, %v1548_v60 }
 0x6d6   :  { %v2262_v40 = vsel %vm36_vm0, %v16858_v56, -inf  ;;  %v2250_v33 = vsel %vm36_vm0, %v16860_v57, -inf  ;;  %v1588_v63 = vrot.slane %v1580_v21, %v15861_v18  ;;  %v2286_v42 = vsel %vm36_vm0, %v16870_v3, -inf }
 0x6d7   :  { %v1139_v12 = vpop.permute.xlu1 %1138  ;;  %2263 = vmax.xlane.f32.xlu1 %v2262_v40  ;;  %2251 = vmax.xlane.f32.xlu0 %v2250_v33  ;;  %v16884_v40 = vcombine.high %v1516_v35, %v1548_v60  ;;  %v2274_v7 = vsel %vm36_vm0, %v16873_v10, -inf  ;;  %v1581_v21 = vcombine.high %v16848_v39, %v1127_v45  ;;  %v1523_v33 = vrot.slane %v1509_v17, %v15881_v41 }
 0x6d8   :  { %v1628_v47 = vcombine.low %v1572_v27, %v1588_v63  ;;  %v2298_v45 = vsel %vm36_vm0, %v16889_v36, -inf }
 0x6d9   :  { %v2310_v60 = vsel %vm36_vm0, %v16884_v40, -inf  ;;  %v16904_v13 = vcombine.high %v1523_v33, %v1555_v31  ;;  %v16908_v17 = vcombine.low %v1523_v33, %v1555_v31  ;;  %v1595_v30 = vrot.slane %v1581_v21, %v15861_v18 }
 0x6db   :  { %v1151_v16 = vpop.permute.xlu1 %1150  ;;  %2287 = vmax.xlane.f32.xlu1 %v2286_v42  ;;  %2275 = vmax.xlane.f32.xlu0 %v2274_v7  ;;  %v1636_v7 = vrot.slane %v1628_v47, %v15881_v41  ;;  %v2322_v48 = vsel %vm36_vm0, %v16908_v17, -inf  ;;  %v1988_v47 = vcombine.low %v16845_v2, %v16856_v26 }
 0x6dc   :  { %v1612_v59 = vcombine.low %v1139_v12, %v1151_v16  ;;  %v1613_v32 = vcombine.high %v1139_v12, %v1151_v16  ;;  %v1629_v16 = vcombine.high %v1572_v27, %v1588_v63 }
 0x6de   :  { %v1620_v42 = vrot.slane %v1612_v59, %v15861_v18  ;;  %v1627_v12 = vrot.slane %v1613_v32, %v15861_v18  ;;  %v1579_v32 = vrot.slane %v1565_v19, %v15861_v18  ;;  %v1643_v19 = vrot.slane %v1629_v16, %v15881_v41 }
 0x6df   :  { %v16902_v35 = vpop.permute.xlu1 %1078  ;;  %2311 = vmax.xlane.f32.xlu1 %v2310_v60  ;;  %2299 = vmax.xlane.f32.xlu0 %v2298_v45  ;;  %v1996_v16 = vrot.slane %v1988_v47, %v15861_v18 }
 0x6e0   :  { %v1660_v15 = vcombine.low %v1604_v43, %v1620_v42  ;;  %v1661_v39 = vcombine.high %v1604_v43, %v1620_v42  ;;  %v1676_v43 = vcombine.low %v1611_v1, %v1627_v12  ;;  %v2334_v42 = vsel %vm36_vm0, %v16904_v13, -inf }
 0x6e1   :  { %v1644_v63 = vcombine.low %v1579_v32, %v1595_v30  ;;  %v1972_v33 = vcombine.low %v16761_v55, %v16902_v35  ;;  %v1645_v23 = vcombine.high %v1579_v32, %v1595_v30 }
 0x6e2   :  { %v1668_v59 = vrot.slane %v1660_v15, %v15881_v41  ;;  %v1675_v31 = vrot.slane %v1661_v39, %v15881_v41  ;;  %v2020_v15 = vcombine.low %v16880_v11, %v1109_v6  ;;  %v1684_v4 = vrot.slane %v1676_v43, %v15881_v41 }
 0x6e3   :  { %v1091_v60 = vpop.permute.xlu1 %1090  ;;  %2335 = vmax.xlane.f32.xlu1 %v2334_v42  ;;  %2323 = vmax.xlane.f32.xlu0 %v2322_v48  ;;  %v1980_v62 = vrot.slane %v1972_v33, %v15861_v18  ;;  %v1652_v9 = vrot.slane %v1644_v63, %v15881_v41  ;;  %v1973_v63 = vcombine.high %v16761_v55, %v16902_v35 }
 0x6e4   :  { %v16920_v21 = vcombine.high %v1636_v7, %v1668_v59  ;;  %v16922_v27 = vcombine.low %v1636_v7, %v1668_v59  ;;  %v16934_v7 = vpop.permute.xlu0 %1122  ;;  %v1677_v59 = vcombine.high %v1611_v1, %v1627_v12  ;;  %v16936_v20 = vcombine.high %v1643_v19, %v1675_v31 }
 0x6e5   :  { %v16939_v50 = vcombine.low %v1643_v19, %v1675_v31  ;;  %v1989_v12 = vcombine.high %v16845_v2, %v16856_v26  ;;  %v2028_v1 = vrot.slane %v2020_v15, %v15861_v18  ;;  %v16953_v30 = vcombine.high %v1652_v9, %v1684_v4 }
 0x6e6   :  { %v2265_v39 = vsel %vm36_vm0, %v16920_v21, -inf  ;;  %v2253_v45 = vsel %vm36_vm0, %v16922_v27, -inf  ;;  %v2289_v31 = vsel %vm36_vm0, %v16936_v20, -inf  ;;  %v1691_v32 = vrot.slane %v1677_v59, %v15881_v41 }
 0x6e7   :  { %v1103_v42 = vpop.permute.xlu1 %1102  ;;  %2266 = vmax.xlane.f32.xlu1 %v2265_v39  ;;  %2254 = vmax.xlane.f32.xlu0 %v2253_v45  ;;  %v2021_v39 = vcombine.high %v16880_v11, %v1109_v6  ;;  %v2277_v26 = vsel %vm36_vm0, %v16939_v50, -inf  ;;  %v2036_v6 = vcombine.low %v1980_v62, %v1996_v16  ;;  %v1659_v33 = vrot.slane %v1645_v23, %v15881_v41 }
 0x6e8   :  { %v2004_v48 = vcombine.low %v1091_v60, %v1103_v42  ;;  %v2005_v46 = vcombine.high %v1091_v60, %v1103_v42  ;;  %v16960_v60 = vcombine.low %v1652_v9, %v1684_v4  ;;  %v16962_v11 = vpop.permute.xlu0 %1134  ;;  %v2003_v19 = vrot.slane %v1989_v12, %v15861_v18 }
 0x6e9   :  { %v2313_v55 = vsel %vm36_vm0, %v16953_v30, -inf  ;;  %v16971_v59 = vcombine.high %v1659_v33, %v1691_v32  ;;  %v2035_v4 = vrot.slane %v2021_v39, %v15861_v18  ;;  %v1987_v42 = vrot.slane %v1973_v63, %v15861_v18 }
 0x6ea   :  { %v2012_v43 = vrot.slane %v2004_v48, %v15861_v18  ;;  %v2019_v15 = vrot.slane %v2005_v46, %v15861_v18  ;;  %v2301_v23 = vsel %vm36_vm0, %v16960_v60, -inf  ;;  %v16978_v48 = vcombine.low %v1659_v33, %v1691_v32 }
 0x6eb   :  { %v16951_v47 = vpop.permute.xlu1 %1116  ;;  %2290 = vmax.xlane.f32.xlu1 %v2289_v31  ;;  %2278 = vmax.xlane.f32.xlu0 %v2277_v26  ;;  %v2037_v46 = vcombine.high %v1980_v62, %v1996_v16  ;;  %v2044_v12 = vrot.slane %v2036_v6, %v15881_v41  ;;  %v2337_v31 = vsel %vm36_vm0, %v16971_v59, -inf  ;;  %v2052_v63 = vcombine.low %v1987_v42, %v2003_v19 }
 0x6ec   :  { %v2068_v2 = vcombine.low %v2012_v43, %v2028_v1  ;;  %v2069_v45 = vcombine.high %v2012_v43, %v2028_v1  ;;  %v2084_v1 = vcombine.low %v2019_v15, %v2035_v4  ;;  %v1147_v43 = vpop.permute.xlu0 %1146  ;;  %v2325_v32 = vsel %vm36_vm0, %v16978_v48, -inf }
 0x6ed   :  { %v2051_v16 = vrot.slane %v2037_v46, %v15881_v41  ;;  %v2140_v6 = vcombine.low %v16962_v11, %v1147_v43  ;;  %v2060_v22 = vrot.slane %v2052_v63, %v15881_v41  ;;  %v2141_v63 = vcombine.high %v16962_v11, %v1147_v43 }
 0x6ee   :  { %v2076_v9 = vrot.slane %v2068_v2, %v15881_v41  ;;  %v2083_v39 = vrot.slane %v2069_v45, %v15881_v41  ;;  %v2108_v45 = vcombine.low %v16779_v52, %v16934_v7 }
 0x6ef   :  { %v16969_v35 = vpop.permute.xlu1 %1128  ;;  %2314 = vmax.xlane.f32.xlu1 %v2313_v55  ;;  %2302 = vmax.xlane.f32.xlu0 %v2301_v23  ;;  %v2092_v55 = vrot.slane %v2084_v1, %v15881_v41  ;;  %v2085_v23 = vcombine.high %v2019_v15, %v2035_v4  ;;  %v2053_v1 = vcombine.high %v1987_v42, %v2003_v19 }
 0x6f0   :  { %v16983_v26 = vcombine.high %v2044_v12, %v2076_v9  ;;  %v16988_v33 = vcombine.low %v2044_v12, %v2076_v9  ;;  %v2124_v62 = vcombine.low %v16951_v47, %v16969_v35  ;;  %v16999_v9 = vcombine.high %v2051_v16, %v2083_v39 }
 0x6f1   :  { %v17003_v46 = vcombine.low %v2051_v16, %v2083_v39  ;;  %v2148_v15 = vrot.slane %v2140_v6, %v15861_v18  ;;  %v17009_v44 = vcombine.high %v2060_v22, %v2092_v55  ;;  %v2099_v39 = vrot.slane %v2085_v23, %v15881_v41 }
 0x6f2   :  { %v2346_v12 = vsel %vm36_vm0, %v16988_v33, -inf  ;;  %v2132_v37 = vrot.slane %v2124_v62, %v15861_v18  ;;  %v2382_v49 = vsel %vm36_vm0, %v16999_v9, -inf  ;;  %v17017_v42 = vcombine.low %v2060_v22, %v2092_v55 }
 0x6f3   :  { %v1141_v2 = vpop.permute.xlu1 %1140  ;;  %2338 = vmax.xlane.f32.xlu1 %v2337_v31  ;;  %2326 = vmax.xlane.f32.xlu0 %v2325_v32  ;;  %v2358_v31 = vsel %vm36_vm0, %v16983_v26, -inf  ;;  %v2370_v19 = vsel %vm36_vm0, %v17003_v46, -inf  ;;  %v2125_v62 = vcombine.high %v16951_v47, %v16969_v35  ;;  %v2155_v43 = vrot.slane %v2141_v63, %v15861_v18 }
 0x6f4   :  { %v2394_v47 = vsel %vm36_vm0, %v17017_v42, -inf }
 0x6f7   :  { %v1153_v51 = vpop.permute.xlu1 %1152  ;;  %2359 = vmax.xlane.f32.xlu1 %v2358_v31  ;;  %2347 = vmax.xlane.f32.xlu0 %v2346_v12  ;;  %v2116_v31 = vrot.slane %v2108_v45, %v15861_v18 }
 0x6f8   :  { %v2156_v32 = vcombine.low %v1141_v2, %v1153_v51  ;;  %v2157_v29 = vcombine.high %v1141_v2, %v1153_v51  ;;  %v2067_v51 = vrot.slane %v2053_v1, %v15881_v41  ;;  %v2109_v2 = vcombine.high %v16779_v52, %v16934_v7 }
 0x6f9   :  { %v2172_v6 = vcombine.low %v2116_v31, %v2132_v37  ;;  %v2139_v52 = vrot.slane %v2125_v62, %v15861_v18  ;;  %v2173_v7 = vcombine.high %v2116_v31, %v2132_v37 }
 0x6fa   :  { %v2164_v4 = vrot.slane %v2156_v32, %v15861_v18  ;;  %v2171_v45 = vrot.slane %v2157_v29, %v15861_v18  ;;  %v17028_v22 = vcombine.high %v2067_v51, %v2099_v39  ;;  %v17033_v35 = vcombine.low %v2067_v51, %v2099_v39 }
 0x6fb   :  { %2383 = vmax.xlane.f32.xlu1 %v2382_v49  ;;  %2371 = vmax.xlane.f32.xlu0 %v2370_v19  ;;  %v2406_v49 = vsel %vm36_vm0, %v17009_v44, -inf  ;;  %v2180_v55 = vrot.slane %v2172_v6, %v15881_v41  ;;  %v2123_v29 = vrot.slane %v2109_v2, %v15861_v18  ;;  %v2187_v31 = vrot.slane %v2173_v7, %v15881_v41 }
 0x6fc   :  { %v2204_v16 = vcombine.low %v2148_v15, %v2164_v4  ;;  %v2205_v23 = vcombine.high %v2148_v15, %v2164_v4  ;;  %v2220_v12 = vcombine.low %v2155_v43, %v2171_v45  ;;  %v2430_v32 = vsel %vm36_vm0, %v17028_v22, -inf }
 0x6fd   :  { %v2418_v4 = vsel %vm36_vm0, %v17033_v35, -inf  ;;  %v2188_v37 = vcombine.low %v2123_v29, %v2139_v52  ;;  %v2221_v62 = vcombine.high %v2155_v43, %v2171_v45 }
 0x6fe   :  { %v2212_v11 = vrot.slane %v2204_v16, %v15881_v41  ;;  %v2219_v15 = vrot.slane %v2205_v23, %v15881_v41  ;;  %v2228_v63 = vrot.slane %v2220_v12, %v15881_v41 }
 0x6ff   :  { %2407 = vmax.xlane.f32.xlu1 %v2406_v49  ;;  %2395 = vmax.xlane.f32.xlu0 %v2394_v47  ;;  %v2196_v2 = vrot.slane %v2188_v37, %v15881_v41  ;;  %v2189_v49 = vcombine.high %v2123_v29, %v2139_v52  ;;  %v2235_v43 = vrot.slane %v2221_v62, %v15881_v41 }
 0x700   :  { %v17041_v1 = vcombine.high %v2180_v55, %v2212_v11  ;;  %v17046_v39 = vcombine.low %v2180_v55, %v2212_v11  ;;  %v17051_v19 = vcombine.high %v2187_v31, %v2219_v15  ;;  %v17056_v51 = vcombine.low %v2187_v31, %v2219_v15 }
 0x701   :  { %v17061_v11 = vcombine.high %v2196_v2, %v2228_v63  ;;  %v17065_v45 = vcombine.low %v2196_v2, %v2228_v63  ;;  %v2203_v7 = vrot.slane %v2189_v49, %v15881_v41  ;;  %v20456_v15 = vcombine.high %v16703_v53, %v16711_v61 }
 0x702   :  { %v2361_v16 = vsel %vm36_vm0, %v17041_v1, -inf  ;;  %v2349_v6 = vsel %vm36_vm0, %v17046_v39, -inf  ;;  %v2385_v23 = vsel %vm36_vm0, %v17051_v19, -inf  ;;  %v2373_v47 = vsel %vm36_vm0, %v17056_v51, -inf }
 0x703   :  { %2431 = vmax.xlane.f32.xlu1 %v2430_v32  ;;  %2419 = vmax.xlane.f32.xlu0 %v2418_v4  ;;  %v2409_v55 = vsel %vm36_vm0, %v17061_v11, -inf  ;;  %v2397_v52 = vsel %vm36_vm0, %v17065_v45, -inf  ;;  %v17073_v29 = vcombine.low %v2203_v7, %v2235_v43  ;;  %v20455_v32 = vcombine.high %v16561_v28, %v16554_v14 }
 0x704   :  { %v17085_v4 = vcombine.high %v2203_v7, %v2235_v43 }
 0x705   :  { %v2421_v12 = vsel %vm36_vm0, %v17073_v29, -inf }
 0x706   :  { %v2433_v37 = vsel %vm36_vm0, %v17085_v4, -inf }
 0x707   :  { %2362 = vmax.xlane.f32.xlu1 %v2361_v16  ;;  %2350 = vmax.xlane.f32.xlu0 %v2349_v6 }
 0x70b   :  { %2386 = vmax.xlane.f32.xlu1 %v2385_v23  ;;  %2374 = vmax.xlane.f32.xlu0 %v2373_v47 }
 0x70f   :  { %2410 = vmax.xlane.f32.xlu1 %v2409_v55  ;;  %2398 = vmax.xlane.f32.xlu0 %v2397_v52 }
 0x713   :  { %2422 = vmax.xlane.f32.xlu0 %v2421_v12 }
 0x720   :  { %4072 = vrot.lane.b32.xlu1 %v20455_v32, %s15585_s18 }
 0x729   :  { %4054 = vrot.lane.b32.xlu0 %v20456_v15, %s15586_s19 }
 0x744   :  { %2434 = vmax.xlane.f32.xlu1 %v2433_v37 }
 0x760   :  { %v2264_v31 = vpop.xlane.xlu1 %2263  ;;  %v2252_v16 = vpop.xlane.xlu0 %2251 }
 0x761   :  { %v2442_v63 = vsub.f32 %v16858_v56, %v2264_v31  ;;  %v2438_v62 = vsub.f32 %v16860_v57, %v2252_v16 }
 0x763   :  { %v2512_v6 = vmul.f32 1.442695, %v2442_v63  ;;  %v2504_v14 = vmul.f32 1.442695, %v2438_v62 }
 0x764   :  { %v2288_v28 = vpop.xlane.xlu1 %2287  ;;  %v2276_v2 = vpop.xlane.xlu0 %2275 }
 0x765   :  { %15422 = vpow2.f32 %v2512_v6  ;;  %v2450_v53 = vsub.f32 %v16870_v3, %v2288_v28  ;;  %v2446_v61 = vsub.f32 %v16873_v10, %v2276_v2 }
 0x766   :  { %15424 = vpow2.f32 %v2504_v14 }
 0x767   :  { %v2528_v49 = vmul.f32 1.442695, %v2450_v53  ;;  %v2520_v23 = vmul.f32 1.442695, %v2446_v61 }
 0x768   :  { %v2312_v47 = vpop.xlane.xlu1 %2311  ;;  %v2300_v43 = vpop.xlane.xlu0 %2299 }
 0x769   :  { %15426 = vpow2.f32 %v2528_v49  ;;  %v2458_v7 = vsub.f32 %v16884_v40, %v2312_v47  ;;  %v2454_v56 = vsub.f32 %v16889_v36, %v2300_v43 }
 0x76a   :  { %15428 = vpow2.f32 %v2520_v23 }
 0x76b   :  { %v2544_v57 = vmul.f32 1.442695, %v2458_v7  ;;  %v2536_v55 = vmul.f32 1.442695, %v2454_v56 }
 0x76c   :  { %v2336_v52 = vpop.xlane.xlu1 %2335  ;;  %v2324_v12 = vpop.xlane.xlu0 %2323 }
 0x76d   :  { %15430 = vpow2.f32 %v2544_v57  ;;  %v2466_v3 = vsub.f32 %v16904_v13, %v2336_v52  ;;  %v2462_v10 = vsub.f32 %v16908_v17, %v2324_v12 }
 0x76e   :  { %15432 = vpow2.f32 %v2536_v55 }
 0x76f   :  { %v2560_v32 = vmul.f32 1.442695, %v2466_v3  ;;  %v2552_v15 = vmul.f32 1.442695, %v2462_v10 }
 0x770   :  { %v2267_v37 = vpop.xlane.xlu1 %2266  ;;  %v2255_v31 = vpop.xlane.xlu0 %2254 }
 0x771   :  { %15434 = vpow2.f32 %v2560_v32  ;;  %v2443_v40 = vsub.f32 %v16920_v21, %v2267_v37  ;;  %v2439_v36 = vsub.f32 %v16922_v27, %v2255_v31 }
 0x772   :  { %v17098_v16 = vpop.eup %15422  ;;  %15436 = vpow2.f32 %v2552_v15 }
 0x773   :  { %v17101_v63 = vpop.eup %15424  ;;  %v2514_v62 = vmul.f32 1.442695, %v2443_v40  ;;  %v2646_v13 = vsel %vm36_vm0, %v17098_v16, 0.0  ;;  %v2506_v6 = vmul.f32 1.442695, %v2439_v36 }
 0x774   :  { %v2634_v17 = vsel %vm36_vm0, %v17101_v63, 0.0  ;;  %2647 = vadd.xlane.f32.xlu1 %v2646_v13  ;;  %v2291_v14 = vpop.xlane.xlu1 %2290  ;;  %v2279_v28 = vpop.xlane.xlu0 %2278 }
 0x775   :  { %15438 = vpow2.f32 %v2514_v62  ;;  %2635 = vadd.xlane.f32.xlu0 %v2634_v17  ;;  %v2451_v21 = vsub.f32 %v16936_v20, %v2291_v14  ;;  %v2447_v27 = vsub.f32 %v16939_v50, %v2279_v28 }
 0x776   :  { %v17108_v2 = vpop.eup %15426  ;;  %15440 = vpow2.f32 %v2506_v6 }
 0x777   :  { %v17111_v53 = vpop.eup %15428  ;;  %v2530_v61 = vmul.f32 1.442695, %v2451_v21  ;;  %v2670_v49 = vsel %vm36_vm0, %v17108_v2, 0.0  ;;  %v2522_v23 = vmul.f32 1.442695, %v2447_v27 }
 0x778   :  { %v2658_v47 = vsel %vm36_vm0, %v17111_v53, 0.0  ;;  %2671 = vadd.xlane.f32.xlu1 %v2670_v49  ;;  %v2315_v43 = vpop.xlane.xlu1 %2314  ;;  %v2303_v7 = vpop.xlane.xlu0 %2302 }
 0x779   :  { %15442 = vpow2.f32 %v2530_v61  ;;  %2659 = vadd.xlane.f32.xlu0 %v2658_v47  ;;  %v2459_v20 = vsub.f32 %v16953_v30, %v2315_v43  ;;  %v2455_v50 = vsub.f32 %v16960_v60, %v2303_v7 }
 0x77a   :  { %v17118_v56 = vpop.eup %15430  ;;  %15444 = vpow2.f32 %v2522_v23 }
 0x77b   :  { %v17121_v57 = vpop.eup %15432  ;;  %v2546_v55 = vmul.f32 1.442695, %v2459_v20  ;;  %v2694_v52 = vsel %vm36_vm0, %v17118_v56, 0.0  ;;  %v2538_v12 = vmul.f32 1.442695, %v2455_v50 }
 0x77c   :  { %v2682_v3 = vsel %vm36_vm0, %v17121_v57, 0.0  ;;  %2695 = vadd.xlane.f32.xlu1 %v2694_v52  ;;  %v2339_v10 = vpop.xlane.xlu1 %2338  ;;  %v2327_v32 = vpop.xlane.xlu0 %2326 }
 0x77d   :  { %15446 = vpow2.f32 %v2546_v55  ;;  %2683 = vadd.xlane.f32.xlu0 %v2682_v3  ;;  %v2467_v30 = vsub.f32 %v16971_v59, %v2339_v10  ;;  %v2463_v60 = vsub.f32 %v16978_v48, %v2327_v32 }
 0x77e   :  { %v17128_v15 = vpop.eup %15434  ;;  %15448 = vpow2.f32 %v2538_v12 }
 0x77f   :  { %v17131_v37 = vpop.eup %15436  ;;  %v2562_v31 = vmul.f32 1.442695, %v2467_v30  ;;  %v2718_v40 = vsel %vm36_vm0, %v17128_v15, 0.0  ;;  %v2554_v36 = vmul.f32 1.442695, %v2463_v60 }
 0x780   :  { %v2706_v62 = vsel %vm36_vm0, %v17131_v37, 0.0  ;;  %2719 = vadd.xlane.f32.xlu1 %v2718_v40  ;;  %v2360_v13 = vpop.xlane.xlu1 %2359  ;;  %v2348_v6 = vpop.xlane.xlu0 %2347 }
 0x781   :  { %15450 = vpow2.f32 %v2562_v31  ;;  %2707 = vadd.xlane.f32.xlu0 %v2706_v62  ;;  %v2474_v59 = vsub.f32 %v16983_v26, %v2360_v13  ;;  %v2470_v48 = vsub.f32 %v16988_v33, %v2348_v6 }
 0x782   :  { %v17138_v17 = vpop.eup %15438  ;;  %15452 = vpow2.f32 %v2554_v36 }
 0x783   :  { %v17141_v14 = vpop.eup %15440  ;;  %v2576_v28 = vmul.f32 1.442695, %v2474_v59  ;;  %v2649_v21 = vsel %vm36_vm0, %v17138_v17, 0.0  ;;  %v2568_v27 = vmul.f32 1.442695, %v2470_v48 }
 0x784   :  { %v2637_v61 = vsel %vm36_vm0, %v17141_v14, 0.0  ;;  %2650 = vadd.xlane.f32.xlu1 %v2649_v21  ;;  %v2384_v49 = vpop.xlane.xlu1 %2383  ;;  %v2372_v23 = vpop.xlane.xlu0 %2371 }
 0x785   :  { %15454 = vpow2.f32 %v2576_v28  ;;  %2638 = vadd.xlane.f32.xlu0 %v2637_v61  ;;  %v2482_v26 = vsub.f32 %v16999_v9, %v2384_v49  ;;  %v2478_v33 = vsub.f32 %v17003_v46, %v2372_v23 }
 0x786   :  { %v17148_v47 = vpop.eup %15442  ;;  %15456 = vpow2.f32 %v2568_v27 }
 0x787   :  { %v17151_v43 = vpop.eup %15444  ;;  %v2592_v7 = vmul.f32 1.442695, %v2482_v26  ;;  %v2673_v20 = vsel %vm36_vm0, %v17148_v47, 0.0  ;;  %v2584_v50 = vmul.f32 1.442695, %v2478_v33 }
 0x788   :  { %v2661_v55 = vsel %vm36_vm0, %v17151_v43, 0.0  ;;  %2674 = vadd.xlane.f32.xlu1 %v2673_v20  ;;  %v2408_v52 = vpop.xlane.xlu1 %2407  ;;  %v2396_v12 = vpop.xlane.xlu0 %2395 }
 0x789   :  { %15458 = vpow2.f32 %v2592_v7  ;;  %2662 = vadd.xlane.f32.xlu0 %v2661_v55  ;;  %v2490_v9 = vsub.f32 %v17009_v44, %v2408_v52  ;;  %v2486_v46 = vsub.f32 %v17017_v42, %v2396_v12 }
 0x78a   :  { %v17158_v3 = vpop.eup %15446  ;;  %15460 = vpow2.f32 %v2584_v50 }
 0x78b   :  { %v17161_v10 = vpop.eup %15448  ;;  %v2608_v32 = vmul.f32 1.442695, %v2490_v9  ;;  %v2697_v30 = vsel %vm36_vm0, %v17158_v3, 0.0  ;;  %v2600_v60 = vmul.f32 1.442695, %v2486_v46 }
 0x78c   :  { %v2685_v31 = vsel %vm36_vm0, %v17161_v10, 0.0  ;;  %2698 = vadd.xlane.f32.xlu1 %v2697_v30  ;;  %v2432_v40 = vpop.xlane.xlu1 %2431  ;;  %v2420_v36 = vpop.xlane.xlu0 %2419 }
 0x78d   :  { %15462 = vpow2.f32 %v2608_v32  ;;  %2686 = vadd.xlane.f32.xlu0 %v2685_v31  ;;  %v2498_v44 = vsub.f32 %v17028_v22, %v2432_v40  ;;  %v2494_v42 = vsub.f32 %v17033_v35, %v2420_v36 }
 0x78e   :  { %v17168_v62 = vpop.eup %15450  ;;  %15464 = vpow2.f32 %v2600_v60 }
 0x78f   :  { %v17171_v13 = vpop.eup %15452  ;;  %v2624_v6 = vmul.f32 1.442695, %v2498_v44  ;;  %v2721_v59 = vsel %vm36_vm0, %v17168_v62, 0.0  ;;  %v2616_v48 = vmul.f32 1.442695, %v2494_v42 }
 0x790   :  { %v2709_v28 = vsel %vm36_vm0, %v17171_v13, 0.0  ;;  %2722 = vadd.xlane.f32.xlu1 %v2721_v59  ;;  %v2363_v21 = vpop.xlane.xlu1 %2362  ;;  %v2351_v22 = vpop.xlane.xlu0 %2350 }
 0x791   :  { %15466 = vpow2.f32 %v2624_v6  ;;  %2710 = vadd.xlane.f32.xlu0 %v2709_v28  ;;  %v2475_v27 = vsub.f32 %v17041_v1, %v2363_v21  ;;  %v2471_v35 = vsub.f32 %v17046_v39, %v2351_v22 }
 0x792   :  { %v17178_v61 = vpop.eup %15454  ;;  %15468 = vpow2.f32 %v2616_v48 }
 0x793   :  { %v17181_v49 = vpop.eup %15456  ;;  %v2578_v23 = vmul.f32 1.442695, %v2475_v27  ;;  %v2742_v26 = vsel %vm36_vm0, %v17178_v61, 0.0  ;;  %v2570_v33 = vmul.f32 1.442695, %v2471_v35 }
 0x794   :  { %v2730_v7 = vsel %vm36_vm0, %v17181_v49, 0.0  ;;  %2743 = vadd.xlane.f32.xlu1 %v2742_v26  ;;  %v2387_v20 = vpop.xlane.xlu1 %2386  ;;  %v2375_v1 = vpop.xlane.xlu0 %2374 }
 0x795   :  { %15470 = vpow2.f32 %v2578_v23  ;;  %2731 = vadd.xlane.f32.xlu0 %v2730_v7  ;;  %v2483_v50 = vsub.f32 %v17051_v19, %v2387_v20  ;;  %v2479_v39 = vsub.f32 %v17056_v51, %v2375_v1 }
 0x796   :  { %v17188_v55 = vpop.eup %15458  ;;  %15472 = vpow2.f32 %v2570_v33 }
 0x797   :  { %v17191_v52 = vpop.eup %15460  ;;  %v2594_v12 = vmul.f32 1.442695, %v2483_v50  ;;  %v2766_v9 = vsel %vm36_vm0, %v17188_v55, 0.0  ;;  %v2586_v46 = vmul.f32 1.442695, %v2479_v39 }
 0x798   :  { %v2754_v32 = vsel %vm36_vm0, %v17191_v52, 0.0  ;;  %2767 = vadd.xlane.f32.xlu1 %v2766_v9  ;;  %v2411_v30 = vpop.xlane.xlu1 %2410  ;;  %v2399_v19 = vpop.xlane.xlu0 %2398 }
 0x799   :  { %15474 = vpow2.f32 %v2594_v12  ;;  %2755 = vadd.xlane.f32.xlu0 %v2754_v32  ;;  %v2491_v60 = vsub.f32 %v17061_v11, %v2411_v30  ;;  %v2487_v51 = vsub.f32 %v17065_v45, %v2399_v19  ;;  %v20457_v32 = vcombine.low %v16507_v0, %v16499_v24 }
 0x79a   :  { %v17198_v31 = vpop.eup %15462  ;;  %15476 = vpow2.f32 %v2586_v46  ;;  %v20458_v30 = vcombine.low %v16569_v25, %v16564_v8  ;;  %v20459_v19 = vcombine.low %v16644_v34, %v16639_v38 }
 0x79b   :  { %v17201_v40 = vpop.eup %15464  ;;  %v2610_v36 = vmul.f32 1.442695, %v2491_v60  ;;  %v2790_v44 = vsel %vm36_vm0, %v17198_v31, 0.0  ;;  %v2602_v42 = vmul.f32 1.442695, %v2487_v51  ;;  %v20460_v51 = vcombine.low %v16720_v58, %v16714_v54 }
 0x79c   :  { %v2778_v6 = vsel %vm36_vm0, %v17201_v40, 0.0  ;;  %2791 = vadd.xlane.f32.xlu1 %v2790_v44  ;;  %v2423_v59 = vpop.xlane.xlu0 %2422  ;;  %v17256_v60 = vpop.permute.xlu1 %4072 }
 0x79d   :  { %15478 = vpow2.f32 %v2610_v36  ;;  %2779 = vadd.xlane.f32.xlu0 %v2778_v6  ;;  %v2495_v48 = vsub.f32 %v17073_v29, %v2423_v59  ;;  %v20462_v59 = vcombine.high %v16569_v25, %v16564_v8  ;;  %v20466_v8 = vcombine.high %v16507_v0, %v16499_v24 }
 0x79e   :  { %v17207_v11 = vpop.eup %15466  ;;  %15480 = vpow2.f32 %v2602_v42  ;;  %v20461_v42 = vcombine.high %v16644_v34, %v16639_v38  ;;  %v20467_v34 = vcombine.high %v16720_v58, %v16714_v54 }
 0x79f   :  { %v17210_v45 = vpop.eup %15468  ;;  %v2814_v28 = vsel %vm36_vm0, %v17207_v11, 0.0  ;;  %v2618_v21 = vmul.f32 1.442695, %v2495_v48  ;;  %v20463_v48 = vld [vmem:[#allocation21_spill] sm:$0xff] }
 0x7a0   :  { %v2802_v22 = vsel %vm36_vm0, %v17210_v45, 0.0  ;;  %2815 = vadd.xlane.f32.xlu1 %v2814_v28  ;;  %v20464_v28 = vcombine.low %v16723_v5, %v20463_v48  ;;  %v17287_v25 = vpop.permute.xlu0 %4054 }
 0x7a1   :  { %2803 = vadd.xlane.f32.xlu0 %v2802_v22  ;;  %15482 = vpow2.f32 %v2618_v21 }
 0x7a2   :  { %v17216_v27 = vpop.eup %15470 }
 0x7a3   :  { %v17218_v35 = vpop.eup %15472  ;;  %v2745_v23 = vsel %vm36_vm0, %v17216_v27, 0.0 }
 0x7a4   :  { %v2733_v29 = vsel %vm36_vm0, %v17218_v35, 0.0  ;;  %2746 = vadd.xlane.f32.xlu1 %v2745_v23  ;;  %v20468_v23 = vld [vmem:[#allocation17_spill] sm:$0xff] }
 0x7a5   :  { %2734 = vadd.xlane.f32.xlu0 %v2733_v29  ;;  %v20469_v29 = vld [vmem:[#allocation16_spill] sm:$0xff] }
 0x7a6   :  { %v17224_v26 = vpop.eup %15474  ;;  %v20471_v24 = vcombine.high %v20468_v23, %v20469_v29 }
 0x7a7   :  { %v17226_v33 = vpop.eup %15476  ;;  %v2769_v7 = vsel %vm36_vm0, %v17224_v26, 0.0 }
 0x7a8   :  { %v2757_v20 = vsel %vm36_vm0, %v17226_v33, 0.0  ;;  %2770 = vadd.xlane.f32.xlu1 %v2769_v7  ;;  %v20470_v7 = vcombine.low %v20468_v23, %v20469_v29 }
 0x7a9   :  { %2758 = vadd.xlane.f32.xlu0 %v2757_v20 }
 0x7aa   :  { %v17232_v1 = vpop.eup %15478 }
 0x7ab   :  { %v17234_v50 = vpop.eup %15480  ;;  %v2793_v39 = vsel %vm36_vm0, %v17232_v1, 0.0 }
 0x7ac   :  { %v2781_v12 = vsel %vm36_vm0, %v17234_v50, 0.0  ;;  %2794 = vadd.xlane.f32.xlu1 %v2793_v39 }
 0x7ad   :  { %2782 = vadd.xlane.f32.xlu0 %v2781_v12 }
 0x7ae   :  { %v17240_v9 = vpop.eup %15482 }
 0x7af   :  { %v2805_v46 = vsel %vm36_vm0, %v17240_v9, 0.0 }
 0x7b1   :  { %2806 = vadd.xlane.f32.xlu0 %v2805_v46 }
 0x7bd   :  { %4136 = vrot.lane.b32.xlu1 %v20457_v32, %s15588_s0 }
 0x7c1   :  { %4080 = vrot.lane.b32.xlu1 %v20458_v30, %s15588_s0 }
 0x7c7   :  { %4118 = vrot.lane.b32.xlu0 %v20459_v19, %s15589_s21 }
 0x7cb   :  { %4062 = vrot.lane.b32.xlu0 %v20460_v51, %s15589_s21 }
 0x7cd   :  { %v2435_v36 = vpop.xlane.xlu1 %2434 }
 0x7ce   :  { %v2499_v44 = vsub.f32 %v17085_v4, %v2435_v36  ;;  %v20465_v4 = vcombine.high %v16723_v5, %v20463_v48 }
 0x7cf   :  { %4126 = vrot.lane.b32.xlu0 %v20461_v42, %s15585_s18 }
 0x7d0   :  { %v2626_v6 = vmul.f32 1.442695, %v2499_v44 }
 0x7d2   :  { %15484 = vpow2.f32 %v2626_v6 }
 0x7d3   :  { %4088 = vrot.lane.b32.xlu0 %v20462_v59, %s15584_s17 }
 0x7d7   :  { %4078 = vrot.lane.b32.xlu0 %v20464_v28, %s15588_s0 }
 0x7db   :  { %4086 = vrot.lane.b32.xlu0 %v20465_v4, %s15584_s17 }
 0x7df   :  { %v17279_v21 = vpop.eup %15484 }
 0x7e0   :  { %v2817_v38 = vsel %vm36_vm0, %v17279_v21, 0.0 }
 0x7e5   :  { %2818 = vadd.xlane.f32.xlu1 %v2817_v38 }
 0x7f6   :  { %4144 = vrot.lane.b32.xlu1 %v20466_v8, %s15584_s17 }
 0x7fa   :  { %4070 = vrot.lane.b32.xlu1 %v20467_v34, %s15585_s18 }
 0x7fd   :  { %v2648_v5 = vpop.xlane.xlu1 %2647 }
 0x7fe   :  { %v2636_v22 = vpop.xlane.xlu0 %2635  ;;  %4134 = vrot.lane.b32.xlu1 %v20470_v7, %s15588_s0  ;;  %15486 = vrcp.f32 %v2648_v5 }
 0x7ff   :  { %15488 = vrcp.f32 %v2636_v22 }
 0x801   :  { %v2672_v20 = vpop.xlane.xlu1 %2671 }
 0x802   :  { %v2660_v39 = vpop.xlane.xlu0 %2659  ;;  %15490 = vrcp.f32 %v2672_v20  ;;  %4142 = vrot.lane.b32.xlu1 %v20471_v24, %s15584_s17 }
 0x803   :  { %15492 = vrcp.f32 %v2660_v39 }
 0x805   :  { %v2696_v0 = vpop.xlane.xlu1 %2695 }
 0x806   :  { %v2684_v54 = vpop.xlane.xlu0 %2683  ;;  %15494 = vrcp.f32 %v2696_v0 }
 0x807   :  { %15496 = vrcp.f32 %v2684_v54 }
 0x809   :  { %v2720_v58 = vpop.xlane.xlu1 %2719 }
 0x80a   :  { %v2708_v12 = vpop.xlane.xlu0 %2707  ;;  %15498 = vrcp.f32 %v2720_v58 }
 0x80b   :  { %15500 = vrcp.f32 %v2708_v12  ;;  %v15487_v46 = vpop.eup %15486 }
 0x80c   :  { %v15489_v30 = vpop.eup %15488  ;;  %v2833_v44 = vmul.f32 %v15487_v46, %v17098_v16 }
 0x80d   :  { %v2651_v32 = vpop.xlane.xlu1 %2650  ;;  %v2825_v6 = vmul.f32 %v15489_v30, %v17101_v63 }
 0x80e   :  { %v2639_v19 = vpop.xlane.xlu0 %2638  ;;  %15502 = vrcp.f32 %v2651_v32 }
 0x80f   :  { %v15491_v51 = vpop.eup %15490  ;;  %15504 = vrcp.f32 %v2639_v19 }
 0x810   :  { %v15493_v36 = vpop.eup %15492  ;;  %v2849_v42 = vmul.f32 %v15491_v51, %v17108_v2 }
 0x811   :  { %v2841_v59 = vmul.f32 %v15493_v36, %v17111_v53  ;;  %v2675_v48 = vpop.xlane.xlu1 %2674 }
 0x812   :  { %v2663_v28 = vpop.xlane.xlu0 %2662  ;;  %15506 = vrcp.f32 %v2675_v48  ;;  %v3508_v4 = vcombine.low %v2833_v44, %v2849_v42  ;;  %v3509_v8 = vcombine.high %v2833_v44, %v2849_v42 }
 0x813   :  { %15508 = vrcp.f32 %v2663_v28  ;;  %v3492_v38 = vcombine.low %v2825_v6, %v2841_v59  ;;  %v15495_v34 = vpop.eup %15494  ;;  %v3493_v22 = vcombine.high %v2825_v6, %v2841_v59 }
 0x814   :  { %v15497_v23 = vpop.eup %15496  ;;  %v3516_v29 = vrot.slane %v3508_v4, %v15861_v18  ;;  %v2865_v53 = vmul.f32 %v15495_v34, %v17118_v56  ;;  %v3523_v39 = vrot.slane %v3509_v8, %v15861_v18 }
 0x815   :  { %v2699_v5 = vpop.xlane.xlu1 %2698  ;;  %v3500_v2 = vrot.slane %v3492_v38, %v15861_v18  ;;  %v2857_v24 = vmul.f32 %v15497_v23, %v17121_v57  ;;  %v3507_v58 = vrot.slane %v3493_v22, %v15861_v18 }
 0x816   :  { %v2687_v16 = vpop.xlane.xlu0 %2686  ;;  %15510 = vrcp.f32 %v2699_v5 }
 0x817   :  { %v15499_v63 = vpop.eup %15498  ;;  %15512 = vrcp.f32 %v2687_v16  ;;  %v3557_v32 = vcombine.high %v3500_v2, %v3516_v29  ;;  %v3556_v19 = vcombine.low %v3500_v2, %v3516_v29  ;;  %v3572_v28 = vcombine.low %v3507_v58, %v3523_v39 }
 0x818   :  { %v15501_v7 = vpop.eup %15500  ;;  %v2881_v20 = vmul.f32 %v15499_v63, %v17128_v15  ;;  %v3573_v4 = vcombine.high %v3507_v58, %v3523_v39 }
 0x819   :  { %v2873_v0 = vmul.f32 %v15501_v7, %v17131_v37  ;;  %v2723_v54 = vpop.xlane.xlu1 %2722  ;;  %v3571_v48 = vrot.slane %v3557_v32, %v15881_v41  ;;  %v17319_v34 = vrot.slane %v3556_v19, %v15881_v41  ;;  %v3580_v58 = vrot.slane %v3572_v28, %v15881_v41 }
 0x81a   :  { %v2711_v12 = vpop.xlane.xlu0 %2710  ;;  %15514 = vrcp.f32 %v2723_v54  ;;  %v3540_v46 = vcombine.low %v2865_v53, %v2881_v20  ;;  %v3541_v30 = vcombine.high %v2865_v53, %v2881_v20 }
 0x81b   :  { %15516 = vrcp.f32 %v2711_v12  ;;  %v3524_v56 = vcombine.low %v2857_v24, %v2873_v0  ;;  %v3525_v15 = vcombine.high %v2857_v24, %v2873_v0  ;;  %v15503_v57 = vpop.eup %15502  ;;  %v17337_v12 = vrot.slane %v3573_v4, %v15881_v41 }
 0x81c   :  { %v3548_v51 = vrot.slane %v3540_v46, %v15861_v18  ;;  %v3555_v36 = vrot.slane %v3541_v30, %v15861_v18  ;;  %v15505_v6 = vpop.eup %15504  ;;  %v2835_v16 = vmul.f32 %v15503_v57, %v17138_v17 }
 0x81d   :  { %v2744_v44 = vpop.xlane.xlu1 %2743  ;;  %v3532_v37 = vrot.slane %v3524_v56, %v15861_v18  ;;  %v3539_v42 = vrot.slane %v3525_v15, %v15861_v18 }
 0x81e   :  { %v2732_v59 = vpop.xlane.xlu0 %2731  ;;  %15518 = vrcp.f32 %v2744_v44 }
 0x81f   :  { %v15507_v38 = vpop.eup %15506  ;;  %v3589_v8 = vcombine.high %v3532_v37, %v3548_v51  ;;  %v3588_v5 = vcombine.low %v3532_v37, %v3548_v51  ;;  %v3604_v22 = vcombine.low %v3539_v42, %v3555_v36  ;;  %v3605_v29 = vcombine.high %v3539_v42, %v3555_v36 }
 0x820   :  { %v15509_v23 = vpop.eup %15508  ;;  %v2851_v2 = vmul.f32 %v15507_v38, %v17148_v47  ;;  %15520 = vrcp.f32 %v2732_v59  ;;  %v2827_v47 = vmul.f32 %v15505_v6, %v17141_v14 }
 0x821   :  { %v2843_v63 = vmul.f32 %v15509_v23, %v17151_v43  ;;  %v2768_v7 = vpop.xlane.xlu1 %2767  ;;  %v3603_v53 = vrot.slane %v3589_v8, %v15881_v41  ;;  %v17326_v20 = vrot.slane %v3588_v5, %v15881_v41  ;;  %v3612_v24 = vrot.slane %v3604_v22, %v15881_v41 }
 0x822   :  { %v2756_v39 = vpop.xlane.xlu0 %2755  ;;  %15522 = vrcp.f32 %v2768_v7  ;;  %v17330_v0 = vrot.slane %v3605_v29, %v15881_v41  ;;  %v3780_v17 = vcombine.low %v2835_v16, %v2851_v2  ;;  %v3781_v56 = vcombine.high %v2835_v16, %v2851_v2 }
 0x823   :  { %15524 = vrcp.f32 %v2756_v39  ;;  %v3623_v54 = vcombine.high %v3571_v48, %v3603_v53  ;;  %v3621_v43 = vcombine.high %v17319_v34, %v17326_v20  ;;  %v15511_v46 = vpop.eup %15510  ;;  %v3764_v30 = vcombine.low %v2827_v47, %v2843_v63 }
 0x824   :  { %v15513_v19 = vpop.eup %15512  ;;  %v3624_v15 = vcombine.low %v3580_v58, %v3612_v24  ;;  %v3622_v51 = vcombine.low %v3571_v48, %v3603_v53  ;;  %v3788_v36 = vrot.slane %v3780_v17, %v15861_v18  ;;  %v3627_v57 = vcombine.high %v17337_v12, %v17330_v0 }
 0x825   :  { %4166 = vrot.lane.b32.xlu1 %v3623_v54, %s15586_s19  ;;  %4150 = vrot.lane.b32.xlu0 %v3621_v43, %s15587_s20  ;;  %v2792_v32 = vpop.xlane.xlu1 %2791  ;;  %v3772_v37 = vrot.slane %v3764_v30, %v15861_v18  ;;  %v3765_v42 = vcombine.high %v2827_v47, %v2843_v63  ;;  %v3620_v6 = vcombine.low %v17319_v34, %v17326_v20 }
 0x826   :  { %v2780_v14 = vpop.xlane.xlu0 %2779  ;;  %15526 = vrcp.f32 %v2792_v32  ;;  %v2867_v28 = vmul.f32 %v15511_v46, %v17158_v3  ;;  %v3625_v48 = vcombine.high %v3580_v58, %v3612_v24  ;;  %v2859_v38 = vmul.f32 %v15513_v19, %v17161_v10 }
 0x827   :  { %v15515_v44 = vpop.eup %15514  ;;  %15528 = vrcp.f32 %v2780_v14  ;;  %v3626_v22 = vcombine.low %v17337_v12, %v17330_v0  ;;  %v3795_v3 = vrot.slane %v3781_v56, %v15861_v18  ;;  %v3829_v29 = vcombine.high %v3772_v37, %v3788_v36 }
 0x828   :  { %v15517_v59 = vpop.eup %15516  ;;  %v2883_v4 = vmul.f32 %v15515_v44, %v17168_v62  ;;  %v3779_v10 = vrot.slane %v3765_v42, %v15861_v18  ;;  %v3828_v63 = vcombine.low %v3772_v37, %v3788_v36 }
 0x829   :  { %v2875_v8 = vmul.f32 %v15517_v59, %v17171_v13  ;;  %4174 = vrot.lane.b32.xlu1 %v3624_v15, %s15589_s21  ;;  %4158 = vrot.lane.b32.xlu0 %v3622_v51, %s15590_s22  ;;  %v2816_v5 = vpop.xlane.xlu1 %2815  ;;  %v3843_v43 = vrot.slane %v3829_v29, %v15881_v41 }
 0x82a   :  { %v2804_v23 = vpop.xlane.xlu0 %2803  ;;  %15530 = vrcp.f32 %v2816_v5  ;;  %v3812_v16 = vcombine.low %v2867_v28, %v2883_v4  ;;  %v3813_v62 = vcombine.high %v2867_v28, %v2883_v4  ;;  %v3844_v32 = vcombine.low %v3779_v10, %v3795_v3 }
 0x82b   :  { %15532 = vrcp.f32 %v2804_v23  ;;  %v3796_v2 = vcombine.low %v2859_v38, %v2875_v8  ;;  %v3797_v7 = vcombine.high %v2859_v38, %v2875_v8  ;;  %v15519_v39 = vpop.eup %15518  ;;  %v17365_v56 = vrot.slane %v3828_v63, %v15881_v41 }
 0x82c   :  { %v3820_v13 = vrot.slane %v3812_v16, %v15861_v18  ;;  %v3827_v53 = vrot.slane %v3813_v62, %v15861_v18  ;;  %v3845_v14 = vcombine.high %v3779_v10, %v3795_v3  ;;  %v2897_v42 = vmul.f32 %v15519_v39, %v17178_v61 }
 0x82d   :  { %4182 = vrot.lane.b32.xlu1 %v3625_v48, %s15585_s18  ;;  %4190 = vrot.lane.b32.xlu0 %v3626_v22, %s15588_s0  ;;  %v3804_v24 = vrot.slane %v3796_v2, %v15861_v18  ;;  %v15521_v17 = vpop.eup %15520  ;;  %v3811_v47 = vrot.slane %v3797_v7, %v15861_v18  ;;  %v3852_v61 = vrot.slane %v3844_v32, %v15881_v41 }
 0x82e   :  { %v2889_v28 = vmul.f32 %v15521_v17, %v17181_v49 }
 0x82f   :  { %v15523_v54 = vpop.eup %15522  ;;  %v3861_v58 = vcombine.high %v3804_v24, %v3820_v13  ;;  %v3860_v46 = vcombine.low %v3804_v24, %v3820_v13  ;;  %v3876_v19 = vcombine.low %v3811_v47, %v3827_v53  ;;  %v3877_v15 = vcombine.high %v3811_v47, %v3827_v53 }
 0x830   :  { %v15525_v30 = vpop.eup %15524  ;;  %v2913_v36 = vmul.f32 %v15523_v54, %v17188_v55  ;;  %v17382_v55 = vrot.slane %v3845_v14, %v15881_v41 }
 0x831   :  { %v2905_v51 = vmul.f32 %v15525_v30, %v17191_v52  ;;  %v3875_v44 = vrot.slane %v3861_v58, %v15881_v41  ;;  %v17371_v37 = vrot.slane %v3860_v46, %v15881_v41  ;;  %v17375_v59 = vrot.slane %v3877_v15, %v15881_v41 }
 0x832   :  { %v3884_v52 = vrot.slane %v3876_v19, %v15881_v41  ;;  %v3644_v22 = vcombine.low %v2897_v42, %v2913_v36  ;;  %v3645_v7 = vcombine.high %v2897_v42, %v2913_v36 }
 0x833   :  { %v3894_v4 = vcombine.low %v3843_v43, %v3875_v44  ;;  %v3893_v48 = vcombine.high %v17365_v56, %v17371_v37  ;;  %v15527_v38 = vpop.eup %15526  ;;  %v3628_v5 = vcombine.low %v2889_v28, %v2905_v51  ;;  %v3899_v49 = vcombine.high %v17382_v55, %v17375_v59 }
 0x834   :  { %v15529_v8 = vpop.eup %15528  ;;  %v3895_v16 = vcombine.high %v3843_v43, %v3875_v44  ;;  %v3896_v3 = vcombine.low %v3852_v61, %v3884_v52  ;;  %v3629_v62 = vcombine.high %v2889_v28, %v2905_v51  ;;  %v3892_v2 = vcombine.low %v17365_v56, %v17371_v37 }
 0x835   :  { %4214 = vrot.lane.b32.xlu0 %v3894_v4, %s15590_s22  ;;  %4206 = vrot.lane.b32.xlu1 %v3893_v48, %s15587_s20  ;;  %v2921_v10 = vmul.f32 %v15529_v8, %v17201_v40  ;;  %v2929_v13 = vmul.f32 %v15527_v38, %v17198_v31  ;;  %v3636_v39 = vrot.slane %v3628_v5, %v15861_v18 }
 0x836   :  { %v3652_v24 = vrot.slane %v3644_v22, %v15861_v18  ;;  %v3897_v54 = vcombine.high %v3852_v61, %v3884_v52  ;;  %v3643_v40 = vrot.slane %v3629_v62, %v15861_v18  ;;  %v3898_v14 = vcombine.low %v17382_v55, %v17375_v59  ;;  %v2735_v61 = vpop.xlane.xlu0 %2734 }
 0x837   :  { %v15531_v23 = vpop.eup %15530 }
 0x838   :  { %v15533_v29 = vpop.eup %15532  ;;  %v2945_v63 = vmul.f32 %v15531_v23, %v17207_v11  ;;  %v3659_v11 = vrot.slane %v3645_v7, %v15861_v18  ;;  %v3693_v32 = vcombine.high %v3636_v39, %v3652_v24  ;;  %v3692_v30 = vcombine.low %v3636_v39, %v3652_v24  ;;  %v2747_v39 = vpop.xlane.xlu1 %2746 }
 0x839   :  { %v2937_v53 = vmul.f32 %v15533_v29, %v17210_v45  ;;  %4222 = vrot.lane.b32.xlu0 %v3895_v16, %s15586_s19  ;;  %4230 = vrot.lane.b32.xlu1 %v3896_v3, %s15589_s21 }
 0x83a   :  { %v3676_v17 = vcombine.low %v2929_v13, %v2945_v63  ;;  %v3677_v47 = vcombine.high %v2929_v13, %v2945_v63  ;;  %v3708_v36 = vcombine.low %v3643_v40, %v3659_v11  ;;  %v3707_v42 = vrot.slane %v3693_v32, %v15881_v41  ;;  %v2759_v29 = vpop.xlane.xlu0 %2758 }
 0x83b   :  { %v3660_v43 = vcombine.low %v2921_v10, %v2937_v53  ;;  %v3661_v58 = vcombine.high %v2921_v10, %v2937_v53  ;;  %v17412_v4 = vrot.slane %v3692_v30, %v15881_v41  ;;  %v3709_v62 = vcombine.high %v3643_v40, %v3659_v11 }
 0x83c   :  { %v3684_v31 = vrot.slane %v3676_v17, %v15861_v18  ;;  %v3691_v45 = vrot.slane %v3677_v47, %v15861_v18  ;;  %v3716_v5 = vrot.slane %v3708_v36, %v15881_v41  ;;  %v2771_v47 = vpop.xlane.xlu1 %2770 }
 0x83d   :  { %4238 = vrot.lane.b32.xlu1 %v3897_v54, %s15585_s18  ;;  %v3668_v46 = vrot.slane %v3660_v43, %v15861_v18  ;;  %v3675_v19 = vrot.slane %v3661_v58, %v15861_v18  ;;  %v3723_v63 = vrot.slane %v3709_v62, %v15881_v41  ;;  %15534 = vrcp.f32 %v2771_v47  ;;  %v20472_v58 = vld [vmem:[#allocation22_spill] sm:$0xff] }
 0x83e   :  { %v2783_v53 = vpop.xlane.xlu0 %2782  ;;  %15536 = vrcp.f32 %v2759_v29 }
 0x83f   :  { %v3725_v15 = vcombine.high %v3668_v46, %v3684_v31  ;;  %v3724_v51 = vcombine.low %v3668_v46, %v3684_v31  ;;  %v3740_v44 = vcombine.low %v3675_v19, %v3691_v45  ;;  %v3741_v3 = vcombine.high %v3675_v19, %v3691_v45  ;;  %v20473_v45 = vld [vmem:[#allocation3_spill] sm:$0xff]  ;;  %v20474_v46 = vld [vmem:[#allocation4_spill] sm:$0xff] }
 0x840   :  { %v2795_v43 = vpop.xlane.xlu1 %2794  ;;  %15538 = vrcp.f32 %v2747_v39  ;;  %v20475_v32 = vcombine.low %v20473_v45, %v20474_v46  ;;  %v20476_v19 = vld [vmem:[#allocation28_spill] sm:$0xff]  ;;  %v20486_v39 = vld [vmem:[#allocation29_spill] sm:$0xff] }
 0x841   :  { %4246 = vrot.lane.b32.xlu1 %v3898_v14, %s15588_s0  ;;  %v3739_v28 = vrot.slane %v3725_v15, %v15881_v41  ;;  %v17415_v48 = vrot.slane %v3724_v51, %v15881_v41  ;;  %v3748_v8 = vrot.slane %v3740_v44, %v15881_v41  ;;  %v3755_v13 = vrot.slane %v3741_v3, %v15881_v41  ;;  %v20477_v14 = vld [vmem:[#allocation7_spill] sm:$0xff]  ;;  %v20478_v15 = vld [vmem:[#allocation8_spill] sm:$0xff] }
 0x842   :  { %v2807_v17 = vpop.xlane.xlu0 %2806  ;;  %15540 = vrcp.f32 %v2735_v61  ;;  %v4281_v30 = vsel %vm36_vm0, %v20475_v32, %v20472_v58  ;;  %v20479_v51 = vcombine.low %v20477_v14, %v20478_v15  ;;  %v20484_v3 = vld [vmem:[#allocation27_spill] sm:$0xff]  ;;  %v20489_v14 = vld [vmem:[#allocation20_spill] sm:$0xff] }
 0x843   :  { %v3759_v52 = vcombine.high %v3707_v42, %v3739_v28  ;;  %v3757_v38 = vcombine.high %v17412_v4, %v17415_v48  ;;  %v3756_v22 = vcombine.low %v17412_v4, %v17415_v48  ;;  %v3760_v23 = vcombine.low %v3716_v5, %v3748_v8 }
 0x844   :  { %v3758_v16 = vcombine.low %v3707_v42, %v3739_v28  ;;  %v3761_v10 = vcombine.high %v3716_v5, %v3748_v8  ;;  %v3762_v7 = vcombine.low %v3723_v63, %v3755_v13  ;;  %v3763_v24 = vcombine.high %v3723_v63, %v3755_v13  ;;  %v4137_v31 = vpop.permute.xlu1 %4136  ;;  %v20480_v42 = vld [vmem:[#allocation30_spill] sm:$0xff]  ;;  %v20482_v8 = vld [vmem:[#allocation25_spill] sm:$0xff]  ;;  %v20483_v5 = vld [vmem:[#allocation24_spill] sm:$0xff] }
 0x845   :  { %4168 = vrot.lane.b32.xlu1 %v3759_v52, %s15586_s19  ;;  %4152 = vrot.lane.b32.xlu0 %v3757_v38, %s15587_s20  ;;  %15542 = vrcp.f32 %v2807_v17  ;;  %v4261_v36 = vsel %vm36_vm0, %v20479_v51, %v20476_v19  ;;  %v4283_v28 = vsel %vm4262_vm1, %v4281_v30, %v20480_v42  ;;  %v20481_v52 = vld [vmem:[#allocation23_spill] sm:$0xff]  ;;  %v20485_v13 = vld [vmem:[#allocation26_spill] sm:$0xff]  ;;  %v20487_v30 = vld [vmem:[#allocation32_spill] sm:$0xff] }
 0x846   :  { %v17432_v54 = vpop.permute.xlu0 %4118  ;;  %15544 = vrcp.f32 %v2783_v53  ;;  %v4264_v38 = vsel %vm4262_vm1, %v4261_v36, %v20481_v52  ;;  %v20488_v19 = vld [vmem:[#allocation19_spill] sm:$0xff] }
 0x847   :  { %15546 = vrcp.f32 %v2795_v43  ;;  %v4267_v61 = vsel %vm4265_vm2, %v4264_v38, %v20482_v8  ;;  %v20490_v15 = vcombine.low %v20488_v19, %v20489_v14  ;;  %v15575_v38 = vld [vmem:[%s20362_s1 + $0x20] sm:$0xff] }
 0x848   :  { %v4081_v44 = vpop.permute.xlu1 %4080  ;;  %v4270_v62 = vsel %vm4268_vm3, %v4267_v61, %v20484_v3 }
 0x849   :  { %4176 = vrot.lane.b32.xlu1 %v3760_v23, %s15589_s21  ;;  %4160 = vrot.lane.b32.xlu0 %v3758_v16, %s15590_s22  ;;  %v4285_v23 = vsel %vm4265_vm2, %v4283_v28, %v20483_v5  ;;  %v20491_v28 = vld [vmem:[#allocation34_spill] sm:$0xff] }
 0x84a   :  { %v4063_v40 = vpop.permute.xlu0 %4062  ;;  %v4287_v63 = vsel %vm4268_vm3, %v4285_v23, %v20485_v13 }
 0x84d   :  { %4184 = vrot.lane.b32.xlu0 %v3761_v10, %s15585_s18  ;;  %v15535_v10 = vpop.eup %15534 }
 0x84e   :  { %v17434_v11 = vpop.permute.xlu0 %4126  ;;  %v15537_v53 = vpop.eup %15536  ;;  %v2915_v36 = vmul.f32 %v15535_v10, %v17224_v26 }
 0x84f   :  { %v15539_v47 = vpop.eup %15538  ;;  %v2907_v51 = vmul.f32 %v15537_v53, %v17226_v33 }
 0x850   :  { %v15541_v46 = vpop.eup %15540  ;;  %v2899_v26 = vmul.f32 %v15539_v47, %v17216_v27 }
 0x851   :  { %4192 = vrot.lane.b32.xlu0 %v3762_v7, %s15588_s0  ;;  %v4273_v7 = vsel %vm4271_vm4, %v4270_v62, %v17256_v60  ;;  %v4260_v60 = vsel %vm36_vm0, %v20490_v15, %v20487_v30  ;;  %v2891_v33 = vmul.f32 %v15541_v46, %v17218_v35 }
 0x852   :  { %v4089_v29 = vpop.permute.xlu0 %4088  ;;  %v4276_v17 = vsel %vm4274_vm5, %v4273_v7, %v4081_v44  ;;  %v15543_v42 = vpop.eup %15542  ;;  %v4263_v52 = vsel %vm4262_vm1, %v4260_v60, %v20491_v28  ;;  %v3916_v13 = vcombine.low %v2899_v26, %v2915_v36  ;;  %v20493_v7 = vld [vmem:[#allocation13_spill] sm:$0xff]  ;;  %v3917_v47 = vcombine.high %v2899_v26, %v2915_v36  ;;  %v15577_v26 = vld [vmem:[%s20362_s1] sm:$0xff] }
 0x853   :  { %v4279_v58 = vsel %vm4277_vm6, %v4276_v17, %v4089_v29  ;;  %v4266_v61 = vsel %vm4265_vm2, %v4263_v52, %v17287_v25  ;;  %v15545_v23 = vpop.eup %15544  ;;  %v2939_v62 = vmul.f32 %v15543_v42, %v17240_v9  ;;  %v3900_v10 = vcombine.low %v2891_v33, %v2907_v51  ;;  %v20494_v25 = vld [vmem:[#allocation14_spill] sm:$0xff] }
 0x854   :  { %v4326_v8 = vmul.f32 %v15575_v38, %v4279_v58  ;;  %v20495_v53 = vcombine.low %v20493_v7, %v20494_v25  ;;  %v15547_v27 = vpop.eup %15546  ;;  %v3924_v19 = vrot.slane %v3916_v13, %v15861_v18 }
 0x855   :  { %4200 = vrot.lane.b32.xlu0 %v3763_v24, %s15584_s17  ;;  %v4289_v24 = vsel %vm4271_vm4, %v4287_v63, %v20486_v39  ;;  %v20492_v63 = vld [vmem:[#allocation31_spill] sm:$0xff]  ;;  %v20496_v39 = vld [vmem:[#allocation33_spill] sm:$0xff]  ;;  %v3908_v30 = vrot.slane %v3900_v10, %v15861_v18  ;;  %v2931_v15 = vmul.f32 %v15547_v27, %v17232_v1 }
 0x856   :  { %v4291_v43 = vsel %vm4274_vm5, %v4289_v24, %v4137_v31  ;;  %v15574_v31 = vld [vmem:[%s20362_s1 + $0x28] sm:$0xff]  ;;  %v4079_v3 = vpop.permute.xlu0 %4078  ;;  %v4280_v35 = vsel %vm36_vm0, %v20495_v53, %v20492_v63 }
 0x857   :  { %v4282_v24 = vsel %vm4262_vm1, %v4280_v35, %v20496_v39 }
 0x85a   :  { %v4087_v60 = vpop.permute.xlu0 %4086 }
 0x86e   :  { %v2819_v16 = vpop.xlane.xlu1 %2818 }
 0x86f   :  { %15548 = vrcp.f32 %v2819_v16  ;;  %v4269_v16 = vsel %vm4268_vm3, %v4266_v61, %v4063_v40  ;;  %v2923_v40 = vmul.f32 %v15545_v23, %v17234_v50  ;;  %v3965_v61 = vcombine.high %v3908_v30, %v3924_v19 }
 0x871   :  { %v3932_v14 = vcombine.low %v2923_v40, %v2939_v62  ;;  %v3979_v63 = vrot.slane %v3965_v61, %v15881_v41 }
 0x872   :  { %v4145_v45 = vpop.permute.xlu1 %4144 }
 0x873   :  { %v4293_v32 = vsel %vm4277_vm6, %v4291_v43, %v4145_v45  ;;  %v20497_v43 = vld [vmem:[#allocation35_spill] sm:$0xff]  ;;  %v3901_v45 = vcombine.high %v2891_v33, %v2907_v51  ;;  %v3964_v33 = vcombine.low %v3908_v30, %v3924_v19  ;;  %v17549_v30 = vld [vmem:[%s20361_s2 + $0x38] sm:$0xff] }
 0x874   :  { %v4327_v44 = vmul.f32 %v15574_v31, %v4293_v32  ;;  %v4284_v9 = vsel %vm4265_vm2, %v4282_v24, %v20497_v43  ;;  %v3933_v31 = vcombine.high %v2923_v40, %v2939_v62  ;;  %v17537_v43 = vld [vmem:[%s20361_s2 + $0x30] sm:$0xff] }
 0x875   :  { %v4286_v32 = vsel %vm4268_vm3, %v4284_v9, %v17432_v54  ;;  %v3931_v54 = vrot.slane %v3917_v47, %v15861_v18  ;;  %v3915_v38 = vrot.slane %v3901_v45, %v15861_v18  ;;  %v17525_v25 = vrot.slane %v3964_v33, %v15881_v41 }
 0x876   :  { %4367 = vmatprep.subr.mxu0 %v4327_v44  ;;  %v4071_v5 = vpop.permute.xlu1 %4070  ;;  %v4288_v50 = vsel %vm4271_vm4, %v4286_v32, %v17434_v11  ;;  %v15576_v11 = vld [vmem:[%s20362_s1 + $0x8] sm:$0xff] }
 0x877   :  { %4368 = vmatpush1.msra.mxu0 %v4326_v8  ;;  %v4272_v29 = vsel %vm4271_vm4, %v4269_v16, %v4071_v5  ;;  %v3947_v16 = vrot.slane %v3933_v31, %v15861_v18  ;;  %v3981_v13 = vcombine.high %v3915_v38, %v3931_v54  ;;  %v3980_v47 = vcombine.low %v3915_v38, %v3931_v54 }
 0x878   :  { %v4275_v58 = vsel %vm4274_vm5, %v4272_v29, %v4079_v3 }
 0x879   :  { %v4278_v51 = vsel %vm4277_vm6, %v4275_v58, %v4087_v60  ;;  %v3988_v32 = vrot.slane %v3980_v47, %v15881_v41 }
 0x87a   :  { %v4135_v17 = vpop.permute.xlu1 %4134  ;;  %v4322_v5 = vmul.f32 %v15577_v26, %v4278_v51 }
 0x87b   :  { %v4290_v44 = vsel %vm4274_vm5, %v4288_v50, %v4135_v17  ;;  %v3995_v17 = vrot.slane %v3981_v13, %v15881_v41 }
 0x87c   :  { %v15549_v46 = vpop.eup %15548 }
 0x87d   :  { %v2947_v36 = vmul.f32 %v15549_v46, %v17279_v21  ;;  %v3940_v21 = vrot.slane %v3932_v14, %v15861_v18  ;;  %v20498_v46 = vmov 0.0  }
 0x87e   :  { %v4143_v42 = vpop.permute.xlu1 %4142 }
 0x87f   :  { %v4292_v28 = vsel %vm4277_vm6, %v4290_v44, %v4143_v42  ;;  %v3948_v52 = vcombine.low %v2931_v15, %v2947_v36  ;;  %v3949_v1 = vcombine.high %v2931_v15, %v2947_v36 }
 0x880   :  { %v4323_v8 = vmul.f32 %v15576_v11, %v4292_v28 }
 0x881   :  { %v3956_v23 = vrot.slane %v3948_v52, %v15861_v18  ;;  %v3963_v3 = vrot.slane %v3949_v1, %v15861_v18 }
 0x882   :  { %4369 = vmatprep.subr.mxu0 %v4323_v8 }
 0x883   :  { %4370 = vmatpush1.msra.mxu0 %v4322_v5  ;;  %v3997_v62 = vcombine.high %v3940_v21, %v3956_v23  ;;  %v3996_v29 = vcombine.low %v3940_v21, %v3956_v23  ;;  %v4013_v10 = vcombine.high %v3947_v16, %v3963_v3  ;;  %v4012_v24 = vcombine.low %v3947_v16, %v3963_v3 }
 0x884   :  { %14441 = vmatmul.mubr.msk.f32.vlgmr.msra.gmra.mxu0 %vm36_vm0, %v17537_v43 }
 0x885   :  { %v4011_v7 = vrot.slane %v3997_v62, %v15881_v41  ;;  %v4004_v53 = vrot.slane %v3996_v29, %v15881_v41  ;;  %v4027_v39 = vrot.slane %v4013_v10, %v15881_v41  ;;  %v4020_v45 = vrot.slane %v4012_v24, %v15881_v41  ;;  %4409 = vmatprep.mubr.f32.mxu0 %v20498_v46 }
 0x887   :  { %v4031_v35 = vcombine.high %v3979_v63, %v4011_v7  ;;  %v4029_v27 = vcombine.high %v17525_v25, %v4004_v53  ;;  %v4028_v40 = vcombine.low %v17525_v25, %v4004_v53  ;;  %v4034_v9 = vcombine.low %v3995_v17, %v4027_v39 }
 0x888   :  { %v4030_v58 = vcombine.low %v3979_v63, %v4011_v7  ;;  %v4035_v19 = vcombine.high %v3995_v17, %v4027_v39  ;;  %v4032_v14 = vcombine.low %v3988_v32, %v4020_v45  ;;  %14442 = vmatmul.mubr.msk.f32.gmra.mxu0 %vm36_vm0, %v17549_v30  ;;  %v4033_v15 = vcombine.high %v3988_v32, %v4020_v45  ;;  %v15578_v32 = vld [vmem:[%s20362_s1 + $0x38] sm:$0xff] }
 0x889   :  { %4224 = vrot.lane.b32.xlu0 %v4031_v35, %s15586_s19  ;;  %4208 = vrot.lane.b32.xlu1 %v4029_v27, %s15587_s20 }
 0x88a   :  { %4662 = vmatprep.mubr.f32.mxu0 %v20498_v46 }
 0x88d   :  { %4248 = vrot.lane.b32.xlu0 %v4034_v9, %s15588_s0  ;;  %4216 = vrot.lane.b32.xlu1 %v4030_v58, %s15590_s22 }
 0x891   :  { %4256 = vrot.lane.b32.xlu0 %v4035_v19, %s15584_s17  ;;  %4232 = vrot.lane.b32.xlu1 %v4032_v14, %s15589_s21  ;;  %v15579_v14 = vld [vmem:[%s20362_s1 + $0x30] sm:$0xff] }
 0x895   :  { %4198 = vrot.lane.b32.xlu0 %v3627_v57, %s15584_s17  ;;  %4240 = vrot.lane.b32.xlu1 %v4033_v15, %s15585_s18 }
 0x897   :  { %v4151_v50 = vpop.permute.xlu0 %4150  ;;  %v4167_v60 = vpop.permute.xlu1 %4166 }
 0x898   :  { %v4294_v61 = vsel %vm36_vm0, %v3620_v6, %v4151_v50 }
 0x899   :  { %4254 = vrot.lane.b32.xlu1 %v3899_v49, %s15584_s17 }
 0x89b   :  { %v4159_v36 = vpop.permute.xlu0 %4158  ;;  %v4175_v31 = vpop.permute.xlu1 %4174 }
 0x89c   :  { %v4296_v26 = vsel %vm4262_vm1, %v4294_v61, %v4159_v36 }
 0x89d   :  { %v4298_v3 = vsel %vm4265_vm2, %v4296_v26, %v4167_v60  ;;  %v15580_v60 = vld [vmem:[%s20362_s1 + $0x18] sm:$0xff] }
 0x89f   :  { %v4191_v51 = vpop.permute.xlu0 %4190  ;;  %v4183_v44 = vpop.permute.xlu1 %4182 }
 0x8a7   :  { %v4215_v42 = vpop.permute.xlu0 %4214  ;;  %v4207_v54 = vpop.permute.xlu1 %4206 }
 0x8a8   :  { %v4308_v34 = vsel %vm36_vm0, %v3892_v2, %v4207_v54 }
 0x8a9   :  { %v4310_v10 = vsel %vm4262_vm1, %v4308_v34, %v4215_v42 }
 0x8ab   :  { %v4223_v28 = vpop.permute.xlu0 %4222  ;;  %v4231_v52 = vpop.permute.xlu1 %4230 }
 0x8ac   :  { %v4312_v13 = vsel %vm4265_vm2, %v4310_v10, %v4223_v28 }
 0x8ad   :  { %v4314_v27 = vsel %vm4268_vm3, %v4312_v13, %v4231_v52 }
 0x8af   :  { %v4239_v0 = vpop.permute.xlu1 %4238 }
 0x8b3   :  { %v4247_v57 = vpop.permute.xlu1 %4246 }
 0x8b7   :  { %v4153_v38 = vpop.permute.xlu0 %4152  ;;  %v4169_v11 = vpop.permute.xlu1 %4168 }
 0x8b8   :  { %v4295_v33 = vsel %vm36_vm0, %v3756_v22, %v4153_v38  ;;  %v4300_v22 = vsel %vm4268_vm3, %v4298_v3, %v4175_v31  ;;  %v15581_v31 = vld [vmem:[%s20362_s1 + $0x10] sm:$0xff] }
 0x8b9   :  { %v4302_v56 = vsel %vm4271_vm4, %v4300_v22, %v4183_v44 }
 0x8ba   :  { %v4304_v17 = vsel %vm4274_vm5, %v4302_v56, %v4191_v51 }
 0x8bb   :  { %v4161_v12 = vpop.permute.xlu0 %4160  ;;  %v4177_v21 = vpop.permute.xlu1 %4176 }
 0x8bc   :  { %v4297_v5 = vsel %vm4262_vm1, %v4295_v33, %v4161_v12 }
 0x8bd   :  { %v4299_v62 = vsel %vm4265_vm2, %v4297_v5, %v4169_v11 }
 0x8be   :  { %v4301_v29 = vsel %vm4268_vm3, %v4299_v62, %v4177_v21 }
 0x8bf   :  { %v4185_v1 = vpop.permute.xlu0 %4184 }
 0x8c0   :  { %v4303_v37 = vsel %vm4271_vm4, %v4301_v29, %v4185_v1 }
 0x8c3   :  { %v4193_v8 = vpop.permute.xlu0 %4192 }
 0x8c4   :  { %v4305_v25 = vsel %vm4274_vm5, %v4303_v37, %v4193_v8 }
 0x8c7   :  { %v4201_v59 = vpop.permute.xlu0 %4200 }
 0x8c8   :  { %v4307_v39 = vsel %vm4277_vm6, %v4305_v25, %v4201_v59 }
 0x8c9   :  { %v4328_v15 = vmul.f32 %v15579_v14, %v4307_v39 }
 0x8fb   :  { %v4225_v55 = vpop.permute.xlu0 %4224  ;;  %v4209_v49 = vpop.permute.xlu1 %4208 }
 0x8fc   :  { %v4309_v20 = vsel %vm36_vm0, %v4028_v40, %v4209_v49  ;;  %v4316_v40 = vsel %vm4271_vm4, %v4314_v27, %v4239_v0 }
 0x8fd   :  { %v4318_v9 = vsel %vm4274_vm5, %v4316_v40, %v4247_v57  ;;  %v14445_v40 = vld [vmem:[%s20364_s3 + $0x60] sm:$0xff] }
 0x8ff   :  { %v4249_v23 = vpop.permute.xlu0 %4248  ;;  %v4217_v16 = vpop.permute.xlu1 %4216 }
 0x900   :  { %v4311_v6 = vsel %vm4262_vm1, %v4309_v20, %v4217_v16 }
 0x901   :  { %v4313_v63 = vsel %vm4265_vm2, %v4311_v6, %v4225_v55 }
 0x903   :  { %v4257_v4 = vpop.permute.xlu0 %4256  ;;  %v4233_v48 = vpop.permute.xlu1 %4232 }
 0x904   :  { %v4315_v2 = vsel %vm4268_vm3, %v4313_v63, %v4233_v48 }
 0x907   :  { %v4241_v7 = vpop.permute.xlu1 %4240  ;;  %v4199_v53 = vpop.permute.xlu0 %4198 }
 0x908   :  { %v4317_v35 = vsel %vm4271_vm4, %v4315_v2, %v4241_v7  ;;  %v4306_v58 = vsel %vm4277_vm6, %v4304_v17, %v4199_v53 }
 0x909   :  { %v4319_v24 = vsel %vm4274_vm5, %v4317_v35, %v4249_v23  ;;  %v4324_v51 = vmul.f32 %v15581_v31, %v4306_v58 }
 0x90a   :  { %v4321_v47 = vsel %vm4277_vm6, %v4319_v24, %v4257_v4 }
 0x90b   :  { %v4255_v45 = vpop.permute.xlu1 %4254  ;;  %v4329_v19 = vmul.f32 %v15578_v32, %v4321_v47 }
 0x90c   :  { %v4320_v50 = vsel %vm4277_vm6, %v4318_v9, %v4255_v45  ;;  %v14446_v9 = vld [vmem:[%s20364_s3 + $0x68] sm:$0xff]  ;;  %v14448_v45 = vld [vmem:[%s20364_s3 + $0x78] sm:$0xff] }
 0x90d   :  { %v4325_v36 = vmul.f32 %v15580_v60, %v4320_v50  ;;  %4444 = vmatprep.subr.mxu1 %v4329_v19  ;;  %v14447_v19 = vld [vmem:[%s20364_s3 + $0x70] sm:$0xff] }
 0x90e   :  { %4445 = vmatpush1.msra.mxu1 %v4328_v15 }
 0x90f   :  { %4446 = vmatprep.subr.mxu1 %v4325_v36 }
 0x910   :  { %4447 = vmatpush1.msra.mxu1 %v4324_v51 }
 0x911   :  { %14443 = vmatmul.mubr.msk.f32.vlgmr.msra.gmra.mxu1 %vm36_vm0, %v17537_v43 }
 0x912   :  { %4486 = vmatprep.mubr.f32.mxu1 %v20498_v46 }
 0x915   :  { %14444 = vmatmul.mubr.msk.f32.gmra.mxu1 %vm36_vm0, %v17549_v30 }
 0x916   :  { %4739 = vmatprep.mubr.f32.mxu1 %v20498_v46 }
 0x944   :  { %v4405_v44 = vpop.f32.mrf.mxu0 }
 0x946   :  { %v4407_v42 = vpop.f32.mrf.mxu0 }
 0x947   :  { %v4493_v28 = vadd.f32 %v4407_v42, %v4405_v44 }
 0x948   :  { %v4411_v54 = vpop.f32.mrf.mxu0 }
 0x94a   :  { %v4413_v52 = vpop.f32.mrf.mxu0 }
 0x94b   :  { %v4498_v57 = vadd.f32 %v4413_v52, %v4411_v54 }
 0x9d1   :  { %v4482_v38 = vpop.f32.mrf.mxu1 }
 0x9d2   :  { %v4494_v0 = vadd.f32 %v4493_v28, %v4482_v38 }
 0x9d3   :  { %v4484_v12 = vpop.f32.mrf.mxu1 }
 0x9d4   :  { %v4495_v1 = vadd.f32 %v4494_v0, %v4484_v12 }
 0x9d5   :  { %v4488_v11 = vpop.f32.mrf.mxu1 }
 0x9d6   :  { %v4499_v8 = vadd.f32 %v4498_v57, %v4488_v11  ;;  %4496 = vadd.xlane.f32.xlu0 %v4495_v1 }
 0x9d7   :  { %v4490_v43 = vpop.f32.mrf.mxu1 }
 0x9d8   :  { %v4500_v21 = vadd.f32 %v4499_v8, %v4490_v43 }
 0x9da   :  { %4501 = vadd.xlane.f32.xlu1 %v4500_v21 }
 0xa5f   :  { %v4497_v59 = vpop.xlane.xlu0 %4496 }
 0xa60   :  { %v4503_v30 = vmul.f32 0.001953125, %v4497_v59 }
 0xa62   :  { %v4505_v55 = vsub.f32 %v4405_v44, %v4503_v30  ;;  %v4506_v49 = vsub.f32 %v4407_v42, %v4503_v30  ;;  %v4507_v61 = vsub.f32 %v4482_v38, %v4503_v30  ;;  %v4508_v26 = vsub.f32 %v4484_v12, %v4503_v30 }
 0xa63   :  { %v4502_v33 = vpop.xlane.xlu1 %4501 }
 0xa64   :  { %v4504_v5 = vmul.f32 0.001953125, %v4502_v33  ;;  %v4513_v23 = vmul.f32 %v4505_v55, %v4505_v55  ;;  %v4514_v16 = vmul.f32 %v4506_v49, %v4506_v49  ;;  %v4515_v3 = vmul.f32 %v4507_v61, %v4507_v61 }
 0xa65   :  { %v4516_v4 = vmul.f32 %v4508_v26, %v4508_v26 }
 0xa66   :  { %v4509_v62 = vsub.f32 %v4411_v54, %v4504_v5  ;;  %v4510_v34 = vsub.f32 %v4413_v52, %v4504_v5  ;;  %v4511_v20 = vsub.f32 %v4488_v11, %v4504_v5  ;;  %v4521_v6 = vadd.f32 %v4514_v16, %v4513_v23 }
 0xa67   :  { %v4512_v22 = vsub.f32 %v4490_v43, %v4504_v5 }
 0xa68   :  { %v4522_v48 = vadd.f32 %v4521_v6, %v4515_v3  ;;  %v4517_v29 = vmul.f32 %v4509_v62, %v4509_v62  ;;  %v4518_v10 = vmul.f32 %v4510_v34, %v4510_v34  ;;  %v4519_v63 = vmul.f32 %v4511_v20, %v4511_v20 }
 0xa69   :  { %v4520_v37 = vmul.f32 %v4512_v22, %v4512_v22 }
 0xa6a   :  { %v4523_v13 = vadd.f32 %v4522_v48, %v4516_v4  ;;  %v4526_v56 = vadd.f32 %v4518_v10, %v4517_v29 }
 0xa6c   :  { %4524 = vadd.xlane.f32.xlu1 %v4523_v13  ;;  %v4527_v2 = vadd.f32 %v4526_v56, %v4519_v63 }
 0xa6e   :  { %v4528_v7 = vadd.f32 %v4527_v2, %v4520_v37 }
 0xa70   :  { %4529 = vadd.xlane.f32.xlu0 %v4528_v7 }
 0xaf5   :  { %v4525_v25 = vpop.xlane.xlu1 %4524 }
 0xaf6   :  { %v4531_v53 = vmul.f32 0.001953125, %v4525_v25 }
 0xaf8   :  { %v4536_v35 = vadd.f32 1e-05, %v4531_v53 }
 0xaf9   :  { %v4530_v27 = vpop.xlane.xlu0 %4529 }
 0xafa   :  { %15550 = vrsqrt.f32 %v4536_v35  ;;  %v4532_v39 = vmul.f32 0.001953125, %v4530_v27 }
 0xafc   :  { %v4537_v24 = vadd.f32 1e-05, %v4532_v39 }
 0xafe   :  { %15552 = vrsqrt.f32 %v4537_v24 }
 0xb07   :  { %v15551_v17 = vpop.eup %15550 }
 0xb08   :  { %v4540_v47 = vmul.f32 %v15551_v17, %v14445_v40 }
 0xb0a   :  { %4544 = vperm.xlu1 %15145, %v4540_v47  }
 0xb0b   :  { %v15553_v58 = vpop.eup %15552 }
 0xb0c   :  { %v4541_v32 = vmul.f32 %v15553_v58, %v14446_v9 }
 0xb0e   :  { %4549 = vperm.xlu0 %15144, %v4541_v32   ;;  %4570 = vperm.xlu1 %15145, %v14448_v45  }
 0xb12   :  { %4565 = vperm.xlu0 %15144, %v14447_v19  }
 0xb85   :  { %v4545_v14 = vpop.permute.xlu1 %4544 }
 0xb86   :  { %v4552_v52 = vmul.f32 %v4545_v14, %v4505_v55  ;;  %v4554_v38 = vmul.f32 %v4545_v14, %v4507_v61  ;;  %v4553_v12 = vmul.f32 %v4545_v14, %v4506_v49  ;;  %v4555_v57 = vmul.f32 %v4545_v14, %v4508_v26  ;;  %v14449_v49 = vld [vmem:[%s20361_s2 + $0x40] sm:$0xff]  ;;  %v14450_v61 = vld [vmem:[%s20361_s2 + $0x48] sm:$0xff] }
 0xb89   :  { %v4550_v15 = vpop.permute.xlu0 %4549  ;;  %v4571_v51 = vpop.permute.xlu1 %4570 }
 0xb8a   :  { %v4556_v50 = vmul.f32 %v4550_v15, %v4509_v62  ;;  %v4558_v60 = vmul.f32 %v4550_v15, %v4511_v20  ;;  %v4557_v36 = vmul.f32 %v4550_v15, %v4510_v34  ;;  %v4559_v31 = vmul.f32 %v4550_v15, %v4512_v22 }
 0xb8c   :  { %v4578_v44 = vadd.f32 %v4571_v51, %v4557_v36  ;;  %v4580_v42 = vadd.f32 %v4571_v51, %v4559_v31  ;;  %v4577_v54 = vadd.f32 %v4571_v51, %v4556_v50  ;;  %v4579_v28 = vadd.f32 %v4571_v51, %v4558_v60 }
 0xb8d   :  { %v4566_v0 = vpop.permute.xlu0 %4565 }
 0xb8e   :  { %v4586_v1 = vmax.f32 %v4578_v44, 0.0  ;;  %v4588_v11 = vmax.f32 %v4580_v42, 0.0  ;;  %v4585_v8 = vmax.f32 %v4577_v54, 0.0  ;;  %v4587_v43 = vmax.f32 %v4579_v28, 0.0 }
 0xb8f   :  { %v4574_v21 = vadd.f32 %v4566_v0, %v4553_v12  ;;  %v4576_v59 = vadd.f32 %v4566_v0, %v4555_v57  ;;  %v4573_v30 = vadd.f32 %v4566_v0, %v4552_v52  ;;  %v4575_v33 = vadd.f32 %v4566_v0, %v4554_v38  ;;  %v14455_v57 = vld [vmem:[%s20364_s3 + $0x80] sm:$0xff] }
 0xb90   :  { %4626 = vmatprep.subr.mxu0 %v4586_v1  ;;  %4703 = vmatprep.subr.mxu1 %v4588_v11 }
 0xb91   :  { %4627 = vmatpush1.msra.mxu0 %v4585_v8  ;;  %4704 = vmatpush1.msra.mxu1 %v4587_v43  ;;  %v4582_v5 = vmax.f32 %v4574_v21, 0.0  ;;  %v4584_v23 = vmax.f32 %v4576_v59, 0.0  ;;  %v4581_v16 = vmax.f32 %v4573_v30, 0.0  ;;  %v4583_v55 = vmax.f32 %v4575_v33, 0.0  ;;  %v14456_v8 = vld [vmem:[%s20364_s3 + $0x88] sm:$0xff]  ;;  %v14458_v21 = vld [vmem:[%s20364_s3 + $0x98] sm:$0xff] }
 0xb92   :  { %v14457_v30 = vld [vmem:[%s20364_s3 + $0x90] sm:$0xff] }
 0xb93   :  { %4628 = vmatprep.subr.mxu0 %v4582_v5  ;;  %4705 = vmatprep.subr.mxu1 %v4584_v23 }
 0xb94   :  { %4629 = vmatpush1.msra.mxu0 %v4581_v16  ;;  %4706 = vmatpush1.msra.mxu1 %v4583_v55 }
 0xb95   :  { %14451 = vmatmul.mubr.msk.f32.vlgmr.msra.gmra.mxu0 %vm36_vm0, %v14449_v49  ;;  %14453 = vmatmul.mubr.msk.f32.vlgmr.msra.gmra.mxu1 %vm36_vm0, %v14449_v49 }
 0xb96   :  { %4668 = vmatprep.mubr.f32.mxu0 %v20498_v46  ;;  %4745 = vmatprep.mubr.f32.mxu1 %v20498_v46 }
 0xb99   :  { %14452 = vmatmul.mubr.msk.f32.gmra.mxu0 %vm36_vm0, %v14450_v61  ;;  %14454 = vmatmul.mubr.msk.f32.gmra.mxu1 %vm36_vm0, %v14450_v61 }
 0xb9a   :  { %4921 = vmatprep.mubr.f32.mxu0 %v20498_v46  ;;  %4998 = vmatprep.mubr.f32.mxu1 %v20498_v46 }
 0xc55   :  { %v4664_v26 = vpop.f32.mrf.mxu0  ;;  %v4741_v3 = vpop.f32.mrf.mxu1 }
 0xc57   :  { %v4666_v62 = vpop.f32.mrf.mxu0  ;;  %v4743_v34 = vpop.f32.mrf.mxu1 }
 0xc58   :  { %v4752_v20 = vadd.f32 %v4666_v62, %v4664_v26 }
 0xc59   :  { %v4670_v6 = vpop.f32.mrf.mxu0  ;;  %v4747_v22 = vpop.f32.mrf.mxu1 }
 0xc5a   :  { %v4753_v4 = vadd.f32 %v4752_v20, %v4741_v3 }
 0xc5b   :  { %v4672_v48 = vpop.f32.mrf.mxu0  ;;  %v4749_v63 = vpop.f32.mrf.mxu1 }
 0xc5c   :  { %v4754_v29 = vadd.f32 %v4753_v4, %v4743_v34  ;;  %v4757_v10 = vadd.f32 %v4672_v48, %v4670_v6 }
 0xc5e   :  { %v4758_v13 = vadd.f32 %v4757_v10, %v4747_v22  ;;  %4755 = vadd.xlane.f32.xlu0 %v4754_v29 }
 0xc60   :  { %v4759_v56 = vadd.f32 %v4758_v13, %v4749_v63 }
 0xc62   :  { %4760 = vadd.xlane.f32.xlu1 %v4759_v56 }
 0xce7   :  { %v4756_v37 = vpop.xlane.xlu0 %4755 }
 0xce8   :  { %v4762_v2 = vmul.f32 0.001953125, %v4756_v37 }
 0xcea   :  { %v4764_v7 = vsub.f32 %v4664_v26, %v4762_v2  ;;  %v4765_v25 = vsub.f32 %v4666_v62, %v4762_v2  ;;  %v4766_v53 = vsub.f32 %v4741_v3, %v4762_v2  ;;  %v4767_v27 = vsub.f32 %v4743_v34, %v4762_v2 }
 0xceb   :  { %v4761_v35 = vpop.xlane.xlu1 %4760 }
 0xcec   :  { %v4763_v39 = vmul.f32 0.001953125, %v4761_v35  ;;  %v4772_v24 = vmul.f32 %v4764_v7, %v4764_v7  ;;  %v4773_v40 = vmul.f32 %v4765_v25, %v4765_v25  ;;  %v4774_v17 = vmul.f32 %v4766_v53, %v4766_v53 }
 0xced   :  { %v4775_v32 = vmul.f32 %v4767_v27, %v4767_v27 }
 0xcee   :  { %v4768_v47 = vsub.f32 %v4670_v6, %v4763_v39  ;;  %v4769_v9 = vsub.f32 %v4672_v48, %v4763_v39  ;;  %v4770_v58 = vsub.f32 %v4747_v22, %v4763_v39  ;;  %v4780_v45 = vadd.f32 %v4773_v40, %v4772_v24 }
 0xcef   :  { %v4771_v14 = vsub.f32 %v4749_v63, %v4763_v39 }
 0xcf0   :  { %v4781_v19 = vadd.f32 %v4780_v45, %v4774_v17  ;;  %v4776_v15 = vmul.f32 %v4768_v47, %v4768_v47  ;;  %v4777_v50 = vmul.f32 %v4769_v9, %v4769_v9  ;;  %v4778_v36 = vmul.f32 %v4770_v58, %v4770_v58 }
 0xcf1   :  { %v4779_v51 = vmul.f32 %v4771_v14, %v4771_v14 }
 0xcf2   :  { %v4782_v60 = vadd.f32 %v4781_v19, %v4775_v32  ;;  %v4785_v31 = vadd.f32 %v4777_v50, %v4776_v15 }
 0xcf4   :  { %4783 = vadd.xlane.f32.xlu1 %v4782_v60  ;;  %v4786_v44 = vadd.f32 %v4785_v31, %v4778_v36 }
 0xcf6   :  { %v4787_v42 = vadd.f32 %v4786_v44, %v4779_v51 }
 0xcf8   :  { %4788 = vadd.xlane.f32.xlu0 %v4787_v42 }
 0xd7d   :  { %v4784_v54 = vpop.xlane.xlu1 %4783 }
 0xd7e   :  { %v4790_v28 = vmul.f32 0.001953125, %v4784_v54 }
 0xd80   :  { %v4795_v52 = vadd.f32 1e-05, %v4790_v28 }
 0xd81   :  { %v4789_v38 = vpop.xlane.xlu0 %4788 }
 0xd82   :  { %15554 = vrsqrt.f32 %v4795_v52  ;;  %v4791_v0 = vmul.f32 0.001953125, %v4789_v38 }
 0xd84   :  { %v4796_v12 = vadd.f32 1e-05, %v4791_v0 }
 0xd86   :  { %15556 = vrsqrt.f32 %v4796_v12 }
 0xd8f   :  { %v15555_v1 = vpop.eup %15554 }
 0xd90   :  { %v4799_v11 = vmul.f32 %v15555_v1, %v14455_v57 }
 0xd92   :  { %4803 = vperm.xlu1 %15145, %v4799_v11  }
 0xd93   :  { %v15557_v43 = vpop.eup %15556 }
 0xd94   :  { %v4800_v59 = vmul.f32 %v15557_v43, %v14456_v8 }
 0xd96   :  { %4808 = vperm.xlu0 %15144, %v4800_v59   ;;  %4829 = vperm.xlu1 %15145, %v14458_v21  }
 0xd9a   :  { %4824 = vperm.xlu0 %15144, %v14457_v30  }
 0xe0d   :  { %v4804_v33 = vpop.permute.xlu1 %4803 }
 0xe0e   :  { %v4811_v20 = vmul.f32 %v4804_v33, %v4764_v7  ;;  %v4813_v6 = vmul.f32 %v4804_v33, %v4766_v53  ;;  %v4812_v48 = vmul.f32 %v4804_v33, %v4765_v25  ;;  %v4814_v22 = vmul.f32 %v4804_v33, %v4767_v27  ;;  %v14459_v25 = vld [vmem:[%s20361_s2 + $0x50] sm:$0xff]  ;;  %v14460_v53 = vld [vmem:[%s20361_s2 + $0x58] sm:$0xff] }
 0xe11   :  { %v4809_v5 = vpop.permute.xlu0 %4808  ;;  %v4830_v61 = vpop.permute.xlu1 %4829 }
 0xe12   :  { %v4815_v23 = vmul.f32 %v4809_v5, %v4768_v47  ;;  %v4817_v16 = vmul.f32 %v4809_v5, %v4770_v58  ;;  %v4816_v55 = vmul.f32 %v4809_v5, %v4769_v9  ;;  %v4818_v49 = vmul.f32 %v4809_v5, %v4771_v14 }
 0xe14   :  { %v4837_v26 = vadd.f32 %v4830_v61, %v4816_v55  ;;  %v4839_v3 = vadd.f32 %v4830_v61, %v4818_v49  ;;  %v4836_v62 = vadd.f32 %v4830_v61, %v4815_v23  ;;  %v4838_v34 = vadd.f32 %v4830_v61, %v4817_v16 }
 0xe15   :  { %v4825_v4 = vpop.permute.xlu0 %4824 }
 0xe16   :  { %v4845_v29 = vmax.f32 %v4837_v26, 0.0  ;;  %v4847_v10 = vmax.f32 %v4839_v3, 0.0  ;;  %v4844_v13 = vmax.f32 %v4836_v62, 0.0  ;;  %v4846_v63 = vmax.f32 %v4838_v34, 0.0 }
 0xe17   :  { %v4833_v56 = vadd.f32 %v4825_v4, %v4812_v48  ;;  %v4835_v37 = vadd.f32 %v4825_v4, %v4814_v22  ;;  %v4832_v2 = vadd.f32 %v4825_v4, %v4811_v20  ;;  %v4834_v35 = vadd.f32 %v4825_v4, %v4813_v6  ;;  %v14465_v22 = vld [vmem:[%s20364_s3 + $0xa0] sm:$0xff] }
 0xe18   :  { %4885 = vmatprep.subr.mxu0 %v4845_v29  ;;  %4962 = vmatprep.subr.mxu1 %v4847_v10 }
 0xe19   :  { %4886 = vmatpush1.msra.mxu0 %v4844_v13  ;;  %4963 = vmatpush1.msra.mxu1 %v4846_v63  ;;  %v4841_v39 = vmax.f32 %v4833_v56, 0.0  ;;  %v4843_v24 = vmax.f32 %v4835_v37, 0.0  ;;  %v4840_v40 = vmax.f32 %v4832_v2, 0.0  ;;  %v4842_v7 = vmax.f32 %v4834_v35, 0.0  ;;  %v14466_v13 = vld [vmem:[%s20364_s3 + $0xa8] sm:$0xff]  ;;  %v14468_v56 = vld [vmem:[%s20364_s3 + $0xb8] sm:$0xff] }
 0xe1a   :  { %v14467_v2 = vld [vmem:[%s20364_s3 + $0xb0] sm:$0xff]  ;;  %v20499_v35 = vld [vmem:[#allocation5_spill] sm:$0xff] }
 0xe1b   :  { %4887 = vmatprep.subr.mxu0 %v4841_v39  ;;  %4964 = vmatprep.subr.mxu1 %v4843_v24  ;;  %v20500_v39 = vld [vmem:[#allocation6_spill] sm:$0xff] }
 0xe1c   :  { %4888 = vmatpush1.msra.mxu0 %v4840_v40  ;;  %4965 = vmatpush1.msra.mxu1 %v4842_v7  ;;  %v714_v24 = vadd.f32 %v20500_v39, %v20499_v35  ;;  %v20501_v40 = vld [vmem:[#allocation9_spill] sm:$0xff]  ;;  %v20502_v7 = vld [vmem:[#allocation10_spill] sm:$0xff] }
 0xe1d   :  { %14461 = vmatmul.mubr.msk.f32.vlgmr.msra.gmra.mxu0 %vm36_vm0, %v14459_v25  ;;  %14463 = vmatmul.mubr.msk.f32.vlgmr.msra.gmra.mxu1 %vm36_vm0, %v14459_v25  ;;  %v719_v25 = vadd.f32 %v20502_v7, %v20501_v40 }
 0xe1e   :  { %4927 = vmatprep.mubr.f32.mxu0 %v20498_v46  ;;  %5004 = vmatprep.mubr.f32.mxu1 %v20498_v46 }
 0xe21   :  { %14462 = vmatmul.mubr.msk.f32.gmra.mxu0 %vm36_vm0, %v14460_v53  ;;  %14464 = vmatmul.mubr.msk.f32.gmra.mxu1 %vm36_vm0, %v14460_v53  ;;  %v20503_v53 = vld [vmem:[#allocation11_spill] sm:$0xff] }
 0xe22   :  { %5180 = vmatprep.mubr.f32.mxu0 %v20498_v46  ;;  %5257 = vmatprep.mubr.f32.mxu1 %v20498_v46 }
 0xedd   :  { %v4923_v27 = vpop.f32.mrf.mxu0  ;;  %v5000_v17 = vpop.f32.mrf.mxu1 }
 0xedf   :  { %v4925_v47 = vpop.f32.mrf.mxu0  ;;  %v5002_v9 = vpop.f32.mrf.mxu1 }
 0xee0   :  { %v5011_v58 = vadd.f32 %v4925_v47, %v4923_v27 }
 0xee1   :  { %v4929_v45 = vpop.f32.mrf.mxu0  ;;  %v5006_v14 = vpop.f32.mrf.mxu1 }
 0xee2   :  { %v5012_v32 = vadd.f32 %v5011_v58, %v5000_v17 }
 0xee3   :  { %v4931_v19 = vpop.f32.mrf.mxu0  ;;  %v5008_v36 = vpop.f32.mrf.mxu1 }
 0xee4   :  { %v5013_v15 = vadd.f32 %v5012_v32, %v5002_v9  ;;  %v5016_v50 = vadd.f32 %v4931_v19, %v4929_v45 }
 0xee6   :  { %v5017_v60 = vadd.f32 %v5016_v50, %v5006_v14  ;;  %5014 = vadd.xlane.f32.xlu0 %v5013_v15 }
 0xee8   :  { %v5018_v31 = vadd.f32 %v5017_v60, %v5008_v36 }
 0xeea   :  { %5019 = vadd.xlane.f32.xlu1 %v5018_v31 }
 0xf6f   :  { %v5015_v51 = vpop.xlane.xlu0 %5014 }
 0xf70   :  { %v5021_v44 = vmul.f32 0.001953125, %v5015_v51 }
 0xf72   :  { %v17672_v42 = vsub.f32 %v4923_v27, %v5021_v44  ;;  %v17674_v54 = vsub.f32 %v4925_v47, %v5021_v44  ;;  %v17676_v28 = vsub.f32 %v5000_v17, %v5021_v44  ;;  %v17678_v38 = vsub.f32 %v5002_v9, %v5021_v44  ;;  %v20504_v17 = vld [vmem:[#allocation15_spill] sm:$0xff]  ;;  %v20505_v9 = vld [vmem:[#allocation12_spill] sm:$0xff] }
 0xf73   :  { %v5020_v52 = vpop.xlane.xlu1 %5019  ;;  %v715_v27 = vadd.f32 %v714_v24, %v20503_v53  ;;  %v720_v47 = vadd.f32 %v719_v25, %v20504_v17 }
 0xf74   :  { %v5022_v0 = vmul.f32 0.001953125, %v5020_v52  ;;  %v5031_v12 = vmul.f32 %v17672_v42, %v17672_v42  ;;  %v5032_v57 = vmul.f32 %v17674_v54, %v17674_v54  ;;  %v5033_v1 = vmul.f32 %v17676_v28, %v17676_v28 }
 0xf75   :  { %v5034_v59 = vmul.f32 %v17678_v38, %v17678_v38  ;;  %v716_v58 = vadd.f32 %v715_v27, %v20505_v9 }
 0xf76   :  { %v5027_v11 = vsub.f32 %v4929_v45, %v5022_v0  ;;  %v5028_v8 = vsub.f32 %v4931_v19, %v5022_v0  ;;  %v5029_v43 = vsub.f32 %v5006_v14, %v5022_v0  ;;  %v5039_v21 = vadd.f32 %v5032_v57, %v5031_v12  ;;  %v20506_v45 = vld [vmem:[#allocation18_spill] sm:$0xff] }
 0xf77   :  { %v5030_v33 = vsub.f32 %v5008_v36, %v5022_v0  ;;  %v721_v32 = vadd.f32 %v720_v47, %v20506_v45 }
 0xf78   :  { %v5040_v30 = vadd.f32 %v5039_v21, %v5033_v1  ;;  %v5035_v5 = vmul.f32 %v5027_v11, %v5027_v11  ;;  %v5036_v23 = vmul.f32 %v5028_v8, %v5028_v8  ;;  %v5037_v55 = vmul.f32 %v5029_v43, %v5029_v43 }
 0xf79   :  { %v5038_v61 = vmul.f32 %v5030_v33, %v5030_v33 }
 0xf7a   :  { %v5041_v16 = vadd.f32 %v5040_v30, %v5034_v59  ;;  %v5044_v49 = vadd.f32 %v5036_v23, %v5035_v5 }
 0xf7c   :  { %5042 = vadd.xlane.f32.xlu1 %v5041_v16  ;;  %v5045_v26 = vadd.f32 %v5044_v49, %v5037_v55 }
 0xf7e   :  { %v5046_v3 = vadd.f32 %v5045_v26, %v5038_v61 }
 0xf80   :  { %5047 = vadd.xlane.f32.xlu0 %v5046_v3 }
0x1005   :  { %v5043_v62 = vpop.xlane.xlu1 %5042 }
0x1006   :  { %v5049_v34 = vmul.f32 0.001953125, %v5043_v62 }
0x1008   :  { %v5054_v20 = vadd.f32 1e-05, %v5049_v34 }
0x1009   :  { %v5048_v6 = vpop.xlane.xlu0 %5047 }
0x100a   :  { %15558 = vrsqrt.f32 %v5054_v20  ;;  %v5050_v4 = vmul.f32 0.001953125, %v5048_v6 }
0x100c   :  { %v5055_v48 = vadd.f32 1e-05, %v5050_v4 }
0x100e   :  { %15560 = vrsqrt.f32 %v5055_v48 }
0x1017   :  { %v15559_v29 = vpop.eup %15558 }
0x1018   :  { %v5058_v10 = vmul.f32 %v15559_v29, %v14465_v22 }
0x101a   :  { %5062 = vperm.xlu1 %15145, %v5058_v10  }
0x101b   :  { %v15561_v63 = vpop.eup %15560 }
0x101c   :  { %v5059_v37 = vmul.f32 %v15561_v63, %v14466_v13 }
0x101e   :  { %5067 = vperm.xlu0 %15144, %v5059_v37   ;;  %5088 = vperm.xlu1 %15145, %v14468_v56  }
0x1022   :  { %5083 = vperm.xlu0 %15144, %v14467_v2  }
0x1041   :  { %717 = vadd.xlane.f32.xlu0 %v716_v58 }
0x1042   :  { %722 = vadd.xlane.f32.xlu1 %v721_v32 }
0x1095   :  { %v5063_v19 = vpop.permute.xlu1 %5062 }
0x1096   :  { %v5070_v12 = vmul.f32 %v5063_v19, %v17672_v42  ;;  %v5072_v57 = vmul.f32 %v5063_v19, %v17676_v28  ;;  %v5071_v21 = vmul.f32 %v5063_v19, %v17674_v54  ;;  %v5073_v59 = vmul.f32 %v5063_v19, %v17678_v38  ;;  %v14469_v54 = vld [vmem:[%s20361_s2 + $0x60] sm:$0xff]  ;;  %v14470_v38 = vld [vmem:[%s20361_s2 + $0x68] sm:$0xff] }
0x1099   :  { %v5068_v14 = vpop.permute.xlu0 %5067  ;;  %v5089_v31 = vpop.permute.xlu1 %5088 }
0x109a   :  { %v5074_v15 = vmul.f32 %v5068_v14, %v5027_v11  ;;  %v5076_v50 = vmul.f32 %v5068_v14, %v5029_v43  ;;  %v5075_v60 = vmul.f32 %v5068_v14, %v5028_v8  ;;  %v5077_v36 = vmul.f32 %v5068_v14, %v5030_v33 }
0x109c   :  { %v5096_v51 = vadd.f32 %v5089_v31, %v5075_v60  ;;  %v5098_v44 = vadd.f32 %v5089_v31, %v5077_v36  ;;  %v5095_v52 = vadd.f32 %v5089_v31, %v5074_v15  ;;  %v5097_v0 = vadd.f32 %v5089_v31, %v5076_v50 }
0x109d   :  { %v5084_v1 = vpop.permute.xlu0 %5083 }
0x109e   :  { %v5104_v30 = vmax.f32 %v5096_v51, 0.0  ;;  %v5106_v5 = vmax.f32 %v5098_v44, 0.0  ;;  %v5103_v11 = vmax.f32 %v5095_v52, 0.0  ;;  %v5105_v43 = vmax.f32 %v5097_v0, 0.0 }
0x109f   :  { %v5092_v8 = vadd.f32 %v5084_v1, %v5071_v21  ;;  %v5094_v33 = vadd.f32 %v5084_v1, %v5073_v59  ;;  %v5091_v23 = vadd.f32 %v5084_v1, %v5070_v12  ;;  %v5093_v16 = vadd.f32 %v5084_v1, %v5072_v57 }
0x10a0   :  { %5144 = vmatprep.subr.mxu0 %v5104_v30  ;;  %5221 = vmatprep.subr.mxu1 %v5106_v5 }
0x10a1   :  { %5145 = vmatpush1.msra.mxu0 %v5103_v11  ;;  %5222 = vmatpush1.msra.mxu1 %v5105_v43  ;;  %v5100_v42 = vmax.f32 %v5092_v8, 0.0  ;;  %v5102_v55 = vmax.f32 %v5094_v33, 0.0  ;;  %v5099_v28 = vmax.f32 %v5091_v23, 0.0  ;;  %v5101_v49 = vmax.f32 %v5093_v16, 0.0 }
0x10a3   :  { %5146 = vmatprep.subr.mxu0 %v5100_v42  ;;  %5223 = vmatprep.subr.mxu1 %v5102_v55 }
0x10a4   :  { %5147 = vmatpush1.msra.mxu0 %v5099_v28  ;;  %5224 = vmatpush1.msra.mxu1 %v5101_v49 }
0x10a5   :  { %14471 = vmatmul.mubr.msk.f32.vlgmr.msra.gmra.mxu0 %vm36_vm0, %v14469_v54  ;;  %14473 = vmatmul.mubr.msk.f32.vlgmr.msra.gmra.mxu1 %vm36_vm0, %v14469_v54 }
0x10a6   :  { %5186 = vmatprep.mubr.f32.mxu0 %v20498_v46  ;;  %5263 = vmatprep.mubr.f32.mxu1 %v20498_v46 }
0x10a9   :  { %14472 = vmatmul.mubr.msk.f32.gmra.mxu0 %vm36_vm0, %v14470_v38  ;;  %14474 = vmatmul.mubr.msk.f32.gmra.mxu1 %vm36_vm0, %v14470_v38 }
0x10ca   :  { %v718_v3 = vpop.xlane.xlu0 %717 }
0x10cb   :  { %v723_v61 = vpop.xlane.xlu1 %722  ;;  %v724_v62 = vmul.f32 0.001953125, %v718_v3 }
0x10cc   :  { %v725_v26 = vmul.f32 0.001953125, %v723_v61 }
0x10cd   :  { %v17731_v6 = vsub.f32 %v20499_v35, %v724_v62  ;;  %v17734_v4 = vsub.f32 %v20500_v39, %v724_v62 }
0x10ce   :  { %v17725_v34 = vsub.f32 %v20501_v40, %v725_v26  ;;  %v17728_v20 = vsub.f32 %v20502_v7, %v725_v26  ;;  %v17741_v10 = vsub.f32 %v20504_v17, %v725_v26  ;;  %v17748_v40 = vsub.f32 %v20503_v53, %v724_v62 }
0x10cf   :  { %v734_v2 = vmul.f32 %v17731_v6, %v17731_v6  ;;  %v735_v35 = vmul.f32 %v17734_v4, %v17734_v4  ;;  %v17751_v25 = vsub.f32 %v20506_v45, %v725_v26  ;;  %v17758_v53 = vsub.f32 %v20505_v9, %v724_v62 }
0x10d0   :  { %v738_v46 = vmul.f32 %v17725_v34, %v17725_v34  ;;  %v739_v48 = vmul.f32 %v17728_v20, %v17728_v20  ;;  %v740_v27 = vmul.f32 %v17741_v10, %v17741_v10  ;;  %v736_v45 = vmul.f32 %v17748_v40, %v17748_v40 }
0x10d1   :  { %v742_v19 = vadd.f32 %v735_v35, %v734_v2  ;;  %v741_v50 = vmul.f32 %v17751_v25, %v17751_v25  ;;  %v737_v51 = vmul.f32 %v17758_v53, %v17758_v53  ;;  %v14432_v2 = vld [vmem:[%s20364_s3 + $0x48] sm:$0xff] }
0x10d2   :  { %v747_v37 = vadd.f32 %v739_v48, %v738_v46 }
0x10d3   :  { %v743_v31 = vadd.f32 %v742_v19, %v736_v45 }
0x10d4   :  { %v748_v32 = vadd.f32 %v747_v37, %v740_v27  ;;  %v14434_v37 = vld [vmem:[%s20364_s3 + $0x58] sm:$0xff]  ;;  %v14433_v27 = vld [vmem:[%s20364_s3 + $0x50] sm:$0xff] }
0x10d5   :  { %v744_v44 = vadd.f32 %v743_v31, %v737_v51 }
0x10d6   :  { %v749_v36 = vadd.f32 %v748_v32, %v741_v50 }
0x1165   :  { %v5182_v22 = vpop.f32.mrf.mxu0  ;;  %v5259_v29 = vpop.f32.mrf.mxu1 }
0x1167   :  { %v5184_v13 = vpop.f32.mrf.mxu0  ;;  %v5261_v63 = vpop.f32.mrf.mxu1 }
0x1168   :  { %v5270_v56 = vadd.f32 %v5184_v13, %v5182_v22 }
0x1169   :  { %v5188_v39 = vpop.f32.mrf.mxu0  ;;  %v5265_v24 = vpop.f32.mrf.mxu1 }
0x116a   :  { %v5271_v7 = vadd.f32 %v5270_v56, %v5259_v29 }
0x116b   :  { %v5190_v17 = vpop.f32.mrf.mxu0  ;;  %v5267_v14 = vpop.f32.mrf.mxu1 }
0x116c   :  { %v5275_v47 = vadd.f32 %v5190_v17, %v5188_v39  ;;  %v5272_v58 = vadd.f32 %v5271_v7, %v5261_v63 }
0x116e   :  { %v5276_v15 = vadd.f32 %v5275_v47, %v5265_v24  ;;  %5273 = vadd.xlane.f32.xlu0 %v5272_v58  ;;  %v14478_v47 = vld [vmem:[%s20364_s3 + $0xd8] sm:$0xff] }
0x1170   :  { %v5277_v60 = vadd.f32 %v5276_v15, %v5267_v14 }
0x1172   :  { %5278 = vadd.xlane.f32.xlu1 %v5277_v60  ;;  %750 = vadd.xlane.f32.xlu0 %v749_v36 }
0x1176   :  { %745 = vadd.xlane.f32.xlu1 %v744_v44 }
0x11f7   :  { %v5274_v52 = vpop.xlane.xlu0 %5273 }
0x11f8   :  { %v5280_v0 = vmul.f32 0.001953125, %v5274_v52 }
0x11fa   :  { %v17764_v12 = vsub.f32 %v5182_v22, %v5280_v0  ;;  %v17766_v57 = vsub.f32 %v5184_v13, %v5280_v0  ;;  %v17768_v9 = vsub.f32 %v5259_v29, %v5280_v0  ;;  %v17774_v5 = vsub.f32 %v5261_v63, %v5280_v0 }
0x11fb   :  { %v5279_v1 = vpop.xlane.xlu1 %5278  ;;  %v751_v11 = vpop.xlane.xlu0 %750 }
0x11fc   :  { %v5281_v21 = vmul.f32 0.001953125, %v5279_v1  ;;  %v5290_v59 = vmul.f32 %v17764_v12, %v17764_v12  ;;  %v5291_v30 = vmul.f32 %v17766_v57, %v17766_v57  ;;  %v5292_v23 = vmul.f32 %v17768_v9, %v17768_v9 }
0x11fd   :  { %v753_v54 = vmul.f32 0.001953125, %v751_v11  ;;  %v5293_v38 = vmul.f32 %v17774_v5, %v17774_v5 }
0x11fe   :  { %v17776_v43 = vsub.f32 %v5188_v39, %v5281_v21  ;;  %v17778_v8 = vsub.f32 %v5190_v17, %v5281_v21  ;;  %v17780_v33 = vsub.f32 %v5265_v24, %v5281_v21  ;;  %v5298_v16 = vadd.f32 %v5291_v30, %v5290_v59  ;;  %v14431_v39 = vld [vmem:[%s20364_s3 + $0x40] sm:$0xff]  ;;  %v14477_v17 = vld [vmem:[%s20364_s3 + $0xd0] sm:$0xff] }
0x11ff   :  { %v746_v42 = vpop.xlane.xlu1 %745  ;;  %v17784_v55 = vsub.f32 %v5267_v14, %v5281_v21  ;;  %v758_v29 = vadd.f32 1e-05, %v753_v54 }
0x1200   :  { %v5294_v28 = vmul.f32 %v17776_v43, %v17776_v43  ;;  %v5295_v49 = vmul.f32 %v17778_v8, %v17778_v8  ;;  %v5299_v61 = vadd.f32 %v5298_v16, %v5292_v23  ;;  %v5296_v26 = vmul.f32 %v17780_v33, %v17780_v33  ;;  %v14475_v23 = vld [vmem:[%s20364_s3 + $0xc0] sm:$0xff] }
0x1201   :  { %v752_v62 = vmul.f32 0.001953125, %v746_v42  ;;  %v5297_v48 = vmul.f32 %v17784_v55, %v17784_v55  ;;  %15562 = vrsqrt.f32 %v758_v29 }
0x1202   :  { %v5303_v3 = vadd.f32 %v5295_v49, %v5294_v28  ;;  %v5300_v46 = vadd.f32 %v5299_v61, %v5293_v38  ;;  %v14476_v28 = vld [vmem:[%s20364_s3 + $0xc8] sm:$0xff] }
0x1203   :  { %v757_v63 = vadd.f32 1e-05, %v752_v62 }
0x1204   :  { %v5304_v22 = vadd.f32 %v5303_v3, %v5296_v26  ;;  %5301 = vadd.xlane.f32.xlu0 %v5300_v46 }
0x1205   :  { %15564 = vrsqrt.f32 %v757_v63 }
0x1206   :  { %v5305_v13 = vadd.f32 %v5304_v22, %v5297_v48 }
0x1208   :  { %5306 = vadd.xlane.f32.xlu1 %v5305_v13 }
0x120e   :  { %v15563_v56 = vpop.eup %15562 }
0x120f   :  { %v762_v24 = vmul.f32 %v15563_v56, %v14432_v2 }
0x1212   :  { %v15565_v35 = vpop.eup %15564 }
0x1213   :  { %v761_v7 = vmul.f32 %v15565_v35, %v14431_v39 }
0x1219   :  { %791 = vperm.xlu1 %15145, %v14434_v37  }
0x121a   :  { %770 = vperm.xlu0 %15144, %v762_v24  }
0x121d   :  { %765 = vperm.xlu1 %15145, %v761_v7  }
0x121e   :  { %786 = vperm.xlu0 %15144, %v14433_v27  }
0x1221   :  { %5342 = vperm.xlu1 %15145, %v14477_v17  }
0x1222   :  { %5347 = vperm.xlu0 %15144, %v14478_v47  }
0x128d   :  { %v5302_v32 = vpop.xlane.xlu0 %5301 }
0x1291   :  { %v5307_v58 = vpop.xlane.xlu1 %5306 }
0x1292   :  { %v5309_v52 = vmul.f32 0.001953125, %v5307_v58 }
0x1294   :  { %v5314_v1 = vadd.f32 1e-05, %v5309_v52 }
0x1295   :  { %v17814_v19 = vpop.permute.xlu1 %791  ;;  %v17816_v14 = vpop.permute.xlu0 %770 }
0x1296   :  { %v777_v15 = vmul.f32 %v17816_v14, %v17725_v34  ;;  %v778_v0 = vmul.f32 %v17816_v14, %v17728_v20  ;;  %v779_v54 = vmul.f32 %v17816_v14, %v17741_v10 }
0x1298   :  { %v798_v50 = vadd.f32 %v17814_v19, %v777_v15  ;;  %v799_v21 = vadd.f32 %v17814_v19, %v778_v0  ;;  %v800_v38 = vadd.f32 %v17814_v19, %v779_v54 }
0x1299   :  { %v17821_v45 = vpop.permute.xlu1 %765  ;;  %v17827_v31 = vpop.permute.xlu0 %786 }
0x129a   :  { %v773_v60 = vmul.f32 %v17821_v45, %v17731_v6  ;;  %v17825_v36 = vmax.f32 %v798_v50, 0.0  ;;  %v5308_v6 = vmul.f32 0.001953125, %v5302_v32  ;;  %v774_v59 = vmul.f32 %v17821_v45, %v17734_v4 }
0x129b   :  { %v17865_v20 = vmax.f32 %v799_v21, 0.0  ;;  %v775_v61 = vmul.f32 %v17821_v45, %v17748_v40  ;;  %v17909_v26 = vmax.f32 %v800_v38, 0.0 }
0x129c   :  { %v794_v51 = vadd.f32 %v17827_v31, %v773_v60  ;;  %7728 = vrot.lane.b32.xlu0 %v17825_v36, %s15588_s0  ;;  %7722 = vrot.lane.b32.xlu1 %v17825_v36, %s15584_s17  ;;  %v5313_v44 = vadd.f32 1e-05, %v5308_v6  ;;  %v795_v30 = vadd.f32 %v17827_v31, %v774_v59 }
0x129d   :  { %v796_v10 = vadd.f32 %v17827_v31, %v775_v61  ;;  %v17926_v40 = vpop.permute.xlu0 %5347  ;;  %v17928_v62 = vpop.permute.xlu1 %5342 }
0x129e   :  { %v17834_v34 = vmax.f32 %v794_v51, 0.0  ;;  %15566 = vrsqrt.f32 %v5313_v44  ;;  %v17872_v11 = vmax.f32 %v795_v30, 0.0 }
0x129f   :  { %15568 = vrsqrt.f32 %v5314_v1  ;;  %v17916_v3 = vmax.f32 %v796_v10, 0.0 }
0x12a0   :  { %7734 = vrot.lane.b32.xlu1 %v17825_v36, %s15585_s18  ;;  %7720 = vrot.lane.b32.xlu0 %v17834_v34, %s15584_s17 }
0x12a4   :  { %7726 = vrot.lane.b32.xlu1 %v17834_v34, %s15588_s0  ;;  %7732 = vrot.lane.b32.xlu0 %v17834_v34, %s15585_s18 }
0x12a8   :  { %7740 = vrot.lane.b32.xlu1 %v17825_v36, %s15589_s21  ;;  %7746 = vrot.lane.b32.xlu0 %v17825_v36, %s15586_s19 }
0x12ab   :  { %v15567_v4 = vpop.eup %15566 }
0x12ac   :  { %7752 = vrot.lane.b32.xlu1 %v17825_v36, %s15590_s22  ;;  %7758 = vrot.lane.b32.xlu0 %v17825_v36, %s15587_s20  ;;  %v5317_v16 = vmul.f32 %v15567_v4, %v14475_v23  ;;  %v15569_v42 = vpop.eup %15568 }
0x12ad   :  { %v5318_v49 = vmul.f32 %v15569_v42, %v14476_v28 }
0x12b0   :  { %7738 = vrot.lane.b32.xlu1 %v17834_v34, %s15589_s21  ;;  %7744 = vrot.lane.b32.xlu0 %v17834_v34, %s15586_s19 }
0x12b4   :  { %7750 = vrot.lane.b32.xlu1 %v17834_v34, %s15590_s22  ;;  %7756 = vrot.lane.b32.xlu0 %v17834_v34, %s15587_s20 }
0x12b8   :  { %7766 = vrot.lane.b32.xlu1 %v17865_v20, %s15584_s17  ;;  %7772 = vrot.lane.b32.xlu0 %v17865_v20, %s15588_s0 }
0x12bc   :  { %7778 = vrot.lane.b32.xlu1 %v17865_v20, %s15585_s18  ;;  %7764 = vrot.lane.b32.xlu0 %v17872_v11, %s15584_s17 }
0x12c0   :  { %7770 = vrot.lane.b32.xlu1 %v17872_v11, %s15588_s0  ;;  %7776 = vrot.lane.b32.xlu0 %v17872_v11, %s15585_s18 }
0x12c4   :  { %5321 = vperm.xlu1 %15145, %v5317_v16   ;;  %7790 = vrot.lane.b32.xlu0 %v17865_v20, %s15586_s19 }
0x12c8   :  { %7784 = vrot.lane.b32.xlu1 %v17865_v20, %s15589_s21  ;;  %5326 = vperm.xlu0 %15144, %v5318_v49  }
0x12cc   :  { %7796 = vrot.lane.b32.xlu1 %v17865_v20, %s15590_s22  ;;  %7802 = vrot.lane.b32.xlu0 %v17865_v20, %s15587_s20 }
0x12d0   :  { %7782 = vrot.lane.b32.xlu1 %v17872_v11, %s15589_s21  ;;  %7788 = vrot.lane.b32.xlu0 %v17872_v11, %s15586_s19 }
0x12d4   :  { %7794 = vrot.lane.b32.xlu1 %v17872_v11, %s15590_s22  ;;  %7800 = vrot.lane.b32.xlu0 %v17872_v11, %s15587_s20 }
0x12d8   :  { %7810 = vrot.lane.b32.xlu1 %v17909_v26, %s15584_s17  ;;  %7816 = vrot.lane.b32.xlu0 %v17909_v26, %s15588_s0 }
0x12dc   :  { %7822 = vrot.lane.b32.xlu1 %v17909_v26, %s15585_s18  ;;  %7808 = vrot.lane.b32.xlu0 %v17916_v3, %s15584_s17 }
0x12e0   :  { %7814 = vrot.lane.b32.xlu1 %v17916_v3, %s15588_s0  ;;  %7820 = vrot.lane.b32.xlu0 %v17916_v3, %s15585_s18 }
0x130e   :  { %v7729_v46 = vpop.permute.xlu0 %7728  ;;  %v7723_v48 = vpop.permute.xlu1 %7722 }
0x130f   :  { %v8438_v22 = vcombine.low %v17825_v36, %v7729_v46  ;;  %v8439_v29 = vcombine.high %v17825_v36, %v7729_v46 }
0x1311   :  { %v8446_v2 = vrot.slane %v8438_v22, %v15861_v18  ;;  %v8453_v35 = vrot.slane %v8439_v29, %v15861_v18 }
0x1312   :  { %v7721_v13 = vpop.permute.xlu0 %7720  ;;  %v7735_v63 = vpop.permute.xlu1 %7734 }
0x1313   :  { %v8454_v56 = vcombine.low %v7723_v48, %v7735_v63  ;;  %v8455_v37 = vcombine.high %v7723_v48, %v7735_v63 }
0x1315   :  { %v8462_v39 = vrot.slane %v8454_v56, %v15861_v18  ;;  %v8469_v24 = vrot.slane %v8455_v37, %v15861_v18 }
0x1316   :  { %v7733_v7 = vpop.permute.xlu0 %7732  ;;  %v7727_v27 = vpop.permute.xlu1 %7726 }
0x1317   :  { %v8502_v17 = vcombine.low %v8446_v2, %v8462_v39  ;;  %v8503_v47 = vcombine.high %v8446_v2, %v8462_v39  ;;  %v8518_v58 = vcombine.low %v8453_v35, %v8469_v24  ;;  %v8519_v32 = vcombine.high %v8453_v35, %v8469_v24 }
0x1318   :  { %v7910_v15 = vcombine.low %v7721_v13, %v7733_v7  ;;  %v7911_v50 = vcombine.high %v7721_v13, %v7733_v7  ;;  %v7894_v60 = vcombine.low %v17834_v34, %v7727_v27  ;;  %v7895_v36 = vcombine.high %v17834_v34, %v7727_v27 }
0x1319   :  { %v8510_v51 = vrot.slane %v8502_v17, %v15881_v41  ;;  %v8517_v6 = vrot.slane %v8503_v47, %v15881_v41  ;;  %v8526_v44 = vrot.slane %v8518_v58, %v15881_v41  ;;  %v8533_v52 = vrot.slane %v8519_v32, %v15881_v41 }
0x131a   :  { %v7918_v0 = vrot.slane %v7910_v15, %v15861_v18  ;;  %v7925_v1 = vrot.slane %v7911_v50, %v15861_v18  ;;  %v7902_v21 = vrot.slane %v7894_v60, %v15861_v18  ;;  %v7909_v59 = vrot.slane %v7895_v36, %v15861_v18  ;;  %v17946_v30 = vpop.permute.xlu1 %7740 }
0x131b   :  { %v14551_v4 = vcombine.low %v8510_v51, %v8517_v6  ;;  %v14553_v34 = vcombine.high %v8510_v51, %v8517_v6  ;;  %v14555_v23 = vcombine.low %v8526_v44, %v8533_v52  ;;  %v14557_v16 = vcombine.high %v8526_v44, %v8533_v52  ;;  %v17966_v6 = vpop.permute.xlu0 %7746 }
0x131c   :  { %v7958_v42 = vcombine.low %v7902_v21, %v7918_v0  ;;  %v7959_v28 = vcombine.high %v7902_v21, %v7918_v0  ;;  %v7974_v49 = vcombine.low %v7909_v59, %v7925_v1  ;;  %v7975_v54 = vcombine.high %v7909_v59, %v7925_v1 }
0x131d   :  { %v9126_v38 = vrot.slane %v14551_v4, %v15861_v18  ;;  %v9142_v61 = vrot.slane %v14553_v34, %v15861_v18  ;;  %v9158_v10 = vrot.slane %v14555_v23, %v15861_v18  ;;  %v9174_v46 = vrot.slane %v14557_v16, %v15861_v18 }
0x131e   :  { %v7966_v48 = vrot.slane %v7958_v42, %v15881_v41  ;;  %v7973_v22 = vrot.slane %v7959_v28, %v15881_v41  ;;  %v7982_v29 = vrot.slane %v7974_v49, %v15881_v41  ;;  %v7989_v13 = vrot.slane %v7975_v54, %v15881_v41  ;;  %v17956_v63 = vpop.permute.xlu1 %7752 }
0x131f   :  { %v9182_v39 = vcombine.low %v9126_v38, %v9142_v61  ;;  %v9214_v24 = vcombine.low %v9158_v10, %v9174_v46  ;;  %v9183_v59 = vcombine.high %v9126_v38, %v9142_v61  ;;  %v17976_v4 = vpop.permute.xlu0 %7758  ;;  %v9215_v16 = vcombine.high %v9158_v10, %v9174_v46 }
0x1320   :  { %v14543_v56 = vcombine.low %v7966_v48, %v7973_v22  ;;  %v14545_v37 = vcombine.high %v7966_v48, %v7973_v22  ;;  %v14547_v2 = vcombine.low %v7982_v29, %v7989_v13  ;;  %v14549_v35 = vcombine.high %v7982_v29, %v7989_v13 }
0x1321   :  { %v9190_v47 = vrot.slane %v9182_v39, %v15881_v41  ;;  %v9222_v58 = vrot.slane %v9214_v24, %v15881_v41  ;;  %v9197_v23 = vrot.slane %v9183_v59, %v15881_v41  ;;  %v9229_v28 = vrot.slane %v9215_v16, %v15881_v41 }
0x1322   :  { %v8990_v7 = vrot.slane %v14543_v56, %v15861_v18  ;;  %v9006_v27 = vrot.slane %v14545_v37, %v15861_v18  ;;  %v17960_v17 = vpop.permute.xlu1 %7738  ;;  %v9022_v32 = vrot.slane %v14547_v2, %v15861_v18  ;;  %v9038_v15 = vrot.slane %v14549_v35, %v15861_v18 }
0x1323   :  { %v9246_v50 = vcombine.low %v9190_v47, %v9222_v58  ;;  %v9247_v60 = vcombine.high %v9190_v47, %v9222_v58  ;;  %v17986_v54 = vpop.permute.xlu0 %7744  ;;  %v17988_v38 = vcombine.low %v9197_v23, %v9229_v28  ;;  %v17990_v61 = vcombine.high %v9197_v23, %v9229_v28 }
0x1324   :  { %v9046_v36 = vcombine.low %v8990_v7, %v9006_v27  ;;  %v9078_v51 = vcombine.low %v9022_v32, %v9038_v15  ;;  %v9047_v42 = vcombine.high %v8990_v7, %v9006_v27  ;;  %v9079_v49 = vcombine.high %v9022_v32, %v9038_v15 }
0x1325   :  { %14909 = vmatprep.subr.msk.mxu0 %vm36_vm0, %v9246_v50  ;;  %14916 = vmatprep.subr.msk.mxu1 %vm36_vm0, %v9247_v60 }
0x1326   :  { %14910 = vmatpush3.xpose.msk.msra.mxu0 %vm36_vm0, %v9246_v50  ;;  %14917 = vmatpush3.xpose.msk.msra.mxu1 %vm36_vm0, %v9247_v60  ;;  %v17972_v44 = vpop.permute.xlu1 %7750  ;;  %v9054_v52 = vrot.slane %v9046_v36, %v15881_v41  ;;  %v9086_v0 = vrot.slane %v9078_v51, %v15881_v41  ;;  %v9061_v10 = vrot.slane %v9047_v42, %v15881_v41 }
0x1327   :  { %v9093_v46 = vrot.slane %v9079_v49, %v15881_v41  ;;  %v18000_v22 = vpop.permute.xlu0 %7756  ;;  %v7926_v16 = vcombine.low %v17960_v17, %v17972_v44 }
0x1328   :  { %v9110_v1 = vcombine.low %v9054_v52, %v9086_v0  ;;  %v9111_v21 = vcombine.high %v9054_v52, %v9086_v0  ;;  %v8470_v52 = vcombine.low %v17946_v30, %v17956_v63  ;;  %v8487_v0 = vcombine.high %v17966_v6, %v17976_v4 }
0x1329   :  { %v18002_v29 = vcombine.low %v9061_v10, %v9093_v46  ;;  %v18004_v13 = vcombine.high %v9061_v10, %v9093_v46  ;;  %v7942_v23 = vcombine.low %v17986_v54, %v18000_v22  ;;  %v7934_v10 = vrot.slane %v7926_v16, %v15861_v18 }
0x132a   :  { %14911 = vmatprep.subr.msk.mxu0 %vm36_vm0, %v9110_v1  ;;  %14918 = vmatprep.subr.msk.mxu1 %vm36_vm0, %v9111_v21  ;;  %v17982_v34 = vpop.permute.xlu1 %7766  ;;  %v8478_v59 = vrot.slane %v8470_v52, %v15861_v18  ;;  %v780_v46 = vmul.f32 %v17816_v14, %v17751_v25 }
0x132b   :  { %14912 = vmatpush3.xpose.msk.msra.mxu0 %vm36_vm0, %v9110_v1  ;;  %14919 = vmatpush3.xpose.msk.msra.mxu1 %vm36_vm0, %v9111_v21  ;;  %v18008_v37 = vpop.permute.xlu0 %7772  ;;  %v8471_v1 = vcombine.high %v17946_v30, %v17956_v63  ;;  %v7943_v63 = vcombine.high %v17986_v54, %v18000_v22  ;;  %v7950_v49 = vrot.slane %v7942_v23, %v15861_v18 }
0x132c   :  { %14923 = vmatprep.subr.msk.mxu0 %vm36_vm0, %v17988_v38  ;;  %14930 = vmatprep.subr.msk.mxu1 %vm36_vm0, %v17990_v61  ;;  %v8574_v52 = vcombine.low %v17865_v20, %v18008_v37 }
0x132d   :  { %v8485_v30 = vrot.slane %v8471_v1, %v15861_v18 }
0x132e   :  { %v17996_v48 = vpop.permute.xlu1 %7778 }
0x132f   :  { %v18017_v7 = vpop.permute.xlu0 %7764  ;;  %v8590_v25 = vcombine.low %v17982_v34, %v17996_v48 }
0x1331   :  { %v8598_v23 = vrot.slane %v8590_v25, %v15861_v18 }
0x1332   :  { %v18006_v56 = vpop.permute.xlu1 %7770 }
0x1333   :  { %v18027_v47 = vpop.permute.xlu0 %7776 }
0x1334   :  { %v8046_v1 = vcombine.low %v18017_v7, %v18027_v47 }
0x1337   :  { %v18038_v32 = vpop.permute.xlu0 %7790 }
0x133f   :  { %v18010_v2 = vpop.permute.xlu1 %5321 }
0x1340   :  { %v5329_v35 = vmul.f32 %v18010_v2, %v17764_v12  ;;  %v5330_v27 = vmul.f32 %v18010_v2, %v17766_v57  ;;  %v5331_v57 = vmul.f32 %v18010_v2, %v17768_v9 }
0x1342   :  { %v5350_v39 = vadd.f32 %v17928_v62, %v5329_v35  ;;  %v5351_v12 = vadd.f32 %v17928_v62, %v5330_v27  ;;  %v5352_v50 = vadd.f32 %v17928_v62, %v5331_v57  ;;  %v776_v35 = vmul.f32 %v17821_v45, %v17758_v53 }
0x1343   :  { %v18046_v15 = vpop.permute.xlu0 %5326  ;;  %v7991_v57 = vcombine.high %v7934_v10, %v7950_v49  ;;  %v18124_v14 = vpop.permute.xlu1 %7784  ;;  %v18129_v53 = vadd.f32 %v17814_v19, %v780_v46 }
0x1344   :  { %v18015_v24 = vmax.f32 %v5350_v39, 0.0  ;;  %v18036_v58 = vmax.f32 %v5351_v12, 0.0  ;;  %v5333_v60 = vmul.f32 %v18046_v15, %v17776_v43  ;;  %v18059_v9 = vmax.f32 %v5352_v50, 0.0 }
0x1345   :  { %v8486_v43 = vcombine.low %v17966_v6, %v17976_v4  ;;  %v8501_v6 = vrot.slane %v8487_v0, %v15861_v18  ;;  %v7927_v4 = vcombine.high %v17960_v17, %v17972_v44  ;;  %v7957_v17 = vrot.slane %v7943_v63, %v15861_v18 }
0x1346   :  { %5374 = vrot.lane.b32.xlu0 %v18015_v24, %s15588_s0  ;;  %5368 = vrot.lane.b32.xlu1 %v18015_v24, %s15584_s17  ;;  %v5354_v36 = vadd.f32 %v17926_v40, %v5333_v60  ;;  %v7990_v12 = vcombine.low %v7934_v10, %v7950_v49  ;;  %v18132_v45 = vadd.f32 %v17827_v31, %v776_v35 }
0x1347   :  { %v8494_v21 = vrot.slane %v8486_v43, %v15861_v18  ;;  %v8550_v39 = vcombine.low %v8485_v30, %v8501_v6  ;;  %v7941_v44 = vrot.slane %v7927_v4, %v15861_v18  ;;  %v8551_v22 = vcombine.high %v8485_v30, %v8501_v6 }
0x1348   :  { %v18066_v51 = vmax.f32 %v5354_v36, 0.0  ;;  %v8591_v60 = vcombine.high %v17982_v34, %v17996_v48  ;;  %v5334_v19 = vmul.f32 %v18046_v15, %v17778_v8  ;;  %v8575_v31 = vcombine.high %v17865_v20, %v18008_v37 }
0x1349   :  { %v8534_v42 = vcombine.low %v8478_v59, %v8494_v21  ;;  %v8535_v28 = vcombine.high %v8478_v59, %v8494_v21  ;;  %v8558_v50 = vrot.slane %v8550_v39, %v15881_v41  ;;  %v8006_v36 = vcombine.low %v7941_v44, %v7957_v17 }
0x134a   :  { %5392 = vrot.lane.b32.xlu0 %v18015_v24, %s15586_s19  ;;  %5380 = vrot.lane.b32.xlu1 %v18015_v24, %s15585_s18  ;;  %v8007_v43 = vcombine.high %v7941_v44, %v7957_v17  ;;  %v8565_v0 = vrot.slane %v8551_v22, %v15881_v41  ;;  %v8030_v34 = vcombine.low %v17872_v11, %v18006_v56 }
0x134b   :  { %v8542_v54 = vrot.slane %v8534_v42, %v15881_v41  ;;  %v8549_v27 = vrot.slane %v8535_v28, %v15881_v41  ;;  %v7998_v21 = vrot.slane %v7990_v12, %v15881_v41  ;;  %v8005_v59 = vrot.slane %v7991_v57, %v15881_v41  ;;  %v18166_v42 = vpop.permute.xlu0 %7802  ;;  %v18168_v28 = vpop.permute.xlu1 %7796 }
0x134c   :  { %v8605_v16 = vrot.slane %v8591_v60, %v15861_v18  ;;  %v8047_v20 = vcombine.high %v18017_v7, %v18027_v47  ;;  %v8031_v37 = vcombine.high %v17872_v11, %v18006_v56  ;;  %v8014_v6 = vrot.slane %v8006_v36, %v15881_v41 }
0x134d   :  { %v14552_v48 = vcombine.low %v8542_v54, %v8549_v27  ;;  %v14554_v8 = vcombine.high %v8542_v54, %v8549_v27  ;;  %v8021_v30 = vrot.slane %v8007_v43, %v15881_v41  ;;  %v8582_v63 = vrot.slane %v8574_v52, %v15861_v18 }
0x134e   :  { %5404 = vrot.lane.b32.xlu0 %v18015_v24, %s15587_s20  ;;  %5386 = vrot.lane.b32.xlu1 %v18015_v24, %s15589_s21  ;;  %v5355_v4 = vadd.f32 %v17926_v40, %v5334_v19  ;;  %v14556_v49 = vcombine.low %v8558_v50, %v8565_v0  ;;  %v8589_v7 = vrot.slane %v8575_v31, %v15861_v18 }
0x134f   :  { %v8054_v11 = vrot.slane %v8046_v1, %v15861_v18  ;;  %v8038_v56 = vrot.slane %v8030_v34, %v15861_v18  ;;  %v14558_v47 = vcombine.high %v8558_v50, %v8565_v0  ;;  %v14544_v10 = vcombine.low %v7998_v21, %v8005_v59  ;;  %v18193_v19 = vpop.permute.xlu0 %7788  ;;  %v18195_v0 = vpop.permute.xlu1 %7782 }
0x1350   :  { %v8638_v46 = vcombine.low %v8582_v63, %v8598_v23  ;;  %v8639_v35 = vcombine.high %v8582_v63, %v8598_v23  ;;  %v8654_v39 = vcombine.low %v8589_v7, %v8605_v16  ;;  %v8655_v17 = vcombine.high %v8589_v7, %v8605_v16 }
0x1351   :  { %v8061_v44 = vrot.slane %v8047_v20, %v15861_v18  ;;  %v8045_v54 = vrot.slane %v8031_v37, %v15861_v18  ;;  %v14546_v22 = vcombine.high %v7998_v21, %v8005_v59  ;;  %v14548_v27 = vcombine.low %v8014_v6, %v8021_v30 }
0x1352   :  { %5418 = vrot.lane.b32.xlu0 %v18036_v58, %s15588_s0  ;;  %5398 = vrot.lane.b32.xlu1 %v18015_v24, %s15590_s22  ;;  %v14550_v12 = vcombine.high %v8014_v6, %v8021_v30  ;;  %v18179_v57 = vmax.f32 %v5355_v4, 0.0  ;;  %v8094_v25 = vcombine.low %v8038_v56, %v8054_v11  ;;  %v8095_v50 = vcombine.high %v8038_v56, %v8054_v11 }
0x1353   :  { %v18182_v60 = vrot.slane %v14552_v48, %v15861_v18  ;;  %v18185_v36 = vrot.slane %v14554_v8, %v15861_v18  ;;  %v18188_v43 = vrot.slane %v8638_v46, %v15881_v41  ;;  %v18191_v52 = vrot.slane %v8639_v35, %v15881_v41  ;;  %v18258_v46 = vpop.permute.xlu0 %7800  ;;  %v18260_v35 = vpop.permute.xlu1 %7794 }
0x1354   :  { %v18200_v31 = vrot.slane %v14556_v49, %v15861_v18  ;;  %v9181_v1 = vrot.slane %v14558_v47, %v15861_v18  ;;  %v18204_v34 = vrot.slane %v8654_v39, %v15881_v41  ;;  %v18207_v48 = vrot.slane %v8655_v17, %v15881_v41 }
0x1355   :  { %v8110_v21 = vcombine.low %v8045_v54, %v8061_v44  ;;  %v8111_v59 = vcombine.high %v8045_v54, %v8061_v44  ;;  %v18212_v23 = vrot.slane %v14544_v10, %v15861_v18  ;;  %v18215_v8 = vrot.slane %v14546_v22, %v15861_v18 }
0x1356   :  { %5436 = vrot.lane.b32.xlu0 %v18036_v58, %s15586_s19  ;;  %5412 = vrot.lane.b32.xlu1 %v18036_v58, %s15584_s17  ;;  %v18218_v16 = vrot.slane %v14548_v27, %v15861_v18  ;;  %v18221_v20 = vrot.slane %v14550_v12, %v15861_v18  ;;  %v18224_v37 = vrot.slane %v8094_v25, %v15881_v41  ;;  %v18232_v63 = vmax.f32 %v18129_v53, 0.0 }
0x1357   :  { %v18227_v6 = vrot.slane %v8095_v50, %v15881_v41  ;;  %v9198_v30 = vcombine.low %v18182_v60, %v18185_v36  ;;  %v18235_v4 = vmax.f32 %v18132_v45, 0.0  ;;  %v14567_v49 = vcombine.low %v18188_v43, %v18191_v52 }
0x1358   :  { %v9230_v7 = vcombine.low %v18200_v31, %v9181_v1  ;;  %v14569_v11 = vcombine.high %v18188_v43, %v18191_v52  ;;  %v18245_v56 = vrot.slane %v8110_v21, %v15881_v41  ;;  %v18248_v53 = vrot.slane %v8111_v59, %v15881_v41 }
0x1359   :  { %v5332_v45 = vmul.f32 %v18010_v2, %v17774_v5  ;;  %v14571_v47 = vcombine.low %v18204_v34, %v18207_v48  ;;  %v14573_v10 = vcombine.high %v18204_v34, %v18207_v48  ;;  %v9062_v39 = vcombine.low %v18212_v23, %v18215_v8 }
0x135a   :  { %5448 = vrot.lane.b32.xlu0 %v18036_v58, %s15587_s20  ;;  %5424 = vrot.lane.b32.xlu1 %v18036_v58, %s15585_s18  ;;  %v9094_v17 = vcombine.low %v18218_v16, %v18221_v20  ;;  %v14559_v5 = vcombine.low %v18224_v37, %v18227_v6  ;;  %v8622_v2 = vcombine.low %v18038_v32, %v18166_v42 }
0x135b   :  { %v8606_v44 = vcombine.low %v18124_v14, %v18168_v28  ;;  %v9206_v54 = vrot.slane %v9198_v30, %v15881_v41  ;;  %v14561_v22 = vcombine.high %v18224_v37, %v18227_v6  ;;  %v8623_v27 = vcombine.high %v18038_v32, %v18166_v42 }
0x135c   :  { %v8607_v12 = vcombine.high %v18124_v14, %v18168_v28  ;;  %v9238_v25 = vrot.slane %v9230_v7, %v15881_v41  ;;  %v14563_v50 = vcombine.low %v18245_v56, %v18248_v53  ;;  %v5353_v43 = vadd.f32 %v17928_v62, %v5332_v45 }
0x135d   :  { %v9199_v52 = vcombine.high %v18182_v60, %v18185_v36  ;;  %v9231_v32 = vcombine.high %v18200_v31, %v9181_v1  ;;  %v5335_v14 = vmul.f32 %v18046_v15, %v17780_v33  ;;  %v5336_v42 = vmul.f32 %v18046_v15, %v17784_v55  ;;  %v18304_v31 = vpop.permute.xlu0 %7816  ;;  %v18306_v55 = vpop.permute.xlu1 %7810 }
0x135e   :  { %5462 = vrot.lane.b32.xlu0 %v18059_v9, %s15588_s0  ;;  %5430 = vrot.lane.b32.xlu1 %v18036_v58, %s15589_s21  ;;  %v9070_v28 = vrot.slane %v9062_v39, %v15881_v41  ;;  %v9102_v34 = vrot.slane %v9094_v17, %v15881_v41  ;;  %v14565_v62 = vcombine.high %v18245_v56, %v18248_v53  ;;  %v18314_v59 = vmax.f32 %v5353_v43, 0.0 }
0x135f   :  { %v8630_v48 = vrot.slane %v8622_v2, %v15861_v18  ;;  %v8614_v21 = vrot.slane %v8606_v44, %v15861_v18  ;;  %v9063_v60 = vcombine.high %v18212_v23, %v18215_v8  ;;  %v8637_v36 = vrot.slane %v8623_v27, %v15861_v18 }
0x1360   :  { %v8621_v33 = vrot.slane %v8607_v12, %v15861_v18  ;;  %v18310_v15 = vcombine.low %v9206_v54, %v9238_v25  ;;  %v18312_v1 = vcombine.high %v9206_v54, %v9238_v25  ;;  %v9213_v23 = vrot.slane %v9199_v52, %v15881_v41 }
0x1361   :  { %v9245_v8 = vrot.slane %v9231_v32, %v15881_v41  ;;  %v9095_v30 = vcombine.high %v18218_v16, %v18221_v20  ;;  %v5356_v7 = vadd.f32 %v17926_v40, %v5335_v14  ;;  %v5357_v45 = vadd.f32 %v17926_v40, %v5336_v42 }
0x1362   :  { %5370 = vrot.lane.b32.xlu0 %v18066_v51, %s15584_s17  ;;  %5442 = vrot.lane.b32.xlu1 %v18036_v58, %s15590_s22  ;;  %v18324_v39 = vcombine.low %v9070_v28, %v9102_v34  ;;  %v18326_v17 = vcombine.high %v9070_v28, %v9102_v34  ;;  %v8670_v2 = vcombine.low %v8614_v21, %v8630_v48  ;;  %v18356_v28 = vpop.permute.xlu0 %7808  ;;  %v7823_v34 = vpop.permute.xlu1 %7822 }
0x1363   :  { %v8671_v44 = vcombine.high %v8614_v21, %v8630_v48  ;;  %v9077_v54 = vrot.slane %v9063_v60, %v15881_v41  ;;  %v18330_v27 = vrot.slane %v14567_v49, %v15861_v18  ;;  %v8686_v12 = vcombine.low %v8621_v33, %v8637_v36 }
0x1364   :  { %v8687_v25 = vcombine.high %v8621_v33, %v8637_v36  ;;  %v8078_v16 = vcombine.low %v18193_v19, %v18258_v46  ;;  %v8062_v20 = vcombine.low %v18195_v0, %v18260_v35  ;;  %v9109_v40 = vrot.slane %v9095_v30, %v15881_v41 }
0x1365   :  { %v18342_v43 = vrot.slane %v14569_v11, %v15861_v18  ;;  %v18345_v49 = vrot.slane %v14571_v47, %v15861_v18  ;;  %v18348_v52 = vrot.slane %v14573_v10, %v15861_v18  ;;  %v18350_v32 = vmax.f32 %v5356_v7, 0.0 }
0x1366   :  { %7834 = vrot.lane.b32.xlu0 %v17909_v26, %s15586_s19  ;;  %5456 = vrot.lane.b32.xlu1 %v18059_v9, %s15584_s17  ;;  %v8079_v14 = vcombine.high %v18193_v19, %v18258_v46  ;;  %v8063_v42 = vcombine.high %v18195_v0, %v18260_v35  ;;  %v18358_v48 = vcombine.low %v9213_v23, %v9245_v8  ;;  %v18360_v11 = vmax.f32 %v5357_v45, 0.0 }
0x1367   :  { %20507 = vst [vmem:[#allocation21_spill] sm:$0xff] %v18350_v32  ;;  %v18363_v47 = vrot.slane %v8670_v2, %v15881_v41  ;;  %v18366_v10 = vrot.slane %v8671_v44, %v15881_v41  ;;  %v18368_v21 = vcombine.high %v9213_v23, %v9245_v8  ;;  %v18371_v19 = vrot.slane %v8686_v12, %v15881_v41 }
0x1368   :  { %20508 = vst [vmem:[#allocation17_spill] sm:$0xff] %v18360_v11  ;;  %v18374_v0 = vrot.slane %v8687_v25, %v15881_v41  ;;  %v8086_v46 = vrot.slane %v8078_v16, %v15861_v18  ;;  %v8070_v35 = vrot.slane %v8062_v20, %v15861_v18  ;;  %v18382_v60 = vcombine.low %v9077_v54, %v9109_v40 }
0x1369   :  { %v18384_v36 = vcombine.high %v9077_v54, %v9109_v40  ;;  %v9454_v33 = vcombine.low %v18330_v27, %v18342_v43  ;;  %v9486_v23 = vcombine.low %v18345_v49, %v18348_v52  ;;  %v8093_v8 = vrot.slane %v8079_v14, %v15861_v18  ;;  %v7821_v40 = vpop.permute.xlu0 %7820  ;;  %v7815_v14 = vpop.permute.xlu1 %7814 }
0x136a   :  { %7846 = vrot.lane.b32.xlu0 %v17909_v26, %s15587_s20  ;;  %5468 = vrot.lane.b32.xlu1 %v18059_v9, %s15585_s18  ;;  %v8077_v30 = vrot.slane %v8063_v42, %v15861_v18  ;;  %v8726_v7 = vcombine.low %v18306_v55, %v7823_v34  ;;  %v8727_v45 = vcombine.high %v18306_v55, %v7823_v34 }
0x136b   :  { %v8710_v54 = vcombine.low %v17909_v26, %v18304_v31  ;;  %v8711_v12 = vcombine.high %v17909_v26, %v18304_v31  ;;  %v8126_v20 = vcombine.low %v8070_v35, %v8086_v46  ;;  %v8127_v55 = vcombine.high %v8070_v35, %v8086_v46 }
0x136c   :  { %v9462_v42 = vrot.slane %v9454_v33, %v15881_v41  ;;  %v18416_v31 = vrot.slane %v14559_v5, %v15861_v18  ;;  %v18422_v34 = vrot.slane %v14561_v22, %v15861_v18  ;;  %v8142_v46 = vcombine.low %v8077_v30, %v8093_v8 }
0x136d   :  { %v8143_v35 = vcombine.high %v8077_v30, %v8093_v8  ;;  %v8734_v16 = vrot.slane %v8726_v7, %v15861_v18  ;;  %v8741_v33 = vrot.slane %v8727_v45, %v15861_v18  ;;  %v8725_v25 = vrot.slane %v8711_v12, %v15861_v18 }
0x136e   :  { %5382 = vrot.lane.b32.xlu0 %v18066_v51, %s15585_s18  ;;  %5376 = vrot.lane.b32.xlu1 %v18066_v51, %s15588_s0  ;;  %v8182_v44 = vcombine.low %v18356_v28, %v7821_v40  ;;  %v8166_v5 = vcombine.low %v17916_v3, %v7815_v14  ;;  %v18431_v2 = vrot.slane %v8126_v20, %v15881_v41 }
0x136f   :  { %v18434_v37 = vrot.slane %v8127_v55, %v15881_v41  ;;  %v18442_v6 = vrot.slane %v14563_v50, %v15861_v18  ;;  %v18448_v22 = vrot.slane %v14565_v62, %v15861_v18  ;;  %v8183_v8 = vcombine.high %v18356_v28, %v7821_v40 }
0x1370   :  { %v8167_v30 = vcombine.high %v17916_v3, %v7815_v14  ;;  %v8790_v12 = vcombine.low %v8725_v25, %v8741_v33  ;;  %v8791_v20 = vcombine.high %v8725_v25, %v8741_v33  ;;  %v8150_v55 = vrot.slane %v8142_v46, %v15881_v41 }
0x1371   :  { %v8157_v56 = vrot.slane %v8143_v35, %v15881_v41  ;;  %v8190_v53 = vrot.slane %v8182_v44, %v15861_v18  ;;  %v8174_v62 = vrot.slane %v8166_v5, %v15861_v18  ;;  %v14562_v28 = vcombine.high %v18431_v2, %v18434_v37 }
0x1372   :  { %5394 = vrot.lane.b32.xlu0 %v18066_v51, %s15586_s19  ;;  %7828 = vrot.lane.b32.xlu1 %v17909_v26, %s15589_s21  ;;  %v9318_v25 = vcombine.low %v18416_v31, %v18422_v34  ;;  %v8197_v40 = vrot.slane %v8183_v8, %v15861_v18  ;;  %v8181_v44 = vrot.slane %v8167_v30, %v15861_v18 }
0x1373   :  { %v9455_v14 = vcombine.high %v18330_v27, %v18342_v43  ;;  %v8798_v46 = vrot.slane %v8790_v12, %v15881_v41  ;;  %v8805_v35 = vrot.slane %v8791_v20, %v15881_v41  ;;  %v14564_v33 = vcombine.low %v8150_v55, %v8157_v56 }
0x1374   :  { %v8230_v5 = vcombine.low %v8174_v62, %v8190_v53  ;;  %v9326_v27 = vrot.slane %v9318_v25, %v15881_v41  ;;  %v8246_v8 = vcombine.low %v8181_v44, %v8197_v40  ;;  %v8247_v30 = vcombine.high %v8181_v44, %v8197_v40 }
0x1375   :  { %v20511_v40 = vcombine.low %v18371_v19, %v18374_v0 }
0x1376   :  { %7832 = vrot.lane.b32.xlu0 %v17916_v3, %s15586_s19  ;;  %7840 = vrot.lane.b32.xlu1 %v17909_v26, %s15590_s22  ;;  %v9494_v26 = vrot.slane %v9486_v23, %v15881_v41  ;;  %v8718_v23 = vrot.slane %v8710_v54, %v15861_v18 }
0x1377   :  { %v9437_v44 = vrot.slane %v20511_v40, %v15861_v18 }
0x1378   :  { %v18454_v7 = vcombine.low %v9462_v42, %v9494_v26  ;;  %v18456_v45 = vcombine.high %v9462_v42, %v9494_v26  ;;  %v8774_v54 = vcombine.low %v8718_v23, %v8734_v16  ;;  %v8775_v50 = vcombine.high %v8718_v23, %v8734_v16 }
0x1379   :  { %v9350_v16 = vcombine.low %v18442_v6, %v18448_v22  ;;  %v14566_v23 = vcombine.high %v8150_v55, %v8157_v56  ;;  %v14587_v55 = vcombine.low %v8798_v46, %v8805_v35  ;;  %v14589_v56 = vcombine.high %v8798_v46, %v8805_v35 }
0x137a   :  { %7844 = vrot.lane.b32.xlu0 %v17916_v3, %s15587_s20  ;;  %5388 = vrot.lane.b32.xlu1 %v18066_v51, %s15589_s21  ;;  %v8782_v42 = vrot.slane %v8774_v54, %v15881_v41  ;;  %v8789_v26 = vrot.slane %v8775_v50, %v15881_v41  ;;  %v9469_v54 = vrot.slane %v9455_v14, %v15881_v41 }
0x137b   :  { %v9358_v43 = vrot.slane %v9350_v16, %v15881_v41  ;;  %v20512_v14 = vcombine.high %v18371_v19, %v18374_v0  ;;  %v9285_v35 = vrot.slane %v14562_v28, %v15861_v18  ;;  %v9317_v19 = vrot.slane %v14566_v23, %v15861_v18 }
0x137c   :  { %v14583_v12 = vcombine.low %v8782_v42, %v8789_v26  ;;  %v14585_v20 = vcombine.high %v8782_v42, %v8789_v26  ;;  %v9702_v28 = vrot.slane %v14587_v55, %v15861_v18 }
0x137d   :  { %v18508_v25 = vcombine.low %v9326_v27, %v9358_v43  ;;  %v18510_v16 = vcombine.high %v9326_v27, %v9358_v43 }
0x137e   :  { %5406 = vrot.lane.b32.xlu0 %v18066_v51, %s15587_s20  ;;  %5400 = vrot.lane.b32.xlu1 %v18066_v51, %s15590_s22 }
0x1382   :  { %5480 = vrot.lane.b32.xlu0 %v18059_v9, %s15586_s19  ;;  %7826 = vrot.lane.b32.xlu1 %v17916_v3, %s15589_s21 }
0x1386   :  { %5414 = vrot.lane.b32.xlu0 %v18179_v57, %s15584_s17  ;;  %7838 = vrot.lane.b32.xlu1 %v17916_v3, %s15590_s22  ;;  %v14560_v3 = vcombine.low %v18431_v2, %v18434_v37  ;;  %v9487_v2 = vcombine.high %v18345_v49, %v18348_v52  ;;  %v8231_v37 = vcombine.high %v8174_v62, %v8190_v53 }
0x1387   :  { %v9319_v49 = vcombine.high %v18416_v31, %v18422_v34  ;;  %v9351_v52 = vcombine.high %v18442_v6, %v18448_v22  ;;  %v8238_v53 = vrot.slane %v8230_v5, %v15881_v41  ;;  %v20509_v34 = vcombine.low %v18363_v47, %v18366_v10 }
0x1388   :  { %v9501_v50 = vrot.slane %v9487_v2, %v15881_v41  ;;  %v8245_v31 = vrot.slane %v8231_v37, %v15881_v41  ;;  %v20510_v22 = vcombine.high %v18363_v47, %v18366_v10  ;;  %v9453_v2 = vrot.slane %v20512_v14, %v15861_v18 }
0x1389   :  { %v9405_v6 = vrot.slane %v20509_v34, %v15861_v18  ;;  %v8254_v47 = vrot.slane %v8246_v8, %v15881_v41  ;;  %v8261_v10 = vrot.slane %v8247_v30, %v15881_v41  ;;  %v9269_v46 = vrot.slane %v14560_v3, %v15861_v18 }
0x138a   :  { %5492 = vrot.lane.b32.xlu0 %v18059_v9, %s15587_s20  ;;  %5474 = vrot.lane.b32.xlu1 %v18059_v9, %s15589_s21  ;;  %v9421_v62 = vrot.slane %v20510_v22, %v15861_v18  ;;  %v18524_v42 = vcombine.low %v9469_v54, %v9501_v50  ;;  %v18526_v26 = vcombine.high %v9469_v54, %v9501_v50 }
0x138b   :  { %v9301_v5 = vrot.slane %v14564_v33, %v15861_v18  ;;  %v14575_v0 = vcombine.low %v8238_v53, %v8245_v31  ;;  %v14577_v37 = vcombine.high %v8238_v53, %v8245_v31  ;;  %v9502_v8 = vcombine.low %v9437_v44, %v9453_v2 }
0x138c   :  { %v9470_v27 = vcombine.low %v9405_v6, %v9421_v62  ;;  %v9471_v43 = vcombine.high %v9405_v6, %v9421_v62  ;;  %v9503_v30 = vcombine.high %v9437_v44, %v9453_v2  ;;  %v9670_v54 = vrot.slane %v14583_v12, %v15861_v18 }
0x138d   :  { %v9686_v50 = vrot.slane %v14585_v20, %v15861_v18  ;;  %v14579_v3 = vcombine.low %v8254_v47, %v8261_v10  ;;  %v14581_v34 = vcombine.high %v8254_v47, %v8261_v10  ;;  %v9718_v33 = vrot.slane %v14589_v56, %v15861_v18 }
0x138e   :  { %5426 = vrot.lane.b32.xlu0 %v18179_v57, %s15585_s18  ;;  %5420 = vrot.lane.b32.xlu1 %v18179_v57, %s15588_s0  ;;  %v9333_v23 = vrot.slane %v9319_v49, %v15881_v41  ;;  %v9365_v53 = vrot.slane %v9351_v52, %v15881_v41  ;;  %v9334_v31 = vcombine.low %v9269_v46, %v9285_v35 }
0x138f   :  { %v9366_v6 = vcombine.low %v9301_v5, %v9317_v19  ;;  %v9478_v22 = vrot.slane %v9470_v27, %v15881_v41  ;;  %v9485_v12 = vrot.slane %v9471_v43, %v15881_v41  ;;  %v9335_v20 = vcombine.high %v9269_v46, %v9285_v35 }
0x1390   :  { %v9367_v62 = vcombine.high %v9301_v5, %v9317_v19  ;;  %v9510_v40 = vrot.slane %v9502_v8, %v15881_v41  ;;  %v9517_v55 = vrot.slane %v9503_v30, %v15881_v41  ;;  %v9726_v56 = vcombine.low %v9670_v54, %v9686_v50 }
0x1391   :  { %v9534_v49 = vrot.slane %v14575_v0, %v15861_v18  ;;  %v9758_v52 = vcombine.low %v9702_v28, %v9718_v33  ;;  %v9550_v44 = vrot.slane %v14577_v37, %v15861_v18  ;;  %v9566_v14 = vrot.slane %v14579_v3, %v15861_v18 }
0x1392   :  { %7860 = vrot.lane.b32.xlu0 %v18232_v63, %s15588_s0  ;;  %5486 = vrot.lane.b32.xlu1 %v18059_v9, %s15590_s22  ;;  %v9582_v2 = vrot.slane %v14581_v34, %v15861_v18  ;;  %v18554_v46 = vcombine.low %v9333_v23, %v9365_v53  ;;  %v18556_v35 = vcombine.high %v9333_v23, %v9365_v53 }
0x1393   :  { %v9342_v5 = vrot.slane %v9334_v31, %v15881_v41  ;;  %v9374_v19 = vrot.slane %v9366_v6, %v15881_v41  ;;  %v9349_v0 = vrot.slane %v9335_v20, %v15881_v41  ;;  %v9381_v27 = vrot.slane %v9367_v62, %v15881_v41 }
0x1394   :  { %v9727_v43 = vcombine.high %v9670_v54, %v9686_v50  ;;  %v9759_v37 = vcombine.high %v9702_v28, %v9718_v33  ;;  %v18564_v8 = vcombine.low %v9478_v22, %v9510_v40  ;;  %v18566_v30 = vcombine.high %v9478_v22, %v9510_v40 }
0x1395   :  { %v18568_v3 = vcombine.low %v9485_v12, %v9517_v55  ;;  %v9734_v34 = vrot.slane %v9726_v56, %v15881_v41  ;;  %v9766_v23 = vrot.slane %v9758_v52, %v15881_v41  ;;  %v9590_v53 = vcombine.low %v9534_v49, %v9550_v44 }
0x1396   :  { %5438 = vrot.lane.b32.xlu0 %v18179_v57, %s15586_s19  ;;  %7854 = vrot.lane.b32.xlu1 %v18232_v63, %s15584_s17  ;;  %20513 = vst [vmem:[#allocation16_spill] sm:$0xff] %v18564_v8  ;;  %20514 = vst [vmem:[#allocation22_spill] sm:$0xff] %v18566_v30  ;;  %v9622_v31 = vcombine.low %v9566_v14, %v9582_v2  ;;  %v9591_v54 = vcombine.high %v9534_v49, %v9550_v44 }
0x1397   :  { %20515 = vst [vmem:[#allocation3_spill] sm:$0xff] %v18568_v3  ;;  %v18576_v6 = vcombine.low %v9342_v5, %v9374_v19  ;;  %v18578_v22 = vcombine.high %v9485_v12, %v9517_v55  ;;  %v18580_v62 = vcombine.high %v9342_v5, %v9374_v19  ;;  %v9741_v40 = vrot.slane %v9727_v43, %v15881_v41 }
0x1398   :  { %v9773_v56 = vrot.slane %v9759_v37, %v15881_v41  ;;  %v9623_v52 = vcombine.high %v9566_v14, %v9582_v2  ;;  %v18586_v49 = vcombine.low %v9349_v0, %v9381_v27  ;;  %v18592_v12 = vcombine.low %v9734_v34, %v9766_v23 }
0x1399   :  { %20516 = vst [vmem:[#allocation4_spill] sm:$0xff] %v18576_v6  ;;  %20517 = vst [vmem:[#allocation28_spill] sm:$0xff] %v18578_v22  ;;  %v9598_v55 = vrot.slane %v9590_v53, %v15881_v41  ;;  %v9630_v44 = vrot.slane %v9622_v31, %v15881_v41  ;;  %v9605_v14 = vrot.slane %v9591_v54, %v15881_v41 }
0x139a   :  { %7852 = vrot.lane.b32.xlu0 %v18235_v4, %s15584_s17  ;;  %5432 = vrot.lane.b32.xlu1 %v18179_v57, %s15589_s21  ;;  %20518 = vst [vmem:[#allocation7_spill] sm:$0xff] %v18580_v62  ;;  %20519 = vst [vmem:[#allocation8_spill] sm:$0xff] %v18586_v49  ;;  %v18603_v43 = vcombine.low %v9741_v40, %v9773_v56  ;;  %v18605_v37 = vcombine.high %v9741_v40, %v9773_v56 }
0x139b   :  { %20521 = vst [vmem:[#allocation23_spill] sm:$0xff] %v18592_v12  ;;  %v9637_v53 = vrot.slane %v9623_v52, %v15881_v41 }
0x139c   :  { %20523 = vst [vmem:[#allocation24_spill] sm:$0xff] %v18603_v43  ;;  %20524 = vst [vmem:[#allocation27_spill] sm:$0xff] %v18605_v37 }
0x139e   :  { %5450 = vrot.lane.b32.xlu0 %v18179_v57, %s15587_s20  ;;  %5444 = vrot.lane.b32.xlu1 %v18179_v57, %s15590_s22 }
0x13a2   :  { %7864 = vrot.lane.b32.xlu0 %v18235_v4, %s15585_s18  ;;  %7866 = vrot.lane.b32.xlu1 %v18232_v63, %s15585_s18 }
0x13a6   :  { %5506 = vrot.lane.b32.xlu0 %v18314_v59, %s15588_s0  ;;  %7858 = vrot.lane.b32.xlu1 %v18235_v4, %s15588_s0 }
0x13aa   :  { %5458 = vrot.lane.b32.xlu0 %v18350_v32, %s15584_s17  ;;  %5500 = vrot.lane.b32.xlu1 %v18314_v59, %s15584_s17 }
0x13ae   :  { %5470 = vrot.lane.b32.xlu0 %v18350_v32, %s15585_s18  ;;  %5464 = vrot.lane.b32.xlu1 %v18350_v32, %s15588_s0 }
0x13b2   :  { %7878 = vrot.lane.b32.xlu0 %v18232_v63, %s15586_s19  ;;  %5512 = vrot.lane.b32.xlu1 %v18314_v59, %s15585_s18 }
0x13b6   :  { %5482 = vrot.lane.b32.xlu0 %v18350_v32, %s15586_s19  ;;  %7872 = vrot.lane.b32.xlu1 %v18232_v63, %s15589_s21 }
0x13b8   :  { %v5375_v47 = vpop.permute.xlu0 %5374  ;;  %v5369_v10 = vpop.permute.xlu1 %5368 }
0x13b9   :  { %v5542_v50 = vcombine.low %v18015_v24, %v5375_v47  ;;  %v5543_v28 = vcombine.high %v18015_v24, %v5375_v47  ;;  %v18588_v24 = vcombine.high %v9349_v0, %v9381_v27  ;;  %v18601_v27 = vcombine.high %v9734_v34, %v9766_v23 }
0x13ba   :  { %7890 = vrot.lane.b32.xlu0 %v18232_v63, %s15587_s20  ;;  %5476 = vrot.lane.b32.xlu1 %v18350_v32, %s15589_s21  ;;  %v18614_v34 = vcombine.high %v9598_v55, %v9630_v44 }
0x13bb   :  { %20520 = vst [vmem:[#allocation30_spill] sm:$0xff] %v18588_v24  ;;  %v5550_v2 = vrot.slane %v5542_v50, %v15861_v18  ;;  %v5557_v47 = vrot.slane %v5543_v28, %v15861_v18  ;;  %20522 = vst [vmem:[#allocation25_spill] sm:$0xff] %v18601_v27 }
0x13bc   :  { %v5393_v33 = vpop.permute.xlu0 %5392  ;;  %v5381_v20 = vpop.permute.xlu1 %5380  ;;  %20526 = vst [vmem:[#allocation29_spill] sm:$0xff] %v18614_v34 }
0x13bd   :  { %v5558_v3 = vcombine.low %v5369_v10, %v5381_v20  ;;  %v5559_v30 = vcombine.high %v5369_v10, %v5381_v20 }
0x13be   :  { %5494 = vrot.lane.b32.xlu0 %v18350_v32, %s15587_s20  ;;  %5488 = vrot.lane.b32.xlu1 %v18350_v32, %s15590_s22 }
0x13bf   :  { %v5566_v10 = vrot.slane %v5558_v3, %v15861_v18  ;;  %v5573_v5 = vrot.slane %v5559_v30, %v15861_v18  ;;  %v18612_v30 = vcombine.low %v9598_v55, %v9630_v44 }
0x13c0   :  { %v5405_v19 = vpop.permute.xlu0 %5404  ;;  %v5387_v0 = vpop.permute.xlu1 %5386 }
0x13c1   :  { %v5606_v31 = vcombine.low %v5550_v2, %v5566_v10  ;;  %v5607_v54 = vcombine.high %v5550_v2, %v5566_v10  ;;  %v5622_v20 = vcombine.low %v5557_v47, %v5573_v5  ;;  %v5623_v50 = vcombine.high %v5557_v47, %v5573_v5  ;;  %20525 = vst [vmem:[#allocation26_spill] sm:$0xff] %v18612_v30 }
0x13c2   :  { %7876 = vrot.lane.b32.xlu0 %v18235_v4, %s15586_s19  ;;  %v5590_v3 = vcombine.low %v5393_v33, %v5405_v19  ;;  %v5591_v28 = vcombine.high %v5393_v33, %v5405_v19  ;;  %7884 = vrot.lane.b32.xlu1 %v18232_v63, %s15590_s22  ;;  %v18622_v5 = vcombine.low %v9605_v14, %v9637_v53 }
0x13c3   :  { %v5614_v23 = vrot.slane %v5606_v31, %v15881_v41  ;;  %v5621_v40 = vrot.slane %v5607_v54, %v15881_v41  ;;  %v5630_v56 = vrot.slane %v5622_v20, %v15881_v41  ;;  %v5637_v52 = vrot.slane %v5623_v50, %v15881_v41 }
0x13c4   :  { %v5419_v2 = vpop.permute.xlu0 %5418  ;;  %v5399_v10 = vpop.permute.xlu1 %5398  ;;  %20527 = vst [vmem:[#allocation32_spill] sm:$0xff] %v18622_v5  ;;  %v18624_v19 = vcombine.high %v9605_v14, %v9637_v53  ;;  %v5598_v54 = vrot.slane %v5590_v3, %v15861_v18  ;;  %v5605_v20 = vrot.slane %v5591_v28, %v15861_v18 }
0x13c5   :  { %v5678_v47 = vcombine.low %v18036_v58, %v5419_v2  ;;  %v5679_v33 = vcombine.high %v18036_v58, %v5419_v2  ;;  %v14479_v55 = vcombine.low %v5614_v23, %v5621_v40  ;;  %v14481_v44 = vcombine.high %v5614_v23, %v5621_v40 }
0x13c6   :  { %20528 = vst [vmem:[#allocation19_spill] sm:$0xff] %v18624_v19  ;;  %v14483_v37 = vcombine.low %v5630_v56, %v5637_v52  ;;  %v14485_v31 = vcombine.high %v5630_v56, %v5637_v52  ;;  %7888 = vrot.lane.b32.xlu0 %v18235_v4, %s15587_s20  ;;  %v5574_v50 = vcombine.low %v5387_v0, %v5399_v10 }
0x13c7   :  { %v5575_v43 = vcombine.high %v5387_v0, %v5399_v10  ;;  %7870 = vrot.lane.b32.xlu1 %v18235_v4, %s15589_s21  ;;  %v6638_v14 = vrot.slane %v14479_v55, %v15861_v18  ;;  %v6654_v53 = vrot.slane %v14481_v44, %v15861_v18  ;;  %v5686_v56 = vrot.slane %v5678_v47, %v15861_v18 }
0x13c8   :  { %v5437_v58 = vpop.permute.xlu0 %5436  ;;  %v6670_v23 = vrot.slane %v14483_v37, %v15861_v18  ;;  %v6686_v40 = vrot.slane %v14485_v31, %v15861_v18  ;;  %v5693_v3 = vrot.slane %v5679_v33, %v15861_v18  ;;  %v5582_v28 = vrot.slane %v5574_v50, %v15861_v18  ;;  %v5413_v52 = vpop.permute.xlu1 %5412 }
0x13c9   :  { %v5589_v0 = vrot.slane %v5575_v43, %v15861_v18  ;;  %v6694_v2 = vcombine.low %v6638_v14, %v6654_v53  ;;  %v6695_v55 = vcombine.high %v6638_v14, %v6654_v53 }
0x13ca   :  { %5502 = vrot.lane.b32.xlu0 %v18360_v11, %s15584_s17  ;;  %v6726_v10 = vcombine.low %v6670_v23, %v6686_v40  ;;  %v6727_v44 = vcombine.high %v6670_v23, %v6686_v40  ;;  %v5638_v19 = vcombine.low %v5582_v28, %v5598_v54  ;;  %v5639_v37 = vcombine.high %v5582_v28, %v5598_v54 }
0x13cb   :  { %v5654_v5 = vcombine.low %v5589_v0, %v5605_v20  ;;  %v5655_v31 = vcombine.high %v5589_v0, %v5605_v20  ;;  %7882 = vrot.lane.b32.xlu1 %v18235_v4, %s15590_s22  ;;  %v6702_v33 = vrot.slane %v6694_v2, %v15881_v41  ;;  %v18647_v50 = vrot.slane %v6695_v55, %v15881_v41 }
0x13cc   :  { %v5449_v47 = vpop.permute.xlu0 %5448  ;;  %v6734_v43 = vrot.slane %v6726_v10, %v15881_v41  ;;  %v18650_v34 = vrot.slane %v6727_v44, %v15881_v41  ;;  %v5646_v14 = vrot.slane %v5638_v19, %v15881_v41  ;;  %v5653_v54 = vrot.slane %v5639_v37, %v15881_v41  ;;  %v5425_v23 = vpop.permute.xlu1 %5424 }
0x13cd   :  { %v5662_v20 = vrot.slane %v5654_v5, %v15881_v41  ;;  %v5669_v53 = vrot.slane %v5655_v31, %v15881_v41  ;;  %v5726_v40 = vcombine.low %v5437_v58, %v5449_v47  ;;  %v5727_v28 = vcombine.high %v5437_v58, %v5449_v47 }
0x13ce   :  { %v5694_v0 = vcombine.low %v5413_v52, %v5425_v23  ;;  %v5695_v2 = vcombine.high %v5413_v52, %v5425_v23  ;;  %5514 = vrot.lane.b32.xlu0 %v18360_v11, %s15585_s18  ;;  %v14480_v10 = vcombine.low %v5646_v14, %v5653_v54  ;;  %v14482_v55 = vcombine.high %v5646_v14, %v5653_v54 }
0x13cf   :  { %v14484_v44 = vcombine.low %v5662_v20, %v5669_v53  ;;  %v14486_v30 = vcombine.high %v5662_v20, %v5669_v53  ;;  %5508 = vrot.lane.b32.xlu1 %v18360_v11, %s15588_s0  ;;  %v18661_v19 = vrot.slane %v5726_v40, %v15861_v18  ;;  %v18664_v5 = vrot.slane %v5727_v28, %v15861_v18 }
0x13d0   :  { %v5702_v58 = vrot.slane %v5694_v0, %v15861_v18  ;;  %v5709_v52 = vrot.slane %v5695_v2, %v15861_v18  ;;  %v5463_v37 = vpop.permute.xlu0 %5462  ;;  %v6758_v31 = vcombine.low %v6702_v33, %v6734_v43  ;;  %v6759_v47 = vcombine.high %v6702_v33, %v6734_v43  ;;  %v5431_v20 = vpop.permute.xlu1 %5430 }
0x13d1   :  { %v5814_v14 = vcombine.low %v18059_v9, %v5463_v37  ;;  %v5815_v54 = vcombine.high %v18059_v9, %v5463_v37  ;;  %v6645_v37 = vrot.slane %v14480_v10, %v15861_v18  ;;  %v6693_v9 = vrot.slane %v14486_v30, %v15861_v18 }
0x13d2   :  { %v5742_v53 = vcombine.low %v5686_v56, %v5702_v58  ;;  %v5743_v23 = vcombine.high %v5686_v56, %v5702_v58  ;;  %v5758_v27 = vcombine.low %v5693_v3, %v5709_v52  ;;  %v5759_v40 = vcombine.high %v5693_v3, %v5709_v52  ;;  %5524 = vrot.lane.b32.xlu0 %v18314_v59, %s15586_s19 }
0x13d3   :  { %14913 = vmatprep.mubr.msk.f32.mxu0 %vm36_vm0, %v6758_v31  ;;  %14920 = vmatprep.mubr.msk.f32.mxu1 %vm36_vm0, %v6759_v47  ;;  %v18675_v28 = vrot.slane %v5814_v14, %v15861_v18  ;;  %v18678_v33 = vrot.slane %v5815_v54, %v15861_v18  ;;  %v6661_v31 = vrot.slane %v14482_v55, %v15861_v18 }
0x13d4   :  { %v5750_v56 = vrot.slane %v5742_v53, %v15881_v41  ;;  %v5757_v3 = vrot.slane %v5743_v23, %v15881_v41  ;;  %v5766_v43 = vrot.slane %v5758_v27, %v15881_v41  ;;  %v5773_v0 = vrot.slane %v5759_v40, %v15881_v41  ;;  %5518 = vrot.lane.b32.xlu1 %v18314_v59, %s15589_s21  ;;  %v18688_v2 = vpop.permute.xlu0 %5370  ;;  %v5443_v58 = vpop.permute.xlu1 %5442 }
0x13d5   :  { %v6677_v47 = vrot.slane %v14484_v44, %v15861_v18  ;;  %v5710_v23 = vcombine.low %v5431_v20, %v5443_v58  ;;  %v5711_v40 = vcombine.high %v5431_v20, %v5443_v58  ;;  %v6710_v12 = vcombine.low %v6645_v37, %v6661_v31 }
0x13d6   :  { %v14495_v14 = vcombine.low %v5750_v56, %v5757_v3  ;;  %v14497_v54 = vcombine.high %v5750_v56, %v5757_v3  ;;  %v14499_v27 = vcombine.low %v5766_v43, %v5773_v0  ;;  %v14501_v53 = vcombine.high %v5766_v43, %v5773_v0  ;;  %5536 = vrot.lane.b32.xlu0 %v18314_v59, %s15587_s20 }
0x13d7   :  { %v5718_v20 = vrot.slane %v5710_v23, %v15861_v18  ;;  %v5725_v30 = vrot.slane %v5711_v40, %v15861_v18  ;;  %v18715_v43 = vrot.slane %v6710_v12, %v15881_v41  ;;  %v6742_v0 = vcombine.low %v6677_v47, %v6693_v9 }
0x13d8   :  { %v18699_v52 = vrot.slane %v14495_v14, %v15861_v18  ;;  %v18702_v10 = vrot.slane %v14497_v54, %v15861_v18  ;;  %v18705_v55 = vrot.slane %v14499_v27, %v15861_v18  ;;  %v18708_v44 = vrot.slane %v14501_v53, %v15861_v18  ;;  %5530 = vrot.lane.b32.xlu1 %v18314_v59, %s15590_s22  ;;  %v7835_v56 = vpop.permute.xlu0 %7834  ;;  %v5457_v3 = vpop.permute.xlu1 %5456 }
0x13d9   :  { %v6711_v58 = vcombine.high %v6645_v37, %v6661_v31  ;;  %v6743_v14 = vcombine.high %v6677_v47, %v6693_v9  ;;  %v5774_v53 = vcombine.low %v5718_v20, %v18661_v19  ;;  %v5775_v23 = vcombine.high %v5718_v20, %v18661_v19 }
0x13da   :  { %5526 = vrot.lane.b32.xlu0 %v18360_v11, %s15586_s19  ;;  %v6966_v54 = vcombine.low %v18699_v52, %v18702_v10  ;;  %v5790_v40 = vcombine.low %v5725_v30, %v18664_v5  ;;  %v5791_v12 = vcombine.high %v5725_v30, %v18664_v5  ;;  %v18730_v9 = vrot.slane %v6742_v0, %v15881_v41 }
0x13db   :  { %v18733_v37 = vrot.slane %v6711_v58, %v15881_v41  ;;  %v18736_v31 = vrot.slane %v6743_v14, %v15881_v41  ;;  %v5782_v19 = vrot.slane %v5774_v53, %v15881_v41  ;;  %v5789_v5 = vrot.slane %v5775_v23, %v15881_v41 }
0x13dc   :  { %5520 = vrot.lane.b32.xlu1 %v18360_v11, %s15589_s21  ;;  %v7847_v24 = vpop.permute.xlu0 %7846  ;;  %v18739_v47 = vrot.slane %v6966_v54, %v15881_v41  ;;  %v5798_v20 = vrot.slane %v5790_v40, %v15881_v41  ;;  %v5805_v30 = vrot.slane %v5791_v12, %v15881_v41  ;;  %v5469_v27 = vpop.permute.xlu1 %5468 }
0x13dd   :  { %v8758_v0 = vcombine.low %v7835_v56, %v7847_v24  ;;  %v8759_v49 = vcombine.high %v7835_v56, %v7847_v24  ;;  %v5830_v22 = vcombine.low %v5457_v3, %v5469_v27  ;;  %v5831_v58 = vcombine.high %v5457_v3, %v5469_v27 }
0x13de   :  { %5538 = vrot.lane.b32.xlu0 %v18360_v11, %s15587_s20  ;;  %v14496_v14 = vcombine.low %v5782_v19, %v5789_v5  ;;  %v14498_v32 = vcombine.high %v5782_v19, %v5789_v5  ;;  %v14500_v54 = vcombine.low %v5798_v20, %v5805_v30  ;;  %v14502_v62 = vcombine.high %v5798_v20, %v5805_v30 }
0x13df   :  { %v18748_v53 = vrot.slane %v8758_v0, %v15861_v18  ;;  %v18751_v23 = vrot.slane %v8759_v49, %v15861_v18  ;;  %v5838_v40 = vrot.slane %v5830_v22, %v15861_v18  ;;  %v5845_v12 = vrot.slane %v5831_v58, %v15861_v18 }
0x13e0   :  { %5532 = vrot.lane.b32.xlu1 %v18360_v11, %s15590_s22  ;;  %v5383_v24 = vpop.permute.xlu0 %5382  ;;  %v18758_v56 = vrot.slane %v14496_v14, %v15861_v18  ;;  %v18761_v3 = vrot.slane %v14498_v32, %v15861_v18  ;;  %v18764_v27 = vrot.slane %v14500_v54, %v15861_v18  ;;  %v18767_v49 = vrot.slane %v14502_v62, %v15861_v18  ;;  %v5377_v19 = vpop.permute.xlu1 %5376 }
0x13e1   :  { %v5878_v22 = vcombine.low %v18675_v28, %v5838_v40  ;;  %v5879_v5 = vcombine.high %v18675_v28, %v5838_v40  ;;  %v5894_v20 = vcombine.low %v18678_v33, %v5845_v12  ;;  %v5895_v30 = vcombine.high %v18678_v33, %v5845_v12 }
0x13e2   :  { %20529 = vst [vmem:[#allocation20_spill] sm:$0xff] %v18758_v56  ;;  %20530 = vst [vmem:[#allocation34_spill] sm:$0xff] %v18761_v3  ;;  %v6102_v0 = vcombine.low %v18688_v2, %v5383_v24  ;;  %v6103_v32 = vcombine.high %v18688_v2, %v5383_v24  ;;  %v6086_v58 = vcombine.low %v18066_v51, %v5377_v19 }
0x13e3   :  { %20531 = vst [vmem:[#allocation31_spill] sm:$0xff] %v18764_v27  ;;  %20532 = vst [vmem:[#allocation13_spill] sm:$0xff] %v18767_v49  ;;  %v6087_v14 = vcombine.high %v18066_v51, %v5377_v19  ;;  %v5886_v62 = vrot.slane %v5878_v22, %v15881_v41  ;;  %v5893_v54 = vrot.slane %v5879_v5, %v15881_v41 }
0x13e4   :  { %v5902_v11 = vrot.slane %v5894_v20, %v15881_v41  ;;  %v5909_v28 = vrot.slane %v5895_v30, %v15881_v41  ;;  %v18781_v40 = vpop.permute.xlu0 %5394  ;;  %v6110_v33 = vrot.slane %v6102_v0, %v15861_v18  ;;  %v6117_v12 = vrot.slane %v6103_v32, %v15861_v18  ;;  %v7829_v6 = vpop.permute.xlu1 %7828 }
0x13e5   :  { %v6094_v2 = vrot.slane %v6086_v58, %v15861_v18  ;;  %v6101_v24 = vrot.slane %v6087_v14, %v15861_v18  ;;  %v14511_v51 = vcombine.low %v5886_v62, %v5893_v54  ;;  %v14513_v19 = vcombine.high %v5886_v62, %v5893_v54 }
0x13e6   :  { %v14515_v22 = vcombine.low %v5902_v11, %v5909_v28  ;;  %v14517_v27 = vcombine.high %v5902_v11, %v5909_v28 }
0x13e7   :  { %v6150_v5 = vcombine.low %v6094_v2, %v6110_v33  ;;  %v6151_v49 = vcombine.high %v6094_v2, %v6110_v33  ;;  %v6166_v20 = vcombine.low %v6101_v24, %v6117_v12  ;;  %v6167_v56 = vcombine.high %v6101_v24, %v6117_v12 }
0x13e8   :  { %v18788_v30 = vrot.slane %v14511_v51, %v15861_v18  ;;  %v18791_v0 = vrot.slane %v14513_v19, %v15861_v18  ;;  %v18794_v32 = vrot.slane %v14515_v22, %v15861_v18  ;;  %v18797_v58 = vrot.slane %v14517_v27, %v15861_v18  ;;  %v7833_v14 = vpop.permute.xlu0 %7832  ;;  %v7841_v33 = vpop.permute.xlu1 %7840 }
0x13e9   :  { %v6158_v62 = vrot.slane %v6150_v5, %v15881_v41  ;;  %v6165_v11 = vrot.slane %v6151_v49, %v15881_v41  ;;  %v6174_v54 = vrot.slane %v6166_v20, %v15881_v41  ;;  %v6181_v28 = vrot.slane %v6167_v56, %v15881_v41 }
0x13ea   :  { %20533 = vst [vmem:[#allocation14_spill] sm:$0xff] %v18788_v30  ;;  %20534 = vst [vmem:[#allocation33_spill] sm:$0xff] %v18791_v0  ;;  %v8742_v12 = vcombine.low %v7829_v6, %v7841_v33  ;;  %v8743_v2 = vcombine.high %v7829_v6, %v7841_v33 }
0x13eb   :  { %20535 = vst [vmem:[#allocation35_spill] sm:$0xff] %v18794_v32  ;;  %20536 = vst [vmem:[#allocation5_spill] sm:$0xff] %v18797_v58  ;;  %v14487_v27 = vcombine.low %v6158_v62, %v6165_v11  ;;  %v14489_v19 = vcombine.high %v6158_v62, %v6165_v11  ;;  %v14491_v22 = vcombine.low %v6174_v54, %v6181_v28 }
0x13ec   :  { %v14493_v32 = vcombine.high %v6174_v54, %v6181_v28  ;;  %v8750_v5 = vrot.slane %v8742_v12, %v15861_v18  ;;  %v8757_v49 = vrot.slane %v8743_v2, %v15861_v18  ;;  %v7845_v20 = vpop.permute.xlu0 %7844  ;;  %v5389_v11 = vpop.permute.xlu1 %5388 }
0x13ed   :  { %v6774_v33 = vrot.slane %v14487_v27, %v15861_v18  ;;  %v6790_v24 = vrot.slane %v14489_v19, %v15861_v18  ;;  %v6806_v51 = vrot.slane %v14491_v22, %v15861_v18  ;;  %v8215_v8 = vcombine.high %v7833_v14, %v7845_v20 }
0x13ee   :  { %v6822_v62 = vrot.slane %v14493_v32, %v15861_v18  ;;  %v8806_v54 = vcombine.low %v8750_v5, %v18748_v53  ;;  %v8807_v28 = vcombine.high %v8750_v5, %v18748_v53  ;;  %v8822_v12 = vcombine.low %v8757_v49, %v18751_v23 }
0x13ef   :  { %v8823_v2 = vcombine.high %v8757_v49, %v18751_v23  ;;  %v6830_v56 = vcombine.low %v6774_v33, %v6790_v24  ;;  %v6831_v58 = vcombine.high %v6774_v33, %v6790_v24  ;;  %v8214_v5 = vcombine.low %v7833_v14, %v7845_v20 }
0x13f0   :  { %v6862_v6 = vcombine.low %v6806_v51, %v6822_v62  ;;  %v6863_v30 = vcombine.high %v6806_v51, %v6822_v62  ;;  %v8814_v27 = vrot.slane %v8806_v54, %v15881_v41  ;;  %v8821_v19 = vrot.slane %v8807_v28, %v15881_v41  ;;  %v5407_v0 = vpop.permute.xlu0 %5406  ;;  %v5401_v23 = vpop.permute.xlu1 %5400 }
0x13f1   :  { %v8830_v22 = vrot.slane %v8822_v12, %v15881_v41  ;;  %v8837_v32 = vrot.slane %v8823_v2, %v15881_v41  ;;  %v6838_v3 = vrot.slane %v6830_v56, %v15881_v41  ;;  %v18828_v62 = vrot.slane %v8214_v5, %v15861_v18 }
0x13f2   :  { %v6870_v53 = vrot.slane %v6862_v6, %v15881_v41  ;;  %v14584_v49 = vcombine.low %v8814_v27, %v8821_v19  ;;  %v14586_v24 = vcombine.high %v8814_v27, %v8821_v19  ;;  %v18831_v54 = vrot.slane %v8215_v8, %v15861_v18 }
0x13f3   :  { %v14588_v33 = vcombine.low %v8830_v22, %v8837_v32  ;;  %v14590_v51 = vcombine.high %v8830_v22, %v8837_v32  ;;  %v6134_v28 = vcombine.low %v18781_v40, %v5407_v0  ;;  %v6135_v12 = vcombine.high %v18781_v40, %v5407_v0 }
0x13f4   :  { %v18836_v56 = vrot.slane %v14584_v49, %v15861_v18  ;;  %v18839_v14 = vrot.slane %v14586_v24, %v15861_v18  ;;  %v18847_v2 = vpop.permute.xlu0 %5480  ;;  %v6118_v19 = vcombine.low %v5389_v11, %v5401_v23  ;;  %v6119_v40 = vcombine.high %v5389_v11, %v5401_v23  ;;  %v7827_v0 = vpop.permute.xlu1 %7826 }
0x13f5   :  { %v18842_v20 = vrot.slane %v14588_v33, %v15861_v18  ;;  %v18845_v6 = vrot.slane %v14590_v51, %v15861_v18  ;;  %v6142_v8 = vrot.slane %v6134_v28, %v15861_v18  ;;  %v6149_v27 = vrot.slane %v6135_v12, %v15861_v18 }
0x13f6   :  { %v6894_v22 = vcombine.low %v6838_v3, %v6870_v53  ;;  %v6895_v32 = vcombine.high %v6838_v3, %v6870_v53  ;;  %v6845_v5 = vrot.slane %v6831_v58, %v15881_v41  ;;  %v6877_v49 = vrot.slane %v6863_v30, %v15881_v41 }
0x13f7   :  { %v6126_v24 = vrot.slane %v6118_v19, %v15861_v18  ;;  %v6133_v33 = vrot.slane %v6119_v40, %v15861_v18  ;;  %v20537_v51 = vcombine.low %v18705_v55, %v18708_v44 }
0x13f8   :  { %14914 = vmatmul.mubr.msk.f32.vlgmr.msra.gmra.mxu0 %vm36_vm0, %v6894_v22  ;;  %14921 = vmatmul.mubr.msk.f32.vlgmr.msra.gmra.mxu1 %vm36_vm0, %v6895_v32  ;;  %v18865_v3 = vpop.permute.xlu0 %5414  ;;  %v6896_v30 = vcombine.low %v6845_v5, %v6877_v49  ;;  %v6897_v58 = vcombine.high %v6845_v5, %v6877_v49 }
0x13f9   :  { %v18859_v28 = vrot.slane %v20537_v51, %v15881_v41  ;;  %v6182_v23 = vcombine.low %v6126_v24, %v6142_v8  ;;  %v6183_v12 = vcombine.high %v6126_v24, %v6142_v8  ;;  %v6198_v19 = vcombine.low %v6133_v33, %v6149_v27  ;;  %14924 = vmatpush3.xpose.msk.msra.mxu0 %vm36_vm0, %v17988_v38  ;;  %v7839_v51 = vpop.permute.xlu1 %7838 }
0x13fa   :  { %v6199_v40 = vcombine.high %v6133_v33, %v6149_v27  ;;  %14931 = vmatpush3.xpose.msk.msra.mxu1 %vm36_vm0, %v17990_v61  ;;  %14925 = vmatprep.subr.msk.mxu0 %vm36_vm0, %v18002_v29  ;;  %v8198_v22 = vcombine.low %v7827_v0, %v7839_v51  ;;  %v8199_v32 = vcombine.high %v7827_v0, %v7839_v51 }
0x13fb   :  { %v7030_v5 = vcombine.low %v18739_v47, %v18859_v28  ;;  %v6190_v49 = vrot.slane %v6182_v23, %v15881_v41  ;;  %v6197_v8 = vrot.slane %v6183_v12, %v15881_v41  ;;  %v6206_v27 = vrot.slane %v6198_v19, %v15881_v41  ;;  %14932 = vmatprep.subr.msk.mxu1 %vm36_vm0, %v18004_v13 }
0x13fc   :  { %v6213_v38 = vrot.slane %v6199_v40, %v15881_v41  ;;  %v20538_v24 = vcombine.low %v18647_v50, %v18650_v34  ;;  %v20539_v61 = vcombine.high %v18647_v50, %v18650_v34  ;;  %v8206_v0 = vrot.slane %v8198_v22, %v15861_v18  ;;  %v5493_v23 = vpop.permute.xlu0 %5492 }
0x13fd   :  { %v8213_v33 = vrot.slane %v8199_v32, %v15861_v18  ;;  %v14488_v19 = vcombine.low %v6190_v49, %v6197_v8  ;;  %v14490_v40 = vcombine.high %v6190_v49, %v6197_v8  ;;  %14926 = vmatpush3.xpose.msk.msra.mxu0 %vm36_vm0, %v18002_v29  ;;  %v18897_v53 = vpop.permute.xlu1 %5474 }
0x13fe   :  { %14927 = vmatprep.mubr.msk.f32.mxu0 %vm36_vm0, %v20538_v24  ;;  %14934 = vmatprep.mubr.msk.f32.mxu1 %vm36_vm0, %v20539_v61  ;;  %v14492_v51 = vcombine.low %v6206_v27, %v6213_v38  ;;  %v14494_v24 = vcombine.high %v6206_v27, %v6213_v38  ;;  %v8262_v34 = vcombine.low %v8206_v0, %v18828_v62 }
0x13ff   :  { %14933 = vmatpush3.xpose.msk.msra.mxu1 %vm36_vm0, %v18004_v13  ;;  %14937 = vmatprep.subr.msk.mxu0 %vm36_vm0, %v18310_v15  ;;  %v8263_v50 = vcombine.high %v8206_v0, %v18828_v62  ;;  %v8278_v22 = vcombine.low %v8213_v33, %v18831_v54  ;;  %v18907_v32 = vrot.slane %v14488_v19, %v15861_v18 }
0x1400   :  { %v18910_v49 = vrot.slane %v14490_v40, %v15861_v18  ;;  %v18913_v29 = vrot.slane %v14492_v51, %v15861_v18  ;;  %v18916_v13 = vrot.slane %v14494_v24, %v15861_v18  ;;  %14944 = vmatprep.subr.msk.mxu1 %vm36_vm0, %v18312_v1  ;;  %v8270_v8 = vrot.slane %v8262_v34, %v15881_v41  ;;  %v5427_v61 = vpop.permute.xlu0 %5426 }
0x1401   :  { %v8277_v62 = vrot.slane %v8263_v50, %v15881_v41  ;;  %v8279_v27 = vcombine.high %v8213_v33, %v18831_v54  ;;  %v8286_v38 = vrot.slane %v8278_v22, %v15881_v41  ;;  %14928 = vmatmul.mubr.msk.f32.vlgmr.msra.gmra.mxu0 %vm36_vm0, %v6896_v30  ;;  %v5421_v54 = vpop.permute.xlu1 %5420  ;;  %v20540_v34 = vcombine.low %v18715_v43, %v18730_v9 }
0x1402   :  { %v6846_v0 = vcombine.low %v18907_v32, %v18910_v49  ;;  %v6847_v19 = vcombine.high %v18907_v32, %v18910_v49  ;;  %v6878_v40 = vcombine.low %v18913_v29, %v18916_v13  ;;  %v6879_v51 = vcombine.high %v18913_v29, %v18916_v13  ;;  %14935 = vmatmul.mubr.msk.f32.vlgmr.msra.gmra.mxu1 %vm36_vm0, %v6897_v58 }
0x1403   :  { %v8293_v33 = vrot.slane %v8279_v27, %v15881_v41  ;;  %v14576_v24 = vcombine.low %v8270_v8, %v8277_v62  ;;  %v14578_v30 = vcombine.high %v8270_v8, %v8277_v62  ;;  %14938 = vmatpush3.xpose.msk.msra.mxu0 %vm36_vm0, %v18310_v15  ;;  %14941 = vmatprep.mubr.msk.f32.mxu0 %vm36_vm0, %v20540_v34 }
0x1404   :  { %14945 = vmatpush3.xpose.msk.msra.mxu1 %vm36_vm0, %v18312_v1  ;;  %v20541_v50 = vcombine.high %v18715_v43, %v18730_v9  ;;  %v5862_v58 = vcombine.low %v18847_v2, %v5493_v23  ;;  %v5863_v22 = vcombine.high %v18847_v2, %v5493_v23  ;;  %v6238_v8 = vcombine.low %v18865_v3, %v5427_v61  ;;  %v7861_v1 = vpop.permute.xlu0 %7860 }
0x1405   :  { %v18951_v15 = vrot.slane %v14576_v24, %v15861_v18  ;;  %v18954_v62 = vrot.slane %v14578_v30, %v15861_v18  ;;  %v14580_v27 = vcombine.low %v8286_v38, %v8293_v33  ;;  %v14582_v34 = vcombine.high %v8286_v38, %v8293_v33  ;;  %14939 = vmatprep.subr.msk.mxu0 %vm36_vm0, %v18324_v39  ;;  %v5487_v24 = vpop.permute.xlu1 %5486 }
0x1406   :  { %14948 = vmatprep.mubr.msk.f32.mxu1 %vm36_vm0, %v20541_v50  ;;  %v5870_v43 = vrot.slane %v5862_v58, %v15861_v18  ;;  %v18960_v9 = vrot.slane %v5863_v22, %v15861_v18  ;;  %14946 = vmatprep.subr.msk.mxu1 %vm36_vm0, %v18326_v17  ;;  %v6239_v2 = vcombine.high %v18865_v3, %v5427_v61 }
0x1407   :  { %v6246_v23 = vrot.slane %v6238_v8, %v15861_v18  ;;  %v18967_v30 = vrot.slane %v14580_v27, %v15861_v18  ;;  %v18970_v38 = vrot.slane %v14582_v34, %v15861_v18  ;;  %14940 = vmatpush3.xpose.msk.msra.mxu0 %vm36_vm0, %v18324_v39  ;;  %v6222_v33 = vcombine.low %v18179_v57, %v5421_v54 }
0x1408   :  { %v6223_v50 = vcombine.high %v18179_v57, %v5421_v54  ;;  %14947 = vmatpush3.xpose.msk.msra.mxu1 %vm36_vm0, %v18326_v17  ;;  %v6253_v3 = vrot.slane %v6239_v2, %v15861_v18  ;;  %14951 = vmatprep.subr.msk.mxu0 %vm36_vm0, %v18358_v48  ;;  %v6854_v61 = vrot.slane %v6846_v0, %v15881_v41  ;;  %v18989_v54 = vpop.permute.xlu0 %5438 }
0x1409   :  { %v6886_v58 = vrot.slane %v6878_v40, %v15881_v41  ;;  %14958 = vmatprep.subr.msk.mxu1 %vm36_vm0, %v18368_v21  ;;  %v6230_v39 = vrot.slane %v6222_v33, %v15861_v18  ;;  %v8846_v57 = vcombine.low %v18232_v63, %v7861_v1  ;;  %v8847_v17 = vcombine.high %v18232_v63, %v7861_v1  ;;  %v18993_v40 = vpop.permute.xlu1 %7854 }
0x140a   :  { %v6237_v22 = vrot.slane %v6223_v50, %v15861_v18  ;;  %v5846_v34 = vcombine.low %v18897_v53, %v5487_v24  ;;  %v5847_v0 = vcombine.high %v18897_v53, %v5487_v24 }
0x140b   :  { %v6898_v8 = vcombine.low %v6854_v61, %v6886_v58  ;;  %v6899_v27 = vcombine.high %v6854_v61, %v6886_v58  ;;  %v6286_v2 = vcombine.low %v6230_v39, %v6246_v23  ;;  %v6287_v11 = vcombine.high %v6230_v39, %v6246_v23 }
0x140c   :  { %v6302_v12 = vcombine.low %v6237_v22, %v6253_v3  ;;  %v6303_v33 = vcombine.high %v6237_v22, %v6253_v3  ;;  %v18998_v63 = vrot.slane %v8846_v57, %v15861_v18  ;;  %v19001_v1 = vrot.slane %v8847_v17, %v15861_v18  ;;  %v19010_v61 = vpop.permute.xlu0 %7852 }
0x140d   :  { %14942 = vmatmul.mubr.msk.f32.vlgmr.msra.gmra.mxu0 %vm36_vm0, %v6898_v8  ;;  %14949 = vmatmul.mubr.msk.f32.vlgmr.msra.gmra.mxu1 %vm36_vm0, %v6899_v27  ;;  %v5854_v50 = vrot.slane %v5846_v34, %v15861_v18  ;;  %v6294_v53 = vrot.slane %v6286_v2, %v15881_v41  ;;  %v6301_v24 = vrot.slane %v6287_v11, %v15881_v41  ;;  %v5433_v11 = vpop.permute.xlu1 %5432 }
0x140e   :  { %v6310_v23 = vrot.slane %v6302_v12, %v15881_v41  ;;  %v6317_v3 = vrot.slane %v6303_v33, %v15881_v41  ;;  %14952 = vmatpush3.xpose.msk.msra.mxu0 %vm36_vm0, %v18358_v48  ;;  %14959 = vmatpush3.xpose.msk.msra.mxu1 %vm36_vm0, %v18368_v21  ;;  %v5861_v58 = vrot.slane %v5847_v0, %v15861_v18 }
0x140f   :  { %14953 = vmatprep.subr.msk.mxu0 %vm36_vm0, %v18382_v60  ;;  %v5910_v39 = vcombine.low %v5854_v50, %v5870_v43  ;;  %v5911_v22 = vcombine.high %v5854_v50, %v5870_v43  ;;  %v14503_v57 = vcombine.low %v6294_v53, %v6301_v24  ;;  %v14505_v12 = vcombine.high %v6294_v53, %v6301_v24 }
0x1410   :  { %v14507_v17 = vcombine.low %v6310_v23, %v6317_v3  ;;  %v14509_v8 = vcombine.high %v6310_v23, %v6317_v3  ;;  %v20542_v48 = vcombine.low %v18733_v37, %v18736_v31  ;;  %14960 = vmatprep.subr.msk.mxu1 %vm36_vm0, %v18384_v36  ;;  %v20543_v21 = vcombine.high %v18733_v37, %v18736_v31  ;;  %v5451_v37 = vpop.permute.xlu0 %5450 }
0x1411   :  { %v5918_v43 = vrot.slane %v5910_v39, %v15881_v41  ;;  %v5925_v27 = vrot.slane %v5911_v22, %v15881_v41  ;;  %v5926_v34 = vcombine.low %v5861_v58, %v18960_v9  ;;  %v19031_v0 = vrot.slane %v14503_v57, %v15861_v18  ;;  %v5445_v3 = vpop.permute.xlu1 %5444 }
0x1412   :  { %14955 = vmatprep.mubr.msk.f32.mxu0 %vm36_vm0, %v20542_v48  ;;  %14962 = vmatprep.mubr.msk.f32.mxu1 %vm36_vm0, %v20543_v21  ;;  %v19034_v2 = vrot.slane %v14505_v12, %v15861_v18  ;;  %v19037_v33 = vrot.slane %v14507_v17, %v15861_v18  ;;  %v19040_v50 = vrot.slane %v14509_v8, %v15861_v18 }
0x1413   :  { %14954 = vmatpush3.xpose.msk.msra.mxu0 %vm36_vm0, %v18382_v60  ;;  %v5927_v31 = vcombine.high %v5861_v58, %v18960_v9  ;;  %v5934_v53 = vrot.slane %v5926_v34, %v15881_v41  ;;  %v14512_v24 = vcombine.low %v5918_v43, %v5925_v27  ;;  %v14514_v23 = vcombine.high %v5918_v43, %v5925_v27 }
0x1414   :  { %14961 = vmatpush3.xpose.msk.msra.mxu1 %vm36_vm0, %v18384_v36  ;;  %v7102_v39 = vcombine.low %v19031_v0, %v19034_v2  ;;  %v7103_v22 = vcombine.high %v19031_v0, %v19034_v2  ;;  %v7134_v60 = vcombine.low %v19037_v33, %v19040_v50  ;;  %14965 = vmatprep.subr.msk.mxu0 %vm36_vm0, %v18454_v7 }
0x1415   :  { %v5941_v58 = vrot.slane %v5927_v31, %v15881_v41  ;;  %v19060_v36 = vrot.slane %v14512_v24, %v15861_v18  ;;  %v19063_v57 = vrot.slane %v14514_v23, %v15861_v18  ;;  %14972 = vmatprep.subr.msk.mxu1 %vm36_vm0, %v18456_v45  ;;  %v6861_v12 = vrot.slane %v6847_v19, %v15881_v41  ;;  %v7865_v24 = vpop.permute.xlu0 %7864 }
0x1416   :  { %v6893_v17 = vrot.slane %v6879_v51, %v15881_v41  ;;  %v6270_v8 = vcombine.low %v18989_v54, %v5451_v37  ;;  %v6271_v48 = vcombine.high %v18989_v54, %v5451_v37  ;;  %v6254_v21 = vcombine.low %v5433_v11, %v5445_v3  ;;  %v7867_v54 = vpop.permute.xlu1 %7866 }
0x1417   :  { %v14516_v43 = vcombine.low %v5934_v53, %v5941_v58  ;;  %v14518_v27 = vcombine.high %v5934_v53, %v5941_v58  ;;  %v6255_v34 = vcombine.high %v5433_v11, %v5445_v3  ;;  %v7110_v31 = vrot.slane %v7102_v39, %v15881_v41 }
0x1418   :  { %v6900_v23 = vcombine.low %v6861_v12, %v6893_v17  ;;  %v6901_v9 = vcombine.high %v6861_v12, %v6893_v17  ;;  %v6278_v32 = vrot.slane %v6270_v8, %v15861_v18  ;;  %v6285_v49 = vrot.slane %v6271_v48, %v15861_v18 }
0x1419   :  { %v19081_v29 = vrot.slane %v14516_v43, %v15861_v18  ;;  %v19084_v13 = vrot.slane %v14518_v27, %v15861_v18  ;;  %v6262_v19 = vrot.slane %v6254_v21, %v15861_v18  ;;  %v6269_v51 = vrot.slane %v6255_v34, %v15861_v18  ;;  %v5507_v21 = vpop.permute.xlu0 %5506 }
0x141a   :  { %14956 = vmatmul.mubr.msk.f32.vlgmr.msra.gmra.mxu0 %vm36_vm0, %v6900_v23  ;;  %14963 = vmatmul.mubr.msk.f32.vlgmr.msra.gmra.mxu1 %vm36_vm0, %v6901_v9  ;;  %v7142_v11 = vrot.slane %v7134_v60, %v15881_v41  ;;  %v8318_v37 = vcombine.low %v19010_v61, %v7865_v24  ;;  %v8319_v53 = vcombine.high %v19010_v61, %v7865_v24  ;;  %v7859_v23 = vpop.permute.xlu1 %7858 }
0x141b   :  { %14966 = vmatpush3.xpose.msk.msra.mxu0 %vm36_vm0, %v18454_v7  ;;  %14969 = vmatprep.mubr.msk.f32.mxu0 %vm36_vm0, %v7030_v5  ;;  %v6318_v3 = vcombine.low %v6262_v19, %v6278_v32  ;;  %v6319_v39 = vcombine.high %v6262_v19, %v6278_v32  ;;  %v6334_v58 = vcombine.low %v6269_v51, %v6285_v49 }
0x141c   :  { %14973 = vmatpush3.xpose.msk.msra.mxu1 %vm36_vm0, %v18456_v45  ;;  %v20544_v60 = vcombine.high %v18739_v47, %v18859_v28  ;;  %v6335_v61 = vcombine.high %v6269_v51, %v6285_v49  ;;  %v7166_v9 = vcombine.low %v7110_v31, %v7142_v11  ;;  %v7167_v12 = vcombine.high %v7110_v31, %v7142_v11 }
0x141d   :  { %14967 = vmatprep.subr.msk.mxu0 %vm36_vm0, %v18508_v25  ;;  %14974 = vmatprep.subr.msk.mxu1 %vm36_vm0, %v18510_v16  ;;  %v6326_v7 = vrot.slane %v6318_v3, %v15881_v41  ;;  %v6333_v5 = vrot.slane %v6319_v39, %v15881_v41  ;;  %v6342_v45 = vrot.slane %v6334_v58, %v15881_v41  ;;  %v19169_v58 = vpop.permute.xlu0 %5458 }
0x141e   :  { %14976 = vmatprep.mubr.msk.f32.mxu1 %vm36_vm0, %v20544_v60  ;;  %v6349_v17 = vrot.slane %v6335_v61, %v15881_v41  ;;  %v19114_v47 = vrot.slane %v8318_v37, %v15861_v18  ;;  %v19117_v28 = vrot.slane %v8319_v53, %v15861_v18  ;;  %v20545_v8 = vcombine.high %v18699_v52, %v18702_v10 }
0x141f   :  { %14968 = vmatpush3.xpose.msk.msra.mxu0 %vm36_vm0, %v18508_v25  ;;  %v14504_v43 = vcombine.low %v6326_v7, %v6333_v5  ;;  %v14506_v27 = vcombine.high %v6326_v7, %v6333_v5  ;;  %v20546_v34 = vcombine.high %v18705_v55, %v18708_v44  ;;  %v8862_v24 = vcombine.low %v18993_v40, %v7867_v54 }
0x1420   :  { %v6981_v48 = vrot.slane %v20545_v8, %v15881_v41  ;;  %14975 = vmatpush3.xpose.msk.msra.mxu1 %vm36_vm0, %v18510_v16  ;;  %14979 = vmatprep.subr.msk.mxu0 %vm36_vm0, %v18524_v42  ;;  %v14508_v52 = vcombine.low %v6342_v45, %v6349_v17  ;;  %v14510_v10 = vcombine.high %v6342_v45, %v6349_v17  ;;  %v20547_v8 = vld [vmem:[#allocation16_spill] sm:$0xff] }
0x1421   :  { %v7013_v31 = vrot.slane %v20546_v34, %v15881_v41  ;;  %v8863_v25 = vcombine.high %v18993_v40, %v7867_v54  ;;  %14986 = vmatprep.subr.msk.mxu1 %vm36_vm0, %v18526_v26  ;;  %v19138_v32 = vrot.slane %v14504_v43, %v15861_v18  ;;  %v19141_v55 = vrot.slane %v14506_v27, %v15861_v18  ;;  %v20548_v34 = vld [vmem:[#allocation22_spill] sm:$0xff]  ;;  %v5471_v0 = vpop.permute.xlu0 %5470 }
0x1422   :  { %v19144_v16 = vrot.slane %v14508_v52, %v15861_v18  ;;  %v19147_v19 = vrot.slane %v14510_v10, %v15861_v18  ;;  %14970 = vmatmul.mubr.msk.f32.vlgmr.msra.gmra.mxu0 %vm36_vm0, %v7166_v9  ;;  %v8870_v40 = vrot.slane %v8862_v24, %v15861_v18  ;;  %v5950_v37 = vcombine.low %v18314_v59, %v5507_v21  ;;  %v19177_v9 = vpop.permute.xlu1 %5500 }
0x1423   :  { %v7032_v44 = vcombine.low %v6981_v48, %v7013_v31  ;;  %v7033_v49 = vcombine.high %v6981_v48, %v7013_v31  ;;  %v8877_v51 = vrot.slane %v8863_v25, %v15861_v18  ;;  %v7118_v54 = vcombine.low %v19138_v32, %v19141_v55  ;;  %14977 = vmatmul.mubr.msk.f32.vlgmr.msra.gmra.mxu1 %vm36_vm0, %v7167_v12 }
0x1424   :  { %v7119_v11 = vcombine.high %v19138_v32, %v19141_v55  ;;  %14980 = vmatpush3.xpose.msk.msra.mxu0 %vm36_vm0, %v18524_v42  ;;  %v7150_v53 = vcombine.low %v19144_v16, %v19147_v19  ;;  %v7151_v3 = vcombine.high %v19144_v16, %v19147_v19  ;;  %14987 = vmatpush3.xpose.msk.msra.mxu1 %vm36_vm0, %v18526_v26 }
0x1425   :  { %14981 = vmatprep.subr.msk.mxu0 %vm36_vm0, %v18554_v46  ;;  %v8910_v39 = vcombine.low %v18998_v63, %v8870_v40  ;;  %14983 = vmatprep.mubr.msk.f32.mxu0 %vm36_vm0, %v7032_v44  ;;  %v8911_v42 = vcombine.high %v18998_v63, %v8870_v40  ;;  %v8926_v60 = vcombine.low %v19001_v1, %v8877_v51 }
0x1426   :  { %14988 = vmatprep.subr.msk.mxu1 %vm36_vm0, %v18556_v35  ;;  %v8927_v61 = vcombine.high %v19001_v1, %v8877_v51  ;;  %14990 = vmatprep.mubr.msk.f32.mxu1 %vm36_vm0, %v7033_v49  ;;  %v5951_v12 = vcombine.high %v18314_v59, %v5507_v21  ;;  %v19183_v7 = vrot.slane %v5950_v37, %v15861_v18  ;;  %v5465_v44 = vpop.permute.xlu1 %5464  ;;  %v20550_v37 = vld [vmem:[#allocation34_spill] sm:$0xff] }
0x1427   :  { %v8918_v26 = vrot.slane %v8910_v39, %v15881_v41  ;;  %v8302_v5 = vcombine.low %v18235_v4, %v7859_v23  ;;  %v8925_v45 = vrot.slane %v8911_v42, %v15881_v41  ;;  %v8934_v63 = vrot.slane %v8926_v60, %v15881_v41  ;;  %v20551_v39 = vld [vmem:[#allocation20_spill] sm:$0xff]  ;;  %v20552_v60 = vld [vmem:[#allocation13_spill] sm:$0xff] }
0x1428   :  { %v8941_v17 = vrot.slane %v8927_v61, %v15881_v41  ;;  %14982 = vmatpush3.xpose.msk.msra.mxu0 %vm36_vm0, %v18554_v46  ;;  %v8303_v1 = vcombine.high %v18235_v4, %v7859_v23  ;;  %14989 = vmatpush3.xpose.msk.msra.mxu1 %vm36_vm0, %v18556_v35  ;;  %v19195_v59 = vrot.slane %v5951_v12, %v15861_v18  ;;  %v20553_v61 = vld [vmem:[#allocation31_spill] sm:$0xff] }
0x1429   :  { %14993 = vmatprep.subr.msk.mxu0 %vm36_vm0, %v20547_v8  ;;  %v8310_v48 = vrot.slane %v8302_v5, %v15861_v18  ;;  %v7117_v21 = vrot.slane %v7103_v22, %v15881_v41  ;;  %v14599_v43 = vcombine.low %v8918_v26, %v8925_v45  ;;  %v14601_v46 = vcombine.high %v8918_v26, %v8925_v45 }
0x142a   :  { %v14603_v27 = vcombine.low %v8934_v63, %v8941_v17  ;;  %v14605_v4 = vcombine.high %v8934_v63, %v8941_v17  ;;  %15000 = vmatprep.subr.msk.mxu1 %vm36_vm0, %v20548_v34  ;;  %v8317_v35 = vrot.slane %v8303_v1, %v15861_v18  ;;  %v20549_v23 = vcombine.high %v19037_v33, %v19040_v50 }
0x142b   :  { %v8366_v31 = vcombine.low %v8310_v48, %v19114_v47  ;;  %v8367_v24 = vcombine.high %v8310_v48, %v19114_v47  ;;  %v19214_v2 = vrot.slane %v14599_v43, %v15861_v18  ;;  %v19217_v22 = vrot.slane %v14601_v46, %v15861_v18 }
0x142c   :  { %v7149_v52 = vrot.slane %v20549_v23, %v15881_v41  ;;  %v19220_v10 = vrot.slane %v14603_v27, %v15861_v18  ;;  %v19223_v25 = vrot.slane %v14605_v4, %v15861_v18  ;;  %v8382_v33 = vcombine.low %v8317_v35, %v19117_v28  ;;  %v19248_v27 = vpop.permute.xlu0 %7878  ;;  %v5513_v23 = vpop.permute.xlu1 %5512 }
0x142d   :  { %v8374_v47 = vrot.slane %v8366_v31, %v15881_v41  ;;  %v8381_v49 = vrot.slane %v8367_v24, %v15881_v41  ;;  %v8383_v50 = vcombine.high %v8317_v35, %v19117_v28  ;;  %v6982_v42 = vcombine.low %v20551_v39, %v20550_v37  ;;  %v20554_v31 = vld [vmem:[#allocation4_spill] sm:$0xff] }
0x142e   :  { %v7168_v40 = vcombine.low %v7117_v21, %v7149_v52  ;;  %v7169_v51 = vcombine.high %v7117_v21, %v7149_v52  ;;  %v7014_v26 = vcombine.low %v20553_v61, %v20552_v60  ;;  %v8390_v12 = vrot.slane %v8382_v33, %v15881_v41  ;;  %v20556_v33 = vld [vmem:[#allocation21_spill] sm:$0xff] }
0x142f   :  { %v8397_v5 = vrot.slane %v8383_v50, %v15881_v41  ;;  %v14591_v45 = vcombine.low %v8374_v47, %v8381_v49  ;;  %v14593_v63 = vcombine.high %v8374_v47, %v8381_v49  ;;  %v6990_v28 = vrot.slane %v6982_v42, %v15881_v41 }
0x1430   :  { %14984 = vmatmul.mubr.msk.f32.vlgmr.msra.gmra.mxu0 %vm36_vm0, %v7168_v40  ;;  %14991 = vmatmul.mubr.msk.f32.vlgmr.msra.gmra.mxu1 %vm36_vm0, %v7169_v51  ;;  %v7022_v17 = vrot.slane %v7014_v26, %v15881_v41  ;;  %v6374_v1 = vcombine.low %v19169_v58, %v5471_v0  ;;  %v6375_v24 = vcombine.high %v19169_v58, %v5471_v0 }
0x1431   :  { %v19241_v48 = vrot.slane %v14591_v45, %v15861_v18  ;;  %v19244_v21 = vrot.slane %v14593_v63, %v15861_v18  ;;  %v14595_v43 = vcombine.low %v8390_v12, %v8397_v5  ;;  %v14597_v46 = vcombine.high %v8390_v12, %v8397_v5  ;;  %14994 = vmatpush3.xpose.msk.msra.mxu0 %vm36_vm0, %v20547_v8  ;;  %v20555_v8 = vld [vmem:[#allocation7_spill] sm:$0xff]  ;;  %v20558_v45 = vld [vmem:[#allocation28_spill] sm:$0xff] }
0x1432   :  { %v7034_v4 = vcombine.low %v6990_v28, %v7022_v17  ;;  %15001 = vmatpush3.xpose.msk.msra.mxu1 %vm36_vm0, %v20548_v34  ;;  %v7035_v35 = vcombine.high %v6990_v28, %v7022_v17  ;;  %14995 = vmatprep.subr.msk.mxu0 %vm36_vm0, %v20554_v31  ;;  %v6382_v49 = vrot.slane %v6374_v1, %v15861_v18 }
0x1433   :  { %v19256_v52 = vrot.slane %v14595_v43, %v15861_v18  ;;  %v19259_v47 = vrot.slane %v14597_v46, %v15861_v18  ;;  %15002 = vmatprep.subr.msk.mxu1 %vm36_vm0, %v20555_v8  ;;  %v6358_v34 = vcombine.low %v20556_v33, %v5465_v44  ;;  %v6389_v58 = vrot.slane %v6375_v24, %v15861_v18  ;;  %v19297_v43 = vpop.permute.xlu1 %7872 }
0x1434   :  { %14997 = vmatprep.mubr.msk.f32.mxu0 %vm36_vm0, %v7034_v4  ;;  %15004 = vmatprep.mubr.msk.f32.mxu1 %vm36_vm0, %v7035_v35  ;;  %v6359_v0 = vcombine.high %v20556_v33, %v5465_v44  ;;  %v7126_v50 = vrot.slane %v7118_v54, %v15881_v41  ;;  %v7158_v51 = vrot.slane %v7150_v53, %v15881_v41  ;;  %v20557_v54 = vld [vmem:[#allocation3_spill] sm:$0xff]  ;;  %v20560_v33 = vld [vmem:[#allocation30_spill] sm:$0xff] }
0x1435   :  { %14996 = vmatpush3.xpose.msk.msra.mxu0 %vm36_vm0, %v20554_v31  ;;  %v6366_v40 = vrot.slane %v6358_v34, %v15861_v18  ;;  %v6983_v42 = vcombine.high %v20551_v39, %v20550_v37  ;;  %v7015_v44 = vcombine.high %v20553_v61, %v20552_v60  ;;  %v5966_v12 = vcombine.low %v19177_v9, %v5513_v23  ;;  %v19293_v60 = vpop.permute.xlu0 %5482 }
0x1436   :  { %15003 = vmatpush3.xpose.msk.msra.mxu1 %vm36_vm0, %v20555_v8  ;;  %15007 = vmatprep.subr.msk.mxu0 %vm36_vm0, %v20557_v54  ;;  %v6373_v26 = vrot.slane %v6359_v0, %v15861_v18  ;;  %v5967_v5 = vcombine.high %v19177_v9, %v5513_v23  ;;  %v7170_v39 = vcombine.low %v7126_v50, %v7158_v51 }
0x1437   :  { %15014 = vmatprep.subr.msk.mxu1 %vm36_vm0, %v20558_v45  ;;  %v6422_v53 = vcombine.low %v6366_v40, %v6382_v49  ;;  %v6423_v37 = vcombine.high %v6366_v40, %v6382_v49  ;;  %v7171_v63 = vcombine.high %v7126_v50, %v7158_v51  ;;  %v6997_v17 = vrot.slane %v6983_v42, %v15881_v41  ;;  %v20559_v49 = vld [vmem:[#allocation8_spill] sm:$0xff] }
0x1438   :  { %v6438_v61 = vcombine.low %v6373_v26, %v6389_v58  ;;  %v6439_v28 = vcombine.high %v6373_v26, %v6389_v58  ;;  %v7029_v1 = vrot.slane %v7015_v44, %v15881_v41  ;;  %14998 = vmatmul.mubr.msk.f32.vlgmr.msra.gmra.mxu0 %vm36_vm0, %v7170_v39  ;;  %v5974_v4 = vrot.slane %v5966_v12, %v15861_v18 }
0x1439   :  { %v6430_v46 = vrot.slane %v6422_v53, %v15881_v41  ;;  %v6437_v9 = vrot.slane %v6423_v37, %v15881_v41  ;;  %15005 = vmatmul.mubr.msk.f32.vlgmr.msra.gmra.mxu1 %vm36_vm0, %v7171_v63  ;;  %15008 = vmatpush3.xpose.msk.msra.mxu0 %vm36_vm0, %v20557_v54  ;;  %v5981_v50 = vrot.slane %v5967_v5, %v15861_v18  ;;  %v7891_v26 = vpop.permute.xlu0 %7890 }
0x143a   :  { %v6446_v35 = vrot.slane %v6438_v61, %v15881_v41  ;;  %v6453_v31 = vrot.slane %v6439_v28, %v15881_v41  ;;  %15015 = vmatpush3.xpose.msk.msra.mxu1 %vm36_vm0, %v20558_v45  ;;  %v7036_v24 = vcombine.low %v6997_v17, %v7029_v1  ;;  %15009 = vmatprep.subr.msk.mxu0 %vm36_vm0, %v20559_v49  ;;  %v20561_v28 = vld [vmem:[#allocation23_spill] sm:$0xff] }
0x143b   :  { %v14519_v23 = vcombine.low %v6430_v46, %v6437_v9  ;;  %v14521_v8 = vcombine.high %v6430_v46, %v6437_v9  ;;  %15016 = vmatprep.subr.msk.mxu1 %vm36_vm0, %v20560_v33  ;;  %v7037_v34 = vcombine.high %v6997_v17, %v7029_v1  ;;  %v6014_v40 = vcombine.low %v19183_v7, %v5974_v4  ;;  %v20562_v17 = vld [vmem:[#allocation25_spill] sm:$0xff] }
0x143c   :  { %v14523_v58 = vcombine.low %v6446_v35, %v6453_v31  ;;  %v14525_v0 = vcombine.high %v6446_v35, %v6453_v31  ;;  %15011 = vmatprep.mubr.msk.f32.mxu0 %vm36_vm0, %v7036_v24  ;;  %v6015_v44 = vcombine.high %v19183_v7, %v5974_v4  ;;  %v7133_v54 = vrot.slane %v7119_v11, %v15881_v41  ;;  %v5477_v7 = vpop.permute.xlu1 %5476  ;;  %v20563_v4 = vld [vmem:[#allocation33_spill] sm:$0xff]  ;;  %v20564_v35 = vld [vmem:[#allocation14_spill] sm:$0xff] }
0x143d   :  { %v19318_v51 = vrot.slane %v14519_v23, %v15861_v18  ;;  %v19321_v42 = vrot.slane %v14521_v8, %v15861_v18  ;;  %15018 = vmatprep.mubr.msk.f32.mxu1 %vm36_vm0, %v7037_v34  ;;  %v6022_v45 = vrot.slane %v6014_v40, %v15881_v41  ;;  %v6030_v53 = vcombine.low %v19195_v59, %v5981_v50  ;;  %v20565_v24 = vld [vmem:[#allocation5_spill] sm:$0xff]  ;;  %v20566_v23 = vld [vmem:[#allocation35_spill] sm:$0xff]  ;;  %v5495_v16 = vpop.permute.xlu0 %5494 }
0x143e   :  { %v19330_v12 = vrot.slane %v14523_v58, %v15861_v18  ;;  %v19333_v5 = vrot.slane %v14525_v0, %v15861_v18  ;;  %15010 = vmatpush3.xpose.msk.msra.mxu0 %vm36_vm0, %v20559_v49  ;;  %v6029_v55 = vrot.slane %v6015_v44, %v15881_v41  ;;  %v6031_v11 = vcombine.high %v19195_v59, %v5981_v50 }
0x143f   :  { %v7374_v37 = vcombine.low %v19318_v51, %v19321_v42  ;;  %v7375_v32 = vcombine.high %v19318_v51, %v19321_v42  ;;  %15017 = vmatpush3.xpose.msk.msra.mxu1 %vm36_vm0, %v20560_v33  ;;  %v6038_v61 = vrot.slane %v6030_v53, %v15881_v41  ;;  %15021 = vmatprep.subr.msk.mxu0 %vm36_vm0, %v20561_v28 }
0x1440   :  { %v7406_v39 = vcombine.low %v19330_v12, %v19333_v5  ;;  %v7407_v63 = vcombine.high %v19330_v12, %v19333_v5  ;;  %15028 = vmatprep.subr.msk.mxu1 %vm36_vm0, %v20562_v17  ;;  %v6045_v1 = vrot.slane %v6031_v11, %v15881_v41  ;;  %v14527_v59 = vcombine.low %v6022_v45, %v6029_v55 }
0x1441   :  { %v14529_v46 = vcombine.high %v6022_v45, %v6029_v55  ;;  %v7165_v9 = vrot.slane %v7151_v3, %v15881_v41  ;;  %v7238_v31 = vcombine.low %v20564_v35, %v20563_v4  ;;  %v7270_v8 = vcombine.low %v20566_v23, %v20565_v24  ;;  %v5489_v45 = vpop.permute.xlu1 %5488 }
0x1442   :  { %v8894_v49 = vcombine.low %v19248_v27, %v7891_v26  ;;  %v8895_v33 = vcombine.high %v19248_v27, %v7891_v26  ;;  %v19368_v34 = vrot.slane %v14527_v59, %v15861_v18  ;;  %v14531_v0 = vcombine.low %v6038_v61, %v6045_v1 }
0x1443   :  { %v19371_v58 = vrot.slane %v14529_v46, %v15861_v18  ;;  %v14533_v50 = vcombine.high %v6038_v61, %v6045_v1  ;;  %v7172_v19 = vcombine.low %v7133_v54, %v7165_v9  ;;  %v7173_v3 = vcombine.high %v7133_v54, %v7165_v9 }
0x1444   :  { %v7246_v40 = vrot.slane %v7238_v31, %v15881_v41  ;;  %v7278_v44 = vrot.slane %v7270_v8, %v15881_v41  ;;  %v19376_v53 = vrot.slane %v14531_v0, %v15861_v18  ;;  %v19382_v26 = vrot.slane %v8894_v49, %v15861_v18  ;;  %v20567_v49 = vld [vmem:[#allocation26_spill] sm:$0xff] }
0x1445   :  { %v19379_v27 = vrot.slane %v14533_v50, %v15861_v18  ;;  %v19385_v55 = vrot.slane %v8895_v33, %v15861_v18  ;;  %15012 = vmatmul.mubr.msk.f32.vlgmr.msra.gmra.mxu0 %vm36_vm0, %v7172_v19  ;;  %15019 = vmatmul.mubr.msk.f32.vlgmr.msra.gmra.mxu1 %vm36_vm0, %v7173_v3  ;;  %v6406_v61 = vcombine.low %v19293_v60, %v5495_v16  ;;  %v19407_v50 = vpop.permute.xlu0 %7876 }
0x1446   :  { %v7302_v54 = vcombine.low %v7246_v40, %v7278_v44  ;;  %v7303_v11 = vcombine.high %v7246_v40, %v7278_v44  ;;  %15022 = vmatpush3.xpose.msk.msra.mxu0 %vm36_vm0, %v20561_v28  ;;  %15029 = vmatpush3.xpose.msk.msra.mxu1 %vm36_vm0, %v20562_v17  ;;  %v6407_v1 = vcombine.high %v19293_v60, %v5495_v16  ;;  %v20568_v28 = vld [vmem:[#allocation29_spill] sm:$0xff]  ;;  %v7885_v16 = vpop.permute.xlu1 %7884  ;;  %v20569_v44 = vld [vmem:[#allocation24_spill] sm:$0xff] }
0x1447   :  { %v6390_v59 = vcombine.low %v5477_v7, %v5489_v45  ;;  %v6391_v46 = vcombine.high %v5477_v7, %v5489_v45  ;;  %v6414_v9 = vrot.slane %v6406_v61, %v15861_v18  ;;  %v7382_v31 = vrot.slane %v7374_v37, %v15881_v41  ;;  %15023 = vmatprep.subr.msk.mxu0 %vm36_vm0, %v20567_v49  ;;  %v20570_v45 = vld [vmem:[#allocation27_spill] sm:$0xff] }
0x1448   :  { %15025 = vmatprep.mubr.msk.f32.mxu0 %vm36_vm0, %v7302_v54  ;;  %15032 = vmatprep.mubr.msk.f32.mxu1 %vm36_vm0, %v7303_v11  ;;  %v7414_v8 = vrot.slane %v7406_v39, %v15881_v41  ;;  %v6421_v60 = vrot.slane %v6407_v1, %v15861_v18  ;;  %v7239_v37 = vcombine.high %v20564_v35, %v20563_v4 }
0x1449   :  { %15030 = vmatprep.subr.msk.mxu1 %vm36_vm0, %v20568_v28  ;;  %v6398_v7 = vrot.slane %v6390_v59, %v15861_v18  ;;  %v6405_v17 = vrot.slane %v6391_v46, %v15861_v18  ;;  %v7271_v39 = vcombine.high %v20566_v23, %v20565_v24  ;;  %v8878_v61 = vcombine.low %v19297_v43, %v7885_v16 }
0x144a   :  { %v7438_v33 = vcombine.low %v7382_v31, %v7414_v8  ;;  %v7439_v0 = vcombine.high %v7382_v31, %v7414_v8  ;;  %15024 = vmatpush3.xpose.msk.msra.mxu0 %vm36_vm0, %v20567_v49  ;;  %15031 = vmatpush3.xpose.msk.msra.mxu1 %vm36_vm0, %v20568_v28  ;;  %v7253_v35 = vrot.slane %v7239_v37, %v15881_v41  ;;  %v20572_v37 = vld [vmem:[#allocation19_spill] sm:$0xff] }
0x144b   :  { %v6454_v19 = vcombine.low %v6398_v7, %v6414_v9  ;;  %v6455_v3 = vcombine.high %v6398_v7, %v6414_v9  ;;  %v6470_v40 = vcombine.low %v6405_v17, %v6421_v60  ;;  %15035 = vmatprep.subr.msk.mxu0 %vm36_vm0, %v20569_v44  ;;  %15042 = vmatprep.subr.msk.mxu1 %vm36_vm0, %v20570_v45 }
0x144c   :  { %v6471_v4 = vcombine.high %v6405_v17, %v6421_v60  ;;  %v7285_v24 = vrot.slane %v7271_v39, %v15881_v41  ;;  %v8879_v8 = vcombine.high %v19297_v43, %v7885_v16  ;;  %v20571_v60 = vld [vmem:[#allocation32_spill] sm:$0xff]  ;;  %v8886_v7 = vrot.slane %v8878_v61, %v15861_v18  ;;  %v7889_v17 = vpop.permute.xlu0 %7888 }
0x144d   :  { %v6462_v23 = vrot.slane %v6454_v19, %v15881_v41  ;;  %v6469_v54 = vrot.slane %v6455_v3, %v15881_v41  ;;  %v6478_v11 = vrot.slane %v6470_v40, %v15881_v41  ;;  %15026 = vmatmul.mubr.msk.f32.vlgmr.msra.gmra.mxu0 %vm36_vm0, %v7438_v33  ;;  %15033 = vmatmul.mubr.msk.f32.vlgmr.msra.gmra.mxu1 %vm36_vm0, %v7439_v0 }
0x144e   :  { %v6485_v1 = vrot.slane %v6471_v4, %v15881_v41  ;;  %v7304_v59 = vcombine.low %v7253_v35, %v7285_v24  ;;  %v7305_v46 = vcombine.high %v7253_v35, %v7285_v24  ;;  %15036 = vmatpush3.xpose.msk.msra.mxu0 %vm36_vm0, %v20569_v44  ;;  %15043 = vmatpush3.xpose.msk.msra.mxu1 %vm36_vm0, %v20570_v45  ;;  %v7871_v35 = vpop.permute.xlu1 %7870 }
0x144f   :  { %v14520_v9 = vcombine.low %v6462_v23, %v6469_v54  ;;  %v14522_v31 = vcombine.high %v6462_v23, %v6469_v54  ;;  %15037 = vmatprep.subr.msk.mxu0 %vm36_vm0, %v20571_v60  ;;  %15044 = vmatprep.subr.msk.mxu1 %vm36_vm0, %v20572_v37  ;;  %v8893_v43 = vrot.slane %v8879_v8, %v15861_v18 }
0x1450   :  { %v14524_v49 = vcombine.low %v6478_v11, %v6485_v1  ;;  %v14526_v28 = vcombine.high %v6478_v11, %v6485_v1  ;;  %15039 = vmatprep.mubr.msk.f32.mxu0 %vm36_vm0, %v7304_v59  ;;  %15046 = vmatprep.mubr.msk.f32.mxu1 %vm36_vm0, %v7305_v46  ;;  %v8942_v19 = vcombine.low %v8886_v7, %v19382_v26  ;;  %v5503_v8 = vpop.permute.xlu0 %5502 }
0x1451   :  { %v19440_v33 = vrot.slane %v14520_v9, %v15861_v18  ;;  %v19443_v0 = vrot.slane %v14522_v31, %v15861_v18  ;;  %v8943_v3 = vcombine.high %v8886_v7, %v19382_v26  ;;  %v8958_v45 = vcombine.low %v8893_v43, %v19385_v55 }
0x1452   :  { %v19450_v39 = vrot.slane %v14524_v49, %v15861_v18  ;;  %v19453_v16 = vrot.slane %v14526_v28, %v15861_v18  ;;  %v8959_v4 = vcombine.high %v8893_v43, %v19385_v55  ;;  %15038 = vmatpush3.xpose.msk.msra.mxu0 %vm36_vm0, %v20571_v60  ;;  %v8950_v23 = vrot.slane %v8942_v19, %v15881_v41 }
0x1453   :  { %v7390_v40 = vcombine.low %v19440_v33, %v19443_v0  ;;  %v7391_v44 = vcombine.high %v19440_v33, %v19443_v0  ;;  %v8957_v54 = vrot.slane %v8943_v3, %v15881_v41  ;;  %15045 = vmatpush3.xpose.msk.msra.mxu1 %vm36_vm0, %v20572_v37  ;;  %v8966_v11 = vrot.slane %v8958_v45, %v15881_v41 }
0x1454   :  { %v7422_v24 = vcombine.low %v19450_v39, %v19453_v16  ;;  %v7423_v26 = vcombine.high %v19450_v39, %v19453_v16  ;;  %v8973_v55 = vrot.slane %v8959_v4, %v15881_v41  ;;  %v8350_v61 = vcombine.low %v19407_v50, %v7889_v17 }
0x1455   :  { %v8351_v1 = vcombine.high %v19407_v50, %v7889_v17  ;;  %v14600_v59 = vcombine.low %v8950_v23, %v8957_v54  ;;  %v14602_v46 = vcombine.high %v8950_v23, %v8957_v54  ;;  %v9742_v9 = vcombine.low %v18836_v56, %v18839_v14  ;;  %v7883_v23 = vpop.permute.xlu1 %7882 }
0x1456   :  { %v9774_v31 = vcombine.low %v18842_v20, %v18845_v6  ;;  %v14604_v49 = vcombine.low %v8966_v11, %v8973_v55  ;;  %v14606_v28 = vcombine.high %v8966_v11, %v8973_v55  ;;  %v8358_v60 = vrot.slane %v8350_v61, %v15861_v18 }
0x1457   :  { %v8365_v7 = vrot.slane %v8351_v1, %v15861_v18  ;;  %v19484_v37 = vrot.slane %v14600_v59, %v15861_v18  ;;  %v19487_v50 = vrot.slane %v14602_v46, %v15861_v18  ;;  %v9750_v17 = vrot.slane %v9742_v9, %v15881_v41 }
0x1458   :  { %v9782_v43 = vrot.slane %v9774_v31, %v15881_v41  ;;  %v19492_v19 = vrot.slane %v14604_v49, %v15861_v18  ;;  %v19495_v3 = vrot.slane %v14606_v28, %v15861_v18  ;;  %v7389_v45 = vrot.slane %v7375_v32, %v15881_v41 }
0x1459   :  { %v7421_v4 = vrot.slane %v7407_v63, %v15881_v41  ;;  %v7254_v55 = vcombine.low %v19060_v36, %v19063_v57  ;;  %v7286_v61 = vcombine.low %v19081_v29, %v19084_v13  ;;  %v9606_v51 = vcombine.low %v18951_v15, %v18954_v62  ;;  %v5515_v63 = vpop.permute.xlu0 %5514 }
0x145a   :  { %v9794_v54 = vcombine.low %v9750_v17, %v9782_v43  ;;  %v9795_v11 = vcombine.high %v9750_v17, %v9782_v43  ;;  %v9638_v42 = vcombine.low %v18967_v30, %v18970_v38  ;;  %v8334_v32 = vcombine.low %v7871_v35, %v7883_v23 }
0x145b   :  { %v7440_v1 = vcombine.low %v7389_v45, %v7421_v4  ;;  %v7441_v59 = vcombine.high %v7389_v45, %v7421_v4  ;;  %v7262_v12 = vrot.slane %v7254_v55, %v15881_v41  ;;  %v7294_v5 = vrot.slane %v7286_v61, %v15881_v41 }
0x145c   :  { %15049 = vmatprep.subr.msk.mxu0 %vm36_vm0, %v9794_v54  ;;  %15056 = vmatprep.subr.msk.mxu1 %vm36_vm0, %v9795_v11  ;;  %v9614_v46 = vrot.slane %v9606_v51, %v15881_v41  ;;  %v9646_v9 = vrot.slane %v9638_v42, %v15881_v41  ;;  %v8335_v31 = vcombine.high %v7871_v35, %v7883_v23 }
0x145d   :  { %15040 = vmatmul.mubr.msk.f32.vlgmr.msra.gmra.mxu0 %vm36_vm0, %v7440_v1  ;;  %15047 = vmatmul.mubr.msk.f32.vlgmr.msra.gmra.mxu1 %vm36_vm0, %v7441_v59  ;;  %v7306_v49 = vcombine.low %v7262_v12, %v7294_v5  ;;  %v7307_v28 = vcombine.high %v7262_v12, %v7294_v5  ;;  %v8342_v17 = vrot.slane %v8334_v32, %v15861_v18  ;;  %v5509_v59 = vpop.permute.xlu1 %5508 }
0x145e   :  { %15050 = vmatpush3.xpose.msk.msra.mxu0 %vm36_vm0, %v9794_v54  ;;  %15057 = vmatpush3.xpose.msk.msra.mxu1 %vm36_vm0, %v9795_v11  ;;  %v9658_v43 = vcombine.low %v9614_v46, %v9646_v9  ;;  %v9659_v45 = vcombine.high %v9614_v46, %v9646_v9  ;;  %v8349_v4 = vrot.slane %v8335_v31, %v15861_v18  ;;  %v20573_v46 = vld [vmem:[#allocation17_spill] sm:$0xff] }
0x145f   :  { %v6510_v55 = vcombine.low %v5503_v8, %v5515_v63  ;;  %15053 = vmatprep.mubr.msk.f32.mxu0 %vm36_vm0, %v7306_v49  ;;  %15060 = vmatprep.mubr.msk.f32.mxu1 %vm36_vm0, %v7307_v28  ;;  %v8398_v61 = vcombine.low %v8342_v17, %v8358_v60  ;;  %v8399_v1 = vcombine.high %v8342_v17, %v8358_v60 }
0x1460   :  { %v6511_v35 = vcombine.high %v5503_v8, %v5515_v63  ;;  %15051 = vmatprep.subr.msk.mxu0 %vm36_vm0, %v9658_v43  ;;  %15058 = vmatprep.subr.msk.mxu1 %vm36_vm0, %v9659_v45  ;;  %v8414_v23 = vcombine.low %v8349_v4, %v8365_v7  ;;  %v8415_v54 = vcombine.high %v8349_v4, %v8365_v7 }
0x1461   :  { %v6518_v11 = vrot.slane %v6510_v55, %v15861_v18  ;;  %v8406_v51 = vrot.slane %v8398_v61, %v15881_v41  ;;  %v8413_v42 = vrot.slane %v8399_v1, %v15881_v41  ;;  %v9743_v7 = vcombine.high %v18836_v56, %v18839_v14 }
0x1462   :  { %15052 = vmatpush3.xpose.msk.msra.mxu0 %vm36_vm0, %v9658_v43  ;;  %15059 = vmatpush3.xpose.msk.msra.mxu1 %vm36_vm0, %v9659_v45  ;;  %v6525_v60 = vrot.slane %v6511_v35, %v15861_v18  ;;  %v8422_v8 = vrot.slane %v8414_v23, %v15881_v41  ;;  %v8429_v12 = vrot.slane %v8415_v54, %v15881_v41 }
0x1463   :  { %v9775_v5 = vcombine.high %v18842_v20, %v18845_v6  ;;  %v14592_v32 = vcombine.low %v8406_v51, %v8413_v42  ;;  %v14594_v63 = vcombine.high %v8406_v51, %v8413_v42  ;;  %v6494_v9 = vcombine.low %v20573_v46, %v5509_v59 }
0x1464   :  { %v6495_v31 = vcombine.high %v20573_v46, %v5509_v59  ;;  %v14596_v49 = vcombine.low %v8422_v8, %v8429_v12  ;;  %v14598_v28 = vcombine.high %v8422_v8, %v8429_v12  ;;  %v9757_v17 = vrot.slane %v9743_v7, %v15881_v41  ;;  %v5525_v59 = vpop.permute.xlu0 %5524  ;;  %v5519_v8 = vpop.permute.xlu1 %5518 }
0x1465   :  { %v9789_v43 = vrot.slane %v9775_v5, %v15881_v41  ;;  %v19546_v45 = vrot.slane %v14592_v32, %v15861_v18  ;;  %v19549_v56 = vrot.slane %v14594_v63, %v15861_v18  ;;  %v6502_v14 = vrot.slane %v6494_v9, %v15861_v18 }
0x1466   :  { %v6509_v20 = vrot.slane %v6495_v31, %v15861_v18  ;;  %v19554_v6 = vrot.slane %v14596_v49, %v15861_v18  ;;  %v19557_v4 = vrot.slane %v14598_v28, %v15861_v18  ;;  %v7398_v51 = vrot.slane %v7390_v40, %v15881_v41 }
0x1467   :  { %v9796_v55 = vcombine.low %v9757_v17, %v9789_v43  ;;  %v9797_v61 = vcombine.high %v9757_v17, %v9789_v43  ;;  %v6558_v1 = vcombine.low %v6502_v14, %v6518_v11  ;;  %v6559_v35 = vcombine.high %v6502_v14, %v6518_v11 }
0x1468   :  { %v6574_v23 = vcombine.low %v6509_v20, %v6525_v60  ;;  %v6575_v54 = vcombine.high %v6509_v20, %v6525_v60  ;;  %v7430_v42 = vrot.slane %v7422_v24, %v15881_v41  ;;  %v9607_v11 = vcombine.high %v18951_v15, %v18954_v62  ;;  %v5537_v14 = vpop.permute.xlu0 %5536  ;;  %v5531_v20 = vpop.permute.xlu1 %5530 }
0x1469   :  { %15063 = vmatprep.subr.msk.mxu0 %vm36_vm0, %v9796_v55  ;;  %15070 = vmatprep.subr.msk.mxu1 %vm36_vm0, %v9797_v61  ;;  %v6566_v60 = vrot.slane %v6558_v1, %v15881_v41  ;;  %v6573_v12 = vrot.slane %v6559_v35, %v15881_v41  ;;  %v9639_v46 = vcombine.high %v18967_v30, %v18970_v38 }
0x146a   :  { %v6582_v7 = vrot.slane %v6574_v23, %v15881_v41  ;;  %v6589_v5 = vrot.slane %v6575_v54, %v15881_v41  ;;  %v7442_v32 = vcombine.low %v7398_v51, %v7430_v42  ;;  %v7443_v63 = vcombine.high %v7398_v51, %v7430_v42 }
0x146b   :  { %v9621_v40 = vrot.slane %v9607_v11, %v15881_v41  ;;  %v14535_v24 = vcombine.low %v6566_v60, %v6573_v12  ;;  %v14537_v9 = vcombine.high %v6566_v60, %v6573_v12  ;;  %v9653_v62 = vrot.slane %v9639_v46, %v15881_v41 }
0x146c   :  { %v14539_v31 = vcombine.low %v6582_v7, %v6589_v5  ;;  %v14541_v15 = vcombine.high %v6582_v7, %v6589_v5  ;;  %15054 = vmatmul.mubr.msk.f32.vlgmr.msra.gmra.mxu0 %vm36_vm0, %v7442_v32  ;;  %15061 = vmatmul.mubr.msk.f32.vlgmr.msra.gmra.mxu1 %vm36_vm0, %v7443_v63  ;;  %v7255_v49 = vcombine.high %v19060_v36, %v19063_v57 }
0x146d   :  { %v7287_v28 = vcombine.high %v19081_v29, %v19084_v13  ;;  %v19586_v17 = vrot.slane %v14535_v24, %v15861_v18  ;;  %v19589_v30 = vrot.slane %v14537_v9, %v15861_v18  ;;  %15064 = vmatpush3.xpose.msk.msra.mxu0 %vm36_vm0, %v9796_v55  ;;  %15071 = vmatpush3.xpose.msk.msra.mxu1 %vm36_vm0, %v9797_v61  ;;  %v5527_v24 = vpop.permute.xlu0 %5526 }
0x146e   :  { %v19592_v38 = vrot.slane %v14539_v31, %v15861_v18  ;;  %v19595_v43 = vrot.slane %v14541_v15, %v15861_v18  ;;  %v9660_v36 = vcombine.low %v9621_v40, %v9653_v62  ;;  %v7269_v57 = vrot.slane %v7255_v49, %v15881_v41  ;;  %v5521_v49 = vpop.permute.xlu1 %5520 }
0x146f   :  { %v7301_v29 = vrot.slane %v7287_v28, %v15881_v41  ;;  %v9661_v13 = vcombine.high %v9621_v40, %v9653_v62  ;;  %v7646_v1 = vcombine.low %v19586_v17, %v19589_v30  ;;  %v7647_v35 = vcombine.high %v19586_v17, %v19589_v30 }
0x1470   :  { %v7678_v23 = vcombine.low %v19592_v38, %v19595_v43  ;;  %v7679_v55 = vcombine.high %v19592_v38, %v19595_v43  ;;  %15065 = vmatprep.subr.msk.mxu0 %vm36_vm0, %v9660_v36  ;;  %v5998_v51 = vcombine.low %v5525_v59, %v5537_v14  ;;  %v5999_v42 = vcombine.high %v5525_v59, %v5537_v14 }
0x1471   :  { %v7308_v61 = vcombine.low %v7269_v57, %v7301_v29  ;;  %15072 = vmatprep.subr.msk.mxu1 %vm36_vm0, %v9661_v13  ;;  %v7309_v54 = vcombine.high %v7269_v57, %v7301_v29  ;;  %15066 = vmatpush3.xpose.msk.msra.mxu0 %vm36_vm0, %v9660_v36  ;;  %v9998_v11 = vcombine.low %v19214_v2, %v19217_v22 }
0x1472   :  { %v10030_v60 = vcombine.low %v19220_v10, %v19223_v25  ;;  %v5982_v12 = vcombine.low %v5519_v8, %v5531_v20  ;;  %v6006_v7 = vrot.slane %v5998_v51, %v15861_v18  ;;  %v5983_v5 = vcombine.high %v5519_v8, %v5531_v20  ;;  %15073 = vmatpush3.xpose.msk.msra.mxu1 %vm36_vm0, %v9661_v13 }
0x1473   :  { %15067 = vmatprep.mubr.msk.f32.mxu0 %vm36_vm0, %v7308_v61  ;;  %15074 = vmatprep.mubr.msk.f32.mxu1 %vm36_vm0, %v7309_v54  ;;  %v7405_v32 = vrot.slane %v7391_v44, %v15881_v41  ;;  %v6013_v59 = vrot.slane %v5999_v42, %v15861_v18  ;;  %v10006_v63 = vrot.slane %v9998_v11, %v15881_v41  ;;  %v5539_v42 = vpop.permute.xlu0 %5538 }
0x1474   :  { %v10038_v40 = vrot.slane %v10030_v60, %v15881_v41  ;;  %v5990_v46 = vrot.slane %v5982_v12, %v15861_v18  ;;  %v5997_v9 = vrot.slane %v5983_v5, %v15861_v18  ;;  %v7437_v8 = vrot.slane %v7423_v26, %v15881_v41 }
0x1475   :  { %v7510_v33 = vcombine.low %v19368_v34, %v19371_v58  ;;  %v7542_v0 = vcombine.low %v19376_v53, %v19379_v27  ;;  %v9862_v51 = vcombine.low %v19241_v48, %v19244_v21  ;;  %v9910_v17 = vcombine.low %v19554_v6, %v19557_v4 }
0x1476   :  { %v10062_v44 = vcombine.low %v10006_v63, %v10038_v40  ;;  %v10063_v31 = vcombine.high %v10006_v63, %v10038_v40  ;;  %v6046_v15 = vcombine.low %v5990_v46, %v6006_v7  ;;  %v6047_v62 = vcombine.high %v5990_v46, %v6006_v7  ;;  %v5533_v40 = vpop.permute.xlu1 %5532 }
0x1477   :  { %v6062_v28 = vcombine.low %v5997_v9, %v6013_v59  ;;  %v6063_v14 = vcombine.high %v5997_v9, %v6013_v59  ;;  %v7444_v36 = vcombine.low %v7405_v32, %v7437_v8  ;;  %v7445_v57 = vcombine.high %v7405_v32, %v7437_v8 }
0x1478   :  { %15077 = vmatprep.subr.msk.mxu0 %vm36_vm0, %v10062_v44  ;;  %15084 = vmatprep.subr.msk.mxu1 %vm36_vm0, %v10063_v31  ;;  %v6054_v39 = vrot.slane %v6046_v15, %v15881_v41  ;;  %v6061_v16 = vrot.slane %v6047_v62, %v15881_v41  ;;  %v7518_v26 = vrot.slane %v7510_v33, %v15881_v41 }
0x1479   :  { %v6070_v29 = vrot.slane %v6062_v28, %v15881_v41  ;;  %v6077_v13 = vrot.slane %v6063_v14, %v15881_v41  ;;  %15068 = vmatmul.mubr.msk.f32.vlgmr.msra.gmra.mxu0 %vm36_vm0, %v7444_v36  ;;  %15075 = vmatmul.mubr.msk.f32.vlgmr.msra.gmra.mxu1 %vm36_vm0, %v7445_v57  ;;  %v7550_v20 = vrot.slane %v7542_v0, %v15881_v41 }
0x147a   :  { %v14528_v61 = vcombine.low %v6054_v39, %v6061_v16  ;;  %v14530_v54 = vcombine.high %v6054_v39, %v6061_v16  ;;  %15078 = vmatpush3.xpose.msk.msra.mxu0 %vm36_vm0, %v10062_v44  ;;  %15085 = vmatpush3.xpose.msk.msra.mxu1 %vm36_vm0, %v10063_v31  ;;  %v9870_v59 = vrot.slane %v9862_v51, %v15881_v41 }
0x147b   :  { %v14532_v11 = vcombine.low %v6070_v29, %v6077_v13  ;;  %v14534_v60 = vcombine.high %v6070_v29, %v6077_v13  ;;  %v7574_v12 = vcombine.low %v7518_v26, %v7550_v20  ;;  %v7575_v7 = vcombine.high %v7518_v26, %v7550_v20 }
0x147c   :  { %v19652_v5 = vrot.slane %v14528_v61, %v15861_v18  ;;  %v19655_v32 = vrot.slane %v14530_v54, %v15861_v18  ;;  %v9894_v63 = vcombine.low %v19256_v52, %v19259_v47  ;;  %v6542_v8 = vcombine.low %v5527_v24, %v5539_v42 }
0x147d   :  { %v19661_v46 = vrot.slane %v14532_v11, %v15861_v18  ;;  %v19664_v9 = vrot.slane %v14534_v60, %v15861_v18  ;;  %15081 = vmatprep.mubr.msk.f32.mxu0 %vm36_vm0, %v7574_v12  ;;  %15088 = vmatprep.mubr.msk.f32.mxu1 %vm36_vm0, %v7575_v7  ;;  %v6543_v0 = vcombine.high %v5527_v24, %v5539_v42 }
0x147e   :  { %v9902_v33 = vrot.slane %v9894_v63, %v15881_v41  ;;  %v9999_v44 = vcombine.high %v19214_v2, %v19217_v22  ;;  %v10031_v31 = vcombine.high %v19220_v10, %v19223_v25  ;;  %v6550_v15 = vrot.slane %v6542_v8, %v15861_v18 }
0x147f   :  { %v6526_v62 = vcombine.low %v5521_v49, %v5533_v40  ;;  %v6527_v28 = vcombine.high %v5521_v49, %v5533_v40  ;;  %v7654_v14 = vrot.slane %v7646_v1, %v15881_v41  ;;  %v6557_v39 = vrot.slane %v6543_v0, %v15861_v18 }
0x1480   :  { %v9926_v36 = vcombine.low %v9870_v59, %v9902_v33  ;;  %v9927_v57 = vcombine.high %v9870_v59, %v9902_v33  ;;  %v10013_v24 = vrot.slane %v9999_v44, %v15881_v41  ;;  %v10045_v2 = vrot.slane %v10031_v31, %v15881_v41 }
0x1481   :  { %v6534_v22 = vrot.slane %v6526_v62, %v15861_v18  ;;  %v6541_v10 = vrot.slane %v6527_v28, %v15861_v18  ;;  %v7686_v25 = vrot.slane %v7678_v23, %v15881_v41  ;;  %v9863_v1 = vcombine.high %v19241_v48, %v19244_v21 }
0x1482   :  { %15079 = vmatprep.subr.msk.mxu0 %vm36_vm0, %v9926_v36  ;;  %15086 = vmatprep.subr.msk.mxu1 %vm36_vm0, %v9927_v57  ;;  %v9895_v49 = vcombine.high %v19256_v52, %v19259_v47  ;;  %v7511_v16 = vcombine.high %v19368_v34, %v19371_v58  ;;  %v10064_v26 = vcombine.low %v10013_v24, %v10045_v2 }
0x1483   :  { %15080 = vmatpush3.xpose.msk.msra.mxu0 %vm36_vm0, %v9926_v36  ;;  %15087 = vmatpush3.xpose.msk.msra.mxu1 %vm36_vm0, %v9927_v57  ;;  %v10065_v29 = vcombine.high %v10013_v24, %v10045_v2  ;;  %v6590_v23 = vcombine.low %v6534_v22, %v6550_v15  ;;  %v6591_v13 = vcombine.high %v6534_v22, %v6550_v15 }
0x1484   :  { %v6606_v20 = vcombine.low %v6541_v10, %v6557_v39  ;;  %v6607_v61 = vcombine.high %v6541_v10, %v6557_v39  ;;  %v7710_v54 = vcombine.low %v7654_v14, %v7686_v25  ;;  %15091 = vmatprep.subr.msk.mxu0 %vm36_vm0, %v10064_v26  ;;  %v7711_v21 = vcombine.high %v7654_v14, %v7686_v25 }
0x1485   :  { %15098 = vmatprep.subr.msk.mxu1 %vm36_vm0, %v10065_v29  ;;  %v6598_v48 = vrot.slane %v6590_v23, %v15881_v41  ;;  %v9877_v52 = vrot.slane %v9863_v1, %v15881_v41  ;;  %v6605_v47 = vrot.slane %v6591_v13, %v15881_v41  ;;  %v9909_v51 = vrot.slane %v9895_v49, %v15881_v41 }
0x1486   :  { %v6614_v34 = vrot.slane %v6606_v20, %v15881_v41  ;;  %v6621_v58 = vrot.slane %v6607_v61, %v15881_v41  ;;  %15082 = vmatmul.mubr.msk.f32.vlgmr.msra.gmra.mxu0 %vm36_vm0, %v7710_v54  ;;  %15089 = vmatmul.mubr.msk.f32.vlgmr.msra.gmra.mxu1 %vm36_vm0, %v7711_v21  ;;  %v7525_v42 = vrot.slane %v7511_v16, %v15881_v41 }
0x1487   :  { %15092 = vmatpush3.xpose.msk.msra.mxu0 %vm36_vm0, %v10064_v26  ;;  %v7543_v11 = vcombine.high %v19376_v53, %v19379_v27  ;;  %v10014_v60 = vcombine.low %v19484_v37, %v19487_v50  ;;  %v14536_v12 = vcombine.low %v6598_v48, %v6605_v47  ;;  %v14538_v7 = vcombine.high %v6598_v48, %v6605_v47 }
0x1488   :  { %v14540_v59 = vcombine.low %v6614_v34, %v6621_v58  ;;  %v14542_v63 = vcombine.high %v6614_v34, %v6621_v58  ;;  %15099 = vmatpush3.xpose.msk.msra.mxu1 %vm36_vm0, %v10065_v29  ;;  %v9928_v40 = vcombine.low %v9877_v52, %v9909_v51  ;;  %v9929_v33 = vcombine.high %v9877_v52, %v9909_v51 }
0x1489   :  { %v7557_v8 = vrot.slane %v7543_v11, %v15881_v41  ;;  %v10022_v0 = vrot.slane %v10014_v60, %v15881_v41  ;;  %v19717_v44 = vrot.slane %v14536_v12, %v15861_v18  ;;  %v19720_v53 = vrot.slane %v14538_v7, %v15861_v18 }
0x148a   :  { %v19723_v27 = vrot.slane %v14540_v59, %v15861_v18  ;;  %v19726_v31 = vrot.slane %v14542_v63, %v15861_v18  ;;  %15093 = vmatprep.subr.msk.mxu0 %vm36_vm0, %v9928_v40  ;;  %15100 = vmatprep.subr.msk.mxu1 %vm36_vm0, %v9929_v33  ;;  %v10046_v28 = vcombine.low %v19492_v19, %v19495_v3 }
0x148b   :  { %v7576_v15 = vcombine.low %v7525_v42, %v7557_v8  ;;  %v7577_v62 = vcombine.high %v7525_v42, %v7557_v8  ;;  %v7662_v14 = vcombine.low %v19717_v44, %v19720_v53  ;;  %15094 = vmatpush3.xpose.msk.msra.mxu0 %vm36_vm0, %v9928_v40  ;;  %v7661_v39 = vrot.slane %v7647_v35, %v15881_v41 }
0x148c   :  { %v7694_v36 = vcombine.low %v19723_v27, %v19726_v31  ;;  %v10054_v57 = vrot.slane %v10046_v28, %v15881_v41  ;;  %v7693_v24 = vrot.slane %v7679_v55, %v15881_v41  ;;  %15101 = vmatpush3.xpose.msk.msra.mxu1 %vm36_vm0, %v9929_v33  ;;  %v7526_v2 = vcombine.low %v19652_v5, %v19655_v32 }
0x148d   :  { %15095 = vmatprep.mubr.msk.f32.mxu0 %vm36_vm0, %v7576_v15  ;;  %15102 = vmatprep.mubr.msk.f32.mxu1 %vm36_vm0, %v7577_v62  ;;  %v7558_v22 = vcombine.low %v19661_v46, %v19664_v9  ;;  %v9878_v10 = vcombine.low %v19546_v45, %v19549_v56  ;;  %v9918_v49 = vrot.slane %v9910_v17, %v15881_v41 }
0x148e   :  { %v10066_v30 = vcombine.low %v10022_v0, %v10054_v57  ;;  %v10067_v35 = vcombine.high %v10022_v0, %v10054_v57  ;;  %v7712_v25 = vcombine.low %v7661_v39, %v7693_v24  ;;  %v7713_v1 = vcombine.high %v7661_v39, %v7693_v24 }
0x148f   :  { %v7534_v38 = vrot.slane %v7526_v2, %v15881_v41  ;;  %v7566_v43 = vrot.slane %v7558_v22, %v15881_v41  ;;  %v9886_v55 = vrot.slane %v9878_v10, %v15881_v41  ;;  %v10015_v16 = vcombine.high %v19484_v37, %v19487_v50 }
0x1490   :  { %15105 = vmatprep.subr.msk.mxu0 %vm36_vm0, %v10066_v30  ;;  %15112 = vmatprep.subr.msk.mxu1 %vm36_vm0, %v10067_v35  ;;  %v10047_v26 = vcombine.high %v19492_v19, %v19495_v3  ;;  %v7670_v29 = vrot.slane %v7662_v14, %v15881_v41  ;;  %v7702_v50 = vrot.slane %v7694_v36, %v15881_v41 }
0x1491   :  { %15096 = vmatmul.mubr.msk.f32.vlgmr.msra.gmra.mxu0 %vm36_vm0, %v7712_v25  ;;  %15103 = vmatmul.mubr.msk.f32.vlgmr.msra.gmra.mxu1 %vm36_vm0, %v7713_v1  ;;  %v7578_v23 = vcombine.low %v7534_v38, %v7566_v43  ;;  %v7579_v13 = vcombine.high %v7534_v38, %v7566_v43  ;;  %v9930_v20 = vcombine.low %v9886_v55, %v9918_v49 }
0x1492   :  { %15106 = vmatpush3.xpose.msk.msra.mxu0 %vm36_vm0, %v10066_v30  ;;  %15113 = vmatpush3.xpose.msk.msra.mxu1 %vm36_vm0, %v10067_v35  ;;  %v9931_v61 = vcombine.high %v9886_v55, %v9918_v49  ;;  %v10029_v54 = vrot.slane %v10015_v16, %v15881_v41  ;;  %v10061_v37 = vrot.slane %v10047_v26, %v15881_v41 }
0x1493   :  { %15109 = vmatprep.mubr.msk.f32.mxu0 %vm36_vm0, %v7578_v23  ;;  %15116 = vmatprep.mubr.msk.f32.mxu1 %vm36_vm0, %v7579_v13  ;;  %v9879_v19 = vcombine.high %v19546_v45, %v19549_v56  ;;  %v9911_v3 = vcombine.high %v19554_v6, %v19557_v4  ;;  %v7527_v52 = vcombine.high %v19652_v5, %v19655_v32 }
0x1494   :  { %15107 = vmatprep.subr.msk.mxu0 %vm36_vm0, %v9930_v20  ;;  %15114 = vmatprep.subr.msk.mxu1 %vm36_vm0, %v9931_v61  ;;  %v10068_v48 = vcombine.low %v10029_v54, %v10061_v37  ;;  %v10069_v21 = vcombine.high %v10029_v54, %v10061_v37  ;;  %v7714_v47 = vcombine.low %v7670_v29, %v7702_v50 }
0x1495   :  { %v7715_v34 = vcombine.high %v7670_v29, %v7702_v50  ;;  %v9893_v58 = vrot.slane %v9879_v19, %v15881_v41  ;;  %v9925_v51 = vrot.slane %v9911_v3, %v15881_v41  ;;  %v7541_v45 = vrot.slane %v7527_v52, %v15881_v41 }
0x1496   :  { %15108 = vmatpush3.xpose.msk.msra.mxu0 %vm36_vm0, %v9930_v20  ;;  %15115 = vmatpush3.xpose.msk.msra.mxu1 %vm36_vm0, %v9931_v61  ;;  %v7559_v56 = vcombine.high %v19661_v46, %v19664_v9  ;;  %v7663_v6 = vcombine.high %v19717_v44, %v19720_v53  ;;  %v7695_v4 = vcombine.high %v19723_v27, %v19726_v31 }
0x1497   :  { %15119 = vmatprep.subr.msk.mxu0 %vm36_vm0, %v10068_v48  ;;  %15126 = vmatprep.subr.msk.mxu1 %vm36_vm0, %v10069_v21  ;;  %v9932_v32 = vcombine.low %v9893_v58, %v9925_v51  ;;  %v9933_v42 = vcombine.high %v9893_v58, %v9925_v51 }
0x1498   :  { %v7573_v5 = vrot.slane %v7559_v56, %v15881_v41  ;;  %v7677_v11 = vrot.slane %v7663_v6, %v15881_v41  ;;  %v7709_v60 = vrot.slane %v7695_v4, %v15881_v41 }
0x1499   :  { %15110 = vmatmul.mubr.msk.f32.vlgmr.msra.gmra.mxu0 %vm36_vm0, %v7714_v47  ;;  %15117 = vmatmul.mubr.msk.f32.vlgmr.msra.gmra.mxu1 %vm36_vm0, %v7715_v34 }
0x149a   :  { %15120 = vmatpush3.xpose.msk.msra.mxu0 %vm36_vm0, %v10068_v48  ;;  %15127 = vmatpush3.xpose.msk.msra.mxu1 %vm36_vm0, %v10069_v21  ;;  %v7580_v46 = vcombine.low %v7541_v45, %v7573_v5  ;;  %v7581_v9 = vcombine.high %v7541_v45, %v7573_v5  ;;  %v7716_v12 = vcombine.low %v7677_v11, %v7709_v60 }
0x149b   :  { %15121 = vmatprep.subr.msk.mxu0 %vm36_vm0, %v9932_v32  ;;  %15128 = vmatprep.subr.msk.mxu1 %vm36_vm0, %v9933_v42  ;;  %v7717_v7 = vcombine.high %v7677_v11, %v7709_v60 }
0x149c   :  { %15123 = vmatprep.mubr.msk.f32.mxu0 %vm36_vm0, %v7580_v46  ;;  %15130 = vmatprep.mubr.msk.f32.mxu1 %vm36_vm0, %v7581_v9 }
0x149e   :  { %15122 = vmatpush3.xpose.msk.msra.mxu0 %vm36_vm0, %v9932_v32  ;;  %15129 = vmatpush3.xpose.msk.msra.mxu1 %vm36_vm0, %v9933_v42 }
0x14a1   :  { %15124 = vmatmul.mubr.msk.f32.vlgmr.msra.gmra.mxu0 %vm36_vm0, %v7716_v12  ;;  %15131 = vmatmul.mubr.msk.f32.vlgmr.msra.gmra.mxu1 %vm36_vm0, %v7717_v7 }
0x14b8   :  { %v14915_v59 = vpop.f32.mrf.mxu0  ;;  %v14922_v63 = vpop.f32.mrf.mxu1 }
0x14ba   :  { %v10148_v40 = vpop.f32.mrf.mxu0  ;;  %v10235_v8 = vpop.f32.mrf.mxu1 }
0x14c1   :  { %v14929_v33 = vpop.f32.mrf.mxu0 }
0x14c2   :  { %v14936_v0 = vpop.f32.mrf.mxu1  ;;  %v13398_v44 = vcombine.low %v14915_v59, %v14929_v33  ;;  %v13399_v36 = vcombine.high %v14915_v59, %v14929_v33 }
0x14c3   :  { %v13414_v53 = vcombine.low %v14922_v63, %v14936_v0  ;;  %v10322_v27 = vpop.f32.mrf.mxu0  ;;  %v13415_v57 = vcombine.high %v14922_v63, %v14936_v0 }
0x14c4   :  { %v10409_v31 = vpop.f32.mrf.mxu1  ;;  %v13406_v15 = vrot.slane %v13398_v44, %v15861_v18  ;;  %v12854_v39 = vcombine.low %v10148_v40, %v10322_v27  ;;  %v12855_v22 = vcombine.high %v10148_v40, %v10322_v27  ;;  %v19816_v35 = vrot.slane %v13399_v36, %v15861_v18 }
0x14c5   :  { %v13422_v62 = vrot.slane %v13414_v53, %v15861_v18  ;;  %v12870_v24 = vcombine.low %v10235_v8, %v10409_v31  ;;  %v12871_v10 = vcombine.high %v10235_v8, %v10409_v31  ;;  %v19819_v25 = vrot.slane %v13415_v57, %v15861_v18 }
0x14c6   :  { %v12862_v1 = vrot.slane %v12854_v39, %v15861_v18  ;;  %v12869_v20 = vrot.slane %v12855_v22, %v15861_v18 }
0x14c7   :  { %v13462_v2 = vcombine.low %v13406_v15, %v13422_v62  ;;  %v12878_v38 = vrot.slane %v12870_v24, %v15861_v18  ;;  %v13463_v23 = vcombine.high %v13406_v15, %v13422_v62  ;;  %v12885_v61 = vrot.slane %v12871_v10, %v15861_v18 }
0x14c8   :  { %v13478_v63 = vcombine.low %v19816_v35, %v19819_v25 }
0x14c9   :  { %v19824_v13 = vrot.slane %v13462_v2, %v15881_v41  ;;  %v12918_v58 = vcombine.low %v12862_v1, %v12878_v38  ;;  %v12919_v51 = vcombine.high %v12862_v1, %v12878_v38  ;;  %v12934_v42 = vcombine.low %v12869_v20, %v12885_v61 }
0x14ca   :  { %v13477_v59 = vrot.slane %v13463_v23, %v15881_v41  ;;  %v13486_v57 = vrot.slane %v13478_v63, %v15881_v41 }
0x14cb   :  { %v19844_v40 = vrot.slane %v12918_v58, %v15881_v41  ;;  %v12933_v33 = vrot.slane %v12919_v51, %v15881_v41  ;;  %v12942_v27 = vrot.slane %v12934_v42, %v15881_v41 }
0x14cd   :  { %v14943_v28 = vpop.f32.mrf.mxu0  ;;  %v14950_v14 = vpop.f32.mrf.mxu1 }
0x14cf   :  { %v10496_v17 = vpop.f32.mrf.mxu0  ;;  %v10583_v30 = vpop.f32.mrf.mxu1 }
0x14da   :  { %v14957_v43 = vpop.f32.mrf.mxu0  ;;  %v14964_v55 = vpop.f32.mrf.mxu1 }
0x14db   :  { %v13430_v49 = vcombine.low %v14943_v28, %v14957_v43  ;;  %v13431_v16 = vcombine.high %v14943_v28, %v14957_v43  ;;  %v13446_v26 = vcombine.low %v14950_v14, %v14964_v55  ;;  %v13447_v29 = vcombine.high %v14950_v14, %v14964_v55 }
0x14dc   :  { %v10670_v54 = vpop.f32.mrf.mxu0  ;;  %v10757_v37 = vpop.f32.mrf.mxu1  ;;  %v13479_v43 = vcombine.high %v19816_v35, %v19819_v25 }
0x14dd   :  { %v13438_v50 = vrot.slane %v13430_v49, %v15861_v18  ;;  %v13445_v19 = vrot.slane %v13431_v16, %v15861_v18  ;;  %v13454_v3 = vrot.slane %v13446_v26, %v15861_v18  ;;  %v13461_v48 = vrot.slane %v13447_v29, %v15861_v18 }
0x14de   :  { %v12886_v21 = vcombine.low %v10496_v17, %v10670_v54  ;;  %v12887_v52 = vcombine.high %v10496_v17, %v10670_v54  ;;  %v12902_v47 = vcombine.low %v10583_v30, %v10757_v37  ;;  %v12903_v34 = vcombine.high %v10583_v30, %v10757_v37 }
0x14df   :  { %v13494_v45 = vcombine.low %v13438_v50, %v13454_v3  ;;  %v13495_v56 = vcombine.high %v13438_v50, %v13454_v3  ;;  %v13510_v11 = vcombine.low %v13445_v19, %v13461_v48  ;;  %v12935_v17 = vcombine.high %v12869_v20, %v12885_v61 }
0x14e0   :  { %v12894_v6 = vrot.slane %v12886_v21, %v15861_v18  ;;  %v12901_v4 = vrot.slane %v12887_v52, %v15861_v18  ;;  %v12910_v5 = vrot.slane %v12902_v47, %v15861_v18  ;;  %v12917_v32 = vrot.slane %v12903_v34, %v15861_v18  ;;  %v14253_v47 = vld [vmem:[%s20365_s5 + $0xf8] sm:$0xff] }
0x14e1   :  { %v19837_v46 = vrot.slane %v13494_v45, %v15881_v41  ;;  %v13509_v9 = vrot.slane %v13495_v56, %v15881_v41  ;;  %v13518_v31 = vrot.slane %v13510_v11, %v15881_v41  ;;  %v13511_v30 = vcombine.high %v13445_v19, %v13461_v48  ;;  %v14237_v34 = vld [vmem:[%s20365_s5 + $0x78] sm:$0xff]  ;;  %14865 = vmatprep.subr.mxu0 %v14253_v47  ;;  %v14252_v56 = vld [vmem:[%s20365_s5 + $0xf0] sm:$0xff] }
0x14e2   :  { %v12950_v60 = vcombine.low %v12894_v6, %v12910_v5  ;;  %v12951_v12 = vcombine.high %v12894_v6, %v12910_v5  ;;  %v12966_v7 = vcombine.low %v12901_v4, %v12917_v32  ;;  %v12967_v39 = vcombine.high %v12901_v4, %v12917_v32  ;;  %v19874_v25 = vpop.f32.mrf.mxu0  ;;  %14866 = vmatpush3.msra.mxu0 %v14237_v34  ;;  %v14236_v6 = vld [vmem:[%s20365_s5 + $0x70] sm:$0xff]  ;;  %v14251_v4 = vld [vmem:[%s20365_s5 + $0xe8] sm:$0xff] }
0x14e3   :  { %v13526_v8 = vcombine.low %v19824_v13, %v19837_v46  ;;  %v13528_v15 = vcombine.low %v13477_v59, %v13509_v9  ;;  %v13527_v36 = vcombine.high %v19824_v13, %v19837_v46  ;;  %v13530_v1 = vcombine.low %v13486_v57, %v13518_v31  ;;  %v19876_v50 = vpop.f32.mrf.mxu1  ;;  %14867 = vmatprep.subr.mxu0 %v14252_v56  ;;  %v14235_v5 = vld [vmem:[%s20365_s5 + $0x68] sm:$0xff] }
0x14e4   :  { %v19850_v0 = vrot.slane %v12950_v60, %v15881_v41  ;;  %v12965_v44 = vrot.slane %v12951_v12, %v15881_v41  ;;  %v12974_v53 = vrot.slane %v12966_v7, %v15881_v41  ;;  %v13529_v38 = vcombine.high %v13477_v59, %v13509_v9  ;;  %v19879_v21 = vpop.f32.mrf.mxu0  ;;  %14868 = vmatpush3.msra.mxu0 %v14236_v6  ;;  %v14250_v60 = vld [vmem:[%s20365_s5 + $0xe0] sm:$0xff]  ;;  %v14249_v7 = vld [vmem:[%s20365_s5 + $0xd8] sm:$0xff] }
0x14e5   :  { %v12981_v55 = vrot.slane %v12967_v39, %v15881_v41  ;;  %v12949_v29 = vrot.slane %v12935_v17, %v15881_v41  ;;  %v13525_v23 = vrot.slane %v13511_v30, %v15881_v41  ;;  %v13531_v20 = vcombine.high %v13486_v57, %v13518_v31  ;;  %v19881_v52 = vpop.f32.mrf.mxu1  ;;  %14869 = vmatprep.subr.mxu0 %v14251_v4  ;;  %v14234_v12 = vld [vmem:[%s20365_s5 + $0x60] sm:$0xff]  ;;  %v14233_v59 = vld [vmem:[%s20365_s5 + $0x58] sm:$0xff]  ;;  %v14232_v31 = vld [vmem:[%s20365_s5 + $0x50] sm:$0xff] }
0x14e6   :  { %v12982_v62 = vcombine.low %v19844_v40, %v19850_v0  ;;  %v12984_v28 = vcombine.low %v12933_v33, %v12965_v44  ;;  %v12983_v14 = vcombine.high %v19844_v40, %v19850_v0  ;;  %v12986_v22 = vcombine.low %v12942_v27, %v12974_v53  ;;  %14870 = vmatpush3.msra.mxu0 %v14235_v5  ;;  %v14245_v30 = vld [vmem:[%s20365_s5 + $0xb8] sm:$0xff]  ;;  %v14242_v4 = vld [vmem:[%s20365_s5 + $0xa0] sm:$0xff] }
0x14e7   :  { %v12985_v10 = vcombine.high %v12933_v33, %v12965_v44  ;;  %v12987_v26 = vcombine.high %v12942_v27, %v12974_v53  ;;  %v13493_v61 = vrot.slane %v13479_v43, %v15881_v41  ;;  %v12988_v37 = vcombine.low %v12949_v29, %v12981_v55  ;;  %14871 = vmatprep.subr.mxu0 %v14250_v60  ;;  %v14248_v27 = vld [vmem:[%s20365_s5 + $0xd0] sm:$0xff] }
0x14e8   :  { %v15151_v24 = vpack.i.bf16 %v12984_v28, %v13528_v15  ;;  %v15146_v2 = vpack.i.bf16 %v12983_v14, %v13527_v36  ;;  %v15161_v49 = vpack.i.bf16 %v12986_v22, %v13530_v1  ;;  %v12989_v3 = vcombine.high %v12949_v29, %v12981_v55  ;;  %14872 = vmatpush3.msra.mxu0 %v14234_v12  ;;  %v14247_v15 = vld [vmem:[%s20365_s5 + $0xc8] sm:$0xff]  ;;  %v14244_v29 = vld [vmem:[%s20365_s5 + $0xb0] sm:$0xff] }
0x14e9   :  { %v15156_v16 = vpack.i.bf16 %v12985_v10, %v13529_v38  ;;  %v15166_v54 = vpack.i.bf16 %v12987_v26, %v13531_v20  ;;  %v13532_v35 = vcombine.low %v13493_v61, %v13525_v23  ;;  %v13533_v48 = vcombine.high %v13493_v61, %v13525_v23  ;;  %14873 = vmatprep.subr.mxu0 %v14249_v7  ;;  %v14231_v36 = vld [vmem:[%s20365_s5 + $0x48] sm:$0xff]  ;;  %v14228_v61 = vld [vmem:[%s20365_s5 + $0x30] sm:$0xff] }
0x14ea   :  { %15152 = vrot.lane.b32.xlu0 %v15151_v24, %s15590_s22  ;;  %15147 = vrot.lane.b32.xlu1 %v15146_v2, %s15587_s20  ;;  %v14246_v24 = vld [vmem:[%s20365_s5 + $0xc0] sm:$0xff] }
0x14eb   :  { %v15171_v19 = vpack.i.bf16 %v12988_v37, %v13532_v35  ;;  %v15176_v58 = vpack.i.bf16 %v12989_v3, %v13533_v48  ;;  %14874 = vmatpush3.msra.mxu0 %v14233_v59  ;;  %v14230_v2 = vld [vmem:[%s20365_s5 + $0x40] sm:$0xff]  ;;  %v14243_v3 = vld [vmem:[%s20365_s5 + $0xa8] sm:$0xff]  ;;  %v14241_v59 = vld [vmem:[%s20365_s5 + $0x98] sm:$0xff] }
0x14ec   :  { %14875 = vmatprep.subr.mxu0 %v14248_v27 }
0x14ed   :  { %14876 = vmatpush3.msra.mxu0 %v14232_v31 }
0x14ee   :  { %15162 = vrot.lane.b32.xlu0 %v15161_v49, %s15589_s21  ;;  %15157 = vrot.lane.b32.xlu1 %v15156_v16, %s15586_s19  ;;  %v14229_v49 = vld [vmem:[%s20365_s5 + $0x38] sm:$0xff] }
0x14ef   :  { %14877 = vmatprep.subr.mxu0 %v14247_v15 }
0x14f0   :  { %v19889_v51 = vpop.f32.mrf.mxu0  ;;  %v19891_v45 = vpop.f32.mrf.mxu1  ;;  %14878 = vmatpush3.msra.mxu0 %v14231_v36 }
0x14f1   :  { %v13534_v32 = vcombine.low %v19874_v25, %v19889_v51  ;;  %v13550_v42 = vcombine.low %v19876_v50, %v19891_v45  ;;  %14879 = vmatprep.subr.mxu0 %v14246_v24  ;;  %v14224_v24 = vld [vmem:[%s20365_s5 + $0x10] sm:$0xff] }
0x14f2   :  { %15167 = vrot.lane.b32.xlu0 %v15166_v54, %s15585_s18  ;;  %v19910_v9 = vpop.f32.mrf.mxu0  ;;  %v19912_v11 = vpop.f32.mrf.mxu1  ;;  %14880 = vmatpush3.msra.mxu0 %v14230_v2  ;;  %v13535_v54 = vcombine.high %v19874_v25, %v19889_v51  ;;  %v14227_v25 = vld [vmem:[%s20365_s5 + $0x28] sm:$0xff] }
0x14f3   :  { %v19931_v44 = vrot.slane %v13534_v32, %v15861_v18  ;;  %v19934_v53 = vrot.slane %v13550_v42, %v15861_v18  ;;  %v12990_v28 = vcombine.low %v19879_v21, %v19910_v9  ;;  %v13006_v14 = vcombine.low %v19881_v52, %v19912_v11  ;;  %14881 = vmatprep.subr.mxu0 %v14245_v30  ;;  %v14239_v30 = vld [vmem:[%s20365_s5 + $0x88] sm:$0xff] }
0x14f4   :  { %v12991_v37 = vcombine.high %v19879_v21, %v19910_v9  ;;  %14882 = vmatpush3.msra.mxu0 %v14229_v49  ;;  %v13007_v47 = vcombine.high %v19881_v52, %v19912_v11  ;;  %v14226_v9 = vld [vmem:[%s20365_s5 + $0x20] sm:$0xff]  ;;  %v13551_v11 = vcombine.high %v19876_v50, %v19891_v45  ;;  %v14225_v45 = vld [vmem:[%s20365_s5 + $0x18] sm:$0xff] }
0x14f5   :  { %v13598_v22 = vcombine.low %v19931_v44, %v19934_v53  ;;  %v12998_v1 = vrot.slane %v12990_v28, %v15861_v18  ;;  %v13014_v38 = vrot.slane %v13006_v14, %v15861_v18  ;;  %14883 = vmatprep.subr.mxu0 %v14244_v29  ;;  %v14240_v28 = vld [vmem:[%s20365_s5 + $0x90] sm:$0xff]  ;;  %v14238_v29 = vld [vmem:[%s20365_s5 + $0x80] sm:$0xff] }
0x14f6   :  { %15172 = vrot.lane.b32.xlu0 %v15171_v19, %s15588_s0  ;;  %14884 = vmatpush3.msra.mxu0 %v14228_v61  ;;  %v13021_v14 = vrot.slane %v13007_v47, %v15861_v18 }
0x14f7   :  { %v19992_v48 = vrot.slane %v13598_v22, %v15881_v41  ;;  %v13054_v34 = vcombine.low %v12998_v1, %v13014_v38  ;;  %v13055_v5 = vcombine.high %v12998_v1, %v13014_v38  ;;  %14885 = vmatprep.subr.mxu0 %v14243_v3  ;;  %v13549_v1 = vrot.slane %v13535_v54, %v15861_v18 }
0x14f8   :  { %v19926_v63 = vpop.f32.mrf.mxu0  ;;  %14886 = vmatpush3.msra.mxu0 %v14227_v25  ;;  %v13565_v38 = vrot.slane %v13551_v11, %v15861_v18 }
0x14f9   :  { %v19928_v33 = vpop.f32.mrf.mxu1  ;;  %v20025_v27 = vrot.slane %v13054_v34, %v15881_v41  ;;  %14887 = vmatprep.subr.mxu0 %v14242_v4  ;;  %v13069_v36 = vrot.slane %v13055_v5, %v15881_v41 }
0x14fa   :  { %15177 = vrot.lane.b32.xlu0 %v15176_v58, %s15584_s17  ;;  %v11192_v57 = vpop.f32.mrf.mxu0  ;;  %14888 = vmatpush3.msra.mxu0 %v14226_v9 }
0x14fb   :  { %v11279_v39 = vpop.f32.mrf.mxu1  ;;  %14889 = vmatprep.subr.mxu0 %v14241_v59 }
0x14fc   :  { %14890 = vmatpush3.msra.mxu0 %v14225_v45 }
0x14fd   :  { %14891 = vmatprep.subr.mxu0 %v14240_v28 }
0x14fe   :  { %14892 = vmatpush3.msra.mxu0 %v14224_v24 }
0x14ff   :  { %14893 = vmatprep.subr.mxu0 %v14239_v30 }
0x1505   :  { %v19960_v10 = vpop.f32.mrf.mxu0  ;;  %v19962_v17 = vpop.f32.mrf.mxu1 }
0x1506   :  { %v13566_v43 = vcombine.low %v19926_v63, %v19960_v10  ;;  %v13582_v55 = vcombine.low %v19928_v33, %v19962_v17  ;;  %v13567_v52 = vcombine.high %v19926_v63, %v19960_v10  ;;  %v13583_v32 = vcombine.high %v19928_v33, %v19962_v17 }
0x1507   :  { %v11366_v16 = vpop.f32.mrf.mxu0  ;;  %v11453_v26 = vpop.f32.mrf.mxu1  ;;  %v13599_v63 = vcombine.high %v19931_v44, %v19934_v53  ;;  %v20022_v33 = vrot.slane %v12991_v37, %v15861_v18  ;;  %v13614_v37 = vcombine.low %v13549_v1, %v13565_v38 }
0x1508   :  { %v13574_v23 = vrot.slane %v13566_v43, %v15861_v18  ;;  %v13590_v20 = vrot.slane %v13582_v55, %v15861_v18  ;;  %v13022_v35 = vcombine.low %v11192_v57, %v11366_v16  ;;  %v13038_v19 = vcombine.low %v11279_v39, %v11453_v26  ;;  %v14223_v43 = vld [vmem:[%s20365_s5 + $0x8] sm:$0xff] }
0x1509   :  { %v13023_v21 = vcombine.high %v11192_v57, %v11366_v16  ;;  %v13039_v56 = vcombine.high %v11279_v39, %v11453_v26  ;;  %v13581_v57 = vrot.slane %v13567_v52, %v15861_v18  ;;  %v13597_v39 = vrot.slane %v13583_v32, %v15861_v18  ;;  %14894 = vmatpush3.msra.mxu0 %v14223_v43 }
0x150a   :  { %v13630_v58 = vcombine.low %v13574_v23, %v13590_v20  ;;  %v13030_v51 = vrot.slane %v13022_v35, %v15861_v18  ;;  %v13046_v6 = vrot.slane %v13038_v19, %v15861_v18  ;;  %v13631_v60 = vcombine.high %v13574_v23, %v13590_v20  ;;  %v14222_v23 = vld [vmem:[%s20365_s5] sm:$0xff]  ;;  %14895 = vmatprep.subr.mxu0 %v14238_v29 }
0x150b   :  { %v13037_v31 = vrot.slane %v13023_v21, %v15861_v18  ;;  %v13053_v15 = vrot.slane %v13039_v56, %v15861_v18  ;;  %v13613_v55 = vrot.slane %v13599_v63, %v15881_v41  ;;  %v13070_v20 = vcombine.low %v20022_v33, %v13021_v14  ;;  %14896 = vmatpush3.msra.mxu0 %v14222_v23 }
0x150c   :  { %v20009_v42 = vrot.slane %v13630_v58, %v15881_v41  ;;  %v13086_v12 = vcombine.low %v13030_v51, %v13046_v6  ;;  %v13087_v7 = vcombine.high %v13030_v51, %v13046_v6  ;;  %v13645_v2 = vrot.slane %v13631_v60, %v15881_v41 }
0x150d   :  { %v13102_v49 = vcombine.low %v13037_v31, %v13053_v15  ;;  %v13646_v61 = vcombine.low %v13581_v57, %v13597_v39  ;;  %v13078_v47 = vrot.slane %v13070_v20, %v15881_v41  ;;  %v13622_v25 = vrot.slane %v13614_v37, %v15881_v41 }
0x150e   :  { %v13662_v50 = vcombine.low %v19992_v48, %v20009_v42  ;;  %v20035_v44 = vrot.slane %v13086_v12, %v15881_v41  ;;  %v13101_v53 = vrot.slane %v13087_v7, %v15881_v41  ;;  %v13663_v17 = vcombine.high %v19992_v48, %v20009_v42 }
0x150f   :  { %v13664_v54 = vcombine.low %v13613_v55, %v13645_v2  ;;  %v13110_v35 = vrot.slane %v13102_v49, %v15881_v41  ;;  %v13654_v34 = vrot.slane %v13646_v61, %v15881_v41  ;;  %v13665_v58 = vcombine.high %v13613_v55, %v13645_v2 }
0x1510   :  { %v13118_v22 = vcombine.low %v20025_v27, %v20035_v44  ;;  %v13119_v10 = vcombine.high %v20025_v27, %v20035_v44  ;;  %v13120_v26 = vcombine.low %v13069_v36, %v13101_v53  ;;  %v13121_v3 = vcombine.high %v13069_v36, %v13101_v53 }
0x1511   :  { %v13103_v21 = vcombine.high %v13037_v31, %v13053_v15  ;;  %v13122_v56 = vcombine.low %v13078_v47, %v13110_v35  ;;  %v13071_v6 = vcombine.high %v20022_v33, %v13021_v14  ;;  %v13647_v4 = vcombine.high %v13581_v57, %v13597_v39  ;;  %v20085_v31 = vpop.f32.mrf.mxu0  ;;  %v20087_v15 = vpop.f32.mrf.mxu1 }
0x1512   :  { %v15181_v16 = vpack.i.bf16 %v13119_v10, %v13663_v17  ;;  %v15186_v19 = vpack.i.bf16 %v13120_v26, %v13664_v54  ;;  %v15191_v51 = vpack.i.bf16 %v13121_v3, %v13665_v58  ;;  %v13666_v5 = vcombine.low %v13622_v25, %v13654_v34 }
0x1513   :  { %v13615_v52 = vcombine.high %v13549_v1, %v13565_v38  ;;  %v13117_v32 = vrot.slane %v13103_v21, %v15881_v41  ;;  %v13123_v11 = vcombine.high %v13078_v47, %v13110_v35  ;;  %v13085_v60 = vrot.slane %v13071_v6, %v15881_v41  ;;  %v11540_v36 = vpop.f32.mrf.mxu0  ;;  %v11627_v57 = vpop.f32.mrf.mxu1 }
0x1514   :  { %15182 = vrot.lane.b32.xlu1 %v15181_v16, %s15587_s20  ;;  %v15196_v9 = vpack.i.bf16 %v13122_v56, %v13666_v5  ;;  %v13661_v12 = vrot.slane %v13647_v4, %v15881_v41  ;;  %v13667_v7 = vcombine.high %v13622_v25, %v13654_v34 }
0x1515   :  { %v13629_v59 = vrot.slane %v13615_v52, %v15881_v41  ;;  %v13124_v33 = vcombine.low %v13085_v60, %v13117_v32  ;;  %v13125_v28 = vcombine.high %v13085_v60, %v13117_v32 }
0x1516   :  { %v15201_v63 = vpack.i.bf16 %v13123_v11, %v13667_v7 }
0x1517   :  { %v13668_v45 = vcombine.low %v13629_v59, %v13661_v12  ;;  %v13669_v14 = vcombine.high %v13629_v59, %v13661_v12 }
0x1518   :  { %15187 = vrot.lane.b32.xlu1 %v15186_v19, %s15590_s22 }
0x1519   :  { %v15206_v53 = vpack.i.bf16 %v13124_v33, %v13668_v45  ;;  %v15211_v39 = vpack.i.bf16 %v13125_v28, %v13669_v14 }
0x151c   :  { %15192 = vrot.lane.b32.xlu1 %v15191_v51, %s15586_s19 }
0x151d   :  { %v20090_v24 = vpop.f32.mrf.mxu0  ;;  %v20092_v2 = vpop.f32.mrf.mxu1 }
0x151e   :  { %v13670_v10 = vcombine.low %v20085_v31, %v20090_v24  ;;  %v13686_v17 = vcombine.low %v20087_v15, %v20092_v2  ;;  %v13671_v21 = vcombine.high %v20085_v31, %v20090_v24  ;;  %v13687_v45 = vcombine.high %v20087_v15, %v20092_v2 }
0x151f   :  { %v11714_v30 = vpop.f32.mrf.mxu0  ;;  %v11801_v1 = vpop.f32.mrf.mxu1 }
0x1520   :  { %15197 = vrot.lane.b32.xlu1 %v15196_v9, %s15589_s21  ;;  %v13678_v55 = vrot.slane %v13670_v10, %v15861_v18  ;;  %v13694_v49 = vrot.slane %v13686_v17, %v15861_v18  ;;  %v13126_v16 = vcombine.low %v11540_v36, %v11714_v30  ;;  %v13142_v26 = vcombine.low %v11627_v57, %v11801_v1 }
0x1521   :  { %v13127_v51 = vcombine.high %v11540_v36, %v11714_v30  ;;  %v13143_v5 = vcombine.high %v11627_v57, %v11801_v1 }
0x1522   :  { %v13734_v20 = vcombine.low %v13678_v55, %v13694_v49  ;;  %v13134_v37 = vrot.slane %v13126_v16, %v15861_v18  ;;  %v13150_v35 = vrot.slane %v13142_v26, %v15861_v18  ;;  %v13735_v14 = vcombine.high %v13678_v55, %v13694_v49 }
0x1523   :  { %v13141_v36 = vrot.slane %v13127_v51, %v15861_v18  ;;  %v13157_v2 = vrot.slane %v13143_v5, %v15861_v18  ;;  %v13685_v26 = vrot.slane %v13671_v21, %v15861_v18 }
0x1524   :  { %15202 = vrot.lane.b32.xlu1 %v15201_v63, %s15585_s18  ;;  %v20108_v4 = vrot.slane %v13734_v20, %v15881_v41  ;;  %v13190_v52 = vcombine.low %v13134_v37, %v13150_v35  ;;  %v13191_v7 = vcombine.high %v13134_v37, %v13150_v35 }
0x1525   :  { %v13206_v37 = vcombine.low %v13141_v36, %v13157_v2 }
0x1526   :  { %v20119_v57 = vrot.slane %v13190_v52, %v15881_v41  ;;  %v13205_v30 = vrot.slane %v13191_v7, %v15881_v41 }
0x1527   :  { %v13214_v21 = vrot.slane %v13206_v37, %v15881_v41 }
0x1528   :  { %15207 = vrot.lane.b32.xlu1 %v15206_v53, %s15588_s0 }
0x152c   :  { %15212 = vrot.lane.b32.xlu1 %v15211_v39, %s15584_s17  ;;  %v15055_v38 = vpop.f32.mrf.mxu0  ;;  %v15062_v43 = vpop.f32.mrf.mxu1 }
0x152e   :  { %v11888_v29 = vpop.f32.mrf.mxu0  ;;  %v11975_v23 = vpop.f32.mrf.mxu1 }
0x1539   :  { %v15069_v61 = vpop.f32.mrf.mxu0  ;;  %v15076_v54 = vpop.f32.mrf.mxu1 }
0x153a   :  { %v13702_v19 = vcombine.low %v15055_v38, %v15069_v61  ;;  %v13718_v3 = vcombine.low %v15062_v43, %v15076_v54  ;;  %v13703_v59 = vcombine.high %v15055_v38, %v15069_v61  ;;  %v13719_v63 = vcombine.high %v15062_v43, %v15076_v54 }
0x153b   :  { %v12062_v47 = vpop.f32.mrf.mxu0  ;;  %v12149_v34 = vpop.f32.mrf.mxu1 }
0x153c   :  { %v13710_v58 = vrot.slane %v13702_v19, %v15861_v18  ;;  %v13726_v25 = vrot.slane %v13718_v3, %v15861_v18  ;;  %v13158_v56 = vcombine.low %v11888_v29, %v12062_v47  ;;  %v13174_v6 = vcombine.low %v11975_v23, %v12149_v34 }
0x153d   :  { %v13159_v9 = vcombine.high %v11888_v29, %v12062_v47  ;;  %v13175_v60 = vcombine.high %v11975_v23, %v12149_v34  ;;  %v13717_v1 = vrot.slane %v13703_v59, %v15861_v18  ;;  %v13733_v38 = vrot.slane %v13719_v63, %v15861_v18 }
0x153e   :  { %v13766_v32 = vcombine.low %v13710_v58, %v13726_v25  ;;  %v13166_v11 = vrot.slane %v13158_v56, %v15861_v18  ;;  %v13182_v12 = vrot.slane %v13174_v6, %v15861_v18  ;;  %v13767_v31 = vcombine.high %v13710_v58, %v13726_v25 }
0x153f   :  { %v13173_v24 = vrot.slane %v13159_v9, %v15861_v18  ;;  %v13189_v10 = vrot.slane %v13175_v60, %v15861_v18  ;;  %v13701_v29 = vrot.slane %v13687_v45, %v15861_v18  ;;  %v13749_v23 = vrot.slane %v13735_v14, %v15881_v41 }
0x1540   :  { %v20113_v33 = vrot.slane %v13766_v32, %v15881_v41  ;;  %v13222_v53 = vcombine.low %v13166_v11, %v13182_v12  ;;  %v13223_v28 = vcombine.high %v13166_v11, %v13182_v12  ;;  %v13781_v43 = vrot.slane %v13767_v31, %v15881_v41 }
0x1541   :  { %v13238_v20 = vcombine.low %v13173_v24, %v13189_v10  ;;  %v13782_v35 = vcombine.low %v13717_v1, %v13733_v38  ;;  %v13750_v3 = vcombine.low %v13685_v26, %v13701_v29  ;;  %v13239_v52 = vcombine.high %v13173_v24, %v13189_v10 }
0x1542   :  { %v13798_v39 = vcombine.low %v20108_v4, %v20113_v33  ;;  %v20126_v17 = vrot.slane %v13222_v53, %v15881_v41  ;;  %v13237_v15 = vrot.slane %v13223_v28, %v15881_v41  ;;  %v13799_v16 = vcombine.high %v20108_v4, %v20113_v33 }
0x1543   :  { %v13800_v19 = vcombine.low %v13749_v23, %v13781_v43  ;;  %v13246_v47 = vrot.slane %v13238_v20, %v15881_v41  ;;  %v13790_v56 = vrot.slane %v13782_v35, %v15881_v41  ;;  %v13801_v6 = vcombine.high %v13749_v23, %v13781_v43 }
0x1544   :  { %v13254_v55 = vcombine.low %v20119_v57, %v20126_v17  ;;  %v13255_v49 = vcombine.high %v20119_v57, %v20126_v17  ;;  %v13256_v54 = vcombine.low %v13205_v30, %v13237_v15  ;;  %v13257_v58 = vcombine.high %v13205_v30, %v13237_v15 }
0x1545   :  { %v13758_v5 = vrot.slane %v13750_v3, %v15881_v41  ;;  %v13258_v9 = vcombine.low %v13214_v21, %v13246_v47  ;;  %v13207_v11 = vcombine.high %v13141_v36, %v13157_v2  ;;  %v13783_v60 = vcombine.high %v13717_v1, %v13733_v38 }
0x1546   :  { %v15216_v61 = vpack.i.bf16 %v13255_v49, %v13799_v16  ;;  %v15221_v34 = vpack.i.bf16 %v13256_v54, %v13800_v19  ;;  %v15083_v25 = vpop.f32.mrf.mxu0  ;;  %v15090_v51 = vpop.f32.mrf.mxu1  ;;  %v15226_v32 = vpack.i.bf16 %v13257_v58, %v13801_v6  ;;  %v13751_v63 = vcombine.high %v13685_v26, %v13701_v29 }
0x1547   :  { %v13802_v59 = vcombine.low %v13758_v5, %v13790_v56  ;;  %v13253_v53 = vrot.slane %v13239_v52, %v15881_v41  ;;  %v13259_v14 = vcombine.high %v13214_v21, %v13246_v47  ;;  %v13221_v15 = vrot.slane %v13207_v11, %v15881_v41 }
0x1548   :  { %15217 = vrot.lane.b32.xlu0 %v15216_v61, %s15587_s20  ;;  %v12236_v12 = vpop.f32.mrf.mxu0  ;;  %v12323_v7 = vpop.f32.mrf.mxu1  ;;  %v13797_v24 = vrot.slane %v13783_v60, %v15881_v41  ;;  %v13803_v36 = vcombine.high %v13758_v5, %v13790_v56  ;;  %v13765_v49 = vrot.slane %v13751_v63, %v15881_v41 }
0x1549   :  { %v15231_v28 = vpack.i.bf16 %v13258_v9, %v13802_v59  ;;  %v13260_v23 = vcombine.low %v13221_v15, %v13253_v53 }
0x154a   :  { %v15236_v29 = vpack.i.bf16 %v13259_v14, %v13803_v36  ;;  %v13804_v54 = vcombine.low %v13765_v49, %v13797_v24  ;;  %v13805_v9 = vcombine.high %v13765_v49, %v13797_v24 }
0x154c   :  { %15222 = vrot.lane.b32.xlu0 %v15221_v34, %s15590_s22  ;;  %v15241_v58 = vpack.i.bf16 %v13260_v23, %v13804_v54 }
0x1550   :  { %15227 = vrot.lane.b32.xlu0 %v15226_v32, %s15586_s19 }
0x1551   :  { %v15097_v45 = vpop.f32.mrf.mxu0  ;;  %v15104_v31 = vpop.f32.mrf.mxu1 }
0x1552   :  { %v13806_v2 = vcombine.low %v15083_v25, %v15097_v45  ;;  %v13807_v1 = vcombine.high %v15083_v25, %v15097_v45  ;;  %v13822_v38 = vcombine.low %v15090_v51, %v15104_v31  ;;  %v13823_v43 = vcombine.high %v15090_v51, %v15104_v31 }
0x1553   :  { %v12410_v10 = vpop.f32.mrf.mxu0  ;;  %v12497_v30 = vpop.f32.mrf.mxu1  ;;  %v13261_v25 = vcombine.high %v13221_v15, %v13253_v53 }
0x1554   :  { %15232 = vrot.lane.b32.xlu0 %v15231_v28, %s15589_s21  ;;  %v13262_v16 = vcombine.low %v12236_v12, %v12410_v10  ;;  %v13278_v26 = vcombine.low %v12323_v7, %v12497_v30  ;;  %v13263_v20 = vcombine.high %v12236_v12, %v12410_v10  ;;  %v13279_v61 = vcombine.high %v12323_v7, %v12497_v30 }
0x1555   :  { %v13814_v37 = vrot.slane %v13806_v2, %v15861_v18  ;;  %v13821_v35 = vrot.slane %v13807_v1, %v15861_v18  ;;  %v13830_v19 = vrot.slane %v13822_v38, %v15861_v18  ;;  %v13837_v3 = vrot.slane %v13823_v43, %v15861_v18 }
0x1556   :  { %v13270_v47 = vrot.slane %v13262_v16, %v15861_v18  ;;  %v13286_v34 = vrot.slane %v13278_v26, %v15861_v18  ;;  %v13277_v51 = vrot.slane %v13263_v20, %v15861_v18  ;;  %v13293_v21 = vrot.slane %v13279_v61, %v15861_v18 }
0x1557   :  { %v13870_v5 = vcombine.low %v13814_v37, %v13830_v19  ;;  %v13871_v52 = vcombine.high %v13814_v37, %v13830_v19  ;;  %v13886_v32 = vcombine.low %v13821_v35, %v13837_v3  ;;  %v13887_v60 = vcombine.high %v13821_v35, %v13837_v3 }
0x1558   :  { %15237 = vrot.lane.b32.xlu0 %v15236_v29, %s15585_s18  ;;  %v13326_v12 = vcombine.low %v13270_v47, %v13286_v34  ;;  %v13327_v7 = vcombine.high %v13270_v47, %v13286_v34  ;;  %v15246_v59 = vpack.i.bf16 %v13261_v25, %v13805_v9  ;;  %v13342_v45 = vcombine.low %v13277_v51, %v13293_v21 }
0x1559   :  { %v15111_v56 = vpop.f32.mrf.mxu0  ;;  %v15118_v6 = vpop.f32.mrf.mxu1  ;;  %v13343_v31 = vcombine.high %v13277_v51, %v13293_v21  ;;  %v20168_v14 = vrot.slane %v13870_v5, %v15881_v41  ;;  %v20171_v15 = vrot.slane %v13871_v52, %v15881_v41  ;;  %v20174_v10 = vrot.slane %v13886_v32, %v15881_v41 }
0x155a   :  { %v20180_v30 = vrot.slane %v13887_v60, %v15881_v41  ;;  %v20183_v36 = vrot.slane %v13326_v12, %v15881_v41  ;;  %v20186_v2 = vrot.slane %v13327_v7, %v15881_v41  ;;  %v20189_v23 = vrot.slane %v13342_v45, %v15881_v41 }
0x155b   :  { %v12584_v53 = vpop.f32.mrf.mxu0  ;;  %v12671_v28 = vpop.f32.mrf.mxu1  ;;  %v20192_v20 = vrot.slane %v13343_v31, %v15881_v41 }
0x155c   :  { %15242 = vrot.lane.b32.xlu0 %v15241_v58, %s15588_s0  ;;  %v20165_v11 = vpop.permute.xlu0 %15152  ;;  %v15148_v63 = vpop.permute.xlu1 %15147 }
0x155d   :  { %v15150_v43 = vunpack.i.h.bf16 %v15148_v63  ;;  %v15155_v37 = vunpack.i.h.bf16 %v20165_v11  ;;  %v15149_v35 = vunpack.i.l.bf16 %v15148_v63  ;;  %v15154_v52 = vunpack.i.l.bf16 %v20165_v11 }
0x155f   :  { %v14166_v32 = vsel %vm36_vm0, %v12982_v62, %v15150_v43  ;;  %v14194_v40 = vsel %vm36_vm0, %v13526_v8, %v15149_v35 }
0x1560   :  { %15247 = vrot.lane.b32.xlu0 %v15246_v59, %s15584_s17  ;;  %v20177_v24 = vpop.permute.xlu0 %15162  ;;  %v15158_v59 = vpop.permute.xlu1 %15157  ;;  %v14170_v43 = vsel %vm4262_vm1, %v14166_v32, %v15155_v37 }
0x1561   :  { %v15125_v1 = vpop.f32.mrf.mxu0  ;;  %v15132_v38 = vpop.f32.mrf.mxu1  ;;  %v15159_v8 = vunpack.i.l.bf16 %v15158_v59 }
0x1562   :  { %v13838_v49 = vcombine.low %v15111_v56, %v15125_v1  ;;  %v13839_v16 = vcombine.high %v15111_v56, %v15125_v1  ;;  %v13854_v26 = vcombine.low %v15118_v6, %v15132_v38  ;;  %v13855_v29 = vcombine.high %v15118_v6, %v15132_v38 }
0x1563   :  { %v12758_v61 = vpop.f32.mrf.mxu0  ;;  %v12845_v54 = vpop.f32.mrf.mxu1  ;;  %v15160_v38 = vunpack.i.h.bf16 %v15158_v59 }
0x1564   :  { %v13846_v19 = vrot.slane %v13838_v49, %v15861_v18  ;;  %v13853_v3 = vrot.slane %v13839_v16, %v15861_v18  ;;  %v13862_v47 = vrot.slane %v13854_v26, %v15861_v18  ;;  %v13869_v34 = vrot.slane %v13855_v29, %v15861_v18  ;;  %v20199_v58 = vpop.permute.xlu0 %15167 }
0x1565   :  { %v13294_v25 = vcombine.low %v12584_v53, %v12758_v61  ;;  %v13295_v51 = vcombine.high %v12584_v53, %v12758_v61  ;;  %v13310_v21 = vcombine.low %v12671_v28, %v12845_v54  ;;  %v13311_v56 = vcombine.high %v12671_v28, %v12845_v54 }
0x1566   :  { %v13902_v6 = vcombine.low %v13846_v19, %v13862_v47  ;;  %v13918_v5 = vcombine.low %v13853_v3, %v13869_v34  ;;  %v13903_v63 = vcombine.high %v13846_v19, %v13862_v47  ;;  %v13919_v31 = vcombine.high %v13853_v3, %v13869_v34 }
0x1567   :  { %v13302_v9 = vrot.slane %v13294_v25, %v15861_v18  ;;  %v13309_v60 = vrot.slane %v13295_v51, %v15861_v18  ;;  %v13318_v12 = vrot.slane %v13310_v21, %v15861_v18  ;;  %v13325_v7 = vrot.slane %v13311_v56, %v15861_v18 }
0x1568   :  { %v20211_v45 = vrot.slane %v13902_v6, %v15881_v41  ;;  %v15173_v28 = vpop.permute.xlu0 %15172  ;;  %v13926_v1 = vrot.slane %v13918_v5, %v15881_v41  ;;  %v13917_v16 = vrot.slane %v13903_v63, %v15881_v41  ;;  %v13933_v26 = vrot.slane %v13919_v31, %v15881_v41 }
0x1569   :  { %v13358_v0 = vcombine.low %v13302_v9, %v13318_v12  ;;  %v13359_v62 = vcombine.high %v13302_v9, %v13318_v12  ;;  %v13374_v11 = vcombine.low %v13309_v60, %v13325_v7  ;;  %v13375_v53 = vcombine.high %v13309_v60, %v13325_v7 }
0x156a   :  { %v13934_v18 = vcombine.low %v20168_v14, %v20211_v45  ;;  %v14198_v61 = vsel %vm4262_vm1, %v14194_v40, %v15154_v52  ;;  %v13935_v35 = vcombine.high %v20168_v14, %v20211_v45  ;;  %v15165_v19 = vunpack.i.h.bf16 %v20177_v24 }
0x156b   :  { %v20222_v49 = vrot.slane %v13358_v0, %v15881_v41  ;;  %v13373_v13 = vrot.slane %v13359_v62, %v15881_v41  ;;  %v13382_v46 = vrot.slane %v13374_v11, %v15881_v41  ;;  %v13389_v29 = vrot.slane %v13375_v53, %v15881_v41 }
0x156c   :  { %v13939_v47 = vcombine.high %v20174_v10, %v13926_v1  ;;  %v15164_v34 = vunpack.i.l.bf16 %v20177_v24  ;;  %v14174_v41 = vsel %vm4265_vm2, %v14170_v43, %v15160_v38  ;;  %v14202_v21 = vsel %vm4265_vm2, %v14198_v61, %v15159_v8  ;;  %v15178_v6 = vpop.permute.xlu0 %15177 }
0x156d   :  { %v13390_v54 = vcombine.low %v20183_v36, %v20222_v49  ;;  %v13391_v37 = vcombine.high %v20183_v36, %v20222_v49  ;;  %v13395_v3 = vcombine.high %v20189_v23, %v13382_v46  ;;  %v13392_v25 = vcombine.low %v20186_v2, %v13373_v13 }
0x156e   :  { %v15170_v56 = vunpack.i.h.bf16 %v20199_v58  ;;  %v13397_v5 = vcombine.high %v20192_v20, %v13389_v29  ;;  %v13941_v32 = vcombine.high %v20180_v30, %v13933_v26  ;;  %v13936_v9 = vcombine.low %v20171_v15, %v13917_v16 }
0x156f   :  { %v15251_v51 = vpack.i.bf16 %v13391_v37, %v13935_v35  ;;  %v15271_v52 = vpack.i.bf16 %v13395_v3, %v13939_v47  ;;  %v15169_v24 = vunpack.i.l.bf16 %v20199_v58  ;;  %v14178_v60 = vsel %vm4268_vm3, %v14174_v41, %v15165_v19 }
0x1570   :  { %v15175_v12 = vunpack.i.h.bf16 %v15173_v28  ;;  %v15174_v7 = vunpack.i.l.bf16 %v15173_v28  ;;  %v14182_v59 = vsel %vm4271_vm4, %v14178_v60, %v15170_v56  ;;  %v15180_v63 = vunpack.i.h.bf16 %v15178_v6 }
0x1571   :  { %15252 = vrot.lane.b32.xlu1 %v15251_v51, %s15587_s20  ;;  %15272 = vrot.lane.b32.xlu0 %v15271_v52, %s15585_s18  ;;  %v15179_v31 = vunpack.i.l.bf16 %v15178_v6  ;;  %v14206_v40 = vsel %vm4268_vm3, %v14202_v21, %v15164_v34  ;;  %v13393_v0 = vcombine.high %v20186_v2, %v13373_v13  ;;  %v15256_v62 = vpack.i.bf16 %v13392_v25, %v13936_v9 }
0x1572   :  { %v14210_v11 = vsel %vm4271_vm4, %v14206_v40, %v15169_v24  ;;  %v14186_v53 = vsel %vm4274_vm5, %v14182_v59, %v15175_v12  ;;  %v15281_v58 = vpack.i.bf16 %v13397_v5, %v13941_v32  ;;  %v13937_v43 = vcombine.high %v20171_v15, %v13917_v16 }
0x1573   :  { %v14214_v38 = vsel %vm4274_vm5, %v14210_v11, %v15174_v7  ;;  %v14190_v28 = vsel %vm4277_vm6, %v14186_v53, %v15180_v63  ;;  %v13394_v2 = vcombine.low %v20189_v23, %v13382_v46  ;;  %v13938_v61 = vcombine.low %v20174_v10, %v13926_v1 }
0x1574   :  { %v14218_v8 = vsel %vm4277_vm6, %v14214_v38, %v15179_v31  ;;  %v15261_v13 = vpack.i.bf16 %v13393_v0, %v13937_v43  ;;  %v13396_v37 = vcombine.low %v20192_v20, %v13389_v29  ;;  %v13940_v15 = vcombine.low %v20180_v30, %v13933_v26 }
0x1575   :  { %15257 = vrot.lane.b32.xlu1 %v15256_v62, %s15590_s22  ;;  %15282 = vrot.lane.b32.xlu0 %v15281_v58, %s15584_s17  ;;  %v15266_v35 = vpack.i.bf16 %v13394_v2, %v13938_v61 }
0x1576   :  { %14318 = vmatprep.mubr.f32.mxu0 %v14218_v8  ;;  %v15276_v16 = vpack.i.bf16 %v13396_v37, %v13940_v15 }
0x1577   :  { %14319 = vmatmul.mubr.f32.vlgmr.msra.gmra.mxu0 %v14190_v28 }
0x1579   :  { %15262 = vrot.lane.b32.xlu1 %v15261_v13, %s15586_s19 }
0x157d   :  { %15267 = vrot.lane.b32.xlu1 %v15266_v35, %s15589_s21 }
0x1581   :  { %15277 = vrot.lane.b32.xlu1 %v15276_v16, %s15588_s0 }
0x1586   :  { %v15183_v19 = vpop.permute.xlu1 %15182 }
0x1587   :  { %v15185_v34 = vunpack.i.h.bf16 %v15183_v19  ;;  %v15184_v41 = vunpack.i.l.bf16 %v15183_v19 }
0x1589   :  { %v14167_v30 = vsel %vm36_vm0, %v13118_v22, %v15185_v34  ;;  %v14195_v26 = vsel %vm36_vm0, %v13662_v50, %v15184_v41 }
0x158a   :  { %v15188_v3 = vpop.permute.xlu1 %15187 }
0x158b   :  { %v15190_v25 = vunpack.i.h.bf16 %v15188_v3  ;;  %v15189_v51 = vunpack.i.l.bf16 %v15188_v3 }
0x158d   :  { %v14171_v5 = vsel %vm4262_vm1, %v14167_v30, %v15190_v25  ;;  %v14199_v52 = vsel %vm4262_vm1, %v14195_v26, %v15189_v51 }
0x158e   :  { %v15193_v47 = vpop.permute.xlu1 %15192 }
0x158f   :  { %v15195_v10 = vunpack.i.h.bf16 %v15193_v47  ;;  %v15194_v1 = vunpack.i.l.bf16 %v15193_v47 }
0x1591   :  { %v14175_v24 = vsel %vm4265_vm2, %v14171_v5, %v15195_v10  ;;  %v14203_v60 = vsel %vm4265_vm2, %v14199_v52, %v15194_v1 }
0x1592   :  { %v15198_v23 = vpop.permute.xlu1 %15197 }
0x1593   :  { %v15200_v20 = vunpack.i.h.bf16 %v15198_v23  ;;  %v15199_v29 = vunpack.i.l.bf16 %v15198_v23 }
0x1595   :  { %v14179_v27 = vsel %vm4268_vm3, %v14175_v24, %v15200_v20  ;;  %v14207_v44 = vsel %vm4268_vm3, %v14203_v60, %v15199_v29 }
0x1596   :  { %v15203_v46 = vpop.permute.xlu1 %15202 }
0x1597   :  { %v15205_v56 = vunpack.i.h.bf16 %v15203_v46  ;;  %v15204_v6 = vunpack.i.l.bf16 %v15203_v46 }
0x1599   :  { %v14211_v50 = vsel %vm4271_vm4, %v14207_v44, %v15204_v6  ;;  %v14183_v12 = vsel %vm4271_vm4, %v14179_v27, %v15205_v56 }
0x159a   :  { %v15208_v21 = vpop.permute.xlu1 %15207 }
0x159b   :  { %v15210_v32 = vunpack.i.h.bf16 %v15208_v21  ;;  %v15209_v9 = vunpack.i.l.bf16 %v15208_v21 }
0x159d   :  { %v14215_v7 = vsel %vm4274_vm5, %v14211_v50, %v15209_v9  ;;  %v14187_v59 = vsel %vm4274_vm5, %v14183_v12, %v15210_v32 }
0x159e   :  { %v15213_v22 = vpop.permute.xlu1 %15212 }
0x159f   :  { %v15215_v48 = vunpack.i.h.bf16 %v15213_v22  ;;  %v15214_v42 = vunpack.i.l.bf16 %v15213_v22 }
0x15a1   :  { %v14219_v63 = vsel %vm4277_vm6, %v14215_v7, %v15214_v42  ;;  %v14191_v31 = vsel %vm4277_vm6, %v14187_v59, %v15215_v48 }
0x15a2   :  { %14323 = vmatprep.mubr.f32.mxu0 %v14219_v63 }
0x15a3   :  { %14324 = vmatmul.mubr.f32.gmra.mxu0 %v14191_v31 }
0x15ba   :  { %v15218_v40 = vpop.permute.xlu0 %15217 }
0x15bb   :  { %v15220_v58 = vunpack.i.h.bf16 %v15218_v40  ;;  %v15219_v38 = vunpack.i.l.bf16 %v15218_v40 }
0x15bd   :  { %v14168_v35 = vsel %vm36_vm0, %v13254_v55, %v15220_v58  ;;  %v14196_v15 = vsel %vm36_vm0, %v13798_v39, %v15219_v38 }
0x15be   :  { %v15223_v0 = vpop.permute.xlu0 %15222 }
0x15bf   :  { %v15225_v28 = vunpack.i.h.bf16 %v15223_v0  ;;  %v15224_v43 = vunpack.i.l.bf16 %v15223_v0 }
0x15c1   :  { %v14172_v3 = vsel %vm4262_vm1, %v14168_v35, %v15225_v28  ;;  %v14200_v47 = vsel %vm4262_vm1, %v14196_v15, %v15224_v43 }
0x15c2   :  { %v15228_v62 = vpop.permute.xlu0 %15227 }
0x15c3   :  { %v15230_v8 = vunpack.i.h.bf16 %v15228_v62  ;;  %v15229_v2 = vunpack.i.l.bf16 %v15228_v62 }
0x15c5   :  { %v14176_v34 = vsel %vm4265_vm2, %v14172_v3, %v15230_v8  ;;  %v14204_v41 = vsel %vm4265_vm2, %v14200_v47, %v15229_v2 }
0x15c6   :  { %v15233_v11 = vpop.permute.xlu0 %15232 }
0x15c7   :  { %v15235_v13 = vunpack.i.h.bf16 %v15233_v11  ;;  %v15234_v61 = vunpack.i.l.bf16 %v15233_v11 }
0x15c9   :  { %v14180_v57 = vsel %vm4268_vm3, %v14176_v34, %v15235_v13  ;;  %v14208_v17 = vsel %vm4268_vm3, %v14204_v41, %v15234_v61 }
0x15ca   :  { %v15238_v53 = vpop.permute.xlu0 %15237 }
0x15cb   :  { %v15240_v16 = vunpack.i.h.bf16 %v15238_v53  ;;  %v15239_v19 = vunpack.i.l.bf16 %v15238_v53 }
0x15cd   :  { %v14212_v39 = vsel %vm4271_vm4, %v14208_v17, %v15239_v19  ;;  %v14184_v25 = vsel %vm4271_vm4, %v14180_v57, %v15240_v16 }
0x15ce   :  { %v15243_v37 = vpop.permute.xlu0 %15242 }
0x15cf   :  { %v15245_v23 = vunpack.i.h.bf16 %v15243_v37  ;;  %v15244_v46 = vunpack.i.l.bf16 %v15243_v37 }
0x15d1   :  { %v14216_v51 = vsel %vm4274_vm5, %v14212_v39, %v15244_v46  ;;  %v14188_v10 = vsel %vm4274_vm5, %v14184_v25, %v15245_v23 }
0x15d2   :  { %v15248_v55 = vpop.permute.xlu0 %15247 }
0x15d3   :  { %v15250_v4 = vunpack.i.h.bf16 %v15248_v55  ;;  %v15249_v33 = vunpack.i.l.bf16 %v15248_v55 }
0x15d5   :  { %v14220_v1 = vsel %vm4277_vm6, %v14216_v51, %v15249_v33  ;;  %v14192_v20 = vsel %vm4277_vm6, %v14188_v10, %v15250_v4 }
0x15d6   :  { %14328 = vmatprep.mubr.f32.mxu0 %v14220_v1 }
0x15d7   :  { %14329 = vmatmul.mubr.f32.gmra.mxu0 %v14192_v20 }
0x15e3   :  { %v15253_v29 = vpop.permute.xlu1 %15252  ;;  %v15273_v6 = vpop.permute.xlu0 %15272 }
0x15e4   :  { %v15255_v30 = vunpack.i.h.bf16 %v15253_v29  ;;  %v15254_v26 = vunpack.i.l.bf16 %v15253_v29  ;;  %v15274_v14 = vunpack.i.l.bf16 %v15273_v6 }
0x15e6   :  { %v14169_v24 = vsel %vm36_vm0, %v13390_v54, %v15255_v30  ;;  %v14197_v60 = vsel %vm36_vm0, %v13934_v18, %v15254_v26  ;;  %v15275_v54 = vunpack.i.h.bf16 %v15273_v6 }
0x15e7   :  { %v15258_v21 = vpop.permute.xlu1 %15257  ;;  %v15283_v7 = vpop.permute.xlu0 %15282 }
0x15e8   :  { %v15260_v5 = vunpack.i.h.bf16 %v15258_v21  ;;  %v15259_v52 = vunpack.i.l.bf16 %v15258_v21  ;;  %v15285_v63 = vunpack.i.h.bf16 %v15283_v7  ;;  %v15284_v31 = vunpack.i.l.bf16 %v15283_v7 }
0x15ea   :  { %v14173_v44 = vsel %vm4262_vm1, %v14169_v24, %v15260_v5  ;;  %v14201_v22 = vsel %vm4262_vm1, %v14197_v60, %v15259_v52 }
0x15eb   :  { %v15263_v56 = vpop.permute.xlu1 %15262 }
0x15ec   :  { %v15265_v32 = vunpack.i.h.bf16 %v15263_v56  ;;  %v15264_v9 = vunpack.i.l.bf16 %v15263_v56 }
0x15ee   :  { %v14177_v50 = vsel %vm4265_vm2, %v14173_v44, %v15265_v32  ;;  %v14205_v12 = vsel %vm4265_vm2, %v14201_v22, %v15264_v9 }
0x15ef   :  { %v15268_v27 = vpop.permute.xlu1 %15267 }
0x15f0   :  { %v15270_v48 = vunpack.i.h.bf16 %v15268_v27  ;;  %v15269_v42 = vunpack.i.l.bf16 %v15268_v27 }
0x15f2   :  { %v14181_v36 = vsel %vm4268_vm3, %v14177_v50, %v15270_v48  ;;  %v14209_v49 = vsel %vm4268_vm3, %v14205_v12, %v15269_v42 }
0x15f3   :  { %v15278_v45 = vpop.permute.xlu1 %15277  ;;  %v14213_v40 = vsel %vm4271_vm4, %v14209_v49, %v15274_v14  ;;  %v14185_v0 = vsel %vm4271_vm4, %v14181_v36, %v15275_v54  ;;  %v14375_v36 = vld [vmem:[%s20366_s6] sm:$0x1] }
0x15f4   :  { %v15280_v18 = vunpack.i.h.bf16 %v15278_v45  ;;  %v15279_v59 = vunpack.i.l.bf16 %v15278_v45  ;;  %v20574_v49 = vld [vmem:[#allocation2_spill] sm:$0xff] }
0x15f5   :  { %v14382_v54 = vsub.s32 0, %v20574_v49 }
0x15f6   :  { %v14217_v62 = vsel %vm4274_vm5, %v14213_v40, %v15279_v59  ;;  %v14189_v11 = vsel %vm4274_vm5, %v14185_v0, %v15280_v18  ;;  %v14736_v59 = vld [vmem:[%s20366_s6 + $0x1] ss:$0 sm:$0xff] }
0x15f7   :  { %v14221_v53 = vsel %vm4277_vm6, %v14217_v62, %v15284_v31  ;;  %v14193_v58 = vsel %vm4277_vm6, %v14189_v11, %v15285_v63 }
0x15f8   :  { %14333 = vmatprep.mubr.f32.mxu0 %v14221_v53 }
0x15f9   :  { %14334 = vmatmul.mubr.f32.gmra.mxu0 %v14193_v58 }
0x1637   :  { %v14897_v38 = vpop.f32.mrf.mxu0 }
0x1639   :  { %v14898_v28 = vpop.f32.mrf.mxu0 }
0x163a   :  { %v14899_v37 = vadd.f32 %v14898_v28, %v14897_v38 }
0x163c   :  { %v14339_v19 = vsel %vm36_vm0, %v14899_v37, 0.0 }
0x1663   :  { %v14900_v43 = vpop.f32.mrf.mxu0 }
0x1665   :  { %v14901_v8 = vpop.f32.mrf.mxu0 }
0x1666   :  { %v14902_v61 = vadd.f32 %v14901_v8, %v14900_v43 }
0x1668   :  { %v14340_v15 = vsel %vm36_vm0, %v14902_v61, 0.0 }
0x1669   :  { %v14341_v47 = vadd.f32 %v14340_v15, %v14339_v19 }
0x1697   :  { %v14903_v2 = vpop.f32.mrf.mxu0 }
0x1699   :  { %v14904_v13 = vpop.f32.mrf.mxu0 }
0x169a   :  { %v14905_v35 = vadd.f32 %v14904_v13, %v14903_v2 }
0x169c   :  { %v14342_v3 = vsel %vm36_vm0, %v14905_v35, 0.0 }
0x169d   :  { %v14343_v34 = vadd.f32 %v14342_v3, %v14341_v47 }
0x16b9   :  { %v14906_v16 = vpop.f32.mrf.mxu0 }
0x16bb   :  { %v14907_v23 = vpop.f32.mrf.mxu0 }
0x16bc   :  { %v14908_v46 = vadd.f32 %v14907_v23, %v14906_v16 }
0x16be   :  { %v14344_v41 = vsel %vm36_vm0, %v14908_v46, 0.0 }
0x16bf   :  { %v14345_v57 = vadd.f32 %v14344_v41, %v14343_v34 }
0x16c1   :  { %v14346_v17 = vrot.slane %v14345_v57, 4 }
0x16c3   :  { %v14347_v55 = vadd.f32 %v14346_v17, %v14345_v57 }
0x16c5   :  { %v14348_v4 = vrot.slane %v14347_v55, 2 }
0x16c7   :  { %v14349_v33 = vadd.f32 %v14348_v4, %v14347_v55 }
0x16c9   :  { %v14350_v39 = vrot.slane %v14349_v33, 1 }
0x16cb   :  { %v14351_v25 = vadd.f32 %v14350_v39, %v14349_v33 }
0x16cd   :  { %v14352_v51 = vmul.f32 0.03125, %v14351_v25 }
0x16cf   :  { %v14353_v10 = vsub.f32 %v14899_v37, %v14352_v51  ;;  %v14354_v1 = vsub.f32 %v14902_v61, %v14352_v51  ;;  %v14355_v20 = vsub.f32 %v14905_v35, %v14352_v51  ;;  %v14356_v29 = vsub.f32 %v14908_v46, %v14352_v51 }
0x16d1   :  { %v14357_v21 = vmul.f32 %v14353_v10, %v14353_v10  ;;  %v14358_v30 = vmul.f32 %v14354_v1, %v14354_v1  ;;  %v14359_v26 = vmul.f32 %v14355_v20, %v14355_v20  ;;  %v14360_v56 = vmul.f32 %v14356_v29, %v14356_v29 }
0x16d3   :  { %v14361_v6 = vsel %vm36_vm0, %v14357_v21, 0.0  ;;  %v14362_v5 = vsel %vm36_vm0, %v14358_v30, 0.0  ;;  %v14364_v32 = vsel %vm36_vm0, %v14359_v26, 0.0  ;;  %v14366_v24 = vsel %vm36_vm0, %v14360_v56, 0.0 }
0x16d4   :  { %v14363_v52 = vadd.f32 %v14362_v5, %v14361_v6 }
0x16d6   :  { %v14365_v9 = vadd.f32 %v14364_v32, %v14363_v52 }
0x16d8   :  { %v14367_v60 = vadd.f32 %v14366_v24, %v14365_v9 }
0x16da   :  { %v14368_v27 = vrot.slane %v14367_v60, 4 }
0x16dc   :  { %v14369_v44 = vadd.f32 %v14368_v27, %v14367_v60 }
0x16de   :  { %v14370_v22 = vrot.slane %v14369_v44, 2 }
0x16e0   :  { %v14371_v48 = vadd.f32 %v14370_v22, %v14369_v44 }
0x16e2   :  { %v14372_v42 = vrot.slane %v14371_v48, 1 }
0x16e4   :  { %v14373_v50 = vadd.f32 %v14372_v42, %v14371_v48 }
0x16e6   :  { %v14374_v12 = vmul.f32 0.03125, %v14373_v50 }
0x16e8   :  { %v14376_v7 = vadd.f32 1e-05, %v14374_v12 }
0x16ea   :  { %15570 = vrsqrt.f32 %v14376_v7 }
0x16f7   :  { %v15571_v14 = vpop.eup %15570 }
0x16f8   :  { %v14378_v45 = vmul.f32 %v15571_v14, %v14375_v36 }
0x16fa   :  { %v14383_v18 = vrot.slane %v14378_v45, %v14382_v54 }
0x16fc   :  { %v14385_v63 = vmul.f32 %v14383_v18, %v14353_v10  ;;  %v14386_v31 = vmul.f32 %v14383_v18, %v14354_v1  ;;  %v14387_v40 = vmul.f32 %v14383_v18, %v14355_v20  ;;  %v14388_v0 = vmul.f32 %v14383_v18, %v14356_v29 }
0x16fe   :  { %v14397_v62 = vadd.f32 %v14736_v59, %v14385_v63  ;;  %v14398_v11 = vadd.f32 %v14736_v59, %v14386_v31  ;;  %v14399_v53 = vadd.f32 %v14736_v59, %v14387_v40  ;;  %v14400_v58 = vadd.f32 %v14736_v59, %v14388_v0 }
0x1700   :  { %14401 = vst.msk [vmem:[%s20367_s7] sm:$0xff] %vm36_vm0, %v14397_v62  ;;  %14402 = vst.msk [vmem:[%s20367_s7 + $0x8] sm:$0xff] %vm36_vm0, %v14398_v11 }
0x1701   :  { %14403 = vst.msk [vmem:[%s20367_s7 + $0x10] sm:$0xff] %vm36_vm0, %v14399_v53  ;;  %14404 = vst.msk [vmem:[%s20367_s7 + $0x18] sm:$0xff] %vm36_vm0, %v14400_v58 }

</bundles_post_ra>
